<compile_context>
chip_gen: v7x
topology: tpu7x:2x2x1
jax: 0.10.0
libtpu: 0.0.40
codegen_flags: <defaults>
</compile_context>

<pallas_src>
import functools

import numpy as np

import jax
import jax.numpy as jnp
from jax import lax
from jax.experimental import pallas as pl
from jax.experimental.pallas import tpu as pltpu

BN_EPS = 1e-3
_MASK_BIAS = -1e30


# ---------------------------------------------------------------------------
# Pallas kernel: the whole VRNet forward for B_TILE images per grid step
# ---------------------------------------------------------------------------
def _vrnet_kernel(xd_ref, aux_ref, w1_ref, w234_ref, cs_ref, fcw_ref, fcb_ref, o_ref, *,
                  BT, M, T1, T2, off1, off3, inv_temp):
    dot = lambda a, b: jnp.dot(a, b, preferred_element_type=jnp.float32)
    bf16 = jnp.bfloat16
    L1 = BT * M + T1          # conv1 / conv2 stacked output rows (incl. tail)
    L3 = BT * M + T2          # conv3 stacked output rows
    L4 = BT * M               # conv4 stacked output rows (exactly BT image blocks)

    cs = cs_ref[...]          # (8, 64)  conv bias + folded-BN shifts
    fb = fcb_ref[...]         # (8, 56)  fc biases

    # --- conv1: 7x7/stride-2 == 4x4/stride-1 on the space-to-depth input.
    #     One MXU matmul with K = 16 taps * 16 ch = 256 (taps lane-concatenated).
    xcat = jnp.concatenate([xd_ref[o:o + L1, :] for o in off1], axis=1)        # (L1, 256) bf16
    h = jnp.maximum(dot(xcat, w1_ref[...]) + cs[0:1, :], 0.0)                  # (L1, 64) f32

    # --- conv2 (1x1) + folded BatchNorm.
    h = jnp.maximum(dot(h.astype(bf16), w234_ref[0:64, :]) + cs[1:2, 0:32], 0.0)   # (L1, 32)

    # --- conv3 (3x3 valid) + folded BN: one K=288 matmul.
    hb = h.astype(bf16)
    hcat = jnp.concatenate([hb[o:o + L3, :] for o in off3], axis=1)            # (L3, 288)
    h = jnp.maximum(dot(hcat, w234_ref[64:352, :]) + cs[2:3, 0:32], 0.0)       # (L3, 32)

    # --- conv4 (3x3 valid) + folded BN.
    hb = h.astype(bf16)
    hcat = jnp.concatenate([hb[o:o + L4, :] for o in off3], axis=1)            # (L4, 288)
    f = jnp.maximum(dot(hcat, w234_ref[352:640, :]) + cs[3:4, 0:32], 0.0)      # (BT*M, 32)

    # --- SpatialSoftmax: per-image masked softmax over the M flat spatial rows,
    #     channels on lanes; garbage rows carry a -1e30 additive mask bias.
    fr = f.reshape(BT, M, 32)
    aux = aux_ref[...]                                                          # (M, 4)
    px = aux[:, 0].reshape(1, M, 1)
    py = aux[:, 1].reshape(1, M, 1)
    mb = aux[:, 2].reshape(1, M, 1)
    logits = fr * inv_temp + mb
    mx = jnp.max(logits, axis=1, keepdims=True)                                 # (BT, 1, 32)
    e = jnp.exp(logits - mx)
    inv = pl.reciprocal(jnp.sum(e, axis=1), approx=True)                        # (BT, 32)
    ex = jnp.sum(e * px, axis=1) * inv                                          # (BT, 32)
    ey = jnp.sum(e * py, axis=1) * inv

    # --- MLP head; the (x_c, y_c) keypoint interleave is folded into stacked fc1.
    kp = jnp.concatenate([ex, ey], axis=1)                                      # (BT, 64)
    z = jnp.maximum(dot(kp, fcw_ref[0:64, :]) + fb[0:1, :], 0.0)
    z = jnp.maximum(dot(z, fcw_ref[64:120, :]) + fb[1:2, :], 0.0)
    z = jnp.maximum(dot(z, fcw_ref[120:176, :]) + fb[2:3, :], 0.0)
    z = dot(z, fcw_ref[176:232, :]) + fb[3:4, :]                                # (BT, 56)
    o_ref[...] = z[:, 0:o_ref.shape[1]]


# ---------------------------------------------------------------------------
# Host-side helpers (parameter folding, geometry, constants)
# ---------------------------------------------------------------------------
def _bn_fold(bn):
    scale = bn["gamma"] / jnp.sqrt(bn["var"] + BN_EPS)
    shift = bn["beta"] - bn["mean"] * scale
    return scale, shift


def _pos_vectors(height, width):
    # Exact replica of the PyTorch SpatialSoftmax buffer construction
    # (np.meshgrid default 'xy' indexing, then reshape(height*width)).
    pos_x, pos_y = np.meshgrid(np.linspace(-1.0, 1.0, height),
                               np.linspace(-1.0, 1.0, width))
    return (pos_x.reshape(height * width).astype(np.float32),
            pos_y.reshape(height * width).astype(np.float32))


def _make_aux(h_out, w_out, w_stride, m_rows):
    """(m_rows, 4): pos_x / pos_y scattered onto the flat stride-W0 grid + mask bias."""
    pos_x_pt, pos_y_pt = _pos_vectors(h_out, w_out)
    aux = np.zeros((m_rows, 4), np.float32)
    aux[:, 2] = _MASK_BIAS
    hh, ww = np.meshgrid(np.arange(h_out), np.arange(w_out), indexing="ij")
    m_idx = (hh * w_stride + ww).reshape(-1)         # flat (stride W0) index
    k_idx = (hh * w_out + ww).reshape(-1)            # PyTorch (h, w) flat index
    aux[m_idx, 0] = pos_x_pt[k_idx]
    aux[m_idx, 1] = pos_y_pt[k_idx]
    aux[m_idx, 2] = 0.0
    return jnp.asarray(aux)


def _round_up(v, m):
    return ((v + m - 1) // m) * m


def _vmem_bytes(bt, m, t0, t1, t2):
    """Rough per-grid-step VMEM footprint: double-buffered blocks + in-kernel temps."""
    l1, l3, l4 = bt * m + t1, bt * m + t2, bt * m
    blocks = (bt * m + t0) * 16 * 2 + bt * 9 * 4
    weights = (256 * 64 + 640 * 32) * 2 + (232 * 56 + 8 * 64 + 8 * 56 + m * 4) * 4
    interm = (l1 * 256 * 2 + l1 * 64 * 6 + l1 * 32 * 6
              + l3 * 288 * 2 + l3 * 32 * 6
              + l4 * 288 * 2 + l4 * 32 * 4 + 3 * l4 * 32 * 4)
    return 2 * (blocks + weights) + interm


# ---------------------------------------------------------------------------
# Forward pass (mirrors VRNet.forward, eval-mode BatchNorm)
# ---------------------------------------------------------------------------
def vrnet_forward(rgb_nchw, params, *, bt_max=8):
    n, cin, hin, win = rgb_nchw.shape
    assert cin == 3

    # ---- static geometry ---------------------------------------------------
    hp, wp = hin + (hin & 1), win + (win & 1)          # pad to even for space-to-depth
    H0, W0 = hp // 2, wp // 2                          # space-to-depth dims (row stride W0)
    H1, W1 = H0 - 3, W0 - 3                            # conv1 / conv2 output (valid)
    H3, W3 = H1 - 2, W1 - 2                            # conv3 output
    H4, W4 = H3 - 2, W3 - 2                            # conv4 output
    assert H4 > 0 and W4 > 0, "input too small for VRNet"

    M = _round_up(H0 * W0, 8)                          # per-image flat-row stride
    T2 = _round_up(2 * W0 + 2, 8)                      # tails so every conv output keeps
    T1 = _round_up(T2 + 2 * W0 + 2, 8)                 #   exactly BT*M (+tail) stacked rows
    T0 = _round_up(T1 + 3 * W0 + 3, 8)

    # ---- batch tile: amortize per-step overhead, keep grid >= 2 (v7x has 2 TCs),
    #      shrink if the per-step working set would not fit the VMEM budget.
    try:
        vmem_cap = int(pltpu.get_tpu_info().vmem_capacity_bytes)
    except Exception:
        vmem_cap = 64 * 2**20                          # conservative (v7x per-core VMEM)
    budget = int(0.70 * vmem_cap)
    BT = max(1, min(bt_max, (n + 1) // 2))
    while BT > 1 and _vmem_bytes(BT, M, T0, T1, T2) > budget:
        BT -= 1
    need = _vmem_bytes(BT, M, T0, T1, T2)
    if need > budget:
        raise ValueError("image too large for the VMEM-resident VRNet kernel")
    G = pl.cdiv(n, BT)
    npad = G * BT

    # ---- input: NCHW -> NHWC -> space-to-depth (12ch padded to 16) -> stacked flat rows
    x = jnp.transpose(rgb_nchw, (0, 2, 3, 1)).astype(jnp.float32)
    x = jnp.pad(x, ((0, npad - n), (0, hp - hin), (0, wp - win), (0, 0)))
    xd = jnp.transpose(x.reshape(npad, H0, 2, W0, 2, 3), (0, 1, 3, 2, 4, 5))
    xd = xd.reshape(npad, H0 * W0, 12)
    xd = jnp.pad(xd, ((0, 0), (0, M - H0 * W0), (0, 4)))      # rows -> M, channels -> 16
    xd = xd.reshape(G, BT * M, 16)
    xd = jnp.pad(xd, ((0, 0), (0, T0), (0, 0))).astype(jnp.bfloat16)

    # ---- conv1: rewrite 7x7/stride-2 as 16 concatenated 4x4/stride-1 taps (16 s2d ch each)
    # TODO(synk): conv1 uses pretrained GoogLeNet weights in the original module;
    #             initialized synthetically here (no checkpoint load).
    w1 = jnp.pad(params["conv1_w"], ((0, 0), (0, 0), (0, 1), (0, 1)))          # (64,3,8,8)
    w1 = jnp.transpose(w1.reshape(64, 3, 4, 2, 4, 2), (2, 4, 3, 5, 1, 0))      # (p,q,a,b,ic,oc)
    w1 = jnp.pad(w1.reshape(16, 12, 64), ((0, 0), (0, 4), (0, 0))).reshape(256, 64)
    b1 = params["conv1_b"]

    # ---- conv2/3/4: fold eval-mode BatchNorm + bias; concat 3x3 taps along K.
    # TODO(synk): BatchNorm is folded with running stats (eval mode only).
    s2, sh2 = _bn_fold(params["conv2_bn"])
    w2 = params["conv2_w"][:, :, 0, 0].T * s2[None, :]                          # (64, 32)
    t2 = params["conv2_b"] * s2 + sh2
    s3, sh3 = _bn_fold(params["conv3_bn"])
    w3 = (jnp.transpose(params["conv3_w"], (2, 3, 1, 0)).reshape(9, 32, 32)
          * s3[None, None, :]).reshape(288, 32)
    t3 = params["conv3_b"] * s3 + sh3
    s4, sh4 = _bn_fold(params["conv4_bn"])
    w4 = (jnp.transpose(params["conv4_w"], (2, 3, 1, 0)).reshape(9, 32, 32)
          * s4[None, None, :]).reshape(288, 32)
    t4 = params["conv4_b"] * s4 + sh4

    w1cat = w1.astype(jnp.bfloat16)                                             # (256, 64)
    w234 = jnp.concatenate([w2, w3, w4], axis=0).astype(jnp.bfloat16)           # (640, 32)
    cshift = jnp.zeros((8, 64), jnp.float32)
    cshift = cshift.at[0, :].set(b1)
    cshift = cshift.at[1, :32].set(t2)
    cshift = cshift.at[2, :32].set(t3)
    cshift = cshift.at[3, :32].set(t4)

    # ---- FC head: fold the (x_c, y_c) keypoint interleave into stacked fc1 weights,
    #      pad layers to width 56 and pack all weights / biases into two arrays.
    FD = 56
    w1t = params["fc1_w"].T                                                     # (64, 50)
    f1 = jnp.concatenate([w1t[0::2, :], w1t[1::2, :]], axis=0)                  # x rows then y rows
    pc = lambda a: jnp.pad(a, ((0, 0), (0, FD - a.shape[1])))
    pr = lambda a: jnp.pad(a, ((0, FD - a.shape[0]), (0, 0)))
    fcw = jnp.concatenate([pc(f1), pr(pc(params["fc2_w"].T)),
                           pr(pc(params["fc3_w"].T)), pr(pc(params["fc4_w"].T))], axis=0)
    fcb = jnp.zeros((8, FD), jnp.float32)
    fcb = fcb.at[0, :50].set(params["fc1_b"])
    fcb = fcb.at[1, :50].set(params["fc2_b"])
    fcb = fcb.at[2, :50].set(params["fc3_b"])
    fcb = fcb.at[3, :9].set(params["fc4_b"])

    # ---- SpatialSoftmax constants (pos grids + validity mask on the flat layout)
    aux = _make_aux(H4, W4, W0, M)

    off1 = tuple(p * W0 + q for p in range(4) for q in range(4))
    off3 = tuple(i * W0 + j for i in range(3) for j in range(3))

    kernel = functools.partial(
        _vrnet_kernel, BT=BT, M=M, T1=T1, T2=T2, off1=off1, off3=off3,
        inv_temp=1.0)   # SpatialSoftmax temperature parameter is initialized to 1.0

    operands = (xd, aux, w1cat, w234, cshift, fcw, fcb)

    def _const_spec(a):
        nd = a.ndim
        return pl.BlockSpec(a.shape, lambda g, _nd=nd: (0,) * _nd)

    in_specs = [pl.BlockSpec((None, BT * M + T0, 16), lambda g: (g, 0, 0))]
    in_specs += [_const_spec(a) for a in operands[1:]]

    vmem_limit = int(min(0.85 * vmem_cap, max(need + (8 << 20), 32 << 20)))

    out = pl.pallas_call(
        kernel,
        out_shape=jax.ShapeDtypeStruct((G, BT, 9), jnp.float32),
        grid=(G,),
        in_specs=in_specs,
        out_specs=pl.BlockSpec((None, BT, 9), lambda g: (g, 0, 0)),
        compiler_params=pltpu.CompilerParams(
            dimension_semantics=("parallel",),
            vmem_limit_bytes=vmem_limit),
    )(*operands)
    return out.reshape(npad, 9)[:n]


# ---------------------------------------------------------------------------
# Plain-JAX reference (mirrors the PyTorch module, for validation)
# ---------------------------------------------------------------------------
def reference_forward(rgb_nchw, params):
    hi = jax.lax.Precision.HIGHEST
    # mirror the kernel's bf16 input DMA quantization
    x = rgb_nchw.astype(jnp.bfloat16).astype(jnp.float32)
    dn = ("NCHW", "OIHW", "NCHW")

    def conv(x, w, b, stride):
        y = lax.conv_general_dilated(x, w, (stride, stride), "VALID",
                                     dimension_numbers=dn, precision=hi)
        return y + b.reshape(1, -1, 1, 1)

    def bn(x, p):
        s = p["gamma"] / jnp.sqrt(p["var"] + BN_EPS)
        t = p["beta"] - p["mean"] * s
        return x * s.reshape(1, -1, 1, 1) + t.reshape(1, -1, 1, 1)

    x = jax.nn.relu(conv(x, params["conv1_w"], params["conv1_b"], 2))
    x = jax.nn.relu(bn(conv(x, params["conv2_w"], params["conv2_b"], 1), params["conv2_bn"]))
    x = jax.nn.relu(bn(conv(x, params["conv3_w"], params["conv3_b"], 1), params["conv3_bn"]))
    x = jax.nn.relu(bn(conv(x, params["conv4_w"], params["conv4_b"], 1), params["conv4_bn"]))

    n, c, h, w = x.shape
    feat = x.reshape(n * c, h * w)
    px, py = _pos_vectors(h, w)
    p = jax.nn.softmax(feat, axis=-1)
    ex = jnp.sum(p * px[None, :], axis=1, keepdims=True)
    ey = jnp.sum(p * py[None, :], axis=1, keepdims=True)
    z = jnp.concatenate([ex, ey], axis=1).reshape(n, c * 2)

    lin = lambda z, w, b: jnp.dot(z, w.T, precision=hi) + b
    z = jax.nn.relu(lin(z, params["fc1_w"], params["fc1_b"]))
    z = jax.nn.relu(lin(z, params["fc2_w"], params["fc2_b"]))
    z = jax.nn.relu(lin(z, params["fc3_w"], params["fc3_b"]))
    return lin(z, params["fc4_w"], params["fc4_b"])


# ---------------------------------------------------------------------------
# Synthetic parameter init (matches module shapes / init ranges)
# ---------------------------------------------------------------------------
def init_params(key):
    ks = jax.random.split(key, 32)
    u = lambda k, shape, lo=-0.1, hi=0.1: jax.random.uniform(k, shape, jnp.float32, lo, hi)
    p = {}
    p["conv1_w"] = u(ks[0], (64, 3, 7, 7));  p["conv1_b"] = u(ks[1], (64,))
    p["conv2_w"] = u(ks[2], (32, 64, 1, 1)); p["conv2_b"] = u(ks[3], (32,))
    p["conv3_w"] = u(ks[4], (32, 32, 3, 3)); p["conv3_b"] = u(ks[5], (32,))
    p["conv4_w"] = u(ks[6], (32, 32, 3, 3)); p["conv4_b"] = u(ks[7], (32,))
    for idx, name in enumerate(["conv2_bn", "conv3_bn", "conv4_bn"]):
        base = 8 + 4 * idx
        p[name] = {"gamma": u(ks[base + 0], (32,), 0.5, 1.5),
                   "beta":  u(ks[base + 1], (32,)),
                   "mean":  u(ks[base + 2], (32,)),
                   "var":   u(ks[base + 3], (32,), 0.5, 1.5)}
    p["fc1_w"] = u(ks[20], (50, 64)); p["fc1_b"] = u(ks[21], (50,))
    p["fc2_w"] = u(ks[22], (50, 50)); p["fc2_b"] = u(ks[23], (50,))
    p["fc3_w"] = u(ks[24], (50, 50)); p["fc3_b"] = u(ks[25], (50,))
    p["fc4_w"] = u(ks[26], (9, 50));  p["fc4_b"] = u(ks[27], (9,))
    return p


if __name__ == "__main__":
    key = jax.random.PRNGKey(0)
    pkey, xkey = jax.random.split(key)
    params = init_params(pkey)

    # small synthetic input: (batch=2, channels=3, H=32, W=32)
    rgb = jax.random.normal(xkey, (2, 3, 32, 32), jnp.float32)

    out = jax.block_until_ready(jax.jit(vrnet_forward)(rgb, params))
    assert out.shape == (2, 9), out.shape
    assert bool(jnp.all(jnp.isfinite(out)))

    # validate against a plain-JAX reference of the PyTorch module
    ref = jax.block_until_ready(jax.jit(reference_forward)(rgb, params))
    max_err = float(jnp.max(jnp.abs(out - ref)))
    assert max_err < 5e-2, f"kernel/reference mismatch: max abs err {max_err}"

    print("KERNEL_OK")
</pallas_src>

<mosaic_0001>
module attributes {stable_mosaic.version = 11 : i64} {
  func.func @_vrnet_kernel(%arg0: i32, %arg1: memref<1x392x16xbf16, #tpu.memory_space<vmem>>, %arg2: memref<256x4xf32, #tpu.memory_space<vmem>>, %arg3: memref<256x64xbf16, #tpu.memory_space<vmem>>, %arg4: memref<640x32xbf16, #tpu.memory_space<vmem>>, %arg5: memref<8x64xf32, #tpu.memory_space<vmem>>, %arg6: memref<232x56xf32, #tpu.memory_space<vmem>>, %arg7: memref<8x56xf32, #tpu.memory_space<vmem>>, %arg8: memref<1x1x9xf32, #tpu.memory_space<vmem>>) attributes {dimension_semantics = [#tpu.dimension_semantics<parallel>], iteration_bounds = array<i64: 2>, scalar_prefetch = 0 : i64, scratch_operands = 0 : i64, tpu.core_type = #tpu.core_type<tc>, window_params = [{transform_indices = @transform_0, window_bounds = array<i64: 1, 392, 16>}, {pipeline_mode = #tpu.pipeline_mode<synchronous>, transform_indices = @transform_1, window_bounds = array<i64: 256, 4>}, {pipeline_mode = #tpu.pipeline_mode<synchronous>, transform_indices = @transform_2, window_bounds = array<i64: 256, 64>}, {pipeline_mode = #tpu.pipeline_mode<synchronous>, transform_indices = @transform_3, window_bounds = array<i64: 640, 32>}, {pipeline_mode = #tpu.pipeline_mode<synchronous>, transform_indices = @transform_4, window_bounds = array<i64: 8, 64>}, {pipeline_mode = #tpu.pipeline_mode<synchronous>, transform_indices = @transform_5, window_bounds = array<i64: 232, 56>}, {pipeline_mode = #tpu.pipeline_mode<synchronous>, transform_indices = @transform_6, window_bounds = array<i64: 8, 56>}, {transform_indices = @transform_7, window_bounds = array<i64: 1, 1, 9>}]} {
    %c0 = arith.constant 0 : index
    %c0_0 = arith.constant 0 : index
    %0 = vector.load %arg5[%c0, %c0_0] : memref<8x64xf32, #tpu.memory_space<vmem>>, vector<8x64xf32>
    %c0_1 = arith.constant 0 : index
    %c0_2 = arith.constant 0 : index
    %1 = vector.load %arg7[%c0_1, %c0_2] : memref<8x56xf32, #tpu.memory_space<vmem>>, vector<8x56xf32>
    %c0_3 = arith.constant 0 : index
    %c0_4 = arith.constant 0 : index
    %c0_5 = arith.constant 0 : index
    %2 = vector.load %arg1[%c0_3, %c0_4, %c0_5] : memref<1x392x16xbf16, #tpu.memory_space<vmem>>, vector<1x336x16xbf16>
    %3 = vector.shape_cast %2 : vector<1x336x16xbf16> to vector<336x16xbf16>
    %c0_6 = arith.constant 0 : index
    %c1 = arith.constant 1 : index
    %c0_7 = arith.constant 0 : index
    %4 = vector.load %arg1[%c0_6, %c1, %c0_7] : memref<1x392x16xbf16, #tpu.memory_space<vmem>>, vector<1x336x16xbf16>
    %5 = vector.shape_cast %4 : vector<1x336x16xbf16> to vector<336x16xbf16>
    %c0_8 = arith.constant 0 : index
    %c2 = arith.constant 2 : index
    %c0_9 = arith.constant 0 : index
    %6 = vector.load %arg1[%c0_8, %c2, %c0_9] : memref<1x392x16xbf16, #tpu.memory_space<vmem>>, vector<1x336x16xbf16>
    %7 = vector.shape_cast %6 : vector<1x336x16xbf16> to vector<336x16xbf16>
    %c0_10 = arith.constant 0 : index
    %c3 = arith.constant 3 : index
    %c0_11 = arith.constant 0 : index
    %8 = vector.load %arg1[%c0_10, %c3, %c0_11] : memref<1x392x16xbf16, #tpu.memory_space<vmem>>, vector<1x336x16xbf16>
    %9 = vector.shape_cast %8 : vector<1x336x16xbf16> to vector<336x16xbf16>
    %c0_12 = arith.constant 0 : index
    %c16 = arith.constant 16 : index
    %c0_13 = arith.constant 0 : index
    %10 = vector.load %arg1[%c0_12, %c16, %c0_13] : memref<1x392x16xbf16, #tpu.memory_space<vmem>>, vector<1x336x16xbf16>
    %11 = vector.shape_cast %10 : vector<1x336x16xbf16> to vector<336x16xbf16>
    %c0_14 = arith.constant 0 : index
    %c17 = arith.constant 17 : index
    %c0_15 = arith.constant 0 : index
    %12 = vector.load %arg1[%c0_14, %c17, %c0_15] : memref<1x392x16xbf16, #tpu.memory_space<vmem>>, vector<1x336x16xbf16>
    %13 = vector.shape_cast %12 : vector<1x336x16xbf16> to vector<336x16xbf16>
    %c0_16 = arith.constant 0 : index
    %c18 = arith.constant 18 : index
    %c0_17 = arith.constant 0 : index
    %14 = vector.load %arg1[%c0_16, %c18, %c0_17] : memref<1x392x16xbf16, #tpu.memory_space<vmem>>, vector<1x336x16xbf16>
    %15 = vector.shape_cast %14 : vector<1x336x16xbf16> to vector<336x16xbf16>
    %c0_18 = arith.constant 0 : index
    %c19 = arith.constant 19 : index
    %c0_19 = arith.constant 0 : index
    %16 = vector.load %arg1[%c0_18, %c19, %c0_19] : memref<1x392x16xbf16, #tpu.memory_space<vmem>>, vector<1x336x16xbf16>
    %17 = vector.shape_cast %16 : vector<1x336x16xbf16> to vector<336x16xbf16>
    %c0_20 = arith.constant 0 : index
    %c32 = arith.constant 32 : index
    %c0_21 = arith.constant 0 : index
    %18 = vector.load %arg1[%c0_20, %c32, %c0_21] : memref<1x392x16xbf16, #tpu.memory_space<vmem>>, vector<1x336x16xbf16>
    %19 = vector.shape_cast %18 : vector<1x336x16xbf16> to vector<336x16xbf16>
    %c0_22 = arith.constant 0 : index
    %c33 = arith.constant 33 : index
    %c0_23 = arith.constant 0 : index
    %20 = vector.load %arg1[%c0_22, %c33, %c0_23] : memref<1x392x16xbf16, #tpu.memory_space<vmem>>, vector<1x336x16xbf16>
    %21 = vector.shape_cast %20 : vector<1x336x16xbf16> to vector<336x16xbf16>
    %c0_24 = arith.constant 0 : index
    %c34 = arith.constant 34 : index
    %c0_25 = arith.constant 0 : index
    %22 = vector.load %arg1[%c0_24, %c34, %c0_25] : memref<1x392x16xbf16, #tpu.memory_space<vmem>>, vector<1x336x16xbf16>
    %23 = vector.shape_cast %22 : vector<1x336x16xbf16> to vector<336x16xbf16>
    %c0_26 = arith.constant 0 : index
    %c35 = arith.constant 35 : index
    %c0_27 = arith.constant 0 : index
    %24 = vector.load %arg1[%c0_26, %c35, %c0_27] : memref<1x392x16xbf16, #tpu.memory_space<vmem>>, vector<1x336x16xbf16>
    %25 = vector.shape_cast %24 : vector<1x336x16xbf16> to vector<336x16xbf16>
    %c0_28 = arith.constant 0 : index
    %c48 = arith.constant 48 : index
    %c0_29 = arith.constant 0 : index
    %26 = vector.load %arg1[%c0_28, %c48, %c0_29] : memref<1x392x16xbf16, #tpu.memory_space<vmem>>, vector<1x336x16xbf16>
    %27 = vector.shape_cast %26 : vector<1x336x16xbf16> to vector<336x16xbf16>
    %c0_30 = arith.constant 0 : index
    %c49 = arith.constant 49 : index
    %c0_31 = arith.constant 0 : index
    %28 = vector.load %arg1[%c0_30, %c49, %c0_31] : memref<1x392x16xbf16, #tpu.memory_space<vmem>>, vector<1x336x16xbf16>
    %29 = vector.shape_cast %28 : vector<1x336x16xbf16> to vector<336x16xbf16>
    %c0_32 = arith.constant 0 : index
    %c50 = arith.constant 50 : index
    %c0_33 = arith.constant 0 : index
    %30 = vector.load %arg1[%c0_32, %c50, %c0_33] : memref<1x392x16xbf16, #tpu.memory_space<vmem>>, vector<1x336x16xbf16>
    %31 = vector.shape_cast %30 : vector<1x336x16xbf16> to vector<336x16xbf16>
    %c0_34 = arith.constant 0 : index
    %c51 = arith.constant 51 : index
    %c0_35 = arith.constant 0 : index
    %32 = vector.load %arg1[%c0_34, %c51, %c0_35] : memref<1x392x16xbf16, #tpu.memory_space<vmem>>, vector<1x336x16xbf16>
    %33 = vector.shape_cast %32 : vector<1x336x16xbf16> to vector<336x16xbf16>
    %34 = tpu.concatenate %3, %5, %7, %9, %11, %13, %15, %17, %19, %21, %23, %25, %27, %29, %31, %33 in 1 : vector<336x16xbf16>, vector<336x16xbf16>, vector<336x16xbf16>, vector<336x16xbf16>, vector<336x16xbf16>, vector<336x16xbf16>, vector<336x16xbf16>, vector<336x16xbf16>, vector<336x16xbf16>, vector<336x16xbf16>, vector<336x16xbf16>, vector<336x16xbf16>, vector<336x16xbf16>, vector<336x16xbf16>, vector<336x16xbf16>, vector<336x16xbf16> -> vector<336x256xbf16>
    %c0_36 = arith.constant 0 : index
    %c0_37 = arith.constant 0 : index
    %35 = vector.load %arg3[%c0_36, %c0_37] : memref<256x64xbf16, #tpu.memory_space<vmem>>, vector<256x64xbf16>
    %cst = arith.constant dense<0.000000e+00> : vector<336x64xf32>
    %36 = tpu.matmul %34, %35, %cst {dimension_numbers = #tpu.dot_dimension_numbers<[1], [0], [0], [1], [0, 0, 1, 1], [], []>} : vector<336x256xbf16>, vector<256x64xbf16>, vector<336x64xf32> -> vector<336x64xf32>
    %37 = vector.extract_strided_slice %0 {offsets = [0, 0], sizes = [1, 64], strides = [1, 1]} : vector<8x64xf32> to vector<1x64xf32>
    %38 = vector.broadcast %37 : vector<1x64xf32> to vector<336x64xf32>
    %39 = arith.addf %36, %38 : vector<336x64xf32>
    %cst_38 = arith.constant 0.000000e+00 : f32
    %40 = vector.broadcast %cst_38 : f32 to vector<336x64xf32>
    %41 = arith.maximumf %39, %40 : vector<336x64xf32>
    %42 = arith.truncf %41 : vector<336x64xf32> to vector<336x64xbf16>
    %c0_39 = arith.constant 0 : index
    %c0_40 = arith.constant 0 : index
    %43 = vector.load %arg4[%c0_39, %c0_40] : memref<640x32xbf16, #tpu.memory_space<vmem>>, vector<64x32xbf16>
    %cst_41 = arith.constant dense<0.000000e+00> : vector<336x32xf32>
    %44 = tpu.matmul %42, %43, %cst_41 {dimension_numbers = #tpu.dot_dimension_numbers<[1], [0], [0], [1], [0, 0, 1, 1], [], []>} : vector<336x64xbf16>, vector<64x32xbf16>, vector<336x32xf32> -> vector<336x32xf32>
    %45 = vector.extract_strided_slice %0 {offsets = [1, 0], sizes = [1, 32], strides = [1, 1]} : vector<8x64xf32> to vector<1x32xf32>
    %46 = vector.broadcast %45 : vector<1x32xf32> to vector<336x32xf32>
    %47 = arith.addf %44, %46 : vector<336x32xf32>
    %cst_42 = arith.constant 0.000000e+00 : f32
    %48 = vector.broadcast %cst_42 : f32 to vector<336x32xf32>
    %49 = arith.maximumf %47, %48 : vector<336x32xf32>
    %50 = arith.truncf %49 : vector<336x32xf32> to vector<336x32xbf16>
    %51 = vector.extract_strided_slice %50 {offsets = [0, 0], sizes = [296, 32], strides = [1, 1]} : vector<336x32xbf16> to vector<296x32xbf16>
    %52 = vector.extract_strided_slice %50 {offsets = [1, 0], sizes = [296, 32], strides = [1, 1]} : vector<336x32xbf16> to vector<296x32xbf16>
    %53 = vector.extract_strided_slice %50 {offsets = [2, 0], sizes = [296, 32], strides = [1, 1]} : vector<336x32xbf16> to vector<296x32xbf16>
    %54 = vector.extract_strided_slice %50 {offsets = [16, 0], sizes = [296, 32], strides = [1, 1]} : vector<336x32xbf16> to vector<296x32xbf16>
    %55 = vector.extract_strided_slice %50 {offsets = [17, 0], sizes = [296, 32], strides = [1, 1]} : vector<336x32xbf16> to vector<296x32xbf16>
    %56 = vector.extract_strided_slice %50 {offsets = [18, 0], sizes = [296, 32], strides = [1, 1]} : vector<336x32xbf16> to vector<296x32xbf16>
    %57 = vector.extract_strided_slice %50 {offsets = [32, 0], sizes = [296, 32], strides = [1, 1]} : vector<336x32xbf16> to vector<296x32xbf16>
    %58 = vector.extract_strided_slice %50 {offsets = [33, 0], sizes = [296, 32], strides = [1, 1]} : vector<336x32xbf16> to vector<296x32xbf16>
    %59 = vector.extract_strided_slice %50 {offsets = [34, 0], sizes = [296, 32], strides = [1, 1]} : vector<336x32xbf16> to vector<296x32xbf16>
    %60 = tpu.concatenate %51, %52, %53, %54, %55, %56, %57, %58, %59 in 1 : vector<296x32xbf16>, vector<296x32xbf16>, vector<296x32xbf16>, vector<296x32xbf16>, vector<296x32xbf16>, vector<296x32xbf16>, vector<296x32xbf16>, vector<296x32xbf16>, vector<296x32xbf16> -> vector<296x288xbf16>
    %c64 = arith.constant 64 : index
    %c0_43 = arith.constant 0 : index
    %61 = vector.load %arg4[%c64, %c0_43] : memref<640x32xbf16, #tpu.memory_space<vmem>>, vector<288x32xbf16>
    %cst_44 = arith.constant dense<0.000000e+00> : vector<296x32xf32>
    %62 = tpu.matmul %60, %61, %cst_44 {dimension_numbers = #tpu.dot_dimension_numbers<[1], [0], [0], [1], [0, 0, 1, 1], [], []>} : vector<296x288xbf16>, vector<288x32xbf16>, vector<296x32xf32> -> vector<296x32xf32>
    %63 = vector.extract_strided_slice %0 {offsets = [2, 0], sizes = [1, 32], strides = [1, 1]} : vector<8x64xf32> to vector<1x32xf32>
    %64 = vector.broadcast %63 : vector<1x32xf32> to vector<296x32xf32>
    %65 = arith.addf %62, %64 : vector<296x32xf32>
    %cst_45 = arith.constant 0.000000e+00 : f32
    %66 = vector.broadcast %cst_45 : f32 to vector<296x32xf32>
    %67 = arith.maximumf %65, %66 : vector<296x32xf32>
    %68 = arith.truncf %67 : vector<296x32xf32> to vector<296x32xbf16>
    %69 = vector.extract_strided_slice %68 {offsets = [0, 0], sizes = [256, 32], strides = [1, 1]} : vector<296x32xbf16> to vector<256x32xbf16>
    %70 = vector.extract_strided_slice %68 {offsets = [1, 0], sizes = [256, 32], strides = [1, 1]} : vector<296x32xbf16> to vector<256x32xbf16>
    %71 = vector.extract_strided_slice %68 {offsets = [2, 0], sizes = [256, 32], strides = [1, 1]} : vector<296x32xbf16> to vector<256x32xbf16>
    %72 = vector.extract_strided_slice %68 {offsets = [16, 0], sizes = [256, 32], strides = [1, 1]} : vector<296x32xbf16> to vector<256x32xbf16>
    %73 = vector.extract_strided_slice %68 {offsets = [17, 0], sizes = [256, 32], strides = [1, 1]} : vector<296x32xbf16> to vector<256x32xbf16>
    %74 = vector.extract_strided_slice %68 {offsets = [18, 0], sizes = [256, 32], strides = [1, 1]} : vector<296x32xbf16> to vector<256x32xbf16>
    %75 = vector.extract_strided_slice %68 {offsets = [32, 0], sizes = [256, 32], strides = [1, 1]} : vector<296x32xbf16> to vector<256x32xbf16>
    %76 = vector.extract_strided_slice %68 {offsets = [33, 0], sizes = [256, 32], strides = [1, 1]} : vector<296x32xbf16> to vector<256x32xbf16>
    %77 = vector.extract_strided_slice %68 {offsets = [34, 0], sizes = [256, 32], strides = [1, 1]} : vector<296x32xbf16> to vector<256x32xbf16>
    %78 = tpu.concatenate %69, %70, %71, %72, %73, %74, %75, %76, %77 in 1 : vector<256x32xbf16>, vector<256x32xbf16>, vector<256x32xbf16>, vector<256x32xbf16>, vector<256x32xbf16>, vector<256x32xbf16>, vector<256x32xbf16>, vector<256x32xbf16>, vector<256x32xbf16> -> vector<256x288xbf16>
    %c352 = arith.constant 352 : index
    %c0_46 = arith.constant 0 : index
    %79 = vector.load %arg4[%c352, %c0_46] : memref<640x32xbf16, #tpu.memory_space<vmem>>, vector<288x32xbf16>
    %cst_47 = arith.constant dense<0.000000e+00> : vector<256x32xf32>
    %80 = tpu.matmul %78, %79, %cst_47 {dimension_numbers = #tpu.dot_dimension_numbers<[1], [0], [0], [1], [0, 0, 1, 1], [], []>} : vector<256x288xbf16>, vector<288x32xbf16>, vector<256x32xf32> -> vector<256x32xf32>
    %81 = vector.extract_strided_slice %0 {offsets = [3, 0], sizes = [1, 32], strides = [1, 1]} : vector<8x64xf32> to vector<1x32xf32>
    %82 = vector.broadcast %81 : vector<1x32xf32> to vector<256x32xf32>
    %83 = arith.addf %80, %82 : vector<256x32xf32>
    %cst_48 = arith.constant 0.000000e+00 : f32
    %84 = vector.broadcast %cst_48 : f32 to vector<256x32xf32>
    %85 = arith.maximumf %83, %84 : vector<256x32xf32>
    %86 = vector.shape_cast %85 : vector<256x32xf32> to vector<1x256x32xf32>
    %c0_49 = arith.constant 0 : index
    %c0_50 = arith.constant 0 : index
    %87 = vector.load %arg2[%c0_49, %c0_50] : memref<256x4xf32, #tpu.memory_space<vmem>>, vector<256x4xf32>
    %88 = vector.extract_strided_slice %87 {offsets = [0, 0], sizes = [256, 1], strides = [1, 1]} : vector<256x4xf32> to vector<256x1xf32>
    %89 = vector.shape_cast %88 : vector<256x1xf32> to vector<256xf32>
    %90 = vector.shape_cast %89 : vector<256xf32> to vector<1x256x1xf32>
    %91 = vector.extract_strided_slice %87 {offsets = [0, 1], sizes = [256, 1], strides = [1, 1]} : vector<256x4xf32> to vector<256x1xf32>
    %92 = vector.shape_cast %91 : vector<256x1xf32> to vector<256xf32>
    %93 = vector.shape_cast %92 : vector<256xf32> to vector<1x256x1xf32>
    %94 = vector.extract_strided_slice %87 {offsets = [0, 2], sizes = [256, 1], strides = [1, 1]} : vector<256x4xf32> to vector<256x1xf32>
    %95 = vector.shape_cast %94 : vector<256x1xf32> to vector<256xf32>
    %96 = vector.shape_cast %95 : vector<256xf32> to vector<1x256x1xf32>
    %cst_51 = arith.constant 1.000000e+00 : f32
    %97 = vector.broadcast %cst_51 : f32 to vector<1x256x32xf32>
    %98 = arith.mulf %86, %97 : vector<1x256x32xf32>
    %99 = vector.broadcast %96 : vector<1x256x1xf32> to vector<1x256x32xf32>
    %100 = arith.addf %98, %99 : vector<1x256x32xf32>
    %cst_52 = arith.constant dense<0xFF800000> : vector<1x32xf32>
    %101 = vector.multi_reduction <maximumf>, %100, %cst_52 [1] : vector<1x256x32xf32> to vector<1x32xf32>
    %102 = vector.shape_cast %101 : vector<1x32xf32> to vector<1x1x32xf32>
    %103 = vector.broadcast %102 : vector<1x1x32xf32> to vector<1x256x32xf32>
    %104 = arith.subf %100, %103 : vector<1x256x32xf32>
    %105 = math.exp %104 : vector<1x256x32xf32>
    %cst_53 = arith.constant dense<0.000000e+00> : vector<1x32xf32>
    %106 = vector.multi_reduction <add>, %105, %cst_53 [1] : vector<1x256x32xf32> to vector<1x32xf32>
    %107 = tpu.reciprocal %106 {approx = true} : vector<1x32xf32> -> vector<1x32xf32>
    %108 = vector.broadcast %90 : vector<1x256x1xf32> to vector<1x256x32xf32>
    %109 = arith.mulf %105, %108 : vector<1x256x32xf32>
    %cst_54 = arith.constant dense<0.000000e+00> : vector<1x32xf32>
    %110 = vector.multi_reduction <add>, %109, %cst_54 [1] : vector<1x256x32xf32> to vector<1x32xf32>
    %111 = arith.mulf %110, %107 : vector<1x32xf32>
    %112 = vector.broadcast %93 : vector<1x256x1xf32> to vector<1x256x32xf32>
    %113 = arith.mulf %105, %112 : vector<1x256x32xf32>
    %cst_55 = arith.constant dense<0.000000e+00> : vector<1x32xf32>
    %114 = vector.multi_reduction <add>, %113, %cst_55 [1] : vector<1x256x32xf32> to vector<1x32xf32>
    %115 = arith.mulf %114, %107 : vector<1x32xf32>
    %116 = tpu.concatenate %111, %115 in 1 : vector<1x32xf32>, vector<1x32xf32> -> vector<1x64xf32>
    %c0_56 = arith.constant 0 : index
    %c0_57 = arith.constant 0 : index
    %117 = vector.load %arg6[%c0_56, %c0_57] : memref<232x56xf32, #tpu.memory_space<vmem>>, vector<64x56xf32>
    %cst_58 = arith.constant dense<0.000000e+00> : vector<1x56xf32>
    %118 = tpu.matmul %116, %117, %cst_58 {dimension_numbers = #tpu.dot_dimension_numbers<[1], [0], [0], [1], [0, 0, 1, 1], [], []>} : vector<1x64xf32>, vector<64x56xf32>, vector<1x56xf32> -> vector<1x56xf32>
    %119 = vector.extract_strided_slice %1 {offsets = [0, 0], sizes = [1, 56], strides = [1, 1]} : vector<8x56xf32> to vector<1x56xf32>
    %120 = arith.addf %118, %119 : vector<1x56xf32>
    %cst_59 = arith.constant 0.000000e+00 : f32
    %121 = vector.broadcast %cst_59 : f32 to vector<1x56xf32>
    %122 = arith.maximumf %120, %121 : vector<1x56xf32>
    %c64_60 = arith.constant 64 : index
    %c0_61 = arith.constant 0 : index
    %123 = vector.load %arg6[%c64_60, %c0_61] : memref<232x56xf32, #tpu.memory_space<vmem>>, vector<56x56xf32>
    %cst_62 = arith.constant dense<0.000000e+00> : vector<1x56xf32>
    %124 = tpu.matmul %122, %123, %cst_62 {dimension_numbers = #tpu.dot_dimension_numbers<[1], [0], [0], [1], [0, 0, 1, 1], [], []>} : vector<1x56xf32>, vector<56x56xf32>, vector<1x56xf32> -> vector<1x56xf32>
    %125 = vector.extract_strided_slice %1 {offsets = [1, 0], sizes = [1, 56], strides = [1, 1]} : vector<8x56xf32> to vector<1x56xf32>
    %126 = arith.addf %124, %125 : vector<1x56xf32>
    %cst_63 = arith.constant 0.000000e+00 : f32
    %127 = vector.broadcast %cst_63 : f32 to vector<1x56xf32>
    %128 = arith.maximumf %126, %127 : vector<1x56xf32>
    %c120 = arith.constant 120 : index
    %c0_64 = arith.constant 0 : index
    %129 = vector.load %arg6[%c120, %c0_64] : memref<232x56xf32, #tpu.memory_space<vmem>>, vector<56x56xf32>
    %cst_65 = arith.constant dense<0.000000e+00> : vector<1x56xf32>
    %130 = tpu.matmul %128, %129, %cst_65 {dimension_numbers = #tpu.dot_dimension_numbers<[1], [0], [0], [1], [0, 0, 1, 1], [], []>} : vector<1x56xf32>, vector<56x56xf32>, vector<1x56xf32> -> vector<1x56xf32>
    %131 = vector.extract_strided_slice %1 {offsets = [2, 0], sizes = [1, 56], strides = [1, 1]} : vector<8x56xf32> to vector<1x56xf32>
    %132 = arith.addf %130, %131 : vector<1x56xf32>
    %cst_66 = arith.constant 0.000000e+00 : f32
    %133 = vector.broadcast %cst_66 : f32 to vector<1x56xf32>
    %134 = arith.maximumf %132, %133 : vector<1x56xf32>
    %c176 = arith.constant 176 : index
    %c0_67 = arith.constant 0 : index
    %135 = vector.load %arg6[%c176, %c0_67] : memref<232x56xf32, #tpu.memory_space<vmem>>, vector<56x56xf32>
    %cst_68 = arith.constant dense<0.000000e+00> : vector<1x56xf32>
    %136 = tpu.matmul %134, %135, %cst_68 {dimension_numbers = #tpu.dot_dimension_numbers<[1], [0], [0], [1], [0, 0, 1, 1], [], []>} : vector<1x56xf32>, vector<56x56xf32>, vector<1x56xf32> -> vector<1x56xf32>
    %137 = vector.extract_strided_slice %1 {offsets = [3, 0], sizes = [1, 56], strides = [1, 1]} : vector<8x56xf32> to vector<1x56xf32>
    %138 = arith.addf %136, %137 : vector<1x56xf32>
    %139 = vector.extract_strided_slice %138 {offsets = [0, 0], sizes = [1, 9], strides = [1, 1]} : vector<1x56xf32> to vector<1x9xf32>
    %c0_69 = arith.constant 0 : index
    %c0_70 = arith.constant 0 : index
    %c0_71 = arith.constant 0 : index
    %140 = vector.load %arg8[%c0_69, %c0_70, %c0_71] : memref<1x1x9xf32, #tpu.memory_space<vmem>>, vector<1x1x9xf32>
    %141 = vector.shape_cast %140 : vector<1x1x9xf32> to vector<1x9xf32>
    %142 = vector.shape_cast %139 : vector<1x9xf32> to vector<1x1x9xf32>
    tpu.vector_store %arg8[%c0_69, %c0_70, %c0_71], %142 {strides = array<i32>} : memref<1x1x9xf32, #tpu.memory_space<vmem>>, vector<1x1x9xf32>,
    return
  }
  func.func @transform_0(%arg0: i32) -> (i32, i32, i32) {
    %c0_i32 = arith.constant 0 : i32
    %c0_i32_0 = arith.constant 0 : i32
    %c0_i32_1 = arith.constant 0 : i32
    return %arg0, %c0_i32, %c0_i32_0 : i32, i32, i32
  }
  func.func @transform_1(%arg0: i32) -> (i32, i32) {
    %c0_i32 = arith.constant 0 : i32
    %c0_i32_0 = arith.constant 0 : i32
    %c0_i32_1 = arith.constant 0 : i32
    return %c0_i32, %c0_i32_0 : i32, i32
  }
  func.func @transform_2(%arg0: i32) -> (i32, i32) {
    %c0_i32 = arith.constant 0 : i32
    %c0_i32_0 = arith.constant 0 : i32
    %c0_i32_1 = arith.constant 0 : i32
    return %c0_i32, %c0_i32_0 : i32, i32
  }
  func.func @transform_3(%arg0: i32) -> (i32, i32) {
    %c0_i32 = arith.constant 0 : i32
    %c0_i32_0 = arith.constant 0 : i32
    %c0_i32_1 = arith.constant 0 : i32
    return %c0_i32, %c0_i32_0 : i32, i32
  }
  func.func @transform_4(%arg0: i32) -> (i32, i32) {
    %c0_i32 = arith.constant 0 : i32
    %c0_i32_0 = arith.constant 0 : i32
    %c0_i32_1 = arith.constant 0 : i32
    return %c0_i32, %c0_i32_0 : i32, i32
  }
  func.func @transform_5(%arg0: i32) -> (i32, i32) {
    %c0_i32 = arith.constant 0 : i32
    %c0_i32_0 = arith.constant 0 : i32
    %c0_i32_1 = arith.constant 0 : i32
    return %c0_i32, %c0_i32_0 : i32, i32
  }
  func.func @transform_6(%arg0: i32) -> (i32, i32) {
    %c0_i32 = arith.constant 0 : i32
    %c0_i32_0 = arith.constant 0 : i32
    %c0_i32_1 = arith.constant 0 : i32
    return %c0_i32, %c0_i32_0 : i32, i32
  }
  func.func @transform_7(%arg0: i32) -> (i32, i32, i32) {
    %c0_i32 = arith.constant 0 : i32
    %c0_i32_0 = arith.constant 0 : i32
    %c0_i32_1 = arith.constant 0 : i32
    return %arg0, %c0_i32, %c0_i32_0 : i32, i32, i32
  }
}

</mosaic_0001>

<bundles_post_ra>
// kernel: vrnet_forward.1
= control target key start
LH: loop header
LB: loop body
LE: loop exit
PB: predicated region body
PF: predicated region fallthrough
CT: control target
= control target key end

     0   :  { %12 = vsyncpa [#allocation3], 0  ;;  %s11389_s0 = inlined_call_operand.vmem [shape: bf16[2,392,16], index: 0, kind: input, shape index: {}]   ;;  %s11390_s1 = inlined_call_operand.vmem [shape: f32[256,4], index: 1, kind: input, shape index: {}]   ;;  %s11391_s2 = inlined_call_operand.vmem [shape: bf16[256,64], index: 2, kind: input, shape index: {}]   ;;  %s11392_s3 = inlined_call_operand.vmem [shape: bf16[640,32], index: 3, kind: input, shape index: {}]   ;;  %s11393_s4 = inlined_call_operand.vmem [shape: f32[8,64], index: 4, kind: input, shape index: {}]   ;;  %s11394_s5 = inlined_call_operand.vmem [shape: f32[232,56], index: 5, kind: input, shape index: {}]   ;;  %s11395_s6 = inlined_call_operand.vmem [shape: f32[8,56], index: 6, kind: input, shape index: {}]   ;;  %s11396_s7 = inlined_call_operand.hbm [shape: f32[2,1,9], index: 7, kind: output, shape index: {}]  }
   0x1   :  { %14 = vsyncpa [#allocation3 + $0x1], 0  ;;  %s7435_s24 = smov 0   ;;  %s7437_s25 = smov 0  }
   0x2   :  { %s7439_s26 = smov 0   ;;  %s7441_s27 = smov 0  }
   0x3 LB: > { %s7456_s28 = sadd.s32 4294967295, %s7379_s27   ;;  %s6294_s29 = sadd.s32 4294967294, %s7379_s27   ;;  %s7379_s27 = sphi %s7441_s27, %s11562_s27   ;;  %s7375_s26 = sphi %s7439_s26, %s11561_s26   ;;  %s7371_s25 = sphi %s7437_s25, %s11560_s25   ;;  %s7367_s24 = sphi %s7435_s24, %s11559_s24  }
   0x4   : > { %s7460_s30 = sadd.s32 1, %s7379_s27   ;;  %s179_s8 = sadd.s32 1, %s7375_s26 }
   0x5   : > { %s176_s9 = ssub.s32 %s7379_s27, %s7460_s30  ;;  %p189_p0 = scmp.ne.s32.totalorder %s7375_s26, %s7371_s25 }
   0x6   : > { %p177_p1 = scmp.eq.s32.totalorder %s176_s9, 0  ;;  %p190_p2 = scmp.eq.s32.totalorder %s7456_s28, 1 }
   0x7   : > { %p195_p3 = scmp.ne.s32.totalorder %s7371_s25, %s7367_s24  ;;  %p196_p4 = scmp.eq.s32.totalorder %s6294_s29, 1 }
   0x8   : > { %s7471_s10 = scalar_select %p177_p1, %s7375_s26, %s179_s8  }
   0x9   : > { %p7473_p5 = por %p190_p2, %p189_p0  ;;  %p7477_p6 = por %p196_p4, %p195_p3 }
   0xa   : > { %p6297_p7 = scmp.ge.s32.totalorder %s7379_s27, 1  ;;  %p240_p8 = scmp.lt.s32.totalorder %s7379_s27, 3 }
   0xc   : > { %p241_p9 = pnand %p6297_p7, %p240_p8 }
   0xe   : > { %244 = sbr.rel (%p241_p9) target bundleno = 3037 (0xbdd), region = 48 }
  0x15   : > { %p271_p10 = scmp.lt.s32.totalorder %s7456_s28, 1  ;;  %v11397_v0 = vmov 0   ;;  %v7167_v1 = vld [vmem:[%s11391_s2] sm:$0xff]   ;;  %v7169_v2 = vld [vmem:[%s11391_s2 + $0x8] sm:$0xff]   ;;  %vm665_vm0 = vcmask 1046528   ;;  %v7170_v3 = vld [vmem:[%s11391_s2 + $0x10] sm:$0xff]  }
  0x16   : > { %1784 = vmatprep.subr.bf16.mxu0 %v11397_v0  ;;  %vm447_vm1 = vsmask.f32 7424  ;;  %s7382_s29 = smov 64   ;;  %vm754_vm2 = vsmask.f32 6400  ;;  %v7171_v29 = vld [vmem:[%s11391_s2 + $0x18] sm:$0xff]  }
  0x17   : > { %s272_s13 = scalar_select %p271_p10, %s7456_s28, 1  ;;  %1785 = vmatpush1.bf16.msra.mxu0 %v7167_v1  ;;  %v7172_v38 = vld [vmem:[%s11391_s2 + $0x20] sm:$0xff]   ;;  %v7174_v1 = vld [vmem:[%s11391_s2 + $0x28] sm:$0xff]   ;;  %vm1275_vm3 = vcmask 130048   ;;  %vm1318_vm4 = vcmask 261120   ;;  %vm1361_vm5 = vcmask 392192  }
  0x18   : > { %1786 = vmatprep.subr.bf16.mxu0 %v11397_v0  ;;  %s7383_s15 = smov 32   ;;  %s7385_s19 = smov 48   ;;  %vm1404_vm6 = vcmask 523264   ;;  %vm1447_vm7 = vcmask 654336   ;;  %vm1490_vm8 = vcmask 785408   ;;  %vm1533_vm9 = vcmask 916480  }
  0x19   : > { %s7093_s16 = smul.u32 196, %s272_s13  ;;  %s7386_s23 = smov 80   ;;  %vm7390_vm10 = vmmov 0   ;;  %vm5984_vm11 = vcmask 457728   ;;  %vm6224_vm12 = vcmask 65536  }
  0x1a   : > { %s7387_s13 = smov 96   ;;  %s7388_s18 = smov 112  }
  0x1b   : > { %s7496_s21 = scalar_lea.vmem %s11389_s0, %s7093_s16  ;;  %1787 = vmatpush1.bf16.msra.mxu0 %v7169_v2  ;;  %s7384_s16 = smov 16  }
  0x1c   : > { %v281_v4 = vld [vmem:[%s7496_s21 + $0x8] sm:$0xf]  ;;  %v7503_v5 = vld [vmem:[%s7496_s21 + $0xc] sm:$0xf]  ;;  %v285_v6 = vld [vmem:[%s7496_s21 + $0x18] sm:$0xf]  ;;  %1788 = vmatprep.subr.bf16.mxu0 %v11397_v0 }
  0x1d   : > { %v7507_v7 = vcombine.low %v281_v4, %v7503_v5  ;;  %v7510_v8 = vld [vmem:[%s7496_s21 + $0x1c] sm:$0xf]  ;;  %v283_v9 = vld [vmem:[%s7496_s21 + $0x10] sm:$0xf]  ;;  %v284_v10 = vld [vmem:[%s7496_s21 + $0x14] sm:$0xf] }
  0x1e   : > { %v7515_v11 = vcombine.low %v285_v6, %v7510_v8  ;;  %v332_v12 = vld [vmem:[%s7496_s21 + $0x10] sm:$0xe]  ;;  %v7518_v13 = vcombine.low %v283_v9, %v284_v10  ;;  %v280_v14 = vld [vmem:[%s7496_s21 + $0x4] sm:$0xf]  ;;  %v322_v15 = vld [vmem:[%s7496_s21] sm:$0xe] }
  0x1f   : > { %899 = vrot.lane.b32.xlu1 %v7507_v7, %s7382_s29  ;;  %v6329_v16 = vcombine.low %v332_v12, %v284_v10  ;;  %v6321_v17 = vcombine.low %v322_v15, %v280_v14  ;;  %v667_v18 = vrot.slane %v7507_v7, 1  ;;  %v279_v19 = vld [vmem:[%s7496_s21] sm:$0xf]  ;;  %v456_v20 = vshll.u32 %v7507_v7, 16  ;;  %1789 = vmatpush1.bf16.msra.mxu0 %v7170_v3  ;;  %v327_v48 = vld [vmem:[%s7496_s21 + $0x8] sm:$0xe] }
  0x20   : > { %903 = vrot.lane.b32.xlu0 %v7515_v11, %s7382_s29  ;;  %v7531_v21 = vrot.slane %v7515_v11, 1  ;;  %v464_v22 = vshll.u32 %v7518_v13, 16  ;;  %v468_v23 = vshrl.u32 %v7518_v13, 16  ;;  %v472_v24 = vshll.u32 %v7515_v11, 16  ;;  %1790 = vmatprep.subr.bf16.mxu0 %v11397_v0  ;;  %v7559_v43 = vld [vmem:[%s7496_s21 + $0x20] sm:$0xff]  }
  0x21   : > { %v1147_v25 = vrot.slane %v6329_v16, 1  ;;  %v666_v26 = vrot.slane %v6321_v17, 1  ;;  %v7536_v27 = vcombine.low %v279_v19, %v280_v14  ;;  %v458_v28 = vrot.slane %v456_v20, 1  ;;  %v337_v60 = vld [vmem:[%s7496_s21 + $0x18] sm:$0xe] }
  0x22   : > { %v466_v30 = vrot.slane %v464_v22, 1  ;;  %v474_v31 = vrot.slane %v472_v24, 1  ;;  %v460_v32 = vshrl.u32 %v7507_v7, 16  ;;  %v756_v33 = vshrl.u32 %v6321_v17, 16 }
  0x23   : > { %v1148_v34 = vsel %vm665_vm0, %v1147_v25, %v7531_v21  ;;  %v668_v35 = vsel %vm665_vm0, %v666_v26, %v667_v18  ;;  %v449_v36 = vshrl.u32 %v7536_v27, 16  ;;  %v451_v37 = vshll.u32 %v7536_v27, 16  ;;  %1791 = vmatpush1.bf16.msra.mxu0 %v7171_v29 }
  0x24   : > { %1153 = vrot.lane.b32.xlu1 %v1148_v34, %s7383_s15  ;;  %v470_v39 = vor.u32 %v468_v23, %v466_v30  ;;  %v758_v40 = vrot.slane %v756_v33, 1  ;;  %v759_v41 = vshll.u32 %v6321_v17, 16  ;;  %v763_v42 = vrot.slane %v460_v32, 1  ;;  %1792 = vmatprep.subr.bf16.mxu0 %v11397_v0  ;;  %v7175_v17 = vld [vmem:[%s11391_s2 + $0x30] sm:$0xff]  }
  0x25   : > { %v453_v44 = vrot.slane %v451_v37, 1  ;;  %v764_v45 = vrot.slane %v456_v20, 2  ;;  %v476_v46 = vshrl.u32 %v7515_v11, 16  ;;  %v772_v47 = vrot.slane %v472_v24, 2  ;;  %v7176_v37 = vld [vmem:[%s11391_s2 + $0x38] sm:$0xff]  }
  0x26   : > { %v7564_v49 = vsel %vm447_vm1, %v470_v39, %v474_v31  ;;  %v761_v50 = vrot.slane %v759_v41, 2  ;;  %v1165_v51 = vshrl.u32 %v6329_v16, 16  ;;  %v1168_v52 = vshll.u32 %v6329_v16, 16 }
  0x27   : > { %624 = vrot.lane.b32.xlu0 %v7564_v49, %s7384_s16  ;;  %v454_v53 = vor.u32 %v453_v44, %v449_v36  ;;  %v7569_v54 = vor.u32 %v764_v45, %v763_v42  ;;  %v771_v55 = vrot.slane %v476_v46, 1  ;;  %v462_v56 = vor.u32 %v460_v32, %v458_v28  ;;  %1793 = vmatpush1.bf16.msra.mxu0 %v7172_v38  ;;  %v7178_v44 = vld [vmem:[%s11391_s2 + $0x40] sm:$0xff]  }
  0x28   : > { %709 = vrot.lane.b32.xlu1 %v668_v35, %s7383_s15  ;;  %v762_v57 = vor.u32 %v761_v50, %v758_v40  ;;  %v1167_v58 = vrot.slane %v1165_v51, 1  ;;  %v1170_v59 = vrot.slane %v1168_v52, 2  ;;  %v480_v63 = vshll.u32 %v7559_v43, 16  ;;  %1794 = vmatprep.subr.bf16.mxu0 %v11397_v0  ;;  %v7659_v51 = vld [vmem:[%s7496_s21 + $0x28] sm:$0xff]   ;;  %v7181_v52 = vld [vmem:[%s11391_s2 + $0x58] sm:$0xff]  }
  0x29   : > { %v459_v61 = vsel %vm447_vm1, %v454_v53, %v458_v28  ;;  %v7574_v62 = vor.u32 %v772_v47, %v771_v55  ;;  %v6325_v4 = vcombine.low %v327_v48, %v7503_v5  ;;  %v467_v6 = vsel %vm447_vm1, %v462_v56, %v466_v30  ;;  %v7180_v48 = vld [vmem:[%s11391_s2 + $0x50] sm:$0xff]  }
  0x2a   : > { %v766_v2 = vsel %vm754_vm2, %v762_v57, %v7569_v54  ;;  %v1171_v3 = vor.u32 %v1170_v59, %v1167_v58  ;;  %v478_v9 = vor.u32 %v476_v46, %v474_v31  ;;  %v7587_v10 = vrot.slane %v7518_v13, 1  ;;  %v7179_v46 = vld [vmem:[%s11391_s2 + $0x48] sm:$0xff]  }
  0x2b   : > { %620 = vrot.lane.b32.xlu0 %v459_v61, %s7384_s16  ;;  %v6333_v12 = vcombine.low %v337_v60, %v7510_v8  ;;  %v7593_v15 = vrot.slane %v480_v63, 1  ;;  %v767_v5 = vrot.slane %v468_v23, 1  ;;  %v1054_v16 = vshrl.u32 %v6325_v4, 16  ;;  %1795 = vmatpush1.bf16.msra.mxu0 %v7174_v1  ;;  %v7184_v59 = vld [vmem:[%s11391_s2 + $0x68] sm:$0xff]  }
  0x2c   : > { %852 = vrot.lane.b32.xlu1 %v766_v2, %s7385_s19  ;;  %v1172_v14 = vsel %vm754_vm2, %v1171_v3, %v7574_v62  ;;  %v1002_v19 = vrot.slane %v6325_v4, 1  ;;  %v768_v8 = vrot.slane %v464_v22, 2  ;;  %v1057_v20 = vshll.u32 %v6325_v4, 16  ;;  %1796 = vmatprep.subr.bf16.mxu0 %v11397_v0  ;;  %v7185_v2 = vld [vmem:[%s11391_s2 + $0x70] sm:$0xff]  }
  0x2d   : > { %v484_v24 = vshrl.u32 %v7559_v43, 16  ;;  %v7604_v25 = vrot.slane %v7559_v43, 1  ;;  %v1056_v26 = vrot.slane %v1054_v16, 1  ;;  %v1228_v23 = vrot.slane %v6333_v12, 1 }
  0x2e   : > { %v1059_v28 = vrot.slane %v1057_v20, 2  ;;  %v776_v29 = vrot.slane %v480_v63, 2  ;;  %v1246_v30 = vshrl.u32 %v6333_v12, 16  ;;  %v483_v22 = vsel %vm447_vm1, %v478_v9, %v7593_v15 }
  0x2f   : > { %1186 = vrot.lane.b32.xlu0 %v1172_v14, %s7385_s19  ;;  %v775_v31 = vrot.slane %v484_v24, 1  ;;  %v1249_v32 = vshll.u32 %v6333_v12, 16  ;;  %v1003_v33 = vsel %vm665_vm0, %v1002_v19, %v7587_v10  ;;  %v7615_v34 = vor.u32 %v768_v8, %v767_v5  ;;  %1797 = vmatpush1.bf16.msra.mxu0 %v7175_v17  ;;  %v7737_v8 = vld [vmem:[%s7496_s21 + $0x38] sm:$0xff]  }
  0x30   : > { %957 = vrot.lane.b32.xlu1 %v467_v6, %s7386_s23  ;;  %v1060_v35 = vor.u32 %v1059_v28, %v1056_v26  ;;  %v1248_v36 = vrot.slane %v1246_v30, 1  ;;  %1798 = vmatprep.subr.bf16.mxu0 %v11397_v0  ;;  %v1229_v39 = vsel %vm665_vm0, %v1228_v23, %v7604_v25  ;;  %v670_v47 = vsel %vm665_vm0, %v667_v18, %v7587_v10 }
  0x31   : > { %v1251_v38 = vrot.slane %v1249_v32, 2  ;;  %v7625_v40 = vor.u32 %v776_v29, %v775_v31  ;;  %v7656_v50 = vsel %vm665_vm0, %v7531_v21, %v7604_v25  ;;  %v770_v18 = vsel %vm754_vm2, %v7569_v54, %v7615_v34  ;;  %v7183_v54 = vld [vmem:[%s11391_s2 + $0x60] sm:$0xff]  }
  0x32   : > { %v1061_v42 = vsel %vm754_vm2, %v1060_v35, %v7615_v34  ;;  %v488_v55 = vshll.u32 %v7659_v51, 16  ;;  %v486_v56 = vor.u32 %v484_v24, %v7593_v15  ;;  %v492_v58 = vshrl.u32 %v7659_v51, 16  ;;  %v7762_v35 = vld [vmem:[%s7496_s21 + $0x40] sm:$0xff]  }
  0x33   : > { %961 = vrot.lane.b32.xlu0 %v483_v22, %s7386_s23  ;;  %v1252_v41 = vor.u32 %v1251_v38, %v1248_v36  ;;  %1799 = vmatpush1.bf16.msra.mxu0 %v7176_v37  ;;  %v7674_v53 = vsel %vm754_vm2, %v7574_v62, %v7625_v40  ;;  %v675_v60 = vrot.slane %v7659_v51, 1  ;;  %v672_v3 = vsel %vm665_vm0, %v7587_v10, %v7531_v21  ;;  %v7719_v21 = vld [vmem:[%s7496_s21 + $0x30] sm:$0xff]  }
  0x34   : > { %1008 = vrot.lane.b32.xlu1 %v1003_v33, %s7387_s13  ;;  %1800 = vmatprep.subr.bf16.mxu0 %v11397_v0  ;;  %v490_v57 = vrot.slane %v488_v55, 1  ;;  %v780_v61 = vrot.slane %v488_v55, 2  ;;  %v779_v1 = vrot.slane %v492_v58, 1  ;;  %v500_v10 = vshrl.u32 %v7719_v21, 16 }
  0x35   : > { %v1253_v45 = vsel %vm754_vm2, %v1252_v41, %v7625_v40  ;;  %v677_v12 = vrot.slane %v7719_v21, 1  ;;  %v508_v26 = vshrl.u32 %v7737_v8, 16  ;;  %v679_v32 = vrot.slane %v7737_v8, 1 }
  0x36   : > { %v491_v63 = vsel %vm447_vm1, %v486_v56, %v490_v57  ;;  %v781_v4 = vor.u32 %v780_v61, %v779_v1  ;;  %v783_v14 = vrot.slane %v500_v10, 1  ;;  %v494_v16 = vor.u32 %v492_v58, %v490_v57  ;;  %v7798_v1 = vld [vmem:[%s7496_s21 + $0x50] sm:$0xff]  }
  0x37   : > { %1234 = vrot.lane.b32.xlu0 %v1229_v39, %s7387_s13  ;;  %1801 = vmatpush1.bf16.msra.mxu0 %v7178_v44  ;;  %v678_v17 = vsel %vm665_vm0, %v675_v60, %v677_v12  ;;  %v787_v29 = vrot.slane %v508_v26, 1  ;;  %v512_v36 = vshll.u32 %v7762_v35, 16  ;;  %v516_v37 = vshrl.u32 %v7762_v35, 16 }
  0x38   : > { %1075 = vrot.lane.b32.xlu1 %v1061_v42, %s7388_s18  ;;  %1802 = vmatprep.subr.bf16.mxu0 %v11397_v0  ;;  %v782_v9 = vsel %vm754_vm2, %v7625_v40, %v781_v4  ;;  %v681_v38 = vrot.slane %v7762_v35, 1 }
  0x39   : > { %v514_v40 = vrot.slane %v512_v36, 1  ;;  %v791_v41 = vrot.slane %v516_v37, 1  ;;  %v792_v42 = vrot.slane %v512_v36, 2 }
  0x3a   : > { %v682_v44 = vsel %vm665_vm0, %v679_v32, %v681_v38 }
  0x3b   : > { %1267 = vrot.lane.b32.xlu0 %v1253_v45, %s7388_s18  ;;  %1803 = vmatpush1.bf16.msra.mxu0 %v7179_v46  ;;  %v7774_v45 = vld [vmem:[%s7496_s21 + $0x48] sm:$0xff]  }
  0x3c   : > { %622 = vrot.lane.b32.xlu1 %v467_v6, %s7384_s16  ;;  %1804 = vmatprep.subr.bf16.mxu0 %v11397_v0  ;;  %v774_v6 = vsel %vm754_vm2, %v7615_v34, %v7574_v62  ;;  %v496_v62 = vshll.u32 %v7719_v21, 16  ;;  %v680_v34 = vsel %vm665_vm0, %v677_v12, %v679_v32  ;;  %v683_v58 = vrot.slane %v7774_v45, 1 }
  0x3e   : > { %v784_v15 = vrot.slane %v496_v62, 2  ;;  %v498_v5 = vrot.slane %v496_v62, 1 }
  0x3f   : > { %626 = vrot.lane.b32.xlu0 %v483_v22, %s7384_s16  ;;  %1805 = vmatpush1.bf16.msra.mxu0 %v7180_v48  ;;  %v520_v48 = vshll.u32 %v7774_v45, 16 }
  0x40   : > { %711 = vrot.lane.b32.xlu1 %v670_v47, %s7383_s15  ;;  %1806 = vmatprep.subr.bf16.mxu0 %v11397_v0  ;;  %v785_v19 = vor.u32 %v784_v15, %v783_v14  ;;  %v499_v20 = vsel %vm447_vm1, %v494_v16, %v498_v5  ;;  %v502_v23 = vor.u32 %v500_v10, %v498_v5  ;;  %v7812_v5 = vld [vmem:[%s7496_s21 + $0x58] sm:$0xff]  }
  0x41   : > { %v793_v47 = vor.u32 %v792_v42, %v791_v41 }
  0x42   : > { %v786_v24 = vsel %vm754_vm2, %v781_v4, %v785_v19  ;;  %v685_v4 = vrot.slane %v7798_v1, 1 }
  0x43   : > { %715 = vrot.lane.b32.xlu0 %v7656_v50, %s7383_s15  ;;  %1807 = vmatpush1.bf16.msra.mxu0 %v7181_v52  ;;  %v518_v52 = vor.u32 %v516_v37, %v514_v40 }
  0x44   : > { %854 = vrot.lane.b32.xlu1 %v770_v18, %s7385_s19  ;;  %1808 = vmatprep.subr.bf16.mxu0 %v11397_v0  ;;  %v686_v15 = vsel %vm665_vm0, %v683_v58, %v685_v4 }
  0x47   : > { %858 = vrot.lane.b32.xlu0 %v7674_v53, %s7385_s19  ;;  %1809 = vmatpush1.bf16.msra.mxu0 %v7183_v54  ;;  %v796_v54 = vrot.slane %v520_v48, 2 }
  0x48   : > { %901 = vrot.lane.b32.xlu1 %v7518_v13, %s7382_s29  ;;  %1810 = vmatprep.subr.bf16.mxu0 %v11397_v0 }
  0x4b   : > { %905 = vrot.lane.b32.xlu0 %v7559_v43, %s7382_s29  ;;  %1811 = vmatpush1.bf16.msra.mxu0 %v7184_v59  ;;  %v7187_v43 = vld [vmem:[%s11391_s2 + $0x78] sm:$0xff]  }
  0x4c   : > { %959 = vrot.lane.b32.xlu1 %v7564_v49, %s7386_s23  ;;  %1812 = vmatprep.subr.bf16.mxu0 %v11397_v0  ;;  %v676_v49 = vsel %vm665_vm0, %v7604_v25, %v675_v60  ;;  %v504_v25 = vshll.u32 %v7737_v8, 16 }
  0x4e   : > { %v506_v28 = vrot.slane %v504_v25, 1  ;;  %v788_v30 = vrot.slane %v504_v25, 2  ;;  %v536_v25 = vshll.u32 %v7812_v5, 16 }
  0x4f   : > { %963 = vrot.lane.b32.xlu0 %v491_v63, %s7386_s23  ;;  %1813 = vmatpush1.bf16.msra.mxu0 %v7185_v2 }
  0x50   : > { %1010 = vrot.lane.b32.xlu1 %v672_v3, %s7387_s13  ;;  %1814 = vmatprep.subr.bf16.mxu0 %v11397_v0  ;;  %v507_v22 = vsel %vm447_vm1, %v502_v23, %v506_v28  ;;  %v789_v31 = vor.u32 %v788_v30, %v787_v29  ;;  %v510_v39 = vor.u32 %v508_v26, %v506_v28  ;;  %v540_v26 = vshrl.u32 %v7812_v5, 16 }
  0x52   : > { %v790_v33 = vsel %vm754_vm2, %v785_v19, %v789_v31  ;;  %v515_v46 = vsel %vm447_vm1, %v510_v39, %v514_v40  ;;  %v794_v18 = vsel %vm754_vm2, %v789_v31, %v793_v47  ;;  %v538_v31 = vrot.slane %v536_v25, 1 }
  0x53   : > { %1014 = vrot.lane.b32.xlu0 %v676_v49, %s7387_s13  ;;  %1815 = vmatpush1.bf16.msra.mxu0 %v7187_v43  ;;  %v532_v43 = vshrl.u32 %v7798_v1, 16  ;;  %v803_v32 = vrot.slane %v540_v26, 1 }
  0x54   : > { %1077 = vrot.lane.b32.xlu1 %v774_v6, %s7388_s18 }
  0x55   : > { %v799_v10 = vrot.slane %v532_v43, 1 }
  0x57   : > { %1081 = vrot.lane.b32.xlu0 %v782_v9, %s7388_s18 }
  0x58   : > { %717 = vrot.lane.b32.xlu1 %v676_v49, %s7383_s15 }
  0x5b   : > { %628 = vrot.lane.b32.xlu0 %v491_v63, %s7384_s16  ;;  %v684_v63 = vsel %vm665_vm0, %v681_v38, %v683_v58  ;;  %v7859_v58 = vld [vmem:[%s7496_s21 + $0x60] sm:$0xff]  }
  0x5c   : > { %860 = vrot.lane.b32.xlu1 %v782_v9, %s7385_s19 }
  0x5f   : > { %713 = vrot.lane.b32.xlu0 %v672_v3, %s7383_s15  ;;  %v528_v3 = vshll.u32 %v7798_v1, 16 }
  0x60   : > { %907 = vrot.lane.b32.xlu1 %v7659_v51, %s7382_s29 }
  0x61   : > { %v530_v62 = vrot.slane %v528_v3, 1  ;;  %v800_v12 = vrot.slane %v528_v3, 2 }
  0x63   : > { %856 = vrot.lane.b32.xlu0 %v774_v6, %s7385_s19  ;;  %v801_v19 = vor.u32 %v800_v12, %v799_v10 }
  0x64   : > { %1016 = vrot.lane.b32.xlu1 %v678_v17, %s7387_s13 }
  0x67   : > { %965 = vrot.lane.b32.xlu0 %v499_v20, %s7386_s23 }
  0x68   : > { %1083 = vrot.lane.b32.xlu1 %v786_v24, %s7388_s18 }
  0x6b   : > { %1012 = vrot.lane.b32.xlu0 %v7656_v50, %s7387_s13  ;;  %v524_v50 = vshrl.u32 %v7774_v45, 16 }
  0x6c   : > { %630 = vrot.lane.b32.xlu1 %v499_v20, %s7384_s16 }
  0x6d   : > { %v795_v55 = vrot.slane %v524_v50, 1 }
  0x6f   : > { %1079 = vrot.lane.b32.xlu0 %v7674_v53, %s7388_s18  ;;  %v522_v53 = vrot.slane %v520_v48, 1  ;;  %v797_v57 = vor.u32 %v796_v54, %v795_v55 }
  0x70   : > { %862 = vrot.lane.b32.xlu1 %v786_v24, %s7385_s19 }
  0x71   : > { %v523_v56 = vsel %vm447_vm1, %v518_v52, %v522_v53  ;;  %v798_v60 = vsel %vm754_vm2, %v793_v47, %v797_v57  ;;  %v526_v9 = vor.u32 %v524_v50, %v522_v53  ;;  %v687_v47 = vrot.slane %v7812_v5, 1 }
  0x73   : > { %719 = vrot.lane.b32.xlu0 %v678_v17, %s7383_s15  ;;  %v531_v17 = vsel %vm447_vm1, %v526_v9, %v530_v62 }
  0x74   : > { %967 = vrot.lane.b32.xlu1 %v507_v22, %s7386_s23 }
  0x77   : > { %909 = vrot.lane.b32.xlu0 %v7719_v21, %s7382_s29 }
  0x78   : > { %1085 = vrot.lane.b32.xlu1 %v790_v33, %s7388_s18 }
  0x7b   : > { %1018 = vrot.lane.b32.xlu0 %v680_v34, %s7387_s13 }
  0x7c   : > { %721 = vrot.lane.b32.xlu1 %v680_v34, %s7383_s15 }
  0x7f   : > { %632 = vrot.lane.b32.xlu0 %v507_v22, %s7384_s16  ;;  %v534_v22 = vor.u32 %v532_v43, %v530_v62  ;;  %v689_v43 = vrot.slane %v7859_v58, 1 }
  0x80   : > { %911 = vrot.lane.b32.xlu1 %v7737_v8, %s7382_s29 }
  0x81   : > { %v539_v39 = vsel %vm447_vm1, %v534_v22, %v538_v31  ;;  %v690_v12 = vsel %vm665_vm0, %v687_v47, %v689_v43 }
  0x83   : > { %864 = vrot.lane.b32.xlu0 %v790_v33, %s7385_s19  ;;  %v804_v33 = vrot.slane %v536_v25, 2 }
  0x84   : > { %1020 = vrot.lane.b32.xlu1 %v682_v44, %s7387_s13 }
  0x85   : > { %v805_v40 = vor.u32 %v804_v33, %v803_v32 }
  0x87   : > { %969 = vrot.lane.b32.xlu0 %v515_v46, %s7386_s23  ;;  %v806_v52 = vsel %vm754_vm2, %v801_v19, %v805_v40 }
  0x88   : > { %634 = vrot.lane.b32.xlu1 %v515_v46, %s7384_s16 }
  0x8b   : > { %1087 = vrot.lane.b32.xlu0 %v794_v18, %s7388_s18 }
  0x8c   : > { %866 = vrot.lane.b32.xlu1 %v794_v18, %s7385_s19 }
  0x8f   : > { %723 = vrot.lane.b32.xlu0 %v682_v44, %s7383_s15 }
  0x90   : > { %971 = vrot.lane.b32.xlu1 %v523_v56, %s7386_s23 }
  0x91   : > { %v900_v59 = vpop.permute.xlu1 %899 }
  0x92   : > { %v7793_v61 = vpop.permute.xlu0 %903 }
  0x93   : > { %913 = vrot.lane.b32.xlu0 %v7762_v35, %s7382_s29 }
  0x94   : > { %1089 = vrot.lane.b32.xlu1 %v798_v60, %s7388_s18 }
  0x96   : > { %v1154_v2 = vpop.permute.xlu1 %1153 }
  0x97   : > { %1022 = vrot.lane.b32.xlu0 %v684_v63, %s7387_s13 }
  0x98   : > { %725 = vrot.lane.b32.xlu1 %v684_v63, %s7383_s15  ;;  %v544_v63 = vshll.u32 %v7859_v58, 16 }
  0x99   : > { %v625_v49 = vpop.permute.xlu0 %624 }
  0x9a   : > { %v710_v6 = vpop.permute.xlu1 %709  ;;  %v7824_v28 = vsel %vm1275_vm3, %v7518_v13, %v625_v49  ;;  %v808_v62 = vrot.slane %v544_v63, 2 }
  0x9b   : > { %636 = vrot.lane.b32.xlu0 %v523_v56, %s7384_s16  ;;  %v1604_v13 = vsel %vm1318_vm4, %v7824_v28, %v1154_v2  ;;  %v548_v2 = vshrl.u32 %v7859_v58, 16 }
  0x9c   : > { %915 = vrot.lane.b32.xlu1 %v7774_v45, %s7382_s29 }
  0x9d   : > { %v621_v14 = vpop.permute.xlu0 %620  ;;  %v807_v9 = vrot.slane %v548_v2, 1 }
  0x9e   : > { %v853_v16 = vpop.permute.xlu1 %852  ;;  %v1277_v20 = vsel %vm1275_vm3, %v7536_v27, %v621_v14  ;;  %v802_v27 = vsel %vm754_vm2, %v797_v57, %v801_v19  ;;  %v688_v57 = vsel %vm665_vm0, %v685_v4, %v687_v47  ;;  %v542_v4 = vor.u32 %v540_v26, %v538_v31  ;;  %v7871_v14 = vld [vmem:[%s7496_s21 + $0x68] sm:$0xff]  }
  0x9f   : > { %868 = vrot.lane.b32.xlu0 %v798_v60, %s7385_s19  ;;  %v1320_v29 = vsel %vm1318_vm4, %v1277_v20, %v710_v6  ;;  %v546_v6 = vrot.slane %v544_v63, 1  ;;  %v552_v20 = vshll.u32 %v7871_v14, 16 }
  0xa0   : > { %1024 = vrot.lane.b32.xlu1 %v686_v15, %s7387_s13  ;;  %v1363_v36 = vsel %vm1361_vm5, %v1320_v29, %v853_v16 }
  0xa1   : > { %v1187_v24 = vpop.permute.xlu0 %1186  ;;  %v1406_v41 = vsel %vm1404_vm6, %v1363_v36, %v900_v59  ;;  %v547_v16 = vsel %vm447_vm1, %v542_v4, %v546_v6  ;;  %v554_v22 = vrot.slane %v552_v20, 1  ;;  %v812_v32 = vrot.slane %v552_v20, 2  ;;  %v7314_v4 = vld [vmem:[%s7496_s21 + $0x20] sm:$0xff]  }
  0xa2   : > { %v958_v23 = vpop.permute.xlu1 %957  ;;  %v1612_v37 = vsel %vm1361_vm5, %v1604_v13, %v1187_v24  ;;  %v556_v24 = vshrl.u32 %v7871_v14, 16 }
  0xa3   : > { %973 = vrot.lane.b32.xlu0 %v531_v17, %s7386_s23  ;;  %v1619_v44 = vsel %vm1404_vm6, %v1612_v37, %v7793_v61  ;;  %v1449_v48 = vsel %vm1447_vm7, %v1406_v41, %v958_v23  ;;  %v550_v23 = vor.u32 %v548_v2, %v546_v6 }
  0xa4   : > { %638 = vrot.lane.b32.xlu1 %v531_v17, %s7384_s16  ;;  %v809_v17 = vor.u32 %v808_v62, %v807_v9  ;;  %v811_v31 = vrot.slane %v556_v24, 1  ;;  %v558_v9 = vor.u32 %v556_v24, %v554_v22 }
  0xa5   : > { %v7829_v30 = vpop.permute.xlu0 %961 }
  0xa6   : > { %v1009_v34 = vpop.permute.xlu1 %1008  ;;  %v1625_v46 = vsel %vm1447_vm7, %v1619_v44, %v7829_v30  ;;  %v810_v26 = vsel %vm754_vm2, %v805_v40, %v809_v17 }
  0xa7   : > { %1091 = vrot.lane.b32.xlu0 %v802_v27, %s7388_s18  ;;  %v1492_v53 = vsel %vm1490_vm8, %v1449_v48, %v1009_v34 }
  0xa8   : > { %870 = vrot.lane.b32.xlu1 %v802_v27, %s7385_s19 }
  0xa9   : > { %v1235_v38 = vpop.permute.xlu0 %1234 }
  0xaa   : > { %v1076_v42 = vpop.permute.xlu1 %1075  ;;  %v1633_v50 = vsel %vm1490_vm8, %v1625_v46, %v1235_v38  ;;  %v555_v38 = vsel %vm447_vm1, %v550_v23, %v554_v22  ;;  %v691_v46 = vrot.slane %v7871_v14, 1 }
  0xab   : > { %727 = vrot.lane.b32.xlu0 %v686_v15, %s7383_s15  ;;  %v1535_v56 = vsel %vm1533_vm9, %v1492_v53, %v1076_v42 }
  0xac   : > { %975 = vrot.lane.b32.xlu1 %v539_v39, %s7386_s23 }
  0xad   : > { %v1268_v18 = vpop.permute.xlu0 %1267 }
  0xae   : > { %v623_v55 = vpop.permute.xlu1 %622  ;;  %v1641_v54 = vsel %vm1533_vm9, %v1633_v50, %v1268_v18 }
  0xaf   : > { %917 = vrot.lane.b32.xlu0 %v7798_v1, %s7382_s29  ;;  %1816 = vmatprep.mubr.bf16.mxu0 %v1641_v54  ;;  %v1279_v29 = vsel %vm1275_vm3, %v7507_v7, %v623_v55  ;;  %v7890_v7 = vor.u32 %v812_v32, %v811_v31 }
  0xb0   : > { %1093 = vrot.lane.b32.xlu1 %v806_v52, %s7388_s18  ;;  %1817 = vmatmul.mubr.bf16.vlgmr.msra.gmra.mrb[0].mxu0 %v1535_v56  ;;  %v692_v56 = vsel %vm665_vm0, %v689_v43, %v691_v46 }
  0xb1   : > { %v627_v59 = vpop.permute.xlu0 %626  ;;  %v814_v18 = vsel %vm754_vm2, %v809_v17, %v7890_v7 }
  0xb2   : > { %v712_v60 = vpop.permute.xlu1 %711  ;;  %v1283_v34 = vsel %vm1275_vm3, %v7515_v11, %v627_v59 }
  0xb3   : > { %1026 = vrot.lane.b32.xlu0 %v688_v57, %s7387_s13  ;;  %v1322_v36 = vsel %vm1318_vm4, %v1279_v29, %v712_v60 }
  0xb4   : > { %729 = vrot.lane.b32.xlu1 %v688_v57, %s7383_s15  ;;  %v7915_v57 = vld [vmem:[%s7496_s21 + $0x70] sm:$0xff]  }
  0xb5   : > { %v716_v3 = vpop.permute.xlu0 %715  ;;  %v560_v63 = vshll.u32 %v7915_v57, 16  ;;  %v564_v2 = vshrl.u32 %v7915_v57, 16 }
  0xb6   : > { %v855_v49 = vpop.permute.xlu1 %854  ;;  %v1326_v13 = vsel %vm1318_vm4, %v1283_v34, %v716_v3 }
  0xb7   : > { %640 = vrot.lane.b32.xlu0 %v539_v39, %s7384_s16  ;;  %v1365_v41 = vsel %vm1361_vm5, %v1322_v36, %v855_v49  ;;  %v693_v49 = vrot.slane %v7915_v57, 1  ;;  %v562_v62 = vrot.slane %v560_v63, 1 }
  0xb8   : > { %919 = vrot.lane.b32.xlu1 %v7812_v5, %s7382_s29 }
  0xb9   : > { %v859_v10 = vpop.permute.xlu0 %858  ;;  %v694_v17 = vsel %vm665_vm0, %v691_v46, %v693_v49 }
  0xba   : > { %v902_v15 = vpop.permute.xlu1 %901  ;;  %v1369_v39 = vsel %vm1361_vm5, %v1326_v13, %v859_v10  ;;  %v815_v10 = vrot.slane %v564_v2, 1 }
  0xbb   : > { %872 = vrot.lane.b32.xlu0 %v806_v52, %s7385_s19  ;;  %v1408_v11 = vsel %vm1404_vm6, %v1365_v41, %v902_v15 }
  0xbc   : > { %1028 = vrot.lane.b32.xlu1 %v690_v12, %s7387_s13 }
  0xbd   : > { %v906_v19 = vpop.permute.xlu0 %905 }
  0xbe   : > { %v960_v25 = vpop.permute.xlu1 %959  ;;  %v1412_v42 = vsel %vm1404_vm6, %v1369_v39, %v906_v19  ;;  %v7930_v19 = vld [vmem:[%s7496_s21 + $0x78] sm:$0xff]  }
  0xbf   : > { %977 = vrot.lane.b32.xlu0 %v547_v16, %s7386_s23  ;;  %v1451_v47 = vsel %vm1447_vm7, %v1408_v11, %v960_v25  ;;  %v568_v22 = vshll.u32 %v7930_v19, 16  ;;  %v572_v31 = vshrl.u32 %v7930_v19, 16 }
  0xc0   : > { %642 = vrot.lane.b32.xlu1 %v547_v16, %s7384_s16 }
  0xc1   : > { %v964_v27 = vpop.permute.xlu0 %963  ;;  %v819_v41 = vrot.slane %v572_v31, 1 }
  0xc2   : > { %v1011_v33 = vpop.permute.xlu1 %1010  ;;  %v1455_v44 = vsel %vm1447_vm7, %v1412_v42, %v964_v27  ;;  %v820_v42 = vrot.slane %v568_v22, 2 }
  0xc3   : > { %1095 = vrot.lane.b32.xlu0 %v810_v26, %s7388_s18  ;;  %v1494_v52 = vsel %vm1490_vm8, %v1451_v47, %v1011_v33 }
  0xc4   : > { %874 = vrot.lane.b32.xlu1 %v810_v26, %s7385_s19  ;;  %v563_v26 = vsel %vm447_vm1, %v558_v9, %v562_v62 }
  0xc5   : > { %v1015_v37 = vpop.permute.xlu0 %1014 }
  0xc6   : > { %v1078_v40 = vpop.permute.xlu1 %1077  ;;  %v1498_v48 = vsel %vm1490_vm8, %v1455_v44, %v1015_v37  ;;  %v566_v37 = vor.u32 %v564_v2, %v562_v62 }
  0xc7   : > { %731 = vrot.lane.b32.xlu0 %v690_v12, %s7383_s15  ;;  %v1538_v54 = vsel %vm1533_vm9, %v1494_v52, %v1078_v40  ;;  %v816_v12 = vrot.slane %v560_v63, 2  ;;  %v570_v40 = vrot.slane %v568_v22, 1 }
  0xc8   : > { %979 = vrot.lane.b32.xlu1 %v555_v38, %s7386_s23 }
  0xc9   : > { %v1082_v50 = vpop.permute.xlu0 %1081  ;;  %v817_v24 = vor.u32 %v816_v12, %v815_v10  ;;  %v571_v47 = vsel %vm447_vm1, %v566_v37, %v570_v40 }
  0xca   : > { %v718_v53 = vpop.permute.xlu1 %717  ;;  %v7906_v55 = vsel %vm1533_vm9, %v1498_v48, %v1082_v50 }
  0xcb   : > { %921 = vrot.lane.b32.xlu0 %v7859_v58, %s7382_s29  ;;  %1824 = vmatprep.mubr.bf16.mxu0 %v7906_v55  ;;  %v818_v13 = vsel %vm754_vm2, %v7890_v7, %v817_v24 }
  0xcc   : > { %1097 = vrot.lane.b32.xlu1 %v814_v18, %s7388_s18  ;;  %1825 = vmatmul.mubr.bf16.gmra.mrb[4].mxu0 %v1538_v54 }
  0xcd   : > { %v629_v59 = vpop.permute.xlu0 %628 }
  0xce   : > { %v861_v60 = vpop.permute.xlu1 %860  ;;  %v1285_v6 = vsel %vm1275_vm3, %v7314_v4, %v629_v59  ;;  %v7973_v59 = vld [vmem:[%s7496_s21 + $0x80] sm:$0xff]  }
  0xcf   : > { %1030 = vrot.lane.b32.xlu0 %v692_v56, %s7387_s13  ;;  %v1328_v15 = vsel %vm1318_vm4, %v1285_v6, %v718_v53  ;;  %v576_v4 = vshll.u32 %v7973_v59, 16  ;;  %v580_v6 = vshrl.u32 %v7973_v59, 16  ;;  %v697_v9 = vrot.slane %v7973_v59, 1 }
  0xd0   : > { %733 = vrot.lane.b32.xlu1 %v692_v56, %s7383_s15  ;;  %v1371_v25 = vsel %vm1361_vm5, %v1328_v15, %v861_v60  ;;  %v574_v15 = vor.u32 %v572_v31, %v570_v40 }
  0xd1   : > { %v714_v3 = vpop.permute.xlu0 %713 }
  0xd2   : > { %v908_v43 = vpop.permute.xlu1 %907  ;;  %v1324_v23 = vsel %vm1318_vm4, %v7824_v28, %v714_v3 }
  0xd3   : > { %644 = vrot.lane.b32.xlu0 %v555_v38, %s7384_s16  ;;  %v1414_v29 = vsel %vm1404_vm6, %v1371_v25, %v908_v43 }
  0xd4   : > { %923 = vrot.lane.b32.xlu1 %v7871_v14, %s7382_s29 }
  0xd5   : > { %v857_v16 = vpop.permute.xlu0 %856 }
  0xd6   : > { %v1017_v20 = vpop.permute.xlu1 %1016  ;;  %v1367_v32 = vsel %vm1361_vm5, %v1324_v23, %v857_v16  ;;  %v578_v16 = vrot.slane %v576_v4, 1 }
  0xd7   : > { %876 = vrot.lane.b32.xlu0 %v814_v18, %s7385_s19  ;;  %v1410_v38 = vsel %vm1404_vm6, %v1367_v32, %v7793_v61  ;;  %v821_v61 = vor.u32 %v820_v42, %v819_v41 }
  0xd8   : > { %1032 = vrot.lane.b32.xlu1 %v694_v17, %s7387_s13  ;;  %v1453_v44 = vsel %vm1447_vm7, %v1410_v38, %v7829_v30  ;;  %v695_v30 = vrot.slane %v7930_v19, 1 }
  0xd9   : > { %v966_v27 = vpop.permute.xlu0 %965  ;;  %v822_v53 = vsel %vm754_vm2, %v817_v24, %v821_v61  ;;  %v7996_v24 = vld [vmem:[%s7496_s21 + $0x88] sm:$0xff]  }
  0xda   : > { %v1457_v33 = vsel %vm1447_vm7, %v1414_v29, %v966_v27  ;;  %v1084_v34 = vpop.permute.xlu1 %1083  ;;  %v579_v27 = vsel %vm447_vm1, %v574_v15, %v578_v16  ;;  %v584_v32 = vshll.u32 %v7996_v24, 16 }
  0xdb   : > { %981 = vrot.lane.b32.xlu0 %v563_v26, %s7386_s23  ;;  %v1500_v36 = vsel %vm1490_vm8, %v1457_v33, %v1017_v20  ;;  %v824_v20 = vrot.slane %v576_v4, 2  ;;  %v588_v33 = vshrl.u32 %v7996_v24, 16 }
  0xdc   : > { %646 = vrot.lane.b32.xlu1 %v563_v26, %s7384_s16  ;;  %v7947_v28 = vsel %vm1533_vm9, %v1500_v36, %v1084_v34  ;;  %v698_v26 = vsel %vm665_vm0, %v695_v30, %v697_v9  ;;  %v828_v41 = vrot.slane %v584_v32, 2 }
  0xdd   : > { %1832 = vmatprep.mubr.bf16.mxu0 %v7947_v28  ;;  %v1013_v39 = vpop.permute.xlu0 %1012  ;;  %v827_v40 = vrot.slane %v588_v33, 1 }
  0xde   : > { %v631_v11 = vpop.permute.xlu1 %630  ;;  %v1496_v7 = vsel %vm1490_vm8, %v1453_v44, %v1013_v39  ;;  %v586_v39 = vrot.slane %v584_v32, 1  ;;  %v7208_v44 = vld [vmem:[%s11392_s3] sm:$0xff]  }
  0xdf   : > { %1099 = vrot.lane.b32.xlu0 %v818_v13, %s7388_s18  ;;  %v1287_v18 = vsel %vm1275_vm3, %v7659_v51, %v631_v11  ;;  %v696_v51 = vsel %vm665_vm0, %v693_v49, %v695_v30  ;;  %v7209_v30 = vld [vmem:[%s11392_s3 + $0x8] sm:$0xff]  }
  0xe0   : > { %878 = vrot.lane.b32.xlu1 %v818_v13, %s7385_s19  ;;  %v582_v13 = vor.u32 %v580_v6, %v578_v16 }
  0xe1   : > { %v1080_v46 = vpop.permute.xlu0 %1079 }
  0xe2   : > { %v863_v48 = vpop.permute.xlu1 %862  ;;  %v1541_v50 = vsel %vm1533_vm9, %v1496_v7, %v1080_v46  ;;  %v11399_v7 = vmov 0.0  }
  0xe3   : > { %735 = vrot.lane.b32.xlu0 %v694_v17, %s7383_s15  ;;  %1833 = vmatmul.mubr.bf16.gmra.mrb[8].mxu0 %v1541_v50  ;;  %v823_v17 = vrot.slane %v580_v6, 1 }
  0xe4   : > { %983 = vrot.lane.b32.xlu1 %v571_v47, %s7386_s23  ;;  %6663 = vmatprep.subr.bf16.mxu1 %v11399_v7 }
  0xe5   : > { %v720_v52 = vpop.permute.xlu0 %719  ;;  %v825_v22 = vor.u32 %v824_v20, %v823_v17  ;;  %6664 = vmatpush3.bf16.msra.mxu1 %v7208_v44  ;;  %6671 = vmatprep.mubr.msk.bf16.mxu1 %vm7390_vm10, %v11399_v7 }
  0xe6   : > { %v1330_v54 = vsel %vm1318_vm4, %v1287_v18, %v720_v52  ;;  %v968_v56 = vpop.permute.xlu1 %967  ;;  %6665 = vmatprep.subr.bf16.mxu1 %v11399_v7 }
  0xe7   : > { %925 = vrot.lane.b32.xlu0 %v7915_v57, %s7382_s29  ;;  %v1373_v60 = vsel %vm1361_vm5, %v1330_v54, %v863_v48  ;;  %v8022_v48 = vor.u32 %v828_v41, %v827_v40 }
  0xe8   : > { %1101 = vrot.lane.b32.xlu1 %v822_v53, %s7388_s18 }
  0xe9   : > { %v910_v63 = vpop.permute.xlu0 %909  ;;  %6666 = vmatpush3.bf16.msra.mxu1 %v7209_v30 }
  0xea   : > { %v1416_v2 = vsel %vm1404_vm6, %v1373_v60, %v910_v63  ;;  %v1086_v3 = vpop.permute.xlu1 %1085  ;;  %6667 = vmatprep.subr.bf16.mxu1 %v11399_v7  ;;  %v8052_v63 = vld [vmem:[%s7496_s21 + $0x90] sm:$0xff]  }
  0xeb   : > { %1034 = vrot.lane.b32.xlu0 %v696_v51, %s7387_s13  ;;  %v1459_v43 = vsel %vm1447_vm7, %v1416_v2, %v968_v56  ;;  %v830_v56 = vsel %vm754_vm2, %v825_v22, %v8022_v48  ;;  %v701_v15 = vrot.slane %v8052_v63, 1 }
  0xec   : > { %737 = vrot.lane.b32.xlu1 %v696_v51, %s7383_s15 }
  0xed   : > { %v1019_v49 = vpop.permute.xlu0 %1018 }
  0xee   : > { %v1502_v62 = vsel %vm1490_vm8, %v1459_v43, %v1019_v49  ;;  %v722_v10 = vpop.permute.xlu1 %721  ;;  %v7211_v43 = vld [vmem:[%s11392_s3 + $0x18] sm:$0xff]   ;;  %v592_v49 = vshll.u32 %v8052_v63, 16 }
  0xef   : > { %648 = vrot.lane.b32.xlu0 %v571_v47, %s7384_s16  ;;  %v7986_v12 = vsel %vm1533_vm9, %v1502_v62, %v1086_v3 }
  0xf0   : > { %927 = vrot.lane.b32.xlu1 %v7930_v19, %s7382_s29  ;;  %1840 = vmatprep.mubr.bf16.mxu0 %v7986_v12 }
  0xf1   : > { %1841 = vmatmul.mubr.bf16.gmra.mrb[12].mxu0 %v7906_v55  ;;  %v633_v25 = vpop.permute.xlu0 %632 }
  0xf2   : > { %v1289_v23 = vsel %vm1275_vm3, %v7719_v21, %v633_v25  ;;  %v912_v29 = vpop.permute.xlu1 %911  ;;  %v826_v21 = vsel %vm754_vm2, %v821_v61, %v825_v22  ;;  %v587_v61 = vsel %vm447_vm1, %v582_v13, %v586_v39  ;;  %v590_v25 = vor.u32 %v588_v33, %v586_v39 }
  0xf3   : > { %880 = vrot.lane.b32.xlu0 %v822_v53, %s7385_s19  ;;  %v1332_v55 = vsel %vm1318_vm4, %v1289_v23, %v722_v10  ;;  %v699_v53 = vrot.slane %v7996_v24, 1 }
  0xf4   : > { %1036 = vrot.lane.b32.xlu1 %v698_v26, %s7387_s13 }
  0xf5   : > { %v865_v31 = vpop.permute.xlu0 %864  ;;  %v702_v22 = vsel %vm665_vm0, %v699_v53, %v701_v15 }
  0xf6   : > { %v1375_v34 = vsel %vm1361_vm5, %v1332_v55, %v865_v31  ;;  %v1021_v36 = vpop.permute.xlu1 %1020  ;;  %v8084_v55 = vld [vmem:[%s7496_s21 + $0x98] sm:$0xff]  }
  0xf7   : > { %985 = vrot.lane.b32.xlu0 %v579_v27, %s7386_s23  ;;  %v1418_v37 = vsel %vm1404_vm6, %v1375_v34, %v912_v29  ;;  %v832_v29 = vrot.slane %v592_v49, 2  ;;  %v604_v13 = vshrl.u32 %v8084_v55, 16 }
  0xf8   : > { %650 = vrot.lane.b32.xlu1 %v579_v27, %s7384_s16 }
  0xf9   : > { %v970_v38 = vpop.permute.xlu0 %969 }
  0xfa   : > { %v1461_v42 = vsel %vm1447_vm7, %v1418_v37, %v970_v38  ;;  %v635_v11 = vpop.permute.xlu1 %634 }
  0xfb   : > { %1103 = vrot.lane.b32.xlu0 %v826_v21, %s7388_s18  ;;  %v1504_v47 = vsel %vm1490_vm8, %v1461_v42, %v1021_v36  ;;  %v1291_v52 = vsel %vm1275_vm3, %v7737_v8, %v635_v11  ;;  %v7210_v8 = vld [vmem:[%s11392_s3 + $0x10] sm:$0xff]   ;;  %v835_v11 = vrot.slane %v604_v13, 1 }
  0xfc   : > { %882 = vrot.lane.b32.xlu1 %v826_v21, %s7385_s19  ;;  %6668 = vmatpush3.bf16.msra.mxu1 %v7210_v8  ;;  %v600_v21 = vshll.u32 %v8084_v55, 16 }
  0xfd   : > { %v1088_v46 = vpop.permute.xlu0 %1087  ;;  %6669 = vmatprep.subr.bf16.mxu1 %v11399_v7 }
  0xfe   : > { %v867_v50 = vpop.permute.xlu1 %866  ;;  %v8025_v18 = vsel %vm1533_vm9, %v1504_v47, %v1088_v46  ;;  %v602_v42 = vrot.slane %v600_v21, 1  ;;  %v836_v44 = vrot.slane %v600_v21, 2 }
  0xff   : > { %739 = vrot.lane.b32.xlu0 %v698_v26, %s7383_s15  ;;  %1848 = vmatprep.mubr.bf16.mxu0 %v8025_v18  ;;  %v594_v26 = vrot.slane %v592_v49, 1 }
 0x100   : > { %987 = vrot.lane.b32.xlu1 %v587_v61, %s7386_s23  ;;  %1849 = vmatmul.mubr.bf16.gmra.mrb[16].mxu0 %v7947_v28  ;;  %v700_v28 = vsel %vm665_vm0, %v697_v9, %v699_v53  ;;  %v596_v9 = vshrl.u32 %v8052_v63, 16 }
 0x101   : > { %v724_v54 = vpop.permute.xlu0 %723  ;;  %6670 = vmatpush3.bf16.msra.mxu1 %v7211_v43  ;;  %v595_v33 = vsel %vm447_vm1, %v590_v25, %v594_v26  ;;  %v606_v25 = vor.u32 %v604_v13, %v602_v42 }
 0x102   : > { %v1334_v51 = vsel %vm1318_vm4, %v1291_v52, %v724_v54  ;;  %v972_v60 = vpop.permute.xlu1 %971  ;;  %3358 = vmatprep.subr.bf16.mxu1 %v11397_v0  ;;  %v831_v23 = vrot.slane %v596_v9, 1  ;;  %v598_v39 = vor.u32 %v596_v9, %v594_v26 }
 0x103   : > { %929 = vrot.lane.b32.xlu0 %v7973_v59, %s7382_s29  ;;  %v1377_v2 = vsel %vm1361_vm5, %v1334_v51, %v867_v50 }
 0x104   : > { %1105 = vrot.lane.b32.xlu1 %v830_v56, %s7388_s18  ;;  %v833_v34 = vor.u32 %v832_v29, %v831_v23  ;;  %v603_v30 = vsel %vm447_vm1, %v598_v39, %v602_v42 }
 0x105   : > { %v914_v3 = vpop.permute.xlu0 %913 }
 0x106   : > { %v1420_v4 = vsel %vm1404_vm6, %v1377_v2, %v914_v3  ;;  %v1090_v6 = vpop.permute.xlu1 %1089  ;;  %v8124_v2 = vld [vmem:[%s7496_s21 + $0xa0] sm:$0xff]  }
 0x107   : > { %1038 = vrot.lane.b32.xlu0 %v700_v28, %s7387_s13  ;;  %v1463_v62 = vsel %vm1447_vm7, %v1420_v4, %v972_v60  ;;  %v608_v43 = vshll.u32 %v8124_v2, 16  ;;  %v612_v49 = vshrl.u32 %v8124_v2, 16 }
 0x108   : > { %741 = vrot.lane.b32.xlu1 %v700_v28, %s7383_s15 }
 0x109   : > { %v1023_v10 = vpop.permute.xlu0 %1022  ;;  %v610_v26 = vrot.slane %v608_v43, 1  ;;  %v839_v23 = vrot.slane %v612_v49, 1  ;;  %v840_v29 = vrot.slane %v608_v43, 2 }
 0x10a   : > { %v1506_v16 = vsel %vm1490_vm8, %v1463_v62, %v1023_v10  ;;  %v726_v17 = vpop.permute.xlu1 %725  ;;  %v8134_v10 = vrot.slane %v8124_v2, 1 }
 0x10b   : > { %652 = vrot.lane.b32.xlu0 %v587_v61, %s7384_s16  ;;  %v8070_v20 = vsel %vm1533_vm9, %v1506_v16, %v1090_v6 }
 0x10c   : > { %931 = vrot.lane.b32.xlu1 %v7996_v24, %s7382_s29  ;;  %1856 = vmatprep.mubr.bf16.mxu0 %v8070_v20 }
 0x10d   : > { %1857 = vmatmul.mubr.bf16.gmra.mrb[20].mxu0 %v7986_v12  ;;  %v637_v27 = vpop.permute.xlu0 %636 }
 0x10e   : > { %v1293_v31 = vsel %vm1275_vm3, %v7762_v35, %v637_v27  ;;  %v916_v32 = vpop.permute.xlu1 %915  ;;  %v834_v35 = vsel %vm754_vm2, %v8022_v48, %v833_v34  ;;  %v837_v48 = vor.u32 %v836_v44, %v835_v11 }
 0x10f   : > { %884 = vrot.lane.b32.xlu0 %v830_v56, %s7385_s19  ;;  %v1336_v12 = vsel %vm1318_vm4, %v1293_v31, %v726_v17  ;;  %v703_v56 = vrot.slane %v8084_v55, 1  ;;  %v8148_v31 = vld [vmem:[%s7496_s21 + $0xa8] sm:$0xff]  }
 0x110   : > { %1040 = vrot.lane.b32.xlu1 %v702_v22, %s7387_s13  ;;  %v838_v60 = vsel %vm754_vm2, %v833_v34, %v837_v48  ;;  %v611_v34 = vsel %vm447_vm1, %v606_v25, %v610_v26  ;;  %v945_v21 = vshll.u32 %v8148_v31, 16  ;;  %v949_v13 = vshrl.u32 %v8148_v31, 16 }
 0x111   : > { %v869_v36 = vpop.permute.xlu0 %868 }
 0x112   : > { %v1379_v37 = vsel %vm1361_vm5, %v1336_v12, %v869_v36  ;;  %v1025_v38 = vpop.permute.xlu1 %1024  ;;  %v8155_v12 = vor.u32 %v840_v29, %v839_v23  ;;  %v1062_v42 = vrot.slane %v949_v13, 1  ;;  %v1063_v11 = vrot.slane %v945_v21, 2 }
 0x113   : > { %989 = vrot.lane.b32.xlu0 %v595_v33, %s7386_s23  ;;  %v1422_v40 = vsel %vm1404_vm6, %v1379_v37, %v916_v32 }
 0x114   : > { %654 = vrot.lane.b32.xlu1 %v595_v33, %s7384_s16 }
 0x115   : > { %v974_v41 = vpop.permute.xlu0 %973 }
 0x116   : > { %v1465_v46 = vsel %vm1447_vm7, %v1422_v40, %v974_v41  ;;  %v639_v47 = vpop.permute.xlu1 %638  ;;  %v947_v41 = vrot.slane %v945_v21, 1 }
 0x117   : > { %1107 = vrot.lane.b32.xlu0 %v834_v35, %s7388_s18  ;;  %v1508_v50 = vsel %vm1490_vm8, %v1465_v46, %v1025_v38  ;;  %v1295_v54 = vsel %vm1275_vm3, %v7774_v45, %v639_v47  ;;  %v704_v45 = vsel %vm665_vm0, %v701_v15, %v703_v56 }
 0x118   : > { %886 = vrot.lane.b32.xlu1 %v834_v35, %s7385_s19  ;;  %v8165_v35 = vor.u32 %v612_v49, %v610_v26  ;;  %v8219_v26 = vor.u32 %v949_v13, %v947_v41 }
 0x119   : > { %v1092_v61 = vpop.permute.xlu0 %1091 }
 0x11a   : > { %v871_v52 = vpop.permute.xlu1 %870  ;;  %v8106_v53 = vsel %vm1533_vm9, %v1508_v50, %v1092_v61  ;;  %v948_v50 = vsel %vm447_vm1, %v8165_v35, %v947_v41  ;;  %v7200_v41 = vld [vmem:[%s7496_s21 + $0xa8] ss:$0 sps:$4 sm:$0x11]  }
 0x11b   : > { %743 = vrot.lane.b32.xlu0 %v702_v22, %s7383_s15  ;;  %1864 = vmatprep.mubr.bf16.mxu0 %v8106_v53  ;;  %v706_v22 = vsel %vm665_vm0, %v703_v56, %v8134_v10  ;;  %v8186_v56 = vrot.slane %v8148_v31, 1 }
 0x11c   : > { %991 = vrot.lane.b32.xlu1 %v603_v30, %s7386_s23  ;;  %1865 = vmatmul.mubr.bf16.gmra.mrb[24].mxu0 %v8025_v18 }
 0x11d   : > { %v728_v51 = vpop.permute.xlu0 %727 }
 0x11e   : > { %v1338_v8 = vsel %vm1318_vm4, %v1295_v54, %v728_v51  ;;  %v976_v28 = vpop.permute.xlu1 %975 }
 0x11f   : > { %933 = vrot.lane.b32.xlu0 %v8052_v63, %s7382_s29  ;;  %v1381_v18 = vsel %vm1361_vm5, %v1338_v8, %v871_v52 }
 0x120   : > { %1109 = vrot.lane.b32.xlu1 %v838_v60, %s7388_s18 }
 0x121   : > { %v918_v3 = vpop.permute.xlu0 %917 }
 0x122   : > { %v1424_v4 = vsel %vm1404_vm6, %v1381_v18, %v918_v3  ;;  %v1094_v6 = vpop.permute.xlu1 %1093 }
 0x123   : > { %1042 = vrot.lane.b32.xlu0 %v704_v45, %s7387_s13  ;;  %v1467_v9 = vsel %vm1447_vm7, %v1424_v4, %v976_v28 }
 0x124   : > { %745 = vrot.lane.b32.xlu1 %v704_v45, %s7383_s15 }
 0x125   : > { %v1027_v62 = vpop.permute.xlu0 %1026 }
 0x126   : > { %v1510_v15 = vsel %vm1490_vm8, %v1467_v9, %v1027_v62  ;;  %v730_v16 = vpop.permute.xlu1 %729 }
 0x127   : > { %656 = vrot.lane.b32.xlu0 %v603_v30, %s7384_s16  ;;  %v8139_v17 = vsel %vm1533_vm9, %v1510_v15, %v1094_v6  ;;  %v8174_v30 = vor.u32 %v1063_v11, %v1062_v42 }
 0x128   : > { %935 = vrot.lane.b32.xlu1 %v8084_v55, %s7382_s29  ;;  %1872 = vmatprep.mubr.bf16.mxu0 %v8139_v17 }
 0x129   : > { %1873 = vmatmul.mubr.bf16.gmra.mrb[28].mxu0 %v8070_v20  ;;  %v641_v27 = vpop.permute.xlu0 %640 }
 0x12a   : > { %v1297_v32 = vsel %vm1275_vm3, %v7798_v1, %v641_v27  ;;  %v920_v33 = vpop.permute.xlu1 %919  ;;  %v842_v1 = vsel %vm754_vm2, %v837_v48, %v8155_v12 }
 0x12b   : > { %888 = vrot.lane.b32.xlu0 %v838_v60, %s7385_s19  ;;  %v1340_v20 = vsel %vm1318_vm4, %v1297_v32, %v730_v16  ;;  %v1065_v60 = vsel %vm754_vm2, %v8155_v12, %v8174_v30 }
 0x12c   : > { %1044 = vrot.lane.b32.xlu1 %v706_v22, %s7387_s13 }
 0x12d   : > { %v873_v36 = vpop.permute.xlu0 %872 }
 0x12e   : > { %v1383_v37 = vsel %vm1361_vm5, %v1340_v20, %v873_v36  ;;  %v1029_v38 = vpop.permute.xlu1 %1028 }
 0x12f   : > { %993 = vrot.lane.b32.xlu0 %v611_v34, %s7386_s23  ;;  %v1426_v39 = vsel %vm1404_vm6, %v1383_v37, %v920_v33  ;;  %v8226_v33 = vld [vmem:[%s7496_s21 + $0xb8] sm:$0xff]  }
 0x130   : > { %658 = vrot.lane.b32.xlu1 %v611_v34, %s7384_s16  ;;  %v1207_v37 = vshll.u32 %v8226_v33, 16 }
 0x131   : > { %v978_v40 = vpop.permute.xlu0 %977 }
 0x132   : > { %v1469_v44 = vsel %vm1447_vm7, %v1426_v39, %v978_v40  ;;  %v643_v46 = vpop.permute.xlu1 %642 }
 0x133   : > { %1111 = vrot.lane.b32.xlu0 %v842_v1, %s7388_s18  ;;  %v1512_v61 = vsel %vm1490_vm8, %v1469_v44, %v1029_v38  ;;  %v1299_v54 = vsel %vm1275_vm3, %v7812_v5, %v643_v46  ;;  %v1005_v5 = vsel %vm665_vm0, %v8134_v10, %v8186_v56  ;;  %v1211_v38 = vshrl.u32 %v8226_v33, 16 }
 0x134   : > { %890 = vrot.lane.b32.xlu1 %v842_v1, %s7385_s19  ;;  %v8247_v44 = vrot.slane %v1207_v37, 1 }
 0x135   : > { %v1096_v47 = vpop.permute.xlu0 %1095  ;;  %v1254_v46 = vrot.slane %v1211_v38, 1 }
 0x136   : > { %v875_v48 = vpop.permute.xlu1 %874  ;;  %v8177_v52 = vsel %vm1533_vm9, %v1512_v61, %v1096_v47  ;;  %v1255_v47 = vrot.slane %v1207_v37, 2 }
 0x137   : > { %747 = vrot.lane.b32.xlu0 %v706_v22, %s7383_s15  ;;  %1880 = vmatprep.mubr.bf16.mxu0 %v8177_v52 }
 0x138   : > { %995 = vrot.lane.b32.xlu1 %v948_v50, %s7386_s23  ;;  %1881 = vmatmul.mubr.bf16.gmra.mrb[32].mxu0 %v8106_v53  ;;  %v8199_v53 = vld [vmem:[%s7496_s21 + $0xb0] sm:$0xff]  }
 0x139   : > { %v732_v51 = vpop.permute.xlu0 %731  ;;  %v1126_v6 = vshll.u32 %v8199_v53, 16  ;;  %v1130_v43 = vshrl.u32 %v8199_v53, 16  ;;  %v8209_v62 = vrot.slane %v8199_v53, 1 }
 0x13a   : > { %v1342_v8 = vsel %vm1318_vm4, %v1299_v54, %v732_v51  ;;  %v980_v28 = vpop.permute.xlu1 %979  ;;  %v616_v54 = vshll.u32 %v7200_v41, 16 }
 0x13b   : > { %937 = vrot.lane.b32.xlu0 %v8124_v2, %s7382_s29  ;;  %v1385_v45 = vsel %vm1361_vm5, %v1342_v8, %v875_v48  ;;  %v1128_v23 = vrot.slane %v1126_v6, 1  ;;  %v1173_v29 = vrot.slane %v1130_v43, 1  ;;  %v1174_v27 = vrot.slane %v1126_v6, 2  ;;  %v7201_v48 = vld [vmem:[%s7496_s21 + $0xb8] ss:$0 sps:$4 sm:$0x11]  }
 0x13c   : > { %1113 = vrot.lane.b32.xlu1 %v1065_v60, %s7388_s18  ;;  %v1150_v32 = vsel %vm665_vm0, %v8186_v56, %v8209_v62  ;;  %v1230_v6 = vrot.slane %v8226_v33, 1 }
 0x13d   : > { %v922_v18 = vpop.permute.xlu0 %921  ;;  %v1129_v36 = vsel %vm447_vm1, %v8219_v26, %v1128_v23  ;;  %v1132_v40 = vor.u32 %v1130_v43, %v1128_v23  ;;  %v618_v43 = vrot.slane %v616_v54, 1 }
 0x13e   : > { %v1428_v3 = vsel %vm1404_vm6, %v1385_v45, %v922_v18  ;;  %v1098_v4 = vpop.permute.xlu1 %1097 }
 0x13f   : > { %1046 = vrot.lane.b32.xlu0 %v1005_v5, %s7387_s13  ;;  %v1471_v49 = vsel %vm1447_vm7, %v1428_v3, %v980_v28  ;;  %v1210_v8 = vsel %vm447_vm1, %v1132_v40, %v8247_v44  ;;  %v8258_v28 = vor.u32 %v1255_v47, %v1254_v46 }
 0x140   : > { %1155 = vrot.lane.b32.xlu1 %v1005_v5, %s7383_s15  ;;  %v7202_v5 = vld [vmem:[%s7496_s21 + $0xa8] ss:$0 sps:$4 sm:$0x33]  }
 0x141   : > { %v1031_v9 = vpop.permute.xlu0 %1030 }
 0x142   : > { %v1514_v15 = vsel %vm1490_vm8, %v1471_v49, %v1031_v9  ;;  %v734_v16 = vpop.permute.xlu1 %733  ;;  %v7203_v49 = vld [vmem:[%s7496_s21 + $0xb8] ss:$0 sps:$4 sm:$0x33]  }
 0x143   : > { %1138 = vrot.lane.b32.xlu0 %v948_v50, %s7384_s16  ;;  %v8214_v25 = vsel %vm1533_vm9, %v1514_v15, %v1098_v4  ;;  %v1134_v4 = vshll.u32 %v7201_v48, 16 }
 0x144   : > { %939 = vrot.lane.b32.xlu1 %v8148_v31, %s7382_s29  ;;  %1888 = vmatprep.mubr.bf16.mxu0 %v8214_v25 }
 0x145   : > { %1889 = vmatmul.mubr.bf16.gmra.mrb[36].mxu0 %v8139_v17  ;;  %v645_v22 = vpop.permute.xlu0 %644  ;;  %v8234_v17 = vor.u32 %v1174_v27, %v1173_v29  ;;  %v1136_v27 = vrot.slane %v1134_v4, 1 }
 0x146   : > { %v1301_v34 = vsel %vm1275_vm3, %v7859_v58, %v645_v22  ;;  %v924_v20 = vpop.permute.xlu1 %923  ;;  %v619_v22 = vsel %vm447_vm1, %v8165_v35, %v618_v43  ;;  %v1151_v35 = vrot.slane %v7201_v48, 1 }
 0x147   : > { %1188 = vrot.lane.b32.xlu0 %v1065_v60, %s7385_s19  ;;  %v1344_v21 = vsel %vm1318_vm4, %v1301_v34, %v734_v16  ;;  %v1176_v39 = vsel %vm754_vm2, %v8174_v30, %v8234_v17  ;;  %v1257_v15 = vsel %vm754_vm2, %v8234_v17, %v8258_v28  ;;  %v847_v16 = vshll.u32 %v7202_v5, 16 }
 0x148   : > { %1236 = vrot.lane.b32.xlu1 %v1150_v32, %s7387_s13  ;;  %v1181_v34 = vshll.u32 %v7203_v49, 16  ;;  %v1152_v48 = vsel %vm665_vm0, %v8209_v62, %v1151_v35 }
 0x149   : > { %v877_v13 = vpop.permute.xlu0 %876 }
 0x14a   : > { %v1387_v58 = vsel %vm1361_vm5, %v1344_v21, %v877_v13  ;;  %v1033_v1 = vpop.permute.xlu1 %1032  ;;  %v707_v13 = vrot.slane %v7200_v41, 1  ;;  %v1183_v46 = vrot.slane %v1181_v34, 2 }
 0x14b   : > { %1219 = vrot.lane.b32.xlu0 %v1129_v36, %s7386_s23  ;;  %v1430_v42 = vsel %vm1404_vm6, %v1387_v58, %v924_v20  ;;  %v7204_v20 = vld [vmem:[%s7496_s21 + $0xc0] ss:$0 sps:$4 sm:$0x11]   ;;  %v849_v58 = vrot.slane %v847_v16, 2 }
 0x14c   : > { %1140 = vrot.lane.b32.xlu1 %v1129_v36, %s7384_s16  ;;  %v1215_v47 = vshll.u32 %v7204_v20, 16 }
 0x14d   : > { %v982_v11 = vpop.permute.xlu0 %981 }
 0x14e   : > { %v1473_v61 = vsel %vm1447_vm7, %v1430_v42, %v982_v11  ;;  %v647_v50 = vpop.permute.xlu1 %646  ;;  %v1137_v42 = vsel %vm447_vm1, %v1132_v40, %v1136_v27 }
 0x14f   : > { %1269 = vrot.lane.b32.xlu0 %v1176_v39, %s7388_s18  ;;  %v1516_v60 = vsel %vm1490_vm8, %v1473_v61, %v1033_v1  ;;  %v1303_v3 = vsel %vm1275_vm3, %v7871_v14, %v647_v50  ;;  %v844_v14 = vshrl.u32 %v7202_v5, 16  ;;  %v708_v50 = vsel %vm665_vm0, %v8134_v10, %v707_v13 }
 0x150   : > { %1190 = vrot.lane.b32.xlu1 %v1176_v39, %s7385_s19  ;;  %v1213_v10 = vor.u32 %v1211_v38, %v8247_v44 }
 0x151   : > { %v1100_v51 = vpop.permute.xlu0 %1099  ;;  %v846_v37 = vrot.slane %v844_v14, 1  ;;  %v7207_v14 = vld [vmem:[%s7496_s21 + $0xb0] ss:$0 sps:$4 sm:$0x33]  }
 0x152   : > { %v879_v45 = vpop.permute.xlu1 %878  ;;  %v8262_v18 = vsel %vm1533_vm9, %v1516_v60, %v1100_v51  ;;  %v7206_v51 = vld [vmem:[%s7496_s21 + $0xc0] ss:$0 sps:$4 sm:$0x33]  }
 0x153   : > { %1157 = vrot.lane.b32.xlu0 %v1150_v32, %s7383_s15  ;;  %1896 = vmatprep.mubr.bf16.mxu0 %v8262_v18  ;;  %v1178_v32 = vshrl.u32 %v7203_v49, 16  ;;  %v850_v54 = vor.u32 %v849_v58, %v846_v37  ;;  %v1259_v49 = vshrl.u32 %v7206_v51, 16 }
 0x154   : > { %1221 = vrot.lane.b32.xlu1 %v1210_v8, %s7386_s23  ;;  %1897 = vmatmul.mubr.bf16.gmra.mrb[40].mxu0 %v8177_v52  ;;  %v1231_v52 = vsel %vm665_vm0, %v8209_v62, %v1230_v6 }
 0x155   : > { %v736_v9 = vpop.permute.xlu0 %735  ;;  %v1180_v11 = vrot.slane %v1178_v32, 1  ;;  %v851_v43 = vsel %vm754_vm2, %v8155_v12, %v850_v54  ;;  %v1067_v32 = vshrl.u32 %v7207_v14, 16  ;;  %v1684_v54 = vlaneseq }
 0x156   : > { %v1346_v23 = vsel %vm1318_vm4, %v1303_v3, %v736_v9  ;;  %v984_v29 = vpop.permute.xlu1 %983  ;;  %v7205_v3 = vld [vmem:[%s7496_s21 + $0xb0] ss:$0 sps:$4 sm:$0x11]   ;;  %v1262_v9 = vshll.u32 %v7206_v51, 16 }
 0x157   : > { %1199 = vrot.lane.b32.xlu0 %v8199_v53, %s7382_s29  ;;  %v1389_v36 = vsel %vm1361_vm5, %v1346_v23, %v879_v45  ;;  %v1184_v5 = vor.u32 %v1183_v46, %v1180_v11  ;;  %v1217_v45 = vrot.slane %v1215_v47, 1  ;;  %v1232_v23 = vrot.slane %v7204_v20, 1 }
 0x158   : > { %1271 = vrot.lane.b32.xlu1 %v1257_v15, %s7388_s18  ;;  %v1264_v27 = vrot.slane %v1262_v9, 2 }
 0x159   : > { %v926_v21 = vpop.permute.xlu0 %925  ;;  %v1185_v38 = vsel %vm754_vm2, %v8234_v17, %v1184_v5  ;;  %v1218_v44 = vsel %vm447_vm1, %v1213_v10, %v1217_v45  ;;  %v1070_v17 = vshll.u32 %v7207_v14, 16 }
 0x15a   : > { %v1432_v1 = vsel %vm1404_vm6, %v1389_v36, %v926_v21  ;;  %v1102_v39 = vpop.permute.xlu1 %1101  ;;  %v1233_v21 = vsel %vm665_vm0, %v1230_v6, %v1232_v23 }
 0x15b   : > { %1238 = vrot.lane.b32.xlu0 %v1231_v52, %s7387_s13  ;;  %v1475_v61 = vsel %vm1447_vm7, %v1432_v1, %v984_v29  ;;  %v1261_v29 = vrot.slane %v1259_v49, 1  ;;  %v1006_v1 = vrot.slane %v7205_v3, 1 }
 0x15c   : > { %660 = vrot.lane.b32.xlu1 %v619_v22, %s7384_s16 }
 0x15d   : > { %v1035_v41 = vpop.permute.xlu0 %1034  ;;  %v1265_v20 = vor.u32 %v1264_v27, %v1261_v29 }
 0x15e   : > { %v1518_v60 = vsel %vm1490_vm8, %v1475_v61, %v1035_v41  ;;  %v738_v8 = vpop.permute.xlu1 %737 }
 0x15f   : > { %1142 = vrot.lane.b32.xlu0 %v1137_v42, %s7384_s16  ;;  %v8298_v40 = vsel %vm1533_vm9, %v1518_v60, %v1102_v39  ;;  %v1069_v39 = vrot.slane %v1067_v32, 1  ;;  %v1072_v42 = vrot.slane %v1070_v17, 2  ;;  %v1266_v6 = vsel %vm754_vm2, %v8258_v28, %v1265_v20 }
 0x160   : > { %749 = vrot.lane.b32.xlu1 %v708_v50, %s7383_s15  ;;  %1904 = vmatprep.mubr.bf16.mxu0 %v8298_v40 }
 0x161   : > { %1905 = vmatmul.mubr.bf16.gmra.mrb[44].mxu0 %v8214_v25  ;;  %v649_v4 = vpop.permute.xlu0 %648  ;;  %v953_v25 = vshll.u32 %v7205_v3, 16  ;;  %v1073_v61 = vor.u32 %v1072_v42, %v1069_v39 }
 0x162   : > { %v1305_v15 = vsel %vm1275_vm3, %v7915_v57, %v649_v4  ;;  %v928_v62 = vpop.permute.xlu1 %927 }
 0x163   : > { %1159 = vrot.lane.b32.xlu0 %v1152_v48, %s7383_s15  ;;  %v1348_v16 = vsel %vm1318_vm4, %v1305_v15, %v738_v8  ;;  %v955_v22 = vrot.slane %v953_v25, 1 }
 0x164   : > { %892 = vrot.lane.b32.xlu1 %v851_v43, %s7385_s19  ;;  %v8361_v43 = vld [vmem:[%s11393_s4] sm:$0xff] }
 0x165   : > { %v881_v12 = vpop.permute.xlu0 %880  ;;  %v956_v58 = vsel %vm447_vm1, %v8219_v26, %v955_v22  ;;  %v1007_v26 = vsel %vm665_vm0, %v8186_v56, %v1006_v1  ;;  %v8351_v56 = vshrl.u32 %v1684_v54, 7 }
 0x166   : > { %v1391_v57 = vsel %vm1361_vm5, %v1348_v16, %v881_v12  ;;  %v1037_v52 = vpop.permute.xlu1 %1036 }
 0x167   : > { %1192 = vrot.lane.b32.xlu0 %v1185_v38, %s7385_s19  ;;  %v1434_v34 = vsel %vm1404_vm6, %v1391_v57, %v928_v62  ;;  %11421 = vst [vmem:[#allocation5_spill] sm:$0xff] %v8351_v56 }
 0x168   : > { %1223 = vrot.lane.b32.xlu1 %v1218_v44, %s7386_s23 }
 0x169   : > { %v986_v36 = vpop.permute.xlu0 %985 }
 0x16a   : > { %v1477_v13 = vsel %vm1447_vm7, %v1434_v34, %v986_v36  ;;  %v651_v37 = vpop.permute.xlu1 %650 }
 0x16b   : > { %1201 = vrot.lane.b32.xlu0 %v8226_v33, %s7382_s29  ;;  %v1520_v11 = vsel %vm1490_vm8, %v1477_v13, %v1037_v52  ;;  %v1307_v33 = vsel %vm1275_vm3, %v7930_v19, %v651_v37  ;;  %v1074_v19 = vsel %vm754_vm2, %v8174_v30, %v1073_v61  ;;  %v1686_v30 = vsub.s32 0, %v8351_v56 }
 0x16c   : > { %1240 = vrot.lane.b32.xlu1 %v1233_v21, %s7387_s13 }
 0x16d   : > { %v1104_v35 = vpop.permute.xlu0 %1103  ;;  %v8366_v15 = vrot.slane %v8361_v43, %v1686_v30 }
 0x16e   : > { %v883_v46 = vpop.permute.xlu1 %882  ;;  %v1577_v47 = vsel %vm1533_vm9, %v1520_v11, %v1104_v35 }
 0x16f   : > { %997 = vrot.lane.b32.xlu0 %v956_v58, %s7386_s23  ;;  %1912 = vmatprep.mubr.bf16.mxu0 %v1577_v47 }
 0x170   : > { %1273 = vrot.lane.b32.xlu1 %v1266_v6, %s7388_s18  ;;  %1913 = vmatmul.mubr.bf16.gmra.mrb[48].mxu0 %v8262_v18 }
 0x171   : > { %v740_v41 = vpop.permute.xlu0 %739 }
 0x172   : > { %v1350_v28 = vsel %vm1318_vm4, %v1307_v33, %v740_v41  ;;  %v988_v50 = vpop.permute.xlu1 %987 }
 0x173   : > { %1048 = vrot.lane.b32.xlu0 %v1007_v26, %s7387_s13  ;;  %v1393_v51 = vsel %vm1361_vm5, %v1350_v28, %v883_v46 }
 0x175   : > { %v930_v60 = vpop.permute.xlu0 %929 }
 0x176   : > { %v1436_v8 = vsel %vm1404_vm6, %v1393_v51, %v930_v60  ;;  %v1106_v18 = vpop.permute.xlu1 %1105 }
 0x177   : > { %1115 = vrot.lane.b32.xlu0 %v1074_v19, %s7388_s18  ;;  %v1479_v48 = vsel %vm1447_vm7, %v1436_v8, %v988_v50  ;;  %s6451_s18 = sshll.u32 %s7456_s28, 4  ;;  %s7394_s28 = smov [#allocation2]  }
 0x178   : > { %s7321_s21 = sshll.u32 %s7394_s28, 4  ;;  %s7322_s21 = int_to_ptr.vmem [resolvable:$false] %s7321_s21 }
 0x179   : > { %v1039_v5 = vpop.permute.xlu0 %1038 }
 0x17a   : > { %v1522_v10 = vsel %vm1490_vm8, %v1479_v48, %v1039_v5  ;;  %v742_v45 = vpop.permute.xlu1 %741 }
 0x17b   : > { %v1580_v3 = vsel %vm1533_vm9, %v1522_v10, %v1106_v18 }
 0x17c   : > { %1920 = vmatprep.mubr.bf16.mxu0 %v1580_v3 }
 0x17d   : > { %1921 = vmatmul.mubr.bf16.gmra.mrb[52].mxu0 %v8298_v40  ;;  %v653_v4 = vpop.permute.xlu0 %652 }
 0x17e   : > { %v1309_v49 = vsel %vm1275_vm3, %v7973_v59, %v653_v4  ;;  %v932_v9 = vpop.permute.xlu1 %931 }
 0x17f   : > { %v1352_v62 = vsel %vm1318_vm4, %v1309_v49, %v742_v45 }
 0x181   : > { %v885_v38 = vpop.permute.xlu0 %884 }
 0x182   : > { %v1395_v44 = vsel %vm1361_vm5, %v1352_v62, %v885_v38  ;;  %v1041_v25 = vpop.permute.xlu1 %1040 }
 0x183   : > { %v1818_v40 = vpop.f32.mrb[0].mxu0  ;;  %v1438_v23 = vsel %vm1404_vm6, %v1395_v44, %v932_v9 }
 0x184   : > { %v1819_v14 = vadd.f32 %v1818_v40, %v8366_v15  ;;  %v1820_v16 = vpop.f32.mrb[1].mxu0 }
 0x185   : > { %v1821_v12 = vpop.f32.mrb[2].mxu0  ;;  %v990_v29 = vpop.permute.xlu0 %989 }
 0x186   : > { %v1822_v59 = vadd.f32 %v1821_v12, %v8366_v15  ;;  %v1481_v27 = vsel %vm1447_vm7, %v1438_v23, %v990_v29  ;;  %v655_v57 = vpop.permute.xlu1 %654  ;;  %v1823_v52 = vpop.f32.mrb[3].mxu0  ;;  %v1985_v22 = vmax.f32 %v1819_v14, 0.0 }
 0x187   : > { %v1524_v34 = vsel %vm1490_vm8, %v1481_v27, %v1041_v25  ;;  %v1311_v13 = vsel %vm1275_vm3, %v7996_v24, %v655_v57 }
 0x188   : > { %v1986_v32 = vmax.f32 %v1822_v59, 0.0 }
 0x189   : > { %v1108_v17 = vpop.permute.xlu0 %1107 }
 0x18a   : > { %v2027_v36 = vpack.c.bf16 %v1986_v32, %v1985_v22  ;;  %v887_v21 = vpop.permute.xlu1 %886  ;;  %v1583_v20 = vsel %vm1533_vm9, %v1524_v34, %v1108_v17 }
 0x18b   : > { %1928 = vmatprep.mubr.bf16.mxu0 %v1583_v20 }
 0x18c   : > { %1929 = vmatmul.mubr.bf16.gmra.mrb[56].mxu0 %v1577_v47  ;;  %6672 = vmatmul.mubr.msk.bf16.vlgmr.msra.gmra.mrb[0].mxu1 %vm1404_vm6, %v2027_v36 }
 0x18d   : > { %v744_v37 = vpop.permute.xlu0 %743  ;;  %6675 = vmatprep.mubr.msk.bf16.mxu1 %vm7390_vm10, %v11399_v7 }
 0x18e   : > { %v1354_v58 = vsel %vm1318_vm4, %v1311_v13, %v744_v37  ;;  %v992_v1 = vpop.permute.xlu1 %991 }
 0x18f   : > { %v1397_v39 = vsel %vm1361_vm5, %v1354_v58, %v887_v21 }
 0x191   : > { %v934_v42 = vpop.permute.xlu0 %933 }
 0x192   : > { %v1440_v35 = vsel %vm1404_vm6, %v1397_v39, %v934_v42  ;;  %v1110_v11 = vpop.permute.xlu1 %1109 }
 0x193   : > { %v1483_v6 = vsel %vm1447_vm7, %v1440_v35, %v992_v1 }
 0x195   : > { %v1043_v24 = vpop.permute.xlu0 %1042 }
 0x196   : > { %v1526_v46 = vsel %vm1490_vm8, %v1483_v6, %v1043_v24  ;;  %v746_v47 = vpop.permute.xlu1 %745 }
 0x197   : > { %v1586_v33 = vsel %vm1533_vm9, %v1526_v46, %v1110_v11 }
 0x198   : > { %1936 = vmatprep.mubr.bf16.mxu0 %v1586_v33 }
 0x199   : > { %1937 = vmatmul.mubr.bf16.gmra.mrb[60].mxu0 %v1580_v3  ;;  %v657_v26 = vpop.permute.xlu0 %656 }
 0x19a   : > { %v1313_v61 = vsel %vm1275_vm3, %v8052_v63, %v657_v26  ;;  %v936_v41 = vpop.permute.xlu1 %935 }
 0x19b   : > { %v1356_v28 = vsel %vm1318_vm4, %v1313_v61, %v746_v47 }
 0x19d   : > { %v889_v50 = vpop.permute.xlu0 %888 }
 0x19e   : > { %v1399_v19 = vsel %vm1361_vm5, %v1356_v28, %v889_v50  ;;  %v1045_v54 = vpop.permute.xlu1 %1044 }
 0x19f   : > { %v1826_v51 = vpop.f32.mrb[4].mxu0  ;;  %v1442_v48 = vsel %vm1404_vm6, %v1399_v19, %v936_v41 }
 0x1a0   : > { %v1827_v60 = vadd.f32 %v1826_v51, %v8366_v15  ;;  %v1828_v8 = vpop.f32.mrb[5].mxu0 }
 0x1a1   : > { %v1829_v18 = vpop.f32.mrb[6].mxu0  ;;  %v994_v5 = vpop.permute.xlu0 %993 }
 0x1a2   : > { %v1830_v10 = vadd.f32 %v1829_v18, %v8366_v15  ;;  %v1485_v45 = vsel %vm1447_vm7, %v1442_v48, %v994_v5  ;;  %v659_v63 = vpop.permute.xlu1 %658  ;;  %v1831_v3 = vpop.f32.mrb[7].mxu0  ;;  %v1987_v30 = vmax.f32 %v1827_v60, 0.0 }
 0x1a3   : > { %v1528_v9 = vsel %vm1490_vm8, %v1485_v45, %v1045_v54  ;;  %v1315_v25 = vsel %vm1275_vm3, %v8084_v55, %v659_v63 }
 0x1a4   : > { %v1988_v4 = vmax.f32 %v1830_v10, 0.0 }
 0x1a5   : > { %v1112_v49 = vpop.permute.xlu0 %1111 }
 0x1a6   : > { %v2028_v62 = vpack.c.bf16 %v1988_v4, %v1987_v30  ;;  %v891_v38 = vpop.permute.xlu1 %890  ;;  %v1589_v44 = vsel %vm1533_vm9, %v1528_v9, %v1112_v49 }
 0x1a7   : > { %1944 = vmatprep.mubr.bf16.mxu0 %v1589_v44 }
 0x1a8   : > { %1945 = vmatmul.mubr.bf16.gmra.mrb[64].mxu0 %v1583_v20  ;;  %6676 = vmatmul.mubr.msk.bf16.gmra.mrb[4].mxu1 %vm1404_vm6, %v2028_v62 }
 0x1a9   : > { %v748_v40 = vpop.permute.xlu0 %747  ;;  %6679 = vmatprep.mubr.msk.bf16.mxu1 %vm7390_vm10, %v11399_v7 }
 0x1aa   : > { %v1358_v14 = vsel %vm1318_vm4, %v1315_v25, %v748_v40  ;;  %v996_v16 = vpop.permute.xlu1 %995 }
 0x1ab   : > { %v1401_v12 = vsel %vm1361_vm5, %v1358_v14, %v891_v38 }
 0x1ad   : > { %v938_v23 = vpop.permute.xlu0 %937 }
 0x1ae   : > { %v1444_v29 = vsel %vm1404_vm6, %v1401_v12, %v938_v23  ;;  %v1114_v59 = vpop.permute.xlu1 %1113 }
 0x1af   : > { %v1487_v27 = vsel %vm1447_vm7, %v1444_v29, %v996_v16 }
 0x1b1   : > { %v1047_v55 = vpop.permute.xlu0 %1046 }
 0x1b2   : > { %v1530_v57 = vsel %vm1490_vm8, %v1487_v27, %v1047_v55  ;;  %v1156_v52 = vpop.permute.xlu1 %1155 }
 0x1b3   : > { %v1592_v22 = vsel %vm1533_vm9, %v1530_v57, %v1114_v59 }
 0x1b4   : > { %1952 = vmatprep.mubr.bf16.mxu0 %v1592_v22 }
 0x1b5   : > { %1953 = vmatmul.mubr.bf16.gmra.mrb[68].mxu0 %v1586_v33  ;;  %v1139_v32 = vpop.permute.xlu0 %1138 }
 0x1b6   : > { %v1598_v17 = vsel %vm1275_vm3, %v8124_v2, %v1139_v32  ;;  %v8410_v34 = vpop.permute.xlu1 %939  ;;  %v1834_v36 = vpop.f32.mrb[8].mxu0 }
 0x1b7   : > { %v1835_v21 = vadd.f32 %v1834_v36, %v8366_v15  ;;  %v1836_v20 = vpop.f32.mrb[9].mxu0  ;;  %v1606_v1 = vsel %vm1318_vm4, %v1598_v17, %v1156_v52 }
 0x1b8   : > { %v1837_v13 = vpop.f32.mrb[10].mxu0 }
 0x1b9   : > { %v1838_v37 = vadd.f32 %v1837_v13, %v8366_v15  ;;  %v1839_v58 = vpop.f32.mrb[11].mxu0  ;;  %v1189_v39 = vpop.permute.xlu0 %1188  ;;  %v1989_v11 = vmax.f32 %v1835_v21, 0.0 }
 0x1ba   : > { %v1614_v42 = vsel %vm1361_vm5, %v1606_v1, %v1189_v39  ;;  %v1237_v35 = vpop.permute.xlu1 %1236 }
 0x1bb   : > { %v1990_v6 = vmax.f32 %v1838_v37, 0.0  ;;  %v1620_v46 = vsel %vm1404_vm6, %v1614_v42, %v8410_v34 }
 0x1bd   : > { %v2029_v24 = vpack.c.bf16 %v1990_v6, %v1989_v11  ;;  %v1220_v47 = vpop.permute.xlu0 %1219 }
 0x1be   : > { %v1627_v33 = vsel %vm1447_vm7, %v1620_v46, %v1220_v47  ;;  %v1141_v26 = vpop.permute.xlu1 %1140 }
 0x1bf   : > { %6680 = vmatmul.mubr.msk.bf16.gmra.mrb[8].mxu1 %vm1404_vm6, %v2029_v24  ;;  %v1635_v41 = vsel %vm1490_vm8, %v1627_v33, %v1237_v35  ;;  %v1600_v19 = vsel %vm1275_vm3, %v8148_v31, %v1141_v26 }
 0x1c0   : > { %6683 = vmatprep.mubr.msk.bf16.mxu1 %vm7390_vm10, %v11399_v7 }
 0x1c1   : > { %v1270_v61 = vpop.permute.xlu0 %1269 }
 0x1c2   : > { %v1191_v28 = vpop.permute.xlu1 %1190  ;;  %v1644_v50 = vsel %vm1533_vm9, %v1635_v41, %v1270_v61 }
 0x1c3   : > { %1960 = vmatprep.mubr.bf16.mxu0 %v1644_v50 }
 0x1c4   : > { %v1842_v54 = vpop.f32.mrb[12].mxu0  ;;  %1961 = vmatmul.mubr.bf16.gmra.mrb[72].mxu0 %v1589_v44 }
 0x1c5   : > { %v1843_v51 = vadd.f32 %v1842_v54, %v8366_v15  ;;  %v1844_v60 = vpop.f32.mrb[13].mxu0  ;;  %v1158_v8 = vpop.permute.xlu0 %1157 }
 0x1c6   : > { %v1608_v18 = vsel %vm1318_vm4, %v1600_v19, %v1158_v8  ;;  %v1222_v48 = vpop.permute.xlu1 %1221  ;;  %v1845_v5 = vpop.f32.mrb[14].mxu0 }
 0x1c7   : > { %v1846_v10 = vadd.f32 %v1845_v5, %v8366_v15  ;;  %v1847_v45 = vpop.f32.mrb[15].mxu0  ;;  %v1991_v63 = vmax.f32 %v1843_v51, 0.0  ;;  %v1616_v30 = vsel %vm1361_vm5, %v1608_v18, %v1191_v28 }
 0x1c9   : > { %v1992_v3 = vmax.f32 %v1846_v10, 0.0  ;;  %v1200_v4 = vpop.permute.xlu0 %1199 }
 0x1ca   : > { %v1622_v31 = vsel %vm1404_vm6, %v1616_v30, %v1200_v4  ;;  %v1272_v49 = vpop.permute.xlu1 %1271 }
 0x1cb   : > { %v2030_v9 = vpack.c.bf16 %v1992_v3, %v1991_v63  ;;  %v1629_v62 = vsel %vm1447_vm7, %v1622_v31, %v1222_v48 }
 0x1cd   : > { %6684 = vmatmul.mubr.msk.bf16.gmra.mrb[12].mxu1 %vm1404_vm6, %v2030_v9  ;;  %v1239_v38 = vpop.permute.xlu0 %1238 }
 0x1ce   : > { %v1637_v44 = vsel %vm1490_vm8, %v1629_v62, %v1239_v38  ;;  %v661_v25 = vpop.permute.xlu1 %660  ;;  %6687 = vmatprep.mubr.msk.bf16.mxu1 %vm7390_vm10, %v11399_v7 }
 0x1cf   : > { %v1647_v40 = vsel %vm1533_vm9, %v1637_v44, %v1272_v49  ;;  %v1317_v1 = vsel %vm1275_vm3, %v8124_v2, %v661_v25 }
 0x1d0   : > { %1968 = vmatprep.mubr.bf16.mxu0 %v1647_v40 }
 0x1d1   : > { %1969 = vmatmul.mubr.bf16.gmra.mrb[76].mxu0 %v1592_v22  ;;  %v1143_v14 = vpop.permute.xlu0 %1142 }
 0x1d2   : > { %v750_v16 = vpop.permute.xlu1 %749  ;;  %v1602_v22 = vsel %vm1275_vm3, %v8199_v53, %v1143_v14 }
 0x1d3   : > { %v1850_v12 = vpop.f32.mrb[16].mxu0  ;;  %v1360_v53 = vsel %vm1318_vm4, %v1317_v1, %v750_v16 }
 0x1d4   : > { %v1851_v23 = vadd.f32 %v1850_v12, %v8366_v15  ;;  %v1852_v29 = vpop.f32.mrb[17].mxu0 }
 0x1d5   : > { %v1853_v59 = vpop.f32.mrb[18].mxu0  ;;  %v1160_v27 = vpop.permute.xlu0 %1159 }
 0x1d6   : > { %v1854_v55 = vadd.f32 %v1853_v59, %v8366_v15  ;;  %v893_v57 = vpop.permute.xlu1 %892  ;;  %v1855_v52 = vpop.f32.mrb[19].mxu0  ;;  %v1993_v32 = vmax.f32 %v1851_v23, 0.0  ;;  %v1610_v13 = vsel %vm1318_vm4, %v1602_v22, %v1160_v27 }
 0x1d7   : > { %v1403_v28 = vsel %vm1361_vm5, %v1360_v53, %v893_v57 }
 0x1d8   : > { %v1994_v17 = vmax.f32 %v1854_v55, 0.0  ;;  %v1446_v51 = vsel %vm1404_vm6, %v1403_v28, %v8410_v34 }
 0x1d9   : > { %v1193_v36 = vpop.permute.xlu0 %1192 }
 0x1da   : > { %v2031_v21 = vpack.c.bf16 %v1994_v17, %v1993_v32  ;;  %v1224_v20 = vpop.permute.xlu1 %1223  ;;  %v1618_v37 = vsel %vm1361_vm5, %v1610_v13, %v1193_v36 }
 0x1dc   : > { %6688 = vmatmul.mubr.msk.bf16.gmra.mrb[16].mxu1 %vm1404_vm6, %v2031_v21 }
 0x1dd   : > { %v1202_v58 = vpop.permute.xlu0 %1201  ;;  %6691 = vmatprep.mubr.msk.bf16.mxu1 %vm7390_vm10, %v11399_v7 }
 0x1de   : > { %v1624_v39 = vsel %vm1404_vm6, %v1618_v37, %v1202_v58  ;;  %v1241_v42 = vpop.permute.xlu1 %1240 }
 0x1df   : > { %v1631_v35 = vsel %vm1447_vm7, %v1624_v39, %v1224_v20 }
 0x1e0   : > { %v1858_v11 = vpop.f32.mrb[20].mxu0  ;;  %v1639_v47 = vsel %vm1490_vm8, %v1631_v35, %v1241_v42 }
 0x1e1   : > { %v1859_v6 = vadd.f32 %v1858_v11, %v8366_v15  ;;  %v1860_v24 = vpop.f32.mrb[21].mxu0  ;;  %v998_v46 = vpop.permute.xlu0 %997 }
 0x1e2   : > { %v1274_v33 = vpop.permute.xlu1 %1273  ;;  %v1861_v26 = vpop.f32.mrb[22].mxu0  ;;  %v1489_v8 = vsel %vm1447_vm7, %v1446_v51, %v998_v46 }
 0x1e3   : > { %v1862_v61 = vadd.f32 %v1861_v26, %v8366_v15  ;;  %v1863_v41 = vpop.f32.mrb[23].mxu0  ;;  %v1650_v2 = vsel %vm1533_vm9, %v1639_v47, %v1274_v33  ;;  %v1995_v50 = vmax.f32 %v1859_v6, 0.0 }
 0x1e4   : > { %1976 = vmatprep.mubr.bf16.mxu0 %v1650_v2 }
 0x1e5   : > { %v1996_v19 = vmax.f32 %v1862_v61, 0.0  ;;  %v1049_v54 = vpop.permute.xlu0 %1048 }
 0x1e6   : > { %v1532_v18 = vsel %vm1490_vm8, %v1489_v8, %v1049_v54 }
 0x1e7   : > { %v2032_v60 = vpack.c.bf16 %v1996_v19, %v1995_v50 }
 0x1e9   : > { %6692 = vmatmul.mubr.msk.bf16.gmra.mrb[20].mxu1 %vm1404_vm6, %v2032_v60  ;;  %v1116_v48 = vpop.permute.xlu0 %1115 }
 0x1ea   : > { %v1595_v5 = vsel %vm1533_vm9, %v1532_v18, %v1116_v48  ;;  %6695 = vmatprep.mubr.msk.bf16.mxu1 %vm7390_vm10, %v11399_v7 }
 0x1eb   : > { %1977 = vmatmul.mubr.bf16.gmra.mrb[80].mxu0 %v1595_v5 }
 0x1ef   : > { %v1866_v10 = vpop.f32.mrb[24].mxu0 }
 0x1f0   : > { %v1867_v45 = vadd.f32 %v1866_v10, %v8366_v15  ;;  %v1868_v63 = vpop.f32.mrb[25].mxu0 }
 0x1f1   : > { %v1869_v3 = vpop.f32.mrb[26].mxu0 }
 0x1f2   : > { %v1870_v34 = vadd.f32 %v1869_v3, %v8366_v15  ;;  %v1871_v30 = vpop.f32.mrb[27].mxu0  ;;  %v1997_v4 = vmax.f32 %v1867_v45, 0.0 }
 0x1f4   : > { %v1998_v31 = vmax.f32 %v1870_v34, 0.0 }
 0x1f6   : > { %v2033_v49 = vpack.c.bf16 %v1998_v31, %v1997_v4 }
 0x1f8   : > { %6696 = vmatmul.mubr.msk.bf16.gmra.mrb[24].mxu1 %vm1404_vm6, %v2033_v49 }
 0x1f9   : > { %6699 = vmatprep.mubr.msk.bf16.mxu1 %vm7390_vm10, %v11399_v7 }
 0x1fc   : > { %v1874_v9 = vpop.f32.mrb[28].mxu0 }
 0x1fd   : > { %v1875_v62 = vadd.f32 %v1874_v9, %v8366_v15  ;;  %v1876_v38 = vpop.f32.mrb[29].mxu0 }
 0x1fe   : > { %v1877_v44 = vpop.f32.mrb[30].mxu0 }
 0x1ff   : > { %v1878_v25 = vadd.f32 %v1877_v44, %v8366_v15  ;;  %v1879_v40 = vpop.f32.mrb[31].mxu0  ;;  %v1999_v14 = vmax.f32 %v1875_v62, 0.0 }
 0x201   : > { %v2000_v16 = vmax.f32 %v1878_v25, 0.0  ;;  %v2058_v25 = vsub.s32 1, %v8351_v56 }
 0x203   : > { %v2034_v12 = vpack.c.bf16 %v2000_v16, %v1999_v14  ;;  %v8506_v40 = vrot.slane %v8361_v43, %v2058_v25 }
 0x205   : > { %6700 = vmatmul.mubr.msk.bf16.gmra.mrb[28].mxu1 %vm1404_vm6, %v2034_v12 }
 0x206   : > { %6703 = vmatprep.mubr.msk.bf16.mxu1 %vm7390_vm10, %v11399_v7 }
 0x20b   : > { %v1882_v23 = vpop.f32.mrb[32].mxu0 }
 0x20c   : > { %v1883_v29 = vadd.f32 %v1882_v23, %v8366_v15  ;;  %v1884_v59 = vpop.f32.mrb[33].mxu0 }
 0x20d   : > { %v1885_v27 = vpop.f32.mrb[34].mxu0 }
 0x20e   : > { %v1886_v55 = vadd.f32 %v1885_v27, %v8366_v15  ;;  %v1887_v57 = vpop.f32.mrb[35].mxu0  ;;  %v2001_v52 = vmax.f32 %v1883_v29, 0.0 }
 0x210   : > { %v2002_v32 = vmax.f32 %v1886_v55, 0.0 }
 0x212   : > { %v2035_v17 = vpack.c.bf16 %v2002_v32, %v2001_v52 }
 0x214   : > { %6704 = vmatmul.mubr.msk.bf16.gmra.mrb[32].mxu1 %vm1404_vm6, %v2035_v17 }
 0x215   : > { %6707 = vmatprep.mubr.msk.bf16.mxu1 %vm7390_vm10, %v11399_v7 }
 0x218   : > { %v1890_v36 = vpop.f32.mrb[36].mxu0 }
 0x219   : > { %v1891_v21 = vadd.f32 %v1890_v36, %v8366_v15  ;;  %v1892_v20 = vpop.f32.mrb[37].mxu0 }
 0x21a   : > { %v1893_v22 = vpop.f32.mrb[38].mxu0 }
 0x21b   : > { %v1894_v13 = vadd.f32 %v1893_v22, %v8366_v15  ;;  %v1895_v37 = vpop.f32.mrb[39].mxu0  ;;  %v2003_v58 = vmax.f32 %v1891_v21, 0.0 }
 0x21c   : > { %v7212_v37 = vld [vmem:[%s11392_s3 + $0x20] sm:$0xff]  }
 0x21d   : > { %v2004_v1 = vmax.f32 %v1894_v13, 0.0  ;;  %3359 = vmatpush1.bf16.msra.mxu1 %v7212_v37  ;;  %v7223_v37 = vld [vmem:[%s11392_s3 + $0x78] sm:$0xff]  }
 0x21e   : > { %3360 = vmatprep.subr.bf16.mxu1 %v11397_v0 }
 0x21f   : > { %v2036_v39 = vpack.c.bf16 %v2004_v1, %v2003_v58  ;;  %v7213_v58 = vld [vmem:[%s11392_s3 + $0x28] sm:$0xff]  }
 0x221   : > { %6708 = vmatmul.mubr.msk.bf16.gmra.mrb[36].mxu1 %vm1404_vm6, %v2036_v39 }
 0x222   : > { %6711 = vmatprep.mubr.msk.bf16.mxu1 %vm7390_vm10, %v11399_v7  ;;  %3361 = vmatpush1.bf16.msra.mxu1 %v7213_v58 }
 0x223   : > { %3362 = vmatprep.subr.bf16.mxu1 %v11397_v0 }
 0x227   : > { %v1898_v42 = vpop.f32.mrb[40].mxu0 }
 0x228   : > { %v1899_v35 = vadd.f32 %v1898_v42, %v8366_v15  ;;  %v1900_v11 = vpop.f32.mrb[41].mxu0 }
 0x229   : > { %v1901_v53 = vpop.f32.mrb[42].mxu0  ;;  %v7214_v11 = vld [vmem:[%s11392_s3 + $0x30] sm:$0xff]  }
 0x22a   : > { %v1902_v6 = vadd.f32 %v1901_v53, %v8366_v15  ;;  %v1903_v24 = vpop.f32.mrb[43].mxu0  ;;  %v2005_v46 = vmax.f32 %v1899_v35, 0.0  ;;  %3363 = vmatpush1.bf16.msra.mxu1 %v7214_v11  ;;  %v7224_v11 = vld [vmem:[%s11392_s3 + $0x80] sm:$0xff]  }
 0x22b   : > { %3364 = vmatprep.subr.bf16.mxu1 %v11397_v0 }
 0x22c   : > { %v2006_v47 = vmax.f32 %v1902_v6, 0.0 }
 0x22e   : > { %v2037_v33 = vpack.c.bf16 %v2006_v47, %v2005_v46  ;;  %v7215_v47 = vld [vmem:[%s11392_s3 + $0x38] sm:$0xff]  }
 0x22f   : > { %3365 = vmatpush1.bf16.msra.mxu1 %v7215_v47 }
 0x230   : > { %6712 = vmatmul.mubr.msk.bf16.gmra.mrb[40].mxu1 %vm1404_vm6, %v2037_v33  ;;  %3366 = vmatprep.subr.bf16.mxu1 %v11397_v0 }
 0x231   : > { %6715 = vmatprep.mubr.msk.bf16.mxu1 %vm7390_vm10, %v11399_v7 }
 0x234   : > { %v1906_v26 = vpop.f32.mrb[44].mxu0 }
 0x235   : > { %v1907_v61 = vadd.f32 %v1906_v26, %v8366_v15  ;;  %v1908_v41 = vpop.f32.mrb[45].mxu0  ;;  %v7216_v26 = vld [vmem:[%s11392_s3 + $0x40] sm:$0xff]  }
 0x236   : > { %v1909_v2 = vpop.f32.mrb[46].mxu0  ;;  %3367 = vmatpush1.bf16.msra.mxu1 %v7216_v26 }
 0x237   : > { %v1910_v28 = vadd.f32 %v1909_v2, %v8366_v15  ;;  %v1911_v50 = vpop.f32.mrb[47].mxu0  ;;  %v2007_v19 = vmax.f32 %v1907_v61, 0.0  ;;  %v7217_v61 = vld [vmem:[%s11392_s3 + $0x48] sm:$0xff]   ;;  %3368 = vmatprep.subr.bf16.mxu1 %v11397_v0 }
 0x239   : > { %v2008_v54 = vmax.f32 %v1910_v28, 0.0 }
 0x23a   : > { %3369 = vmatpush1.bf16.msra.mxu1 %v7217_v61 }
 0x23b   : > { %v2038_v51 = vpack.c.bf16 %v2008_v54, %v2007_v19  ;;  %3370 = vmatprep.subr.bf16.mxu1 %v11397_v0 }
 0x23d   : > { %6716 = vmatmul.mubr.msk.bf16.gmra.mrb[44].mxu1 %vm1404_vm6, %v2038_v51 }
 0x23e   : > { %6719 = vmatprep.mubr.msk.bf16.mxu1 %vm7390_vm10, %v11399_v7 }
 0x243   : > { %v1914_v60 = vpop.f32.mrb[48].mxu0 }
 0x244   : > { %v1915_v8 = vadd.f32 %v1914_v60, %v8366_v15  ;;  %v1916_v18 = vpop.f32.mrb[49].mxu0 }
 0x245   : > { %v1917_v48 = vpop.f32.mrb[50].mxu0 }
 0x246   : > { %v1918_v5 = vadd.f32 %v1917_v48, %v8366_v15  ;;  %v1919_v10 = vpop.f32.mrb[51].mxu0  ;;  %v2009_v45 = vmax.f32 %v1915_v8, 0.0 }
 0x247   : > { %v7218_v10 = vld [vmem:[%s11392_s3 + $0x50] sm:$0xff]  }
 0x248   : > { %v2010_v63 = vmax.f32 %v1918_v5, 0.0  ;;  %3371 = vmatpush1.bf16.msra.mxu1 %v7218_v10 }
 0x249   : > { %3372 = vmatprep.subr.bf16.mxu1 %v11397_v0 }
 0x24a   : > { %v2039_v3 = vpack.c.bf16 %v2010_v63, %v2009_v45 }
 0x24c   : > { %6720 = vmatmul.mubr.msk.bf16.gmra.mrb[48].mxu1 %vm1404_vm6, %v2039_v3 }
 0x24d   : > { %6723 = vmatprep.mubr.msk.bf16.mxu1 %vm7390_vm10, %v11399_v7 }
 0x250   : > { %v1922_v34 = vpop.f32.mrb[52].mxu0 }
 0x251   : > { %v1923_v30 = vadd.f32 %v1922_v34, %v8366_v15  ;;  %v1924_v4 = vpop.f32.mrb[53].mxu0 }
 0x252   : > { %v1925_v31 = vpop.f32.mrb[54].mxu0 }
 0x253   : > { %v1926_v49 = vadd.f32 %v1925_v31, %v8366_v15  ;;  %v1927_v9 = vpop.f32.mrb[55].mxu0  ;;  %v2011_v62 = vmax.f32 %v1923_v30, 0.0 }
 0x255   : > { %v2012_v38 = vmax.f32 %v1926_v49, 0.0  ;;  %v7219_v49 = vld [vmem:[%s11392_s3 + $0x58] sm:$0xff]  }
 0x256   : > { %3373 = vmatpush1.bf16.msra.mxu1 %v7219_v49 }
 0x257   : > { %v2040_v44 = vpack.c.bf16 %v2012_v38, %v2011_v62  ;;  %3374 = vmatprep.subr.bf16.mxu1 %v11397_v0 }
 0x259   : > { %6724 = vmatmul.mubr.msk.bf16.gmra.mrb[52].mxu1 %vm1404_vm6, %v2040_v44 }
 0x25a   : > { %6727 = vmatprep.mubr.msk.bf16.mxu1 %vm7390_vm10, %v11399_v7 }
 0x25f   : > { %v1930_v14 = vpop.f32.mrb[56].mxu0  ;;  %v2181_v16 = vpop.f32.mrb[0].mxu1 }
 0x260   : > { %v1931_v12 = vadd.f32 %v1930_v14, %v8366_v15  ;;  %v2182_v23 = vadd.f32 %v2181_v16, %v8506_v40  ;;  %v1932_v29 = vpop.f32.mrb[57].mxu0  ;;  %v6673_v59 = vpop.f32.mrb[1].mxu1  ;;  %v7220_v14 = vld [vmem:[%s11392_s3 + $0x60] sm:$0xff]  }
 0x261   : > { %v1933_v27 = vpop.f32.mrb[58].mxu0  ;;  %v2184_v55 = vpop.f32.mrb[2].mxu1  ;;  %3375 = vmatpush1.bf16.msra.mxu1 %v7220_v14 }
 0x262   : > { %v1934_v57 = vadd.f32 %v1933_v27, %v8366_v15  ;;  %v2185_v52 = vadd.f32 %v2184_v55, %v8506_v40  ;;  %v1935_v32 = vpop.f32.mrb[59].mxu0  ;;  %v6674_v17 = vpop.f32.mrb[3].mxu1  ;;  %v2013_v36 = vmax.f32 %v1931_v12, 0.0  ;;  %v2348_v21 = vmax.f32 %v2182_v23, 0.0  ;;  %3376 = vmatprep.subr.bf16.mxu1 %v11397_v0 }
 0x264   : > { %v2014_v43 = vmax.f32 %v1934_v57, 0.0  ;;  %v2349_v20 = vmax.f32 %v2185_v52, 0.0  ;;  %v7221_v57 = vld [vmem:[%s11392_s3 + $0x68] sm:$0xff]  }
 0x265   : > { %3377 = vmatpush1.bf16.msra.mxu1 %v7221_v57 }
 0x266   : > { %v2041_v22 = vpack.c.bf16 %v2014_v43, %v2013_v36  ;;  %v8512_v13 = vpack.c.bf16 %v2349_v20, %v2348_v21  ;;  %v7222_v43 = vld [vmem:[%s11392_s3 + $0x70] sm:$0xff]   ;;  %3378 = vmatprep.subr.bf16.mxu1 %v11397_v0 }
 0x268   : > { %6728 = vmatmul.mubr.msk.bf16.gmra.mrb[56].mxu1 %vm1404_vm6, %v2041_v22  ;;  %v2414_v30 = vshll.u32 %v8512_v13, 16  ;;  %v2619_v9 = vrot.slane %v8512_v13, 1  ;;  %v2412_v16 = vshrl.u32 %v8512_v13, 16 }
 0x269   : > { %6731 = vmatprep.mubr.msk.bf16.mxu1 %vm7390_vm10, %v11399_v7  ;;  %3379 = vmatpush1.bf16.msra.mxu1 %v7222_v43 }
 0x26a   : > { %v2416_v44 = vrot.slane %v2414_v30, 1  ;;  %3380 = vmatprep.subr.bf16.mxu1 %v11397_v0  ;;  %v7227_v30 = vld [vmem:[%s11392_s3 + $0x98] sm:$0xff]  }
 0x26c   : > { %v1938_v1 = vpop.f32.mrb[60].mxu0  ;;  %v2417_v27 = vor.u32 %v2416_v44, %v2412_v16 }
 0x26d   : > { %v1939_v39 = vadd.f32 %v1938_v1, %v8366_v15  ;;  %v1940_v42 = vpop.f32.mrb[61].mxu0  ;;  %3381 = vmatpush1.bf16.msra.mxu1 %v7223_v37 }
 0x26e   : > { %v1941_v35 = vpop.f32.mrb[62].mxu0  ;;  %3382 = vmatprep.subr.bf16.mxu1 %v11397_v0 }
 0x26f   : > { %v1942_v53 = vadd.f32 %v1941_v35, %v8366_v15  ;;  %v1943_v6 = vpop.f32.mrb[63].mxu0  ;;  %v2015_v24 = vmax.f32 %v1939_v39, 0.0 }
 0x271   : > { %v2016_v46 = vmax.f32 %v1942_v53, 0.0  ;;  %3383 = vmatpush1.bf16.msra.mxu1 %v7224_v11 }
 0x272   : > { %3384 = vmatprep.subr.bf16.mxu1 %v11397_v0 }
 0x273   : > { %v2042_v33 = vpack.c.bf16 %v2016_v46, %v2015_v24 }
 0x275   : > { %6732 = vmatmul.mubr.msk.bf16.gmra.mrb[60].mxu1 %vm1404_vm6, %v2042_v33 }
 0x276   : > { %6735 = vmatprep.mubr.msk.bf16.mxu1 %vm7390_vm10, %v11399_v7 }
 0x27b   : > { %v1946_v41 = vpop.f32.mrb[64].mxu0  ;;  %v2189_v2 = vpop.f32.mrb[4].mxu1 }
 0x27c   : > { %v1947_v28 = vadd.f32 %v1946_v41, %v8366_v15  ;;  %v2190_v50 = vadd.f32 %v2189_v2, %v8506_v40  ;;  %v1948_v19 = vpop.f32.mrb[65].mxu0  ;;  %v6677_v54 = vpop.f32.mrb[5].mxu1  ;;  %v7225_v2 = vld [vmem:[%s11392_s3 + $0x88] sm:$0xff]  }
 0x27d   : > { %v1949_v51 = vpop.f32.mrb[66].mxu0  ;;  %v2192_v60 = vpop.f32.mrb[6].mxu1  ;;  %3385 = vmatpush1.bf16.msra.mxu1 %v7225_v2 }
 0x27e   : > { %v1950_v8 = vadd.f32 %v1949_v51, %v8366_v15  ;;  %v2193_v18 = vadd.f32 %v2192_v60, %v8506_v40  ;;  %v1951_v48 = vpop.f32.mrb[67].mxu0  ;;  %v6678_v5 = vpop.f32.mrb[7].mxu1  ;;  %v2017_v45 = vmax.f32 %v1947_v28, 0.0  ;;  %v2350_v63 = vmax.f32 %v2190_v50, 0.0  ;;  %3386 = vmatprep.subr.bf16.mxu1 %v11397_v0 }
 0x27f   : > { %v7226_v48 = vld [vmem:[%s11392_s3 + $0x90] sm:$0xff]  }
 0x280   : > { %v2018_v3 = vmax.f32 %v1950_v8, 0.0  ;;  %v2351_v34 = vmax.f32 %v2193_v18, 0.0 }
 0x281   : > { %3387 = vmatpush1.bf16.msra.mxu1 %v7226_v48 }
 0x282   : > { %v2043_v4 = vpack.c.bf16 %v2018_v3, %v2017_v45  ;;  %v8554_v31 = vpack.c.bf16 %v2351_v34, %v2350_v63  ;;  %3388 = vmatprep.subr.bf16.mxu1 %v11397_v0 }
 0x284   : > { %2695 = vrot.lane.b32.xlu0 %v8554_v31, %s7387_s13  ;;  %6736 = vmatmul.mubr.msk.bf16.gmra.mrb[64].mxu1 %vm1404_vm6, %v2043_v4  ;;  %v2620_v62 = vrot.slane %v8554_v31, 1  ;;  %v2419_v38 = vshll.u32 %v8554_v31, 16  ;;  %v2423_v8 = vshrl.u32 %v8554_v31, 16 }
 0x285   : > { %6739 = vmatprep.mubr.msk.bf16.mxu1 %vm7390_vm10, %v11399_v7  ;;  %3389 = vmatpush1.bf16.msra.mxu1 %v7227_v30 }
 0x286   : > { %v2621_v25 = vsel %vm665_vm0, %v2619_v9, %v2620_v62  ;;  %v8573_v12 = vrot.slane %v2419_v38, 1  ;;  %6755 = vmatprep.subr.bf16.mxu1 %v11399_v7 }
 0x288   : > { %2656 = vrot.lane.b32.xlu0 %v2621_v25, %s7382_s29  ;;  %v1954_v23 = vpop.f32.mrb[68].mxu0  ;;  %v2422_v17 = vsel %vm447_vm1, %v2417_v27, %v8573_v12  ;;  %v2425_v10 = vor.u32 %v2423_v8, %v8573_v12 }
 0x289   : > { %v1955_v29 = vadd.f32 %v1954_v23, %v8366_v15  ;;  %v1956_v59 = vpop.f32.mrb[69].mxu0 }
 0x28a   : > { %v1957_v55 = vpop.f32.mrb[70].mxu0 }
 0x28b   : > { %v1958_v52 = vadd.f32 %v1957_v55, %v8366_v15  ;;  %v1959_v32 = vpop.f32.mrb[71].mxu0  ;;  %v2019_v36 = vmax.f32 %v1955_v29, 0.0 }
 0x28c   : > { %2562 = vrot.lane.b32.xlu0 %v2422_v17, %s7383_s15 }
 0x28d   : > { %v2020_v21 = vmax.f32 %v1958_v52, 0.0 }
 0x28f   : > { %v2044_v20 = vpack.c.bf16 %v2020_v21, %v2019_v36 }
 0x291   : > { %6740 = vmatmul.mubr.msk.bf16.gmra.mrb[68].mxu1 %vm1404_vm6, %v2044_v20 }
 0x292   : > { %v2197_v22 = vpop.f32.mrb[8].mxu1  ;;  %6743 = vmatprep.mubr.msk.bf16.mxu1 %vm7390_vm10, %v11399_v7 }
 0x293   : > { %v2198_v58 = vadd.f32 %v2197_v22, %v8506_v40  ;;  %v6681_v1 = vpop.f32.mrb[9].mxu1 }
 0x294   : > { %v2200_v39 = vpop.f32.mrb[10].mxu1 }
 0x295   : > { %v2201_v42 = vadd.f32 %v2200_v39, %v8506_v40  ;;  %v6682_v35 = vpop.f32.mrb[11].mxu1  ;;  %v2352_v53 = vmax.f32 %v2198_v58, 0.0 }
 0x297   : > { %v2353_v6 = vmax.f32 %v2201_v42, 0.0  ;;  %v1962_v24 = vpop.f32.mrb[72].mxu0 }
 0x298   : > { %v1963_v46 = vadd.f32 %v1962_v24, %v8366_v15  ;;  %v1964_v47 = vpop.f32.mrb[73].mxu0 }
 0x299   : > { %v8604_v33 = vpack.c.bf16 %v2353_v6, %v2352_v53  ;;  %v1965_v26 = vpop.f32.mrb[74].mxu0 }
 0x29a   : > { %v1966_v61 = vadd.f32 %v1965_v26, %v8366_v15  ;;  %v1967_v41 = vpop.f32.mrb[75].mxu0  ;;  %v2021_v19 = vmax.f32 %v1963_v46, 0.0 }
 0x29b   : > { %2782 = vrot.lane.b32.xlu1 %v8604_v33, %s7382_s29  ;;  %2697 = vrot.lane.b32.xlu0 %v8604_v33, %s7387_s13  ;;  %v2622_v28 = vrot.slane %v8604_v33, 1  ;;  %v2427_v50 = vshll.u32 %v8604_v33, 16  ;;  %v2431_v32 = vshrl.u32 %v8604_v33, 16 }
 0x29c   : > { %v2022_v54 = vmax.f32 %v1966_v61, 0.0 }
 0x29d   : > { %v2623_v51 = vsel %vm665_vm0, %v2620_v62, %v2622_v28  ;;  %v2429_v18 = vrot.slane %v2427_v50, 1 }
 0x29e   : > { %v2045_v60 = vpack.c.bf16 %v2022_v54, %v2021_v19 }
 0x29f   : > { %2743 = vrot.lane.b32.xlu1 %v2623_v51, %s7383_s15  ;;  %2658 = vrot.lane.b32.xlu0 %v2623_v51, %s7382_s29  ;;  %v8631_v34 = vsel %vm447_vm1, %v2425_v10, %v2429_v18  ;;  %v2433_v36 = vor.u32 %v2431_v32, %v2429_v18 }
 0x2a0   : > { %v2205_v5 = vpop.f32.mrb[12].mxu1  ;;  %6744 = vmatmul.mubr.msk.bf16.gmra.mrb[72].mxu1 %vm1404_vm6, %v2045_v60 }
 0x2a1   : > { %v2206_v45 = vadd.f32 %v2205_v5, %v8506_v40  ;;  %v6685_v63 = vpop.f32.mrb[13].mxu1  ;;  %6747 = vmatprep.mubr.msk.bf16.mxu1 %vm7390_vm10, %v11399_v7 }
 0x2a2   : > { %v2208_v3 = vpop.f32.mrb[14].mxu1 }
 0x2a3   : > { %v2209_v4 = vadd.f32 %v2208_v3, %v8506_v40  ;;  %v6686_v49 = vpop.f32.mrb[15].mxu1  ;;  %2564 = vrot.lane.b32.xlu0 %v8631_v34, %s7383_s15  ;;  %v2354_v62 = vmax.f32 %v2206_v45, 0.0 }
 0x2a4   : > { %v1970_v9 = vpop.f32.mrb[76].mxu0 }
 0x2a5   : > { %v2355_v38 = vmax.f32 %v2209_v4, 0.0  ;;  %v1971_v44 = vadd.f32 %v1970_v9, %v8366_v15  ;;  %v1972_v25 = vpop.f32.mrb[77].mxu0 }
 0x2a6   : > { %v1973_v14 = vpop.f32.mrb[78].mxu0 }
 0x2a7   : > { %v8641_v16 = vpack.c.bf16 %v2355_v38, %v2354_v62  ;;  %v1974_v12 = vadd.f32 %v1973_v14, %v8366_v15  ;;  %v1975_v23 = vpop.f32.mrb[79].mxu0  ;;  %v2023_v29 = vmax.f32 %v1971_v44, 0.0 }
 0x2a9   : > { %v2024_v59 = vmax.f32 %v1974_v12, 0.0  ;;  %2784 = vrot.lane.b32.xlu1 %v8641_v16, %s7382_s29  ;;  %2699 = vrot.lane.b32.xlu0 %v8641_v16, %s7387_s13  ;;  %v2624_v27 = vrot.slane %v8641_v16, 1  ;;  %v2435_v55 = vshll.u32 %v8641_v16, 16  ;;  %v2439_v24 = vshrl.u32 %v8641_v16, 16 }
 0x2ab   : > { %v2046_v57 = vpack.c.bf16 %v2024_v59, %v2023_v29  ;;  %v8652_v52 = vsel %vm665_vm0, %v2622_v28, %v2624_v27  ;;  %v2437_v17 = vrot.slane %v2435_v55, 1 }
 0x2ad   : > { %2745 = vrot.lane.b32.xlu1 %v8652_v52, %s7383_s15  ;;  %2660 = vrot.lane.b32.xlu0 %v8652_v52, %s7382_s29  ;;  %v8664_v22 = vsel %vm447_vm1, %v2433_v36, %v2437_v17  ;;  %v2441_v41 = vor.u32 %v2439_v24, %v2437_v17 }
 0x2ae   : > { %6748 = vmatmul.mubr.msk.bf16.gmra.mrb[76].mxu1 %vm1404_vm6, %v2046_v57 }
 0x2af   : > { %v2213_v21 = vpop.f32.mrb[16].mxu1  ;;  %6751 = vmatprep.mubr.msk.bf16.mxu1 %vm7390_vm10, %v11399_v7 }
 0x2b0   : > { %v2214_v43 = vadd.f32 %v2213_v21, %v8506_v40  ;;  %v6689_v20 = vpop.f32.mrb[17].mxu1 }
 0x2b1   : > { %2828 = vrot.lane.b32.xlu1 %v8664_v22, %s7387_s13  ;;  %v2216_v37 = vpop.f32.mrb[18].mxu1  ;;  %2566 = vrot.lane.b32.xlu0 %v8664_v22, %s7383_s15 }
 0x2b2   : > { %v2217_v58 = vadd.f32 %v2216_v37, %v8506_v40  ;;  %v6690_v1 = vpop.f32.mrb[19].mxu1  ;;  %v2356_v39 = vmax.f32 %v2214_v43, 0.0 }
 0x2b4   : > { %v2357_v42 = vmax.f32 %v2217_v58, 0.0 }
 0x2b6   : > { %v8671_v35 = vpack.c.bf16 %v2357_v42, %v2356_v39 }
 0x2b8   : > { %2786 = vrot.lane.b32.xlu1 %v8671_v35, %s7382_s29  ;;  %2701 = vrot.lane.b32.xlu0 %v8671_v35, %s7387_s13  ;;  %v2626_v11 = vrot.slane %v8671_v35, 1  ;;  %v2443_v53 = vshll.u32 %v8671_v35, 16  ;;  %v2447_v9 = vshrl.u32 %v8671_v35, 16 }
 0x2ba   : > { %v8680_v6 = vsel %vm665_vm0, %v2624_v27, %v2626_v11  ;;  %v2445_v46 = vrot.slane %v2443_v53, 1 }
 0x2bc   : > { %2747 = vrot.lane.b32.xlu1 %v8680_v6, %s7383_s15  ;;  %v2221_v47 = vpop.f32.mrb[20].mxu1  ;;  %2662 = vrot.lane.b32.xlu0 %v8680_v6, %s7382_s29  ;;  %v8691_v60 = vsel %vm447_vm1, %v2441_v41, %v2445_v46  ;;  %v2449_v38 = vor.u32 %v2447_v9, %v2445_v46 }
 0x2bd   : > { %v2222_v26 = vadd.f32 %v2221_v47, %v8506_v40  ;;  %v6693_v61 = vpop.f32.mrb[21].mxu1 }
 0x2be   : > { %v1978_v2 = vpop.f32.mrb[80].mxu0  ;;  %v2224_v28 = vpop.f32.mrb[22].mxu1 }
 0x2bf   : > { %v1979_v50 = vadd.f32 %v1978_v2, %v8366_v15  ;;  %v2225_v19 = vadd.f32 %v2224_v28, %v8506_v40  ;;  %v1980_v54 = vpop.f32.mrb[81].mxu0  ;;  %v6694_v51 = vpop.f32.mrb[23].mxu1  ;;  %v2358_v18 = vmax.f32 %v2222_v26, 0.0 }
 0x2c0   : > { %2830 = vrot.lane.b32.xlu1 %v8691_v60, %s7387_s13  ;;  %2568 = vrot.lane.b32.xlu0 %v8691_v60, %s7383_s15  ;;  %v1981_v8 = vpop.f32.mrb[82].mxu0 }
 0x2c1   : > { %v2359_v48 = vmax.f32 %v2225_v19, 0.0  ;;  %v1982_v5 = vadd.f32 %v1981_v8, %v8366_v15  ;;  %v1983_v10 = vpop.f32.mrb[83].mxu0  ;;  %v2025_v45 = vmax.f32 %v1979_v50, 0.0 }
 0x2c3   : > { %v8698_v63 = vpack.c.bf16 %v2359_v48, %v2358_v18  ;;  %v2026_v3 = vmax.f32 %v1982_v5, 0.0 }
 0x2c5   : > { %v2047_v30 = vpack.c.bf16 %v2026_v3, %v2025_v45  ;;  %2788 = vrot.lane.b32.xlu1 %v8698_v63, %s7382_s29  ;;  %2703 = vrot.lane.b32.xlu0 %v8698_v63, %s7387_s13  ;;  %v2628_v4 = vrot.slane %v8698_v63, 1  ;;  %v2451_v49 = vshll.u32 %v8698_v63, 16  ;;  %v2455_v21 = vshrl.u32 %v8698_v63, 16 }
 0x2c7   : > { %6752 = vmatmul.mubr.msk.bf16.gmra.mrb[80].mxu1 %vm1404_vm6, %v2047_v30  ;;  %v8708_v15 = vsel %vm665_vm0, %v2626_v11, %v2628_v4  ;;  %v2453_v62 = vrot.slane %v2451_v49, 1 }
 0x2c9   : > { %2749 = vrot.lane.b32.xlu1 %v8708_v15, %s7383_s15  ;;  %2664 = vrot.lane.b32.xlu0 %v8708_v15, %s7382_s29  ;;  %v8717_v12 = vsel %vm447_vm1, %v2449_v38, %v2453_v62  ;;  %v2457_v1 = vor.u32 %v2455_v21, %v2453_v62 }
 0x2cb   : > { %v2229_v44 = vpop.f32.mrb[24].mxu1 }
 0x2cc   : > { %v2230_v25 = vadd.f32 %v2229_v44, %v8506_v40  ;;  %v6697_v14 = vpop.f32.mrb[25].mxu1 }
 0x2cd   : > { %2832 = vrot.lane.b32.xlu1 %v8717_v12, %s7387_s13  ;;  %v2232_v23 = vpop.f32.mrb[26].mxu1  ;;  %2570 = vrot.lane.b32.xlu0 %v8717_v12, %s7383_s15 }
 0x2ce   : > { %v2233_v29 = vadd.f32 %v2232_v23, %v8506_v40  ;;  %v6698_v59 = vpop.f32.mrb[27].mxu1  ;;  %v2360_v27 = vmax.f32 %v2230_v25, 0.0 }
 0x2d0   : > { %v2361_v55 = vmax.f32 %v2233_v29, 0.0 }
 0x2d2   : > { %v8724_v57 = vpack.c.bf16 %v2361_v55, %v2360_v27 }
 0x2d4   : > { %2790 = vrot.lane.b32.xlu1 %v8724_v57, %s7382_s29  ;;  %2705 = vrot.lane.b32.xlu0 %v8724_v57, %s7387_s13  ;;  %v2630_v32 = vrot.slane %v8724_v57, 1  ;;  %v2459_v17 = vshll.u32 %v8724_v57, 16  ;;  %v2463_v2 = vshrl.u32 %v8724_v57, 16 }
 0x2d6   : > { %v8733_v36 = vsel %vm665_vm0, %v2628_v4, %v2630_v32  ;;  %v2461_v43 = vrot.slane %v2459_v17, 1 }
 0x2d8   : > { %2751 = vrot.lane.b32.xlu1 %v8733_v36, %s7383_s15  ;;  %v2237_v20 = vpop.f32.mrb[28].mxu1  ;;  %2666 = vrot.lane.b32.xlu0 %v8733_v36, %s7382_s29  ;;  %v8743_v53 = vsel %vm447_vm1, %v2457_v1, %v2461_v43  ;;  %v2465_v50 = vor.u32 %v2463_v2, %v2461_v43 }
 0x2d9   : > { %v2238_v37 = vadd.f32 %v2237_v20, %v8506_v40  ;;  %v6701_v58 = vpop.f32.mrb[29].mxu1 }
 0x2da   : > { %v2240_v39 = vpop.f32.mrb[30].mxu1 }
 0x2db   : > { %v2241_v42 = vadd.f32 %v2240_v39, %v8506_v40  ;;  %v6702_v11 = vpop.f32.mrb[31].mxu1  ;;  %v2362_v24 = vmax.f32 %v2238_v37, 0.0 }
 0x2dc   : > { %2834 = vrot.lane.b32.xlu1 %v8743_v53, %s7387_s13  ;;  %2572 = vrot.lane.b32.xlu0 %v8743_v53, %s7383_s15 }
 0x2dd   : > { %v2363_v46 = vmax.f32 %v2241_v42, 0.0 }
 0x2df   : > { %v8749_v47 = vpack.c.bf16 %v2363_v46, %v2362_v24 }
 0x2e1   : > { %2792 = vrot.lane.b32.xlu1 %v8749_v47, %s7382_s29  ;;  %2707 = vrot.lane.b32.xlu0 %v8749_v47, %s7387_s13  ;;  %v2632_v26 = vrot.slane %v8749_v47, 1  ;;  %v2467_v61 = vshll.u32 %v8749_v47, 16  ;;  %v2471_v9 = vshrl.u32 %v8749_v47, 16 }
 0x2e3   : > { %v8758_v41 = vsel %vm665_vm0, %v2630_v32, %v2632_v26  ;;  %v2469_v28 = vrot.slane %v2467_v61, 1 }
 0x2e5   : > { %2753 = vrot.lane.b32.xlu1 %v8758_v41, %s7383_s15  ;;  %2668 = vrot.lane.b32.xlu0 %v8758_v41, %s7382_s29  ;;  %v8767_v8 = vsel %vm447_vm1, %v2465_v50, %v2469_v28  ;;  %v2473_v14 = vor.u32 %v2471_v9, %v2469_v28 }
 0x2e7   : > { %v2245_v19 = vpop.f32.mrb[32].mxu1 }
 0x2e8   : > { %v2246_v54 = vadd.f32 %v2245_v19, %v8506_v40  ;;  %v6705_v51 = vpop.f32.mrb[33].mxu1 }
 0x2e9   : > { %2836 = vrot.lane.b32.xlu1 %v8767_v8, %s7387_s13  ;;  %v2248_v18 = vpop.f32.mrb[34].mxu1  ;;  %2574 = vrot.lane.b32.xlu0 %v8767_v8, %s7383_s15 }
 0x2ea   : > { %v2249_v48 = vadd.f32 %v2248_v18, %v8506_v40  ;;  %v6706_v5 = vpop.f32.mrb[35].mxu1  ;;  %v2364_v10 = vmax.f32 %v2246_v54, 0.0 }
 0x2ec   : > { %v2365_v45 = vmax.f32 %v2249_v48, 0.0 }
 0x2ee   : > { %v8774_v3 = vpack.c.bf16 %v2365_v45, %v2364_v10 }
 0x2f0   : > { %2794 = vrot.lane.b32.xlu1 %v8774_v3, %s7382_s29  ;;  %2709 = vrot.lane.b32.xlu0 %v8774_v3, %s7387_s13  ;;  %v2634_v30 = vrot.slane %v8774_v3, 1  ;;  %v2475_v4 = vshll.u32 %v8774_v3, 16  ;;  %v2479_v58 = vshrl.u32 %v8774_v3, 16 }
 0x2f2   : > { %v8783_v49 = vsel %vm665_vm0, %v2632_v26, %v2634_v30  ;;  %v2477_v62 = vrot.slane %v2475_v4, 1 }
 0x2f4   : > { %2755 = vrot.lane.b32.xlu1 %v8783_v49, %s7383_s15  ;;  %v2253_v38 = vpop.f32.mrb[36].mxu1  ;;  %2670 = vrot.lane.b32.xlu0 %v8783_v49, %s7382_s29  ;;  %v8793_v27 = vsel %vm447_vm1, %v2473_v14, %v2477_v62  ;;  %v2481_v39 = vor.u32 %v2479_v58, %v2477_v62 }
 0x2f5   : > { %v2254_v44 = vadd.f32 %v2253_v38, %v8506_v40  ;;  %v6709_v25 = vpop.f32.mrb[37].mxu1 }
 0x2f6   : > { %v2256_v23 = vpop.f32.mrb[38].mxu1  ;;  %v8801_v21 = vpop.permute.xlu0 %2695 }
 0x2f7   : > { %v2257_v29 = vadd.f32 %v2256_v23, %v8506_v40  ;;  %v6710_v59 = vpop.f32.mrb[39].mxu1  ;;  %v2366_v55 = vmax.f32 %v2254_v44, 0.0 }
 0x2f8   : > { %2838 = vrot.lane.b32.xlu1 %v8793_v27, %s7387_s13  ;;  %2576 = vrot.lane.b32.xlu0 %v8793_v27, %s7383_s15 }
 0x2f9   : > { %v2367_v32 = vmax.f32 %v2257_v29, 0.0 }
 0x2fa   : > { %v8817_v42 = vpop.permute.xlu0 %2656 }
 0x2fb   : > { %v8799_v17 = vpack.c.bf16 %v2367_v32, %v2366_v55 }
 0x2fd   : > { %2796 = vrot.lane.b32.xlu1 %v8799_v17, %s7382_s29  ;;  %2711 = vrot.lane.b32.xlu0 %v8799_v17, %s7387_s13  ;;  %v2636_v43 = vrot.slane %v8799_v17, 1  ;;  %v2483_v20 = vshll.u32 %v8799_v17, 16  ;;  %v2487_v45 = vshrl.u32 %v8799_v17, 16 }
 0x2fe   : > { %v2563_v54 = vpop.permute.xlu0 %2562 }
 0x2ff   : > { %v8810_v37 = vsel %vm665_vm0, %v2634_v30, %v2636_v43  ;;  %v2485_v1 = vrot.slane %v2483_v20, 1 }
 0x301   : > { %2757 = vrot.lane.b32.xlu1 %v8810_v37, %s7383_s15  ;;  %2672 = vrot.lane.b32.xlu0 %v8810_v37, %s7382_s29  ;;  %v8821_v26 = vsel %vm447_vm1, %v2481_v39, %v2485_v1  ;;  %v2489_v44 = vor.u32 %v2487_v45, %v2485_v1 }
 0x303   : > { %v2261_v11 = vpop.f32.mrb[40].mxu1 }
 0x304   : > { %v2262_v24 = vadd.f32 %v2261_v11, %v8506_v40  ;;  %v6713_v46 = vpop.f32.mrb[41].mxu1 }
 0x305   : > { %2840 = vrot.lane.b32.xlu1 %v8821_v26, %s7387_s13  ;;  %v2264_v61 = vpop.f32.mrb[42].mxu1  ;;  %2578 = vrot.lane.b32.xlu0 %v8821_v26, %s7383_s15 }
 0x306   : > { %v2265_v2 = vadd.f32 %v2264_v61, %v8506_v40  ;;  %v6714_v28 = vpop.f32.mrb[43].mxu1  ;;  %v2368_v50 = vmax.f32 %v2262_v24, 0.0 }
 0x308   : > { %v2369_v19 = vmax.f32 %v2265_v2, 0.0 }
 0x30a   : > { %v8828_v51 = vpack.c.bf16 %v2369_v19, %v2368_v50  ;;  %v2869_v50 = vsel %vm1318_vm4, %v8512_v13, %v2563_v54 }
 0x30b   : > { %v2907_v13 = vsel %vm1404_vm6, %v2869_v50, %v8817_v42 }
 0x30c   : > { %2798 = vrot.lane.b32.xlu1 %v8828_v51, %s7382_s29  ;;  %2713 = vrot.lane.b32.xlu0 %v8828_v51, %s7387_s13  ;;  %v2638_v18 = vrot.slane %v8828_v51, 1  ;;  %v2491_v48 = vshll.u32 %v8828_v51, 16  ;;  %v2495_v61 = vshrl.u32 %v8828_v51, 16 }
 0x30d   : > { %v8836_v5 = vpop.permute.xlu0 %2697  ;;  %v2783_v9 = vpop.permute.xlu1 %2782 }
 0x30e   : > { %v8839_v10 = vsel %vm665_vm0, %v2636_v43, %v2638_v18  ;;  %v2493_v30 = vrot.slane %v2491_v48, 1 }
 0x310   : > { %2759 = vrot.lane.b32.xlu1 %v8839_v10, %s7383_s15  ;;  %v2269_v4 = vpop.f32.mrb[44].mxu1  ;;  %2674 = vrot.lane.b32.xlu0 %v8839_v10, %s7382_s29  ;;  %v8851_v59 = vsel %vm447_vm1, %v2489_v44, %v2493_v30  ;;  %v2497_v28 = vor.u32 %v2495_v61, %v2493_v30 }
 0x311   : > { %v2270_v62 = vadd.f32 %v2269_v4, %v8506_v40  ;;  %v6717_v38 = vpop.f32.mrb[45].mxu1  ;;  %v8847_v25 = vpop.permute.xlu0 %2658 }
 0x312   : > { %v2272_v14 = vpop.f32.mrb[46].mxu1  ;;  %v2744_v43 = vpop.permute.xlu1 %2743 }
 0x313   : > { %v2273_v23 = vadd.f32 %v2272_v14, %v8506_v40  ;;  %v6718_v29 = vpop.f32.mrb[47].mxu1  ;;  %v2370_v55 = vmax.f32 %v2270_v62, 0.0  ;;  %v3003_v45 = vsel %vm1318_vm4, %v8631_v34, %v2744_v43  ;;  %v2945_v43 = vsel %vm1490_vm8, %v2907_v13, %v8801_v21 }
 0x314   : > { %2842 = vrot.lane.b32.xlu1 %v8851_v59, %s7387_s13  ;;  %2580 = vrot.lane.b32.xlu0 %v8851_v59, %s7383_s15  ;;  %v3059_v14 = vsel %vm1404_vm6, %v3003_v45, %v2783_v9 }
 0x315   : > { %v2371_v32 = vmax.f32 %v2273_v23, 0.0  ;;  %v2565_v58 = vpop.permute.xlu0 %2564  ;;  %v7228_v23 = vld [vmem:[%s11392_s3 + $0xa0] sm:$0xff]  }
 0x317   : > { %v8857_v20 = vpack.c.bf16 %v2371_v32, %v2370_v55 }
 0x319   : > { %2800 = vrot.lane.b32.xlu1 %v8857_v20, %s7382_s29  ;;  %2715 = vrot.lane.b32.xlu0 %v8857_v20, %s7387_s13  ;;  %v2640_v1 = vrot.slane %v8857_v20, 1  ;;  %v2499_v39 = vshll.u32 %v8857_v20, 16 }
 0x31b   : > { %v8865_v11 = vpop.permute.xlu1 %2784  ;;  %v8867_v24 = vpop.permute.xlu0 %2699  ;;  %v8870_v46 = vsel %vm665_vm0, %v2638_v18, %v2640_v1  ;;  %v2501_v2 = vrot.slane %v2499_v39, 1 }
 0x31d   : > { %2761 = vrot.lane.b32.xlu1 %v8870_v46, %s7383_s15  ;;  %2676 = vrot.lane.b32.xlu0 %v8870_v46, %s7382_s29  ;;  %v8885_v38 = vsel %vm447_vm1, %v2497_v28, %v2501_v2 }
 0x31f   : > { %v2746_v19 = vpop.permute.xlu1 %2745  ;;  %v2277_v48 = vpop.f32.mrb[48].mxu1 }
 0x320   : > { %v2278_v18 = vadd.f32 %v2277_v48, %v8506_v40  ;;  %v8882_v4 = vpop.permute.xlu0 %2660  ;;  %v6721_v62 = vpop.f32.mrb[49].mxu1  ;;  %v2503_v48 = vshrl.u32 %v8857_v20, 16 }
 0x321   : > { %2844 = vrot.lane.b32.xlu1 %v8885_v38, %s7387_s13  ;;  %v2280_v30 = vpop.f32.mrb[50].mxu1  ;;  %2582 = vrot.lane.b32.xlu0 %v8885_v38, %s7383_s15 }
 0x322   : > { %v2281_v34 = vadd.f32 %v2280_v30, %v8506_v40  ;;  %v6722_v54 = vpop.f32.mrb[51].mxu1  ;;  %v2372_v29 = vmax.f32 %v2278_v18, 0.0  ;;  %v2505_v13 = vor.u32 %v2503_v48, %v2501_v2 }
 0x323   : > { %v2829_v44 = vpop.permute.xlu1 %2828 }
 0x324   : > { %v2373_v55 = vmax.f32 %v2281_v34, 0.0  ;;  %v3097_v32 = vsel %vm1490_vm8, %v3059_v14, %v2829_v44  ;;  %v2567_v42 = vpop.permute.xlu0 %2566  ;;  %v3006_v44 = vsel %vm1318_vm4, %v8664_v22, %v2746_v19 }
 0x325   : > { %3390 = vmatprep.mubr.bf16.mxu1 %v3097_v32  ;;  %v3061_v22 = vsel %vm1404_vm6, %v3006_v44, %v8865_v11 }
 0x326   : > { %v8901_v39 = vpack.c.bf16 %v2373_v55, %v2372_v29  ;;  %3391 = vmatmul.mubr.bf16.vlgmr.msra.gmra.mrb[84].mxu1 %v2945_v43 }
 0x327   : > { %6756 = vmatpush3.bf16.msra.mxu1 %v7228_v23 }
 0x328   : > { %2802 = vrot.lane.b32.xlu1 %v8901_v39, %s7382_s29  ;;  %2717 = vrot.lane.b32.xlu0 %v8901_v39, %s7387_s13  ;;  %v2642_v9 = vrot.slane %v8901_v39, 1  ;;  %v2507_v61 = vshll.u32 %v8901_v39, 16 }
 0x329   : > { %6757 = vmatprep.subr.bf16.mxu1 %v11399_v7 }
 0x32a   : > { %v2787_v28 = vpop.permute.xlu1 %2786  ;;  %v8910_v50 = vpop.permute.xlu0 %2701  ;;  %v8913_v21 = vsel %vm665_vm0, %v2640_v1, %v2642_v9  ;;  %v2509_v45 = vrot.slane %v2507_v61, 1  ;;  %v2871_v1 = vsel %vm1318_vm4, %v8554_v31, %v2565_v58 }
 0x32b   : > { %v2909_v58 = vsel %vm1404_vm6, %v2871_v1, %v8847_v25  ;;  %v2873_v1 = vsel %vm1318_vm4, %v8604_v33, %v2567_v42 }
 0x32c   : > { %2763 = vrot.lane.b32.xlu1 %v8913_v21, %s7383_s15  ;;  %v2285_v18 = vpop.f32.mrb[52].mxu1  ;;  %2678 = vrot.lane.b32.xlu0 %v8913_v21, %s7382_s29  ;;  %v8929_v55 = vsel %vm447_vm1, %v2505_v13, %v2509_v45  ;;  %v2948_v48 = vsel %vm1490_vm8, %v2909_v58, %v8836_v5  ;;  %v2511_v13 = vshrl.u32 %v8901_v39, 16 }
 0x32d   : > { %v2286_v62 = vadd.f32 %v2285_v18, %v8506_v40  ;;  %v6725_v30 = vpop.f32.mrb[53].mxu1 }
 0x32e   : > { %v2748_v34 = vpop.permute.xlu1 %2747  ;;  %v2288_v54 = vpop.f32.mrb[54].mxu1  ;;  %v2513_v5 = vor.u32 %v2511_v13, %v2509_v45 }
 0x32f   : > { %v2289_v14 = vadd.f32 %v2288_v54, %v8506_v40  ;;  %v8926_v23 = vpop.permute.xlu0 %2662  ;;  %v6726_v29 = vpop.f32.mrb[55].mxu1  ;;  %v2374_v2 = vmax.f32 %v2286_v62, 0.0 }
 0x330   : > { %2846 = vrot.lane.b32.xlu1 %v8929_v55, %s7387_s13  ;;  %2584 = vrot.lane.b32.xlu0 %v8929_v55, %s7383_s15  ;;  %v3009_v29 = vsel %vm1318_vm4, %v8691_v60, %v2748_v34  ;;  %v2911_v60 = vsel %vm1404_vm6, %v2873_v1, %v8882_v4 }
 0x331   : > { %v2375_v32 = vmax.f32 %v2289_v14, 0.0 }
 0x332   : > { %v2831_v31 = vpop.permute.xlu1 %2830 }
 0x333   : > { %v8939_v19 = vpack.c.bf16 %v2375_v32, %v2374_v2  ;;  %v2569_v43 = vpop.permute.xlu0 %2568  ;;  %v3100_v61 = vsel %vm1490_vm8, %v3061_v22, %v2831_v31  ;;  %v3063_v22 = vsel %vm1404_vm6, %v3009_v29, %v2787_v28 }
 0x334   : > { %3398 = vmatprep.mubr.bf16.mxu1 %v3100_v61 }
 0x335   : > { %2804 = vrot.lane.b32.xlu1 %v8939_v19, %s7382_s29  ;;  %2719 = vrot.lane.b32.xlu0 %v8939_v19, %s7387_s13  ;;  %v2644_v11 = vrot.slane %v8939_v19, 1  ;;  %v2515_v18 = vshll.u32 %v8939_v19, 16 }
 0x336   : > { %3399 = vmatmul.mubr.bf16.gmra.mrb[88].mxu1 %v2948_v48 }
 0x337   : > { %v2789_v25 = vpop.permute.xlu1 %2788  ;;  %v8950_v62 = vpop.permute.xlu0 %2703  ;;  %v8953_v30 = vsel %vm665_vm0, %v2642_v9, %v2644_v11  ;;  %v2517_v54 = vrot.slane %v2515_v18, 1  ;;  %v2951_v18 = vsel %vm1490_vm8, %v2911_v60, %v8867_v24  ;;  %v2519_v24 = vshrl.u32 %v8939_v19, 16 }
 0x339   : > { %2765 = vrot.lane.b32.xlu1 %v8953_v30, %s7383_s15  ;;  %2680 = vrot.lane.b32.xlu0 %v8953_v30, %s7382_s29  ;;  %v8968_v31 = vsel %vm447_vm1, %v2513_v5, %v2517_v54 }
 0x33b   : > { %v2750_v44 = vpop.permute.xlu1 %2749  ;;  %v2293_v14 = vpop.f32.mrb[56].mxu1 }
 0x33c   : > { %v2294_v9 = vadd.f32 %v2293_v14, %v8506_v40  ;;  %v8965_v2 = vpop.permute.xlu0 %2664  ;;  %v6729_v32 = vpop.f32.mrb[57].mxu1 }
 0x33d   : > { %2848 = vrot.lane.b32.xlu1 %v8968_v31, %s7387_s13  ;;  %v2296_v45 = vpop.f32.mrb[58].mxu1  ;;  %2586 = vrot.lane.b32.xlu0 %v8968_v31, %s7383_s15 }
 0x33e   : > { %v2297_v33 = vadd.f32 %v2296_v45, %v8506_v40  ;;  %v6730_v42 = vpop.f32.mrb[59].mxu1  ;;  %v2376_v58 = vmax.f32 %v2294_v9, 0.0 }
 0x33f   : > { %v2833_v34 = vpop.permute.xlu1 %2832  ;;  %v2521_v42 = vor.u32 %v2519_v24, %v2517_v54 }
 0x340   : > { %v2377_v61 = vmax.f32 %v2297_v33, 0.0  ;;  %v3103_v48 = vsel %vm1490_vm8, %v3063_v22, %v2833_v34  ;;  %v2571_v5 = vpop.permute.xlu0 %2570  ;;  %v3012_v22 = vsel %vm1318_vm4, %v8717_v12, %v2750_v44 }
 0x341   : > { %3406 = vmatprep.mubr.bf16.mxu1 %v3103_v48 }
 0x342   : > { %v8981_v13 = vpack.c.bf16 %v2377_v61, %v2376_v58  ;;  %3407 = vmatmul.mubr.bf16.gmra.mrb[92].mxu1 %v2951_v18 }
 0x344   : > { %2806 = vrot.lane.b32.xlu1 %v8981_v13, %s7382_s29  ;;  %2721 = vrot.lane.b32.xlu0 %v8981_v13, %s7387_s13  ;;  %v2646_v4 = vrot.slane %v8981_v13, 1  ;;  %v2523_v28 = vshll.u32 %v8981_v13, 16 }
 0x346   : > { %v2791_v1 = vpop.permute.xlu1 %2790  ;;  %v8989_v14 = vpop.permute.xlu0 %2705  ;;  %v8992_v29 = vsel %vm665_vm0, %v2644_v11, %v2646_v4  ;;  %v2525_v9 = vrot.slane %v2523_v28, 1  ;;  %v2875_v11 = vsel %vm1318_vm4, %v8641_v16, %v2569_v43  ;;  %v3065_v43 = vsel %vm1404_vm6, %v3012_v22, %v2789_v25 }
 0x347   : > { %v2913_v12 = vsel %vm1404_vm6, %v2875_v11, %v8926_v23  ;;  %v2527_v11 = vshrl.u32 %v8981_v13, 16 }
 0x348   : > { %2767 = vrot.lane.b32.xlu1 %v8992_v29, %s7383_s15  ;;  %v2301_v32 = vpop.f32.mrb[60].mxu1  ;;  %2682 = vrot.lane.b32.xlu0 %v8992_v29, %s7382_s29  ;;  %v9008_v18 = vsel %vm447_vm1, %v2521_v42, %v2525_v9 }
 0x349   : > { %v2302_v45 = vadd.f32 %v2301_v32, %v8506_v40  ;;  %v6733_v33 = vpop.f32.mrb[61].mxu1 }
 0x34a   : > { %v2752_v60 = vpop.permute.xlu1 %2751  ;;  %v2304_v34 = vpop.f32.mrb[62].mxu1 }
 0x34b   : > { %v2305_v58 = vadd.f32 %v2304_v34, %v8506_v40  ;;  %v9005_v61 = vpop.permute.xlu0 %2666  ;;  %v6734_v48 = vpop.f32.mrb[63].mxu1  ;;  %v2378_v54 = vmax.f32 %v2302_v45, 0.0  ;;  %v2954_v45 = vsel %vm1490_vm8, %v2913_v12, %v8910_v50  ;;  %v2529_v50 = vor.u32 %v2527_v11, %v2525_v9 }
 0x34c   : > { %2850 = vrot.lane.b32.xlu1 %v9008_v18, %s7387_s13  ;;  %2588 = vrot.lane.b32.xlu0 %v9008_v18, %s7383_s15 }
 0x34d   : > { %v2379_v28 = vmax.f32 %v2305_v58, 0.0  ;;  %v2877_v58 = vsel %vm1318_vm4, %v8671_v35, %v2571_v5 }
 0x34e   : > { %v2835_v16 = vpop.permute.xlu1 %2834 }
 0x34f   : > { %v9017_v44 = vpack.c.bf16 %v2379_v28, %v2378_v54  ;;  %v2573_v24 = vpop.permute.xlu0 %2572  ;;  %v3106_v32 = vsel %vm1490_vm8, %v3065_v43, %v2835_v16  ;;  %v3015_v28 = vsel %vm1318_vm4, %v8743_v53, %v2752_v60  ;;  %v2915_v53 = vsel %vm1404_vm6, %v2877_v58, %v8965_v2 }
 0x350   : > { %3414 = vmatprep.mubr.bf16.mxu1 %v3106_v32  ;;  %v3067_v32 = vsel %vm1404_vm6, %v3015_v28, %v2791_v1 }
 0x351   : > { %2808 = vrot.lane.b32.xlu1 %v9017_v44, %s7382_s29  ;;  %2723 = vrot.lane.b32.xlu0 %v9017_v44, %s7387_s13  ;;  %v2648_v25 = vrot.slane %v9017_v44, 1  ;;  %v2531_v33 = vshll.u32 %v9017_v44, 16 }
 0x352   : > { %3415 = vmatmul.mubr.bf16.gmra.mrb[96].mxu1 %v2954_v45 }
 0x353   : > { %v9028_v23 = vpop.permute.xlu1 %2792  ;;  %v9030_v42 = vpop.permute.xlu0 %2707  ;;  %v9033_v34 = vsel %vm665_vm0, %v2646_v4, %v2648_v25  ;;  %v2533_v22 = vrot.slane %v2531_v33, 1 }
 0x355   : > { %2769 = vrot.lane.b32.xlu1 %v9033_v34, %s7383_s15  ;;  %2684 = vrot.lane.b32.xlu0 %v9033_v34, %s7382_s29  ;;  %v9048_v12 = vsel %vm447_vm1, %v2529_v50, %v2533_v22  ;;  %v2957_v50 = vsel %vm1490_vm8, %v2915_v53, %v8950_v62 }
 0x357   : > { %v2754_v48 = vpop.permute.xlu1 %2753  ;;  %v2309_v54 = vpop.f32.mrb[64].mxu1 }
 0x358   : > { %v2310_v4 = vadd.f32 %v2309_v54, %v8506_v40  ;;  %v9045_v16 = vpop.permute.xlu0 %2668  ;;  %v6737_v43 = vpop.f32.mrb[65].mxu1 }
 0x359   : > { %2852 = vrot.lane.b32.xlu1 %v9048_v12, %s7387_s13  ;;  %v2312_v9 = vpop.f32.mrb[66].mxu1  ;;  %2590 = vrot.lane.b32.xlu0 %v9048_v12, %s7383_s15 }
 0x35a   : > { %v2313_v35 = vadd.f32 %v2312_v9, %v8506_v40  ;;  %v6738_v5 = vpop.f32.mrb[67].mxu1  ;;  %v2380_v45 = vmax.f32 %v2310_v4, 0.0  ;;  %v7229_v9 = vld [vmem:[%s11392_s3 + $0xa8] sm:$0xff]   ;;  %v2535_v4 = vshrl.u32 %v9017_v44, 16 }
 0x35b   : > { %v2837_v60 = vpop.permute.xlu1 %2836  ;;  %6758 = vmatpush3.bf16.msra.mxu1 %v7229_v9 }
 0x35c   : > { %v2381_v33 = vmax.f32 %v2313_v35, 0.0  ;;  %v3109_v11 = vsel %vm1490_vm8, %v3067_v32, %v2837_v60  ;;  %v2575_v43 = vpop.permute.xlu0 %2574  ;;  %v2537_v32 = vor.u32 %v2535_v4, %v2533_v22 }
 0x35d   : > { %3422 = vmatprep.mubr.bf16.mxu1 %v3109_v11  ;;  %v3018_v11 = vsel %vm1318_vm4, %v8767_v8, %v2754_v48 }
 0x35e   : > { %v9061_v54 = vpack.c.bf16 %v2381_v33, %v2380_v45  ;;  %3423 = vmatmul.mubr.bf16.gmra.mrb[100].mxu1 %v2957_v50  ;;  %v3069_v8 = vsel %vm1404_vm6, %v3018_v11, %v9028_v23 }
 0x360   : > { %2810 = vrot.lane.b32.xlu1 %v9061_v54, %s7382_s29  ;;  %2725 = vrot.lane.b32.xlu0 %v9061_v54, %s7387_s13  ;;  %v2650_v2 = vrot.slane %v9061_v54, 1  ;;  %v2539_v1 = vshll.u32 %v9061_v54, 16  ;;  %v2543_v11 = vshrl.u32 %v9061_v54, 16 }
 0x362   : > { %v2795_v62 = vpop.permute.xlu1 %2794  ;;  %v9072_v58 = vpop.permute.xlu0 %2709  ;;  %v9075_v28 = vsel %vm665_vm0, %v2648_v25, %v2650_v2  ;;  %v2541_v35 = vrot.slane %v2539_v1, 1  ;;  %v2879_v25 = vsel %vm1318_vm4, %v8698_v63, %v2573_v24 }
 0x363   : > { %v2917_v24 = vsel %vm1404_vm6, %v2879_v25, %v9005_v61 }
 0x364   : > { %2771 = vrot.lane.b32.xlu1 %v9075_v28, %s7383_s15  ;;  %v2317_v5 = vpop.f32.mrb[68].mxu1  ;;  %2686 = vrot.lane.b32.xlu0 %v9075_v28, %s7382_s29  ;;  %v9091_v0 = vsel %vm447_vm1, %v2537_v32, %v2541_v35 }
 0x365   : > { %v2318_v53 = vadd.f32 %v2317_v5, %v8506_v40  ;;  %v6741_v60 = vpop.f32.mrb[69].mxu1 }
 0x366   : > { %v2756_v45 = vpop.permute.xlu1 %2755  ;;  %v2320_v33 = vpop.f32.mrb[70].mxu1 }
 0x367   : > { %v2321_v50 = vadd.f32 %v2320_v33, %v8506_v40  ;;  %v9088_v9 = vpop.permute.xlu0 %2670  ;;  %v6742_v1 = vpop.f32.mrb[71].mxu1  ;;  %v2382_v22 = vmax.f32 %v2318_v53, 0.0  ;;  %v2960_v53 = vsel %vm1490_vm8, %v2917_v24, %v8989_v14  ;;  %v2545_v14 = vor.u32 %v2543_v11, %v2541_v35 }
 0x368   : > { %2854 = vrot.lane.b32.xlu1 %v9091_v0, %s7387_s13  ;;  %2592 = vrot.lane.b32.xlu0 %v9091_v0, %s7383_s15  ;;  %v2881_v1 = vsel %vm1318_vm4, %v8724_v57, %v2575_v43 }
 0x369   : > { %v2383_v4 = vmax.f32 %v2321_v50, 0.0 }
 0x36a   : > { %v2839_v63 = vpop.permute.xlu1 %2838 }
 0x36b   : > { %v9101_v48 = vpack.c.bf16 %v2383_v4, %v2382_v22  ;;  %v2577_v5 = vpop.permute.xlu0 %2576  ;;  %v3112_v60 = vsel %vm1490_vm8, %v3069_v8, %v2839_v63  ;;  %v3021_v63 = vsel %vm1318_vm4, %v8793_v27, %v2756_v45  ;;  %v2919_v27 = vsel %vm1404_vm6, %v2881_v1, %v9045_v16 }
 0x36c   : > { %3430 = vmatprep.mubr.bf16.mxu1 %v3112_v60 }
 0x36d   : > { %2812 = vrot.lane.b32.xlu1 %v9101_v48, %s7382_s29  ;;  %2727 = vrot.lane.b32.xlu0 %v9101_v48, %s7387_s13  ;;  %v2652_v23 = vrot.slane %v9101_v48, 1  ;;  %v2547_v32 = vshll.u32 %v9101_v48, 16 }
 0x36e   : > { %3431 = vmatmul.mubr.bf16.gmra.mrb[104].mxu1 %v2960_v53  ;;  %v3071_v53 = vsel %vm1404_vm6, %v3021_v63, %v2795_v62 }
 0x36f   : > { %v9112_v61 = vpop.permute.xlu1 %2796  ;;  %v9114_v33 = vpop.permute.xlu0 %2711  ;;  %v9117_v25 = vsel %vm665_vm0, %v2650_v2, %v2652_v23  ;;  %v2549_v50 = vrot.slane %v2547_v32, 1 }
 0x371   : > { %2773 = vrot.lane.b32.xlu1 %v9117_v25, %s7383_s15  ;;  %2688 = vrot.lane.b32.xlu0 %v9117_v25, %s7382_s29  ;;  %v9132_v60 = vsel %vm447_vm1, %v2545_v14, %v2549_v50 }
 0x373   : > { %v2758_v22 = vpop.permute.xlu1 %2757  ;;  %v2325_v4 = vpop.f32.mrb[72].mxu1 }
 0x374   : > { %v2326_v2 = vadd.f32 %v2325_v4, %v8506_v40  ;;  %v9129_v8 = vpop.permute.xlu0 %2672  ;;  %v6745_v24 = vpop.f32.mrb[73].mxu1  ;;  %v2963_v4 = vsel %vm1490_vm8, %v2919_v27, %v9030_v42  ;;  %v2551_v42 = vshrl.u32 %v9101_v48, 16  ;;  %v2883_v27 = vsel %vm1318_vm4, %v8749_v47, %v2577_v5 }
 0x375   : > { %2856 = vrot.lane.b32.xlu1 %v9132_v60, %s7387_s13  ;;  %v2328_v35 = vpop.f32.mrb[74].mxu1  ;;  %2594 = vrot.lane.b32.xlu0 %v9132_v60, %s7383_s15  ;;  %v2921_v5 = vsel %vm1404_vm6, %v2883_v27, %v9088_v9 }
 0x376   : > { %v2329_v57 = vadd.f32 %v2328_v35, %v8506_v40  ;;  %v6746_v43 = vpop.f32.mrb[75].mxu1  ;;  %v2384_v32 = vmax.f32 %v2326_v2, 0.0 }
 0x377   : > { %v2841_v45 = vpop.permute.xlu1 %2840  ;;  %v2553_v43 = vor.u32 %v2551_v42, %v2549_v50 }
 0x378   : > { %v2385_v11 = vmax.f32 %v2329_v57, 0.0  ;;  %v3115_v14 = vsel %vm1490_vm8, %v3071_v53, %v2841_v45  ;;  %v2579_v7 = vpop.permute.xlu0 %2578 }
 0x379   : > { %3438 = vmatprep.mubr.bf16.mxu1 %v3115_v14 }
 0x37a   : > { %v9145_v24 = vpack.c.bf16 %v2385_v11, %v2384_v32  ;;  %3439 = vmatmul.mubr.bf16.gmra.mrb[108].mxu1 %v2963_v4 }
 0x37c   : > { %2814 = vrot.lane.b32.xlu1 %v9145_v24, %s7382_s29  ;;  %2729 = vrot.lane.b32.xlu0 %v9145_v24, %s7387_s13  ;;  %v2654_v16 = vrot.slane %v9145_v24, 1  ;;  %v2555_v62 = vshll.u32 %v9145_v24, 16  ;;  %v2559_v47 = vshrl.u32 %v9145_v24, 16 }
 0x37e   : > { %v2799_v1 = vpop.permute.xlu1 %2798  ;;  %v9153_v63 = vpop.permute.xlu0 %2713  ;;  %v9156_v2 = vsel %vm665_vm0, %v2652_v23, %v2654_v16  ;;  %v2557_v35 = vrot.slane %v2555_v62, 1  ;;  %v3024_v23 = vsel %vm1318_vm4, %v8821_v26, %v2758_v22 }
 0x380   : > { %2775 = vrot.lane.b32.xlu1 %v9156_v2, %s7383_s15  ;;  %2690 = vrot.lane.b32.xlu0 %v9156_v2, %s7382_s29  ;;  %v9169_v4 = vsel %vm447_vm1, %v2553_v43, %v2557_v35  ;;  %v2561_v42 = vor.u32 %v2559_v47, %v2557_v35 }
 0x381   : > { %v2333_v57 = vpop.f32.mrb[76].mxu1 }
 0x382   : > { %v2334_v45 = vadd.f32 %v2333_v57, %v8506_v40  ;;  %v6749_v53 = vpop.f32.mrb[77].mxu1  ;;  %v2760_v32 = vpop.permute.xlu1 %2759  ;;  %v3073_v57 = vsel %vm1404_vm6, %v3024_v23, %v9112_v61 }
 0x383   : > { %v2336_v11 = vpop.f32.mrb[78].mxu1  ;;  %v2675_v14 = vpop.permute.xlu0 %2674  ;;  %v3027_v47 = vsel %vm1318_vm4, %v8851_v59, %v2760_v32 }
 0x384   : > { %v2337_v62 = vadd.f32 %v2336_v11, %v8506_v40  ;;  %v6750_v56 = vpop.f32.mrb[79].mxu1  ;;  %2858 = vrot.lane.b32.xlu1 %v9169_v4, %s7387_s13  ;;  %2596 = vrot.lane.b32.xlu0 %v9169_v4, %s7383_s15  ;;  %v2386_v26 = vmax.f32 %v2334_v45, 0.0  ;;  %v2966_v11 = vsel %vm1490_vm8, %v2921_v5, %v9072_v58  ;;  %v2885_v58 = vsel %vm1318_vm4, %v8774_v3, %v2579_v7 }
 0x386   : > { %v2387_v50 = vmax.f32 %v2337_v62, 0.0  ;;  %v2843_v22 = vpop.permute.xlu1 %2842 }
 0x387   : > { %v2581_v43 = vpop.permute.xlu0 %2580  ;;  %v3118_v56 = vsel %vm1490_vm8, %v3073_v57, %v2843_v22  ;;  %v3075_v22 = vsel %vm1404_vm6, %v3027_v47, %v2799_v1 }
 0x388   : > { %v2409_v53 = vpack.c.bf16 %v2387_v50, %v2386_v26  ;;  %2598 = vrot.lane.b32.xlu0 %v2561_v42, %s7383_s15  ;;  %3446 = vmatprep.mubr.bf16.mxu1 %v3118_v56 }
 0x389   : > { %3447 = vmatmul.mubr.bf16.gmra.mrb[112].mxu1 %v2966_v11 }
 0x38a   : > { %2816 = vrot.lane.b32.xlu1 %v2409_v53, %s7382_s29  ;;  %v2741_v9 = vrot.slane %v2409_v53, 1  ;;  %v2734_v27 = vshll.u32 %v2409_v53, 16 }
 0x38b   : > { %v2801_v45 = vpop.permute.xlu1 %2800  ;;  %v9186_v35 = vpop.permute.xlu0 %2715 }
 0x38c   : > { %2692 = vrot.lane.b32.xlu0 %v2654_v16, %s7382_s29  ;;  %v9190_v61 = vsel %vm665_vm0, %v2654_v16, %v2741_v9  ;;  %v2736_v23 = vrot.slane %v2734_v27, 1  ;;  %v2923_v16 = vsel %vm1404_vm6, %v2885_v58, %v9129_v8  ;;  %v2887_v58 = vsel %vm1318_vm4, %v8799_v17, %v2581_v43 }
 0x38d   : > { %v2969_v3 = vsel %vm1490_vm8, %v2923_v16, %v9114_v33 }
 0x38e   : > { %2777 = vrot.lane.b32.xlu1 %v9190_v61, %s7383_s15  ;;  %v9200_v26 = vsel %vm447_vm1, %v2561_v42, %v2736_v23 }
 0x38f   : > { %v2762_v62 = vpop.permute.xlu1 %2761  ;;  %v2677_v5 = vpop.permute.xlu0 %2676 }
 0x390   : > { %2731 = vrot.lane.b32.xlu0 %v2409_v53, %s7387_s13  ;;  %v3030_v33 = vsel %vm1318_vm4, %v8885_v38, %v2762_v62 }
 0x392   : > { %2860 = vrot.lane.b32.xlu1 %v9200_v26, %s7387_s13 }
 0x393   : > { %v2845_v50 = vpop.permute.xlu1 %2844  ;;  %v2583_v59 = vpop.permute.xlu0 %2582 }
 0x394   : > { %v3121_v7 = vsel %vm1490_vm8, %v3075_v22, %v2845_v50 }
 0x395   : > { %3454 = vmatprep.mubr.bf16.mxu1 %v3121_v7 }
 0x396   : > { %2779 = vrot.lane.b32.xlu1 %v2741_v9, %s7383_s15  ;;  %3455 = vmatmul.mubr.bf16.gmra.mrb[116].mxu1 %v2969_v3  ;;  %v2925_v3 = vsel %vm1404_vm6, %v2887_v58, %v2675_v14 }
 0x397   : > { %v2972_v38 = vsel %vm1490_vm8, %v2925_v3, %v9153_v63 }
 0x39a   : > { %v2803_v32 = vpop.permute.xlu1 %2802  ;;  %v2341_v42 = vpop.f32.mrb[80].mxu1 }
 0x39b   : > { %v2342_v57 = vadd.f32 %v2341_v42, %v8506_v40  ;;  %v2718_v56 = vpop.permute.xlu0 %2717  ;;  %v6753_v11 = vpop.f32.mrb[81].mxu1 }
 0x39c   : > { %v2344_v8 = vpop.f32.mrb[82].mxu1  ;;  %v3077_v11 = vsel %vm1404_vm6, %v3030_v33, %v2801_v45 }
 0x39d   : > { %v2345_v27 = vadd.f32 %v2344_v8, %v8506_v40  ;;  %v6754_v1 = vpop.f32.mrb[83].mxu1  ;;  %v2388_v16 = vmax.f32 %v2342_v57, 0.0  ;;  %v2738_v8 = vshrl.u32 %v2409_v53, 16 }
 0x39e   : > { %v2764_v47 = vpop.permute.xlu1 %2763 }
 0x39f   : > { %v2389_v50 = vmax.f32 %v2345_v27, 0.0  ;;  %v2679_v7 = vpop.permute.xlu0 %2678  ;;  %v9226_v43 = vor.u32 %v2738_v8, %v2736_v23  ;;  %v2889_v27 = vsel %vm1318_vm4, %v8828_v51, %v2583_v59  ;;  %v3033_v23 = vsel %vm1318_vm4, %v8929_v55, %v2764_v47 }
 0x3a0   : > { %v3079_v3 = vsel %vm1404_vm6, %v3033_v23, %v2803_v32 }
 0x3a1   : > { %v9217_v22 = vpack.c.bf16 %v2389_v50, %v2388_v16  ;;  %v2927_v16 = vsel %vm1404_vm6, %v2889_v27, %v2677_v5 }
 0x3a2   : > { %v2847_v42 = vpop.permute.xlu1 %2846  ;;  %v2975_v55 = vsel %vm1490_vm8, %v2927_v16, %v9186_v35 }
 0x3a3   : > { %v3124_v40 = vsel %vm1490_vm8, %v3077_v11, %v2847_v42  ;;  %v2821_v1 = vshll.u32 %v9217_v22, 16  ;;  %v2866_v17 = vrot.slane %v9217_v22, 1  ;;  %v2585_v45 = vpop.permute.xlu0 %2584 }
 0x3a4   : > { %3462 = vmatprep.mubr.bf16.mxu1 %v3124_v40  ;;  %v2891_v11 = vsel %vm1318_vm4, %v8857_v20, %v2585_v45 }
 0x3a5   : > { %3463 = vmatmul.mubr.bf16.gmra.mrb[120].mxu1 %v2972_v38  ;;  %v2823_v62 = vrot.slane %v2821_v1, 1  ;;  %v9231_v14 = vsel %vm665_vm0, %v2741_v9, %v2866_v17  ;;  %v2825_v9 = vshrl.u32 %v9217_v22, 16  ;;  %v2929_v8 = vsel %vm1404_vm6, %v2891_v11, %v2679_v7 }
 0x3a6   : > { %v2978_v35 = vsel %vm1490_vm8, %v2929_v8, %v2718_v56 }
 0x3a7   : > { %v2805_v57 = vpop.permute.xlu1 %2804  ;;  %v2824_v53 = vsel %vm447_vm1, %v9226_v43, %v2823_v62  ;;  %v2720_v58 = vpop.permute.xlu0 %2719  ;;  %v2827_v33 = vor.u32 %v2825_v9, %v2823_v62 }
 0x3a8   : > { %2862 = vrot.lane.b32.xlu1 %v2824_v53, %s7387_s13 }
 0x3ab   : > { %v2766_v63 = vpop.permute.xlu1 %2765  ;;  %v2681_v59 = vpop.permute.xlu0 %2680 }
 0x3ac   : > { %2818 = vrot.lane.b32.xlu1 %v9217_v22, %s7382_s29  ;;  %v3036_v5 = vsel %vm1318_vm4, %v8968_v31, %v2766_v63 }
 0x3ad   : > { %v3081_v38 = vsel %vm1404_vm6, %v3036_v5, %v2805_v57 }
 0x3af   : > { %v2849_v50 = vpop.permute.xlu1 %2848  ;;  %v2587_v42 = vpop.permute.xlu0 %2586 }
 0x3b0   : > { %2864 = vrot.lane.b32.xlu1 %v2827_v33, %s7387_s13  ;;  %v3127_v51 = vsel %vm1490_vm8, %v3079_v3, %v2849_v50  ;;  %v2893_v20 = vsel %vm1318_vm4, %v8901_v39, %v2587_v42 }
 0x3b1   : > { %3470 = vmatprep.mubr.bf16.mxu1 %v3127_v51  ;;  %v2931_v7 = vsel %vm1404_vm6, %v2893_v20, %v2681_v59 }
 0x3b2   : > { %3471 = vmatmul.mubr.bf16.gmra.mrb[124].mxu1 %v2975_v55  ;;  %v2981_v56 = vsel %vm1490_vm8, %v2931_v7, %v2720_v58 }
 0x3b6   : > { %v2807_v47 = vpop.permute.xlu1 %2806  ;;  %v2722_v32 = vpop.permute.xlu0 %2721 }
 0x3ba   : > { %v2768_v40 = vpop.permute.xlu1 %2767  ;;  %v2683_v53 = vpop.permute.xlu0 %2682 }
 0x3bb   : > { %v3039_v31 = vsel %vm1318_vm4, %v9008_v18, %v2768_v40 }
 0x3bc   : > { %v3083_v57 = vsel %vm1404_vm6, %v3039_v31, %v2807_v47 }
 0x3be   : > { %v2851_v1 = vpop.permute.xlu1 %2850  ;;  %v2589_v63 = vpop.permute.xlu0 %2588 }
 0x3bf   : > { %v3130_v62 = vsel %vm1490_vm8, %v3081_v38, %v2851_v1  ;;  %v2895_v39 = vsel %vm1318_vm4, %v8939_v19, %v2589_v63 }
 0x3c0   : > { %3478 = vmatprep.mubr.bf16.mxu1 %v3130_v62  ;;  %v2933_v51 = vsel %vm1404_vm6, %v2895_v39, %v2683_v53 }
 0x3c1   : > { %3479 = vmatmul.mubr.bf16.gmra.mrb[128].mxu1 %v2978_v35  ;;  %v2984_v58 = vsel %vm1490_vm8, %v2933_v51, %v2722_v32 }
 0x3c3   : > { %v2809_v27 = vpop.permute.xlu1 %2808  ;;  %v2724_v33 = vpop.permute.xlu0 %2723 }
 0x3c7   : > { %v2770_v45 = vpop.permute.xlu1 %2769  ;;  %v2685_v50 = vpop.permute.xlu0 %2684 }
 0x3c8   : > { %v3042_v18 = vsel %vm1318_vm4, %v9048_v12, %v2770_v45 }
 0x3c9   : > { %v3085_v59 = vsel %vm1404_vm6, %v3042_v18, %v2809_v27 }
 0x3cb   : > { %v2853_v23 = vpop.permute.xlu1 %2852  ;;  %v2591_v47 = vpop.permute.xlu0 %2590 }
 0x3cc   : > { %v3133_v9 = vsel %vm1490_vm8, %v3083_v57, %v2853_v23  ;;  %v2897_v19 = vsel %vm1318_vm4, %v8981_v13, %v2591_v47 }
 0x3cd   : > { %3486 = vmatprep.mubr.bf16.mxu1 %v3133_v9  ;;  %v2935_v1 = vsel %vm1404_vm6, %v2897_v19, %v2685_v50 }
 0x3ce   : > { %3487 = vmatmul.mubr.bf16.gmra.mrb[132].mxu1 %v2981_v56  ;;  %v2987_v32 = vsel %vm1490_vm8, %v2935_v1, %v2724_v33 }
 0x3d2   : > { %v2811_v16 = vpop.permute.xlu1 %2810  ;;  %v2726_v11 = vpop.permute.xlu0 %2725 }
 0x3d6   : > { %v2772_v3 = vpop.permute.xlu1 %2771  ;;  %v2687_v8 = vpop.permute.xlu0 %2686 }
 0x3d7   : > { %v3045_v12 = vsel %vm1318_vm4, %v9091_v0, %v2772_v3 }
 0x3d8   : > { %v3087_v62 = vsel %vm1404_vm6, %v3045_v12, %v2811_v16 }
 0x3da   : > { %v2855_v55 = vpop.permute.xlu1 %2854  ;;  %v2593_v53 = vpop.permute.xlu0 %2592 }
 0x3db   : > { %v3136_v42 = vsel %vm1490_vm8, %v3085_v59, %v2855_v55  ;;  %v2899_v13 = vsel %vm1318_vm4, %v9017_v44, %v2593_v53 }
 0x3dc   : > { %3494 = vmatprep.mubr.bf16.mxu1 %v3136_v42  ;;  %v2937_v31 = vsel %vm1404_vm6, %v2899_v13, %v2687_v8 }
 0x3dd   : > { %3495 = vmatmul.mubr.bf16.gmra.mrb[136].mxu1 %v2984_v58  ;;  %v2990_v9 = vsel %vm1490_vm8, %v2937_v31, %v2726_v11 }
 0x3df   : > { %v2813_v40 = vpop.permute.xlu1 %2812  ;;  %v2728_v20 = vpop.permute.xlu0 %2727 }
 0x3e3   : > { %v2774_v5 = vpop.permute.xlu1 %2773  ;;  %v2689_v23 = vpop.permute.xlu0 %2688 }
 0x3e4   : > { %v3048_v0 = vsel %vm1318_vm4, %v9132_v60, %v2774_v5 }
 0x3e5   : > { %v3089_v7 = vsel %vm1404_vm6, %v3048_v0, %v2813_v40 }
 0x3e7   : > { %v2857_v38 = vpop.permute.xlu1 %2856  ;;  %v2595_v33 = vpop.permute.xlu0 %2594 }
 0x3e8   : > { %v3139_v35 = vsel %vm1490_vm8, %v3087_v62, %v2857_v38  ;;  %v2901_v44 = vsel %vm1318_vm4, %v9061_v54, %v2595_v33 }
 0x3e9   : > { %3502 = vmatprep.mubr.bf16.mxu1 %v3139_v35  ;;  %v2939_v39 = vsel %vm1404_vm6, %v2901_v44, %v2689_v23 }
 0x3ea   : > { %3503 = vmatmul.mubr.bf16.gmra.mrb[140].mxu1 %v2987_v32  ;;  %v2993_v55 = vsel %vm1490_vm8, %v2939_v39, %v2728_v20  ;;  %v11422_v20 = vmov 0.0  }
 0x3ee   : > { %v2815_v27 = vpop.permute.xlu1 %2814  ;;  %v2730_v50 = vpop.permute.xlu0 %2729 }
 0x3f2   : > { %v2776_v45 = vpop.permute.xlu1 %2775  ;;  %v2691_v59 = vpop.permute.xlu0 %2690 }
 0x3f3   : > { %v3051_v60 = vsel %vm1318_vm4, %v9169_v4, %v2776_v45 }
 0x3f4   : > { %v3091_v18 = vsel %vm1404_vm6, %v3051_v60, %v2815_v27 }
 0x3f6   : > { %v2859_v63 = vpop.permute.xlu1 %2858  ;;  %v2597_v47 = vpop.permute.xlu0 %2596 }
 0x3f7   : > { %v3142_v57 = vsel %vm1490_vm8, %v3089_v7, %v2859_v63  ;;  %v2903_v54 = vsel %vm1318_vm4, %v9101_v48, %v2597_v47 }
 0x3f8   : > { %3510 = vmatprep.mubr.bf16.mxu1 %v3142_v57  ;;  %v2941_v11 = vsel %vm1404_vm6, %v2903_v54, %v2691_v59  ;;  %v7241_v59 = vld [vmem:[%s11392_s3 + $0xd8] sm:$0xff]  }
 0x3f9   : > { %3511 = vmatmul.mubr.bf16.gmra.mrb[144].mxu1 %v2990_v9  ;;  %v2996_v8 = vsel %vm1490_vm8, %v2941_v11, %v2730_v50 }
 0x3fa   : > { %v2599_v42 = vpop.permute.xlu0 %2598 }
 0x3fc   : > { %v2817_v56 = vpop.permute.xlu1 %2816 }
 0x3fe   : > { %v2693_v5 = vpop.permute.xlu0 %2692 }
 0x400   : > { %v2778_v16 = vpop.permute.xlu1 %2777 }
 0x401   : > { %v3054_v4 = vsel %vm1318_vm4, %v9200_v26, %v2778_v16  ;;  %v2905_v26 = vsel %vm1318_vm4, %v9145_v24, %v2599_v42 }
 0x402   : > { %v3093_v19 = vsel %vm1404_vm6, %v3054_v4, %v2817_v56  ;;  %v2732_v38 = vpop.permute.xlu0 %2731  ;;  %v2943_v32 = vsel %vm1404_vm6, %v2905_v26, %v2693_v5 }
 0x403   : > { %v2999_v27 = vsel %vm1490_vm8, %v2943_v32, %v2732_v38  ;;  %v7245_v32 = vld [vmem:[%s11392_s3 + $0xe8] sm:$0xff]  }
 0x404   : > { %v2861_v3 = vpop.permute.xlu1 %2860 }
 0x405   : > { %v3145_v51 = vsel %vm1490_vm8, %v3091_v18, %v2861_v3  ;;  %v7240_v18 = vld [vmem:[%s11392_s3 + $0x118] sm:$0xff]  }
 0x406   : > { %3518 = vmatprep.mubr.bf16.mxu1 %v3145_v51 }
 0x407   : > { %3519 = vmatmul.mubr.bf16.gmra.mrb[148].mxu1 %v2993_v55 }
 0x408   : > { %v2780_v58 = vpop.permute.xlu1 %2779 }
 0x409   : > { %v3057_v48 = vsel %vm1318_vm4, %v9226_v43, %v2780_v58 }
 0x41a   : > { %v2863_v40 = vpop.permute.xlu1 %2862 }
 0x41b   : > { %v3148_v12 = vsel %vm1490_vm8, %v3093_v19, %v2863_v40  ;;  %v7242_v19 = vld [vmem:[%s11392_s3 + $0x120] sm:$0xff]  }
 0x41c   : > { %3526 = vmatprep.mubr.bf16.mxu1 %v3148_v12  ;;  %v7243_v12 = vld [vmem:[%s11392_s3 + $0xe0] sm:$0xff]  }
 0x41d   : > { %3527 = vmatmul.mubr.bf16.gmra.mrb[152].mxu1 %v2996_v8 }
 0x41e   : > { %v2819_v1 = vpop.permute.xlu1 %2818 }
 0x41f   : > { %v3095_v62 = vsel %vm1404_vm6, %v3057_v48, %v2819_v1 }
 0x422   : > { %v2865_v35 = vpop.permute.xlu1 %2864 }
 0x423   : > { %v3151_v53 = vsel %vm1490_vm8, %v3095_v62, %v2865_v35  ;;  %v7244_v35 = vld [vmem:[%s11392_s3 + $0x128] sm:$0xff]  }
 0x424   : > { %3534 = vmatprep.mubr.bf16.mxu1 %v3151_v53 }
 0x425   : > { %3535 = vmatmul.mubr.bf16.gmra.mrb[156].mxu1 %v2999_v27 }
 0x426   : > { %6759 = vmatprep.mubr.msk.bf16.mxu1 %vm7390_vm10, %v11422_v20 }
 0x42d   : > { %6760 = vmatmul.mubr.msk.bf16.vlgmr.msra.gmra.mrb[84].mxu1 %vm1318_vm4, %v8652_v52  ;;  %v7230_v52 = vld [vmem:[%s11392_s3 + $0xf0] sm:$0xff]  }
 0x42e   : > { %6763 = vmatprep.mubr.msk.bf16.mxu1 %vm7390_vm10, %v11422_v20  ;;  %6500 = vmatprep.subr.bf16.mxu0 %v7230_v52 }
 0x435   : > { %6764 = vmatmul.mubr.msk.bf16.gmra.mrb[88].mxu1 %vm1318_vm4, %v8680_v6  ;;  %v7231_v6 = vld [vmem:[%s11392_s3 + $0xb0] sm:$0xff]  }
 0x436   : > { %6767 = vmatprep.mubr.msk.bf16.mxu1 %vm7390_vm10, %v11422_v20  ;;  %6501 = vmatpush3.bf16.msra.mxu0 %v7231_v6 }
 0x43d   : > { %6768 = vmatmul.mubr.msk.bf16.gmra.mrb[92].mxu1 %vm1318_vm4, %v8708_v15  ;;  %v7232_v15 = vld [vmem:[%s11392_s3 + $0xf8] sm:$0xff]  }
 0x43e   : > { %6771 = vmatprep.mubr.msk.bf16.mxu1 %vm7390_vm10, %v11422_v20  ;;  %6502 = vmatprep.subr.bf16.mxu0 %v7232_v15 }
 0x445   : > { %6772 = vmatmul.mubr.msk.bf16.gmra.mrb[96].mxu1 %vm1318_vm4, %v8733_v36  ;;  %v7233_v36 = vld [vmem:[%s11392_s3 + $0xb8] sm:$0xff]  }
 0x446   : > { %6775 = vmatprep.mubr.msk.bf16.mxu1 %vm7390_vm10, %v11422_v20  ;;  %6503 = vmatpush3.bf16.msra.mxu0 %v7233_v36 }
 0x44d   : > { %6776 = vmatmul.mubr.msk.bf16.gmra.mrb[100].mxu1 %vm1318_vm4, %v8758_v41  ;;  %v7234_v41 = vld [vmem:[%s11392_s3 + $0x100] sm:$0xff]  }
 0x44e   : > { %6779 = vmatprep.mubr.msk.bf16.mxu1 %vm7390_vm10, %v11422_v20  ;;  %6504 = vmatprep.subr.bf16.mxu0 %v7234_v41 }
 0x455   : > { %6780 = vmatmul.mubr.msk.bf16.gmra.mrb[104].mxu1 %vm1318_vm4, %v8783_v49  ;;  %v7235_v49 = vld [vmem:[%s11392_s3 + $0xc0] sm:$0xff]  }
 0x456   : > { %6783 = vmatprep.mubr.msk.bf16.mxu1 %vm7390_vm10, %v11422_v20  ;;  %6505 = vmatpush3.bf16.msra.mxu0 %v7235_v49 }
 0x45d   : > { %6784 = vmatmul.mubr.msk.bf16.gmra.mrb[108].mxu1 %vm1318_vm4, %v8810_v37  ;;  %v7236_v37 = vld [vmem:[%s11392_s3 + $0x108] sm:$0xff]  }
 0x45e   : > { %6787 = vmatprep.mubr.msk.bf16.mxu1 %vm7390_vm10, %v11422_v20  ;;  %6506 = vmatprep.subr.bf16.mxu0 %v7236_v37 }
 0x465   : > { %6788 = vmatmul.mubr.msk.bf16.gmra.mrb[112].mxu1 %vm1318_vm4, %v8839_v10  ;;  %v7237_v10 = vld [vmem:[%s11392_s3 + $0xc8] sm:$0xff]  }
 0x466   : > { %6791 = vmatprep.mubr.msk.bf16.mxu1 %vm7390_vm10, %v11422_v20  ;;  %6507 = vmatpush3.bf16.msra.mxu0 %v7237_v10 }
 0x46d   : > { %6792 = vmatmul.mubr.msk.bf16.gmra.mrb[116].mxu1 %vm1318_vm4, %v8870_v46  ;;  %v11423_v46 = vld [vmem:[#allocation5_spill] sm:$0xff] }
 0x46e   : > { %6795 = vmatprep.mubr.msk.bf16.mxu1 %vm7390_vm10, %v11422_v20 }
 0x475   : > { %6796 = vmatmul.mubr.msk.bf16.gmra.mrb[120].mxu1 %vm1318_vm4, %v8913_v21  ;;  %v3191_v21 = vsub.s32 2, %v11423_v46 }
 0x476   : > { %6799 = vmatprep.mubr.msk.bf16.mxu1 %vm7390_vm10, %v11422_v20 }
 0x47d   : > { %6800 = vmatmul.mubr.msk.bf16.gmra.mrb[124].mxu1 %vm1318_vm4, %v8953_v30  ;;  %v7315_v30 = vld [vmem:[%s11393_s4] sm:$0xff] }
 0x47e   : > { %6803 = vmatprep.mubr.msk.bf16.mxu1 %vm7390_vm10, %v11422_v20 }
 0x485   : > { %6804 = vmatmul.mubr.msk.bf16.gmra.mrb[128].mxu1 %vm1318_vm4, %v8992_v29  ;;  %v9418_v29 = vrot.slane %v7315_v30, %v3191_v21 }
 0x486   : > { %6807 = vmatprep.mubr.msk.bf16.mxu1 %vm7390_vm10, %v11422_v20 }
 0x48d   : > { %6808 = vmatmul.mubr.msk.bf16.gmra.mrb[132].mxu1 %vm1318_vm4, %v9033_v34  ;;  %v7238_v34 = vld [vmem:[%s11392_s3 + $0x110] sm:$0xff]  }
 0x48e   : > { %6811 = vmatprep.mubr.msk.bf16.mxu1 %vm7390_vm10, %v11422_v20  ;;  %6508 = vmatprep.subr.bf16.mxu0 %v7238_v34 }
 0x495   : > { %6812 = vmatmul.mubr.msk.bf16.gmra.mrb[136].mxu1 %vm1318_vm4, %v9075_v28  ;;  %v7239_v28 = vld [vmem:[%s11392_s3 + $0xd0] sm:$0xff]  }
 0x496   : > { %6815 = vmatprep.mubr.msk.bf16.mxu1 %vm7390_vm10, %v11422_v20  ;;  %6509 = vmatpush3.bf16.msra.mxu0 %v7239_v28 }
 0x497   : > { %6510 = vmatprep.subr.bf16.mxu0 %v7240_v18 }
 0x49a   : > { %6511 = vmatpush3.bf16.msra.mxu0 %v7241_v59 }
 0x49b   : > { %6512 = vmatprep.subr.bf16.mxu0 %v7242_v19 }
 0x49d   : > { %6816 = vmatmul.mubr.msk.bf16.gmra.mrb[140].mxu1 %vm1318_vm4, %v9117_v25 }
 0x49e   : > { %6819 = vmatprep.mubr.msk.bf16.mxu1 %vm7390_vm10, %v11422_v20  ;;  %6513 = vmatpush3.bf16.msra.mxu0 %v7243_v12 }
 0x49f   : > { %6514 = vmatprep.subr.bf16.mxu0 %v7244_v35 }
 0x4a2   : > { %6515 = vmatpush3.bf16.msra.mxu0 %v7245_v32 }
 0x4a5   : > { %6820 = vmatmul.mubr.msk.bf16.gmra.mrb[144].mxu1 %vm1318_vm4, %v9156_v2 }
 0x4a6   : > { %6823 = vmatprep.mubr.msk.bf16.mxu1 %vm7390_vm10, %v11422_v20 }
 0x4ad   : > { %6824 = vmatmul.mubr.msk.bf16.gmra.mrb[148].mxu1 %vm1318_vm4, %v9190_v61 }
 0x4ae   : > { %6827 = vmatprep.mubr.msk.bf16.mxu1 %vm7390_vm10, %v11422_v20 }
 0x4b5   : > { %6828 = vmatmul.mubr.msk.bf16.gmra.mrb[152].mxu1 %vm1318_vm4, %v9231_v14 }
 0x4b6   : > { %6831 = vmatprep.mubr.msk.bf16.mxu1 %vm7390_vm10, %v11422_v20 }
 0x4bd   : > { %6832 = vmatmul.mubr.msk.bf16.gmra.mrb[156].mxu1 %vm1318_vm4, %v2866_v17 }
 0x500   : > { %v3576_v25 = vpop.f32.mrb[84].mxu1 }
 0x501   : > { %v6980_v24 = vadd.f32 %v3576_v25, %v9418_v29  ;;  %v6761_v2 = vpop.f32.mrb[85].mxu1 }
 0x502   : > { %v3579_v61 = vpop.f32.mrb[86].mxu1 }
 0x503   : > { %v6981_v22 = vadd.f32 %v3579_v61, %v9418_v29  ;;  %v6762_v17 = vpop.f32.mrb[87].mxu1  ;;  %v3726_v43 = vmax.f32 %v6980_v24, 0.0 }
 0x505   : > { %v3727_v14 = vmax.f32 %v6981_v22, 0.0 }
 0x507   : > { %v9428_v13 = vpack.c.bf16 %v3727_v14, %v3726_v43 }
 0x508   : > { %v3584_v45 = vpop.f32.mrb[88].mxu1 }
 0x509   : > { %v6982_v0 = vadd.f32 %v3584_v45, %v9418_v29  ;;  %v6765_v31 = vpop.f32.mrb[89].mxu1  ;;  %v3785_v56 = vshll.u32 %v9428_v13, 16  ;;  %v3963_v50 = vrot.slane %v9428_v13, 1  ;;  %v3783_v58 = vshrl.u32 %v9428_v13, 16 }
 0x50a   : > { %v3587_v63 = vpop.f32.mrb[90].mxu1 }
 0x50b   : > { %v6983_v7 = vadd.f32 %v3587_v63, %v9418_v29  ;;  %v6766_v23 = vpop.f32.mrb[91].mxu1  ;;  %v3728_v57 = vmax.f32 %v6982_v0, 0.0  ;;  %v3787_v55 = vrot.slane %v3785_v56, 1 }
 0x50d   : > { %v3729_v9 = vmax.f32 %v6983_v7, 0.0  ;;  %v3788_v5 = vor.u32 %v3787_v55, %v3783_v58 }
 0x50f   : > { %v9433_v33 = vpack.c.bf16 %v3729_v9, %v3728_v57 }
 0x510   : > { %v3592_v44 = vpop.f32.mrb[92].mxu1 }
 0x511   : > { %v6984_v16 = vadd.f32 %v3592_v44, %v9418_v29  ;;  %4028 = vrot.lane.b32.xlu0 %v9433_v33, %s7387_s13  ;;  %v6769_v60 = vpop.f32.mrb[93].mxu1  ;;  %v3964_v39 = vrot.slane %v9433_v33, 1  ;;  %v3790_v3 = vshll.u32 %v9433_v33, 16  ;;  %v3794_v10 = vshrl.u32 %v9433_v33, 16 }
 0x512   : > { %v3595_v51 = vpop.f32.mrb[94].mxu1 }
 0x513   : > { %v6985_v47 = vadd.f32 %v3595_v51, %v9418_v29  ;;  %v6770_v42 = vpop.f32.mrb[95].mxu1  ;;  %v3965_v54 = vsel %vm665_vm0, %v3963_v50, %v3964_v39  ;;  %v3792_v4 = vrot.slane %v3790_v3, 1  ;;  %v3730_v11 = vmax.f32 %v6984_v16, 0.0 }
 0x515   : > { %v3731_v40 = vmax.f32 %v6985_v47, 0.0  ;;  %3996 = vrot.lane.b32.xlu0 %v3965_v54, %s7382_s29  ;;  %v3793_v38 = vsel %vm447_vm1, %v3788_v5, %v3792_v4  ;;  %v3796_v2 = vor.u32 %v3794_v10, %v3792_v4 }
 0x517   : > { %v9457_v8 = vpack.c.bf16 %v3731_v40, %v3730_v11 }
 0x518   : > { %v3600_v1 = vpop.f32.mrb[96].mxu1 }
 0x519   : > { %v6986_v48 = vadd.f32 %v3600_v1, %v9418_v29  ;;  %3914 = vrot.lane.b32.xlu0 %v3793_v38, %s7383_s15  ;;  %4103 = vrot.lane.b32.xlu1 %v9457_v8, %s7382_s29  ;;  %v6773_v26 = vpop.f32.mrb[97].mxu1  ;;  %v3966_v62 = vrot.slane %v9457_v8, 1  ;;  %v3798_v15 = vshll.u32 %v9457_v8, 16  ;;  %v3802_v14 = vshrl.u32 %v9457_v8, 16 }
 0x51a   : > { %v3603_v53 = vpop.f32.mrb[98].mxu1 }
 0x51b   : > { %v6987_v27 = vadd.f32 %v3603_v53, %v9418_v29  ;;  %v6774_v52 = vpop.f32.mrb[99].mxu1  ;;  %v3967_v6 = vsel %vm665_vm0, %v3964_v39, %v3966_v62  ;;  %v3732_v36 = vmax.f32 %v6986_v48, 0.0  ;;  %v3800_v21 = vrot.slane %v3798_v15, 1 }
 0x51d   : > { %v3733_v41 = vmax.f32 %v6987_v27, 0.0  ;;  %4030 = vrot.lane.b32.xlu0 %v9457_v8, %s7387_s13  ;;  %4071 = vrot.lane.b32.xlu1 %v3967_v6, %s7383_s15  ;;  %v9491_v43 = vsel %vm447_vm1, %v3796_v2, %v3800_v21  ;;  %v3804_v63 = vor.u32 %v3802_v14, %v3800_v21 }
 0x51f   : > { %v9477_v49 = vpack.c.bf16 %v3733_v41, %v3732_v36 }
 0x520   : > { %v3608_v37 = vpop.f32.mrb[100].mxu1 }
 0x521   : > { %v6988_v30 = vadd.f32 %v3608_v37, %v9418_v29  ;;  %3998 = vrot.lane.b32.xlu0 %v3967_v6, %s7382_s29  ;;  %4105 = vrot.lane.b32.xlu1 %v9477_v49, %s7382_s29  ;;  %v6777_v34 = vpop.f32.mrb[101].mxu1  ;;  %v3968_v28 = vrot.slane %v9477_v49, 1  ;;  %v3806_v25 = vshll.u32 %v9477_v49, 16  ;;  %v3810_v47 = vshrl.u32 %v9477_v49, 16 }
 0x522   : > { %v3611_v24 = vpop.f32.mrb[102].mxu1 }
 0x523   : > { %v6989_v61 = vadd.f32 %v3611_v24, %v9418_v29  ;;  %v6778_v22 = vpop.f32.mrb[103].mxu1  ;;  %v9488_v17 = vsel %vm665_vm0, %v3966_v62, %v3968_v28  ;;  %v3808_v45 = vrot.slane %v3806_v25, 1  ;;  %v3734_v0 = vmax.f32 %v6988_v30, 0.0 }
 0x525   : > { %v3735_v31 = vmax.f32 %v6989_v61, 0.0  ;;  %3916 = vrot.lane.b32.xlu0 %v9491_v43, %s7383_s15  ;;  %4073 = vrot.lane.b32.xlu1 %v9488_v17, %s7383_s15  ;;  %v9501_v57 = vsel %vm447_vm1, %v3804_v63, %v3808_v45  ;;  %v3812_v11 = vor.u32 %v3810_v47, %v3808_v45 }
 0x527   : > { %v9498_v7 = vpack.c.bf16 %v3735_v31, %v3734_v0 }
 0x528   : > { %v3616_v23 = vpop.f32.mrb[104].mxu1 }
 0x529   : > { %v6990_v9 = vadd.f32 %v3616_v23, %v9418_v29  ;;  %4032 = vrot.lane.b32.xlu0 %v9477_v49, %s7387_s13  ;;  %4143 = vrot.lane.b32.xlu1 %v9501_v57, %s7387_s13  ;;  %v6781_v56 = vpop.f32.mrb[105].mxu1  ;;  %v3970_v50 = vrot.slane %v9498_v7, 1  ;;  %v3814_v39 = vshll.u32 %v9498_v7, 16  ;;  %v3818_v15 = vshrl.u32 %v9498_v7, 16 }
 0x52a   : > { %v3619_v44 = vpop.f32.mrb[106].mxu1 }
 0x52b   : > { %v6991_v16 = vadd.f32 %v3619_v44, %v9418_v29  ;;  %v6782_v60 = vpop.f32.mrb[107].mxu1  ;;  %v3736_v3 = vmax.f32 %v6990_v9, 0.0  ;;  %v9518_v59 = vsel %vm665_vm0, %v3968_v28, %v3970_v50  ;;  %v3816_v42 = vrot.slane %v3814_v39, 1 }
 0x52d   : > { %v3737_v18 = vmax.f32 %v6991_v16, 0.0  ;;  %4000 = vrot.lane.b32.xlu0 %v9488_v17, %s7382_s29  ;;  %4107 = vrot.lane.b32.xlu1 %v9498_v7, %s7382_s29  ;;  %v9528_v5 = vsel %vm447_vm1, %v3812_v11, %v3816_v42  ;;  %v3820_v10 = vor.u32 %v3818_v15, %v3816_v42 }
 0x52f   : > { %v9515_v51 = vpack.c.bf16 %v3737_v18, %v3736_v3 }
 0x530   : > { %v3624_v55 = vpop.f32.mrb[108].mxu1 }
 0x531   : > { %v6992_v54 = vadd.f32 %v3624_v55, %v9418_v29  ;;  %3918 = vrot.lane.b32.xlu0 %v9501_v57, %s7383_s15  ;;  %4075 = vrot.lane.b32.xlu1 %v9518_v59, %s7383_s15  ;;  %v6785_v58 = vpop.f32.mrb[109].mxu1  ;;  %v3972_v26 = vrot.slane %v9515_v51, 1  ;;  %v3822_v62 = vshll.u32 %v9515_v51, 16  ;;  %v3826_v9 = vshrl.u32 %v9515_v51, 16 }
 0x532   : > { %v3627_v4 = vpop.f32.mrb[110].mxu1 }
 0x533   : > { %v6993_v40 = vadd.f32 %v3627_v4, %v9418_v29  ;;  %v6786_v19 = vpop.f32.mrb[111].mxu1  ;;  %v3738_v12 = vmax.f32 %v6992_v54, 0.0  ;;  %v9545_v6 = vsel %vm665_vm0, %v3970_v50, %v3972_v26  ;;  %v3824_v36 = vrot.slane %v3822_v62, 1  ;;  %v9593_v54 = vld [vmem:[%s11392_s3 + $0x130] sm:$0xff]  }
 0x534   : > { %6835 = vmatprep.subr.bf16.mxu0 %v9593_v54 }
 0x535   : > { %v3739_v1 = vmax.f32 %v6993_v40, 0.0  ;;  %4034 = vrot.lane.b32.xlu0 %v9498_v7, %s7387_s13  ;;  %4145 = vrot.lane.b32.xlu1 %v9528_v5, %s7387_s13  ;;  %v9555_v34 = vsel %vm447_vm1, %v3820_v10, %v3824_v36  ;;  %v3828_v50 = vor.u32 %v3826_v9, %v3824_v36 }
 0x537   : > { %v9534_v38 = vpack.c.bf16 %v3739_v1, %v3738_v12 }
 0x538   : > { %v3632_v48 = vpop.f32.mrb[112].mxu1 }
 0x539   : > { %v6994_v35 = vadd.f32 %v3632_v48, %v9418_v29  ;;  %4002 = vrot.lane.b32.xlu0 %v9518_v59, %s7382_s29  ;;  %4109 = vrot.lane.b32.xlu1 %v9515_v51, %s7382_s29  ;;  %v6789_v32 = vpop.f32.mrb[113].mxu1  ;;  %v3974_v22 = vrot.slane %v9534_v38, 1  ;;  %v3830_v14 = vshll.u32 %v9534_v38, 16  ;;  %v3834_v62 = vshrl.u32 %v9534_v38, 16 }
 0x53a   : > { %v3635_v53 = vpop.f32.mrb[114].mxu1 }
 0x53b   : > { %v6995_v27 = vadd.f32 %v3635_v53, %v9418_v29  ;;  %v6790_v52 = vpop.f32.mrb[115].mxu1  ;;  %v3740_v41 = vmax.f32 %v6994_v35, 0.0  ;;  %v9572_v23 = vsel %vm665_vm0, %v3972_v26, %v3974_v22  ;;  %v3832_v56 = vrot.slane %v3830_v14, 1 }
 0x53d   : > { %v3741_v37 = vmax.f32 %v6995_v27, 0.0  ;;  %3920 = vrot.lane.b32.xlu0 %v9528_v5, %s7383_s15  ;;  %4077 = vrot.lane.b32.xlu1 %v9545_v6, %s7383_s15  ;;  %v9582_v18 = vsel %vm447_vm1, %v3828_v50, %v3832_v56  ;;  %v3836_v27 = vor.u32 %v3834_v62, %v3832_v56 }
 0x53f   : > { %v9552_v21 = vpack.c.bf16 %v3741_v37, %v3740_v41 }
 0x540   : > { %v3640_v30 = vpop.f32.mrb[116].mxu1 }
 0x541   : > { %v6996_v28 = vadd.f32 %v3640_v30, %v9418_v29  ;;  %4036 = vrot.lane.b32.xlu0 %v9515_v51, %s7387_s13  ;;  %4147 = vrot.lane.b32.xlu1 %v9555_v34, %s7387_s13  ;;  %v6793_v25 = vpop.f32.mrb[117].mxu1  ;;  %v3976_v4 = vrot.slane %v9552_v21, 1  ;;  %v3838_v11 = vshll.u32 %v9552_v21, 16 }
 0x542   : > { %v3643_v24 = vpop.f32.mrb[118].mxu1 }
 0x543   : > { %v6997_v2 = vadd.f32 %v3643_v24, %v9418_v29  ;;  %v6794_v61 = vpop.f32.mrb[119].mxu1  ;;  %v3742_v45 = vmax.f32 %v6996_v28, 0.0  ;;  %v9605_v26 = vsel %vm665_vm0, %v3974_v22, %v3976_v4  ;;  %v3840_v35 = vrot.slane %v3838_v11, 1 }
 0x545   : > { %v3743_v0 = vmax.f32 %v6997_v2, 0.0  ;;  %4004 = vrot.lane.b32.xlu0 %v9545_v6, %s7382_s29  ;;  %4111 = vrot.lane.b32.xlu1 %v9534_v38, %s7382_s29  ;;  %v9615_v36 = vsel %vm447_vm1, %v3836_v27, %v3840_v35 }
 0x547   : > { %v9569_v31 = vpack.c.bf16 %v3743_v0, %v3742_v45  ;;  %v3842_v0 = vshrl.u32 %v9552_v21, 16 }
 0x548   : > { %v3648_v63 = vpop.f32.mrb[120].mxu1 }
 0x549   : > { %v6998_v44 = vadd.f32 %v3648_v63, %v9418_v29  ;;  %3922 = vrot.lane.b32.xlu0 %v9555_v34, %s7383_s15  ;;  %4079 = vrot.lane.b32.xlu1 %v9572_v23, %s7383_s15  ;;  %v6797_v16 = vpop.f32.mrb[121].mxu1  ;;  %v3978_v25 = vrot.slane %v9569_v31, 1  ;;  %v3846_v24 = vshll.u32 %v9569_v31, 16 }
 0x54a   : > { %v3651_v60 = vpop.f32.mrb[122].mxu1  ;;  %v3844_v16 = vor.u32 %v3842_v0, %v3840_v35  ;;  %v3850_v35 = vshrl.u32 %v9569_v31, 16 }
 0x54b   : > { %v6999_v39 = vadd.f32 %v3651_v60, %v9418_v29  ;;  %v6798_v3 = vpop.f32.mrb[123].mxu1  ;;  %v3744_v55 = vmax.f32 %v6998_v44, 0.0  ;;  %v9632_v45 = vsel %vm665_vm0, %v3976_v4, %v3978_v25  ;;  %v3848_v63 = vrot.slane %v3846_v24, 1 }
 0x54c   : > { %11424 = vst [vmem:[#allocation6_spill] sm:$0xff] %v9632_v45 }
 0x54d   : > { %v3745_v47 = vmax.f32 %v6999_v39, 0.0  ;;  %4038 = vrot.lane.b32.xlu0 %v9534_v38, %s7387_s13  ;;  %4149 = vrot.lane.b32.xlu1 %v9582_v18, %s7387_s13  ;;  %v9642_v39 = vsel %vm447_vm1, %v3844_v16, %v3848_v63 }
 0x54f   : > { %v9588_v42 = vpack.c.bf16 %v3745_v47, %v3744_v55 }
 0x550   : > { %v3656_v58 = vpop.f32.mrb[124].mxu1 }
 0x551   : > { %v7000_v40 = vadd.f32 %v3656_v58, %v9418_v29  ;;  %4006 = vrot.lane.b32.xlu0 %v9572_v23, %s7382_s29  ;;  %4113 = vrot.lane.b32.xlu1 %v9552_v21, %s7382_s29  ;;  %v6801_v19 = vpop.f32.mrb[125].mxu1  ;;  %v3980_v4 = vrot.slane %v9588_v42, 1  ;;  %v3854_v11 = vshll.u32 %v9588_v42, 16  ;;  %v3858_v16 = vshrl.u32 %v9588_v42, 16 }
 0x552   : > { %v3659_v12 = vpop.f32.mrb[126].mxu1 }
 0x553   : > { %v7001_v1 = vadd.f32 %v3659_v12, %v9418_v29  ;;  %v6802_v48 = vpop.f32.mrb[127].mxu1  ;;  %v3746_v32 = vmax.f32 %v7000_v40, 0.0  ;;  %v9659_v62 = vsel %vm665_vm0, %v3978_v25, %v3980_v4 }
 0x554   : > { %11425 = vst [vmem:[#allocation7_spill] sm:$0xff] %v9659_v62 }
 0x555   : > { %v3747_v53 = vmax.f32 %v7001_v1, 0.0  ;;  %3924 = vrot.lane.b32.xlu0 %v9582_v18, %s7383_s15  ;;  %4081 = vrot.lane.b32.xlu1 %v9605_v26, %s7383_s15 }
 0x557   : > { %v9612_v52 = vpack.c.bf16 %v3747_v53, %v3746_v32  ;;  %v3856_v32 = vrot.slane %v3854_v11, 1 }
 0x558   : > { %v3664_v15 = vpop.f32.mrb[128].mxu1 }
 0x559   : > { %v7002_v41 = vadd.f32 %v3664_v15, %v9418_v29  ;;  %4040 = vrot.lane.b32.xlu0 %v9552_v21, %s7387_s13  ;;  %4151 = vrot.lane.b32.xlu1 %v9615_v36, %s7387_s13  ;;  %v6805_v37 = vpop.f32.mrb[129].mxu1  ;;  %v3852_v15 = vor.u32 %v3850_v35, %v3848_v63 }
 0x55a   : > { %v3667_v10 = vpop.f32.mrb[130].mxu1 }
 0x55b   : > { %v7003_v30 = vadd.f32 %v3667_v10, %v9418_v29  ;;  %v6806_v28 = vpop.f32.mrb[131].mxu1  ;;  %v3748_v2 = vmax.f32 %v7002_v41, 0.0  ;;  %v9669_v10 = vsel %vm447_vm1, %v3852_v15, %v3856_v32 }
 0x55d   : > { %v3749_v61 = vmax.f32 %v7003_v30, 0.0  ;;  %4008 = vrot.lane.b32.xlu0 %v9605_v26, %s7382_s29  ;;  %4115 = vrot.lane.b32.xlu1 %v9569_v31, %s7382_s29 }
 0x55f   : > { %v9629_v22 = vpack.c.bf16 %v3749_v61, %v3748_v2  ;;  %v3982_v61 = vrot.slane %v9612_v52, 1 }
 0x560   : > { %v3672_v14 = vpop.f32.mrb[132].mxu1 }
 0x561   : > { %v7004_v9 = vadd.f32 %v3672_v14, %v9418_v29  ;;  %3926 = vrot.lane.b32.xlu0 %v9615_v36, %s7383_s15  ;;  %4083 = vrot.lane.b32.xlu1 %v9632_v45, %s7383_s15  ;;  %v6809_v56 = vpop.f32.mrb[133].mxu1  ;;  %v3862_v14 = vshll.u32 %v9612_v52, 16  ;;  %v3984_v35 = vrot.slane %v9629_v22, 1 }
 0x562   : > { %v3675_v44 = vpop.f32.mrb[134].mxu1 }
 0x563   : > { %v7005_v60 = vadd.f32 %v3675_v44, %v9418_v29  ;;  %v6810_v50 = vpop.f32.mrb[135].mxu1  ;;  %v3750_v3 = vmax.f32 %v7004_v9, 0.0  ;;  %v9686_v44 = vsel %vm665_vm0, %v3980_v4, %v3982_v61 }
 0x564   : > { %11426 = vst [vmem:[#allocation8_spill] sm:$0xff] %v9686_v44 }
 0x565   : > { %v3751_v55 = vmax.f32 %v7005_v60, 0.0  ;;  %4042 = vrot.lane.b32.xlu0 %v9569_v31, %s7387_s13  ;;  %4153 = vrot.lane.b32.xlu1 %v9642_v39, %s7387_s13  ;;  %v3864_v60 = vrot.slane %v3862_v14, 1 }
 0x567   : > { %v9648_v47 = vpack.c.bf16 %v3751_v55, %v3750_v3 }
 0x568   : > { %v3680_v58 = vpop.f32.mrb[136].mxu1 }
 0x569   : > { %v7006_v40 = vadd.f32 %v3680_v58, %v9418_v29  ;;  %4010 = vrot.lane.b32.xlu0 %v9632_v45, %s7382_s29  ;;  %4117 = vrot.lane.b32.xlu1 %v9588_v42, %s7382_s29  ;;  %v6813_v19 = vpop.f32.mrb[137].mxu1  ;;  %v3860_v58 = vor.u32 %v3858_v16, %v3856_v32  ;;  %v3870_v32 = vshll.u32 %v9629_v22, 16 }
 0x56a   : > { %v3683_v12 = vpop.f32.mrb[138].mxu1 }
 0x56b   : > { %v7007_v1 = vadd.f32 %v3683_v12, %v9418_v29  ;;  %v6814_v48 = vpop.f32.mrb[139].mxu1  ;;  %v3752_v53 = vmax.f32 %v7006_v40, 0.0  ;;  %v9696_v4 = vsel %vm447_vm1, %v3860_v58, %v3864_v60 }
 0x56d   : > { %v3753_v27 = vmax.f32 %v7007_v1, 0.0  ;;  %3928 = vrot.lane.b32.xlu0 %v9642_v39, %s7383_s15  ;;  %4085 = vrot.lane.b32.xlu1 %v9659_v62, %s7383_s15 }
 0x56f   : > { %v9666_v41 = vpack.c.bf16 %v3753_v27, %v3752_v53 }
 0x570   : > { %v3688_v37 = vpop.f32.mrb[140].mxu1 }
 0x571   : > { %v7008_v30 = vadd.f32 %v3688_v37, %v9418_v29  ;;  %4044 = vrot.lane.b32.xlu0 %v9588_v42, %s7387_s13  ;;  %4155 = vrot.lane.b32.xlu1 %v9669_v10, %s7387_s13  ;;  %v6817_v28 = vpop.f32.mrb[141].mxu1 }
 0x572   : > { %v3691_v25 = vpop.f32.mrb[142].mxu1 }
 0x573   : > { %v7009_v24 = vadd.f32 %v3691_v25, %v9418_v29  ;;  %v6818_v2 = vpop.f32.mrb[143].mxu1  ;;  %v3754_v0 = vmax.f32 %v7008_v30, 0.0  ;;  %v9715_v25 = vsel %vm665_vm0, %v3982_v61, %v3984_v35 }
 0x574   : > { %11427 = vst [vmem:[#allocation9_spill] sm:$0xff] %v9715_v25  ;;  %v3872_v2 = vrot.slane %v3870_v32, 1  ;;  %v3878_v32 = vshll.u32 %v9648_v47, 16 }
 0x575   : > { %v3755_v63 = vmax.f32 %v7009_v24, 0.0  ;;  %4012 = vrot.lane.b32.xlu0 %v9659_v62, %s7382_s29  ;;  %4119 = vrot.lane.b32.xlu1 %v9612_v52, %s7382_s29  ;;  %v3866_v24 = vshrl.u32 %v9612_v52, 16 }
 0x577   : > { %v9683_v9 = vpack.c.bf16 %v3755_v63, %v3754_v0  ;;  %v3868_v63 = vor.u32 %v3866_v24, %v3864_v60 }
 0x578   : > { %v3696_v56 = vpop.f32.mrb[144].mxu1 }
 0x579   : > { %v7010_v50 = vadd.f32 %v3696_v56, %v9418_v29  ;;  %3930 = vrot.lane.b32.xlu0 %v9669_v10, %s7383_s15  ;;  %4087 = vrot.lane.b32.xlu1 %v9686_v44, %s7383_s15  ;;  %v6821_v3 = vpop.f32.mrb[145].mxu1  ;;  %v9727_v61 = vsel %vm447_vm1, %v3868_v63, %v3872_v2  ;;  %v3874_v63 = vshrl.u32 %v9629_v22, 16 }
 0x57a   : > { %v3699_v55 = vpop.f32.mrb[146].mxu1 }
 0x57b   : > { %v7011_v11 = vadd.f32 %v3699_v55, %v9418_v29  ;;  %v6822_v40 = vpop.f32.mrb[147].mxu1  ;;  %v3756_v19 = vmax.f32 %v7010_v50, 0.0 }
 0x57d   : > { %v3757_v12 = vmax.f32 %v7011_v11, 0.0  ;;  %4046 = vrot.lane.b32.xlu0 %v9612_v52, %s7387_s13  ;;  %4157 = vrot.lane.b32.xlu1 %v9696_v4, %s7387_s13 }
 0x57f   : > { %v9702_v1 = vpack.c.bf16 %v3757_v12, %v3756_v19 }
 0x580   : > { %v3704_v48 = vpop.f32.mrb[148].mxu1 }
 0x581   : > { %v7012_v53 = vadd.f32 %v3704_v48, %v9418_v29  ;;  %4014 = vrot.lane.b32.xlu0 %v9686_v44, %s7382_s29  ;;  %4121 = vrot.lane.b32.xlu1 %v9629_v22, %s7382_s29  ;;  %v6825_v27 = vpop.f32.mrb[149].mxu1  ;;  %v3986_v48 = vrot.slane %v9648_v47, 1 }
 0x582   : > { %v3707_v15 = vpop.f32.mrb[150].mxu1 }
 0x583   : > { %v7013_v37 = vadd.f32 %v3707_v15, %v9418_v29  ;;  %v9712_v30 = vpop.permute.xlu0 %4028  ;;  %v6826_v28 = vpop.f32.mrb[151].mxu1  ;;  %v3758_v14 = vmax.f32 %v7012_v53, 0.0 }
 0x585   : > { %v3759_v0 = vmax.f32 %v7013_v37, 0.0  ;;  %3932 = vrot.lane.b32.xlu0 %v9696_v4, %s7383_s15  ;;  %4089 = vrot.lane.b32.xlu1 %v9715_v25, %s7383_s15 }
 0x587   : > { %v9722_v56 = vpack.c.bf16 %v3759_v0, %v3758_v14  ;;  %v9724_v16 = vpop.permute.xlu0 %3996  ;;  %v9749_v0 = vsel %vm665_vm0, %v3984_v35, %v3986_v48 }
 0x588   : > { %v3712_v50 = vpop.f32.mrb[152].mxu1  ;;  %11428 = vst [vmem:[#allocation10_spill] sm:$0xff] %v9749_v0 }
 0x589   : > { %v7014_v3 = vadd.f32 %v3712_v50, %v9418_v29  ;;  %4048 = vrot.lane.b32.xlu0 %v9629_v22, %s7387_s13  ;;  %4159 = vrot.lane.b32.xlu1 %v9727_v61, %s7387_s13  ;;  %v6829_v55 = vpop.f32.mrb[153].mxu1  ;;  %v3910_v19 = vshll.u32 %v9722_v56, 16  ;;  %v3880_v50 = vrot.slane %v3878_v32, 1 }
 0x58a   : > { %v3715_v58 = vpop.f32.mrb[154].mxu1 }
 0x58b   : > { %v7015_v60 = vadd.f32 %v3715_v58, %v9418_v29  ;;  %v3915_v11 = vpop.permute.xlu0 %3914  ;;  %v4104_v40 = vpop.permute.xlu1 %4103  ;;  %v3760_v53 = vmax.f32 %v7014_v3, 0.0  ;;  %v9746_v24 = vrot.slane %v3910_v19, 1  ;;  %v4060_v19 = vshrl.u32 %v9722_v56, 16 }
 0x58c   : > { %v6830_v12 = vpop.f32.mrb[155].mxu1 }
 0x58d   : > { %v3761_v27 = vmax.f32 %v7015_v60, 0.0  ;;  %4016 = vrot.lane.b32.xlu0 %v9715_v25, %s7382_s29  ;;  %4123 = vrot.lane.b32.xlu1 %v9648_v47, %s7382_s29  ;;  %v4062_v46 = vor.u32 %v4060_v19, %v9746_v24 }
 0x58f   : > { %v9742_v15 = vpack.c.bf16 %v3761_v27, %v3760_v53  ;;  %v9744_v37 = vpop.permute.xlu0 %4030  ;;  %v4072_v28 = vpop.permute.xlu1 %4071  ;;  %v3876_v53 = vor.u32 %v3874_v63, %v3872_v2  ;;  %v4179_v63 = vsel %vm1318_vm4, %v9428_v13, %v3915_v11 }
 0x590   : > { %v3720_v14 = vpop.f32.mrb[156].mxu1  ;;  %v4211_v11 = vsel %vm1404_vm6, %v4179_v63, %v9724_v16 }
 0x591   : > { %v7016_v55 = vadd.f32 %v3720_v14, %v9418_v29  ;;  %3934 = vrot.lane.b32.xlu0 %v9727_v61, %s7383_s15  ;;  %4091 = vrot.lane.b32.xlu1 %v9749_v0, %s7383_s15  ;;  %v6833_v58 = vpop.f32.mrb[157].mxu1  ;;  %v4069_v60 = vrot.slane %v9742_v15, 1  ;;  %v4064_v35 = vshll.u32 %v9742_v15, 16  ;;  %v11429_v29 = vrot.slane %v9722_v56, 1 }
 0x592   : > { %v3723_v12 = vpop.f32.mrb[158].mxu1  ;;  %v9768_v25 = vsel %vm447_vm1, %v3876_v53, %v3880_v50  ;;  %v4135_v53 = vshrl.u32 %v9742_v15, 16 }
 0x593   : > { %v3762_v32 = vmax.f32 %v7016_v55, 0.0  ;;  %v3999_v27 = vpop.permute.xlu0 %3998  ;;  %v4106_v3 = vpop.permute.xlu1 %4105  ;;  %v9764_v14 = vsel %vm665_vm0, %v11429_v29, %v4069_v60  ;;  %v4066_v20 = vrot.slane %v4064_v35, 1  ;;  %v3988_v29 = vrot.slane %v9666_v41, 1 }
 0x594   : > { %11430 = vst [vmem:[#allocation11_spill] sm:$0xff] %v9764_v14  ;;  %v6834_v58 = vpop.f32.mrb[159].mxu1 }
 0x595   : > { %v3781_v44 = vpack.c.bf16 %v3762_v32, %v3762_v32  ;;  %4050 = vrot.lane.b32.xlu0 %v9648_v47, %s7387_s13  ;;  %4161 = vrot.lane.b32.xlu1 %v9768_v25, %s7387_s13  ;;  %v9775_v2 = vsel %vm447_vm1, %v4062_v46, %v4066_v20  ;;  %v4292_v32 = vsel %vm1318_vm4, %v9491_v43, %v4072_v28  ;;  %v3886_v46 = vshll.u32 %v9666_v41, 16 }
 0x596   : > { %v4137_v13 = vor.u32 %v4135_v53, %v4066_v20  ;;  %v4339_v28 = vsel %vm1404_vm6, %v4292_v32, %v4104_v40  ;;  %v7247_v20 = vld [vmem:[%s11392_s3 + $0x138] sm:$0xff]   ;;  %v9806_v16 = vsel %vm665_vm0, %v3986_v48, %v3988_v29  ;;  %v3882_v40 = vshrl.u32 %v9648_v47, 16 }
 0x597   : > { %v4139_v55 = vshll.u32 %v3781_v44, 16  ;;  %v4176_v19 = vrot.slane %v3781_v44, 1  ;;  %v3917_v35 = vpop.permute.xlu0 %3916  ;;  %v4074_v12 = vpop.permute.xlu1 %4073  ;;  %11432 = vst [vmem:[#allocation13_spill] sm:$0xff] %v9806_v16  ;;  %v3888_v63 = vrot.slane %v3886_v46, 1  ;;  %v3894_v46 = vshll.u32 %v9683_v9, 16 }
 0x598   : > { %v3884_v32 = vor.u32 %v3882_v40, %v3880_v50  ;;  %v4295_v50 = vsel %vm1318_vm4, %v9501_v57, %v4074_v12 }
 0x599   : > { %v4141_v58 = vrot.slane %v4139_v55, 1  ;;  %4018 = vrot.lane.b32.xlu0 %v9749_v0, %s7382_s29  ;;  %4125 = vrot.lane.b32.xlu1 %v9666_v41, %s7382_s29  ;;  %v9789_v44 = vsel %vm665_vm0, %v4069_v60, %v4176_v19  ;;  %v4243_v60 = vsel %vm1490_vm8, %v4211_v11, %v9712_v30  ;;  %v4181_v30 = vsel %vm1318_vm4, %v9433_v33, %v3917_v35 }
 0x59a   : > { %11431 = vst [vmem:[#allocation12_spill] sm:$0xff] %v9789_v44  ;;  %v9817_v48 = vsel %vm447_vm1, %v3884_v32, %v3888_v63  ;;  %v4341_v35 = vsel %vm1404_vm6, %v4295_v50, %v4106_v3  ;;  %v3902_v50 = vshll.u32 %v9702_v1, 16 }
 0x59b   : > { %v9793_v62 = vpop.permute.xlu0 %4032  ;;  %v4144_v43 = vpop.permute.xlu1 %4143  ;;  %v9797_v55 = vsel %vm447_vm1, %v4137_v13, %v4141_v58  ;;  %v4213_v13 = vsel %vm1404_vm6, %v4181_v30, %v3999_v27  ;;  %v3896_v27 = vrot.slane %v3894_v46, 1 }
 0x59c   : > { %v4371_v0 = vsel %vm1490_vm8, %v4339_v28, %v4144_v43  ;;  %v4246_v12 = vsel %vm1490_vm8, %v4213_v13, %v9744_v37  ;;  %v3890_v28 = vshrl.u32 %v9666_v41, 16 }
 0x59d   : > { %4646 = vmatprep.mubr.bf16.mxu0 %v4371_v0  ;;  %3936 = vrot.lane.b32.xlu0 %v9768_v25, %s7383_s15 }
 0x59e   : > { %4093 = vrot.lane.b32.xlu1 %v9806_v16, %s7383_s15  ;;  %4647 = vmatmul.mubr.bf16.vlgmr.msra.gmra.mrb[84].mxu0 %v4243_v60  ;;  %v3892_v60 = vor.u32 %v3890_v28, %v3888_v63  ;;  %v3992_v63 = vrot.slane %v9702_v1, 1 }
 0x59f   : > { %v4001_v19 = vpop.permute.xlu0 %4000  ;;  %v4108_v53 = vpop.permute.xlu1 %4107  ;;  %6836 = vmatpush3.bf16.msra.mxu0 %v9593_v54  ;;  %v3990_v54 = vrot.slane %v9683_v9, 1 }
 0x5a0   : > { %6837 = vmatprep.subr.bf16.mxu0 %v7247_v20  ;;  %v9849_v40 = vsel %vm447_vm1, %v3892_v60, %v3896_v27 }
 0x5a1   : > { %4052 = vrot.lane.b32.xlu0 %v9666_v41, %s7387_s13  ;;  %v9839_v57 = vsel %vm665_vm0, %v3988_v29, %v3990_v54 }
 0x5a2   : > { %4163 = vrot.lane.b32.xlu1 %v9817_v48, %s7387_s13  ;;  %11433 = vst [vmem:[#allocation14_spill] sm:$0xff] %v9839_v57 }
 0x5a3   : > { %v3919_v0 = vpop.permute.xlu0 %3918  ;;  %v4076_v58 = vpop.permute.xlu1 %4075  ;;  %6838 = vmatpush3.bf16.msra.mxu0 %v7247_v20 }
 0x5a4   : > { %v4183_v37 = vsel %vm1318_vm4, %v9457_v8, %v3919_v0  ;;  %v4298_v30 = vsel %vm1318_vm4, %v9528_v5, %v4076_v58  ;;  %v9869_v5 = vsel %vm665_vm0, %v3990_v54, %v3992_v63 }
 0x5a5   : > { %4020 = vrot.lane.b32.xlu0 %v9806_v16, %s7382_s29  ;;  %v4215_v46 = vsel %vm1404_vm6, %v4183_v37, %v4001_v19  ;;  %v4343_v8 = vsel %vm1404_vm6, %v4298_v30, %v4108_v53  ;;  %11434 = vst [vmem:[#allocation15_spill] sm:$0xff] %v9869_v5  ;;  %v11439_v16 = vmov 0  }
 0x5a6   : > { %4127 = vrot.lane.b32.xlu1 %v9683_v9, %s7382_s29  ;;  %v4249_v58 = vsel %vm1490_vm8, %v4215_v46, %v9793_v62 }
 0x5a7   : > { %v9832_v11 = vpop.permute.xlu0 %4034  ;;  %v4146_v33 = vpop.permute.xlu1 %4145 }
 0x5a8   : > { %v4374_v43 = vsel %vm1490_vm8, %v4341_v35, %v4146_v33  ;;  %v3898_v35 = vshrl.u32 %v9683_v9, 16 }
 0x5a9   : > { %4654 = vmatprep.mubr.bf16.mxu0 %v4374_v43  ;;  %3938 = vrot.lane.b32.xlu0 %v9817_v48, %s7383_s15  ;;  %v3904_v43 = vrot.slane %v3902_v50, 1 }
 0x5aa   : > { %4095 = vrot.lane.b32.xlu1 %v9839_v57, %s7383_s15  ;;  %4655 = vmatmul.mubr.bf16.gmra.mrb[88].mxu0 %v4246_v12  ;;  %v3900_v12 = vor.u32 %v3898_v35, %v3896_v27  ;;  %v7391_v27 = vmov 2  }
 0x5ab   : > { %v4003_v3 = vpop.permute.xlu0 %4002  ;;  %v4110_v20 = vpop.permute.xlu1 %4109  ;;  %7146 = vset.pattern.permute.xlu1 %v7391_v27  ;;  %7147 = vset.pattern.permute.xlu0 %v7391_v27 }
 0x5ac   : > { %v9879_v28 = vsel %vm447_vm1, %v3900_v12, %v3904_v43 }
 0x5ad   : > { %4054 = vrot.lane.b32.xlu0 %v9683_v9, %s7387_s13 }
 0x5ae   : > { %4165 = vrot.lane.b32.xlu1 %v9849_v40, %s7387_s13 }
 0x5af   : > { %v3921_v29 = vpop.permute.xlu0 %3920  ;;  %v4078_v32 = vpop.permute.xlu1 %4077 }
 0x5b0   : > { %v4185_v62 = vsel %vm1318_vm4, %v9477_v49, %v3921_v29  ;;  %v4301_v37 = vsel %vm1318_vm4, %v9555_v34, %v4078_v32  ;;  %v11435_v34 = vrot.slane %v9722_v56, 1 }
 0x5b1   : > { %4022 = vrot.lane.b32.xlu0 %v9839_v57, %s7382_s29  ;;  %v4217_v30 = vsel %vm1404_vm6, %v4185_v62, %v4003_v3  ;;  %v4345_v49 = vsel %vm1404_vm6, %v4301_v37, %v4110_v20  ;;  %v10162_v57 = vld [vmem:[%s11390_s1 + $0xe8] sm:$0xff] }
 0x5b2   : > { %4129 = vrot.lane.b32.xlu1 %v9702_v1, %s7382_s29  ;;  %v9900_v32 = vsel %vm665_vm0, %v3992_v63, %v11435_v34  ;;  %v4252_v3 = vsel %vm1490_vm8, %v4217_v30, %v9832_v11 }
 0x5b3   : > { %v4037_v13 = vpop.permute.xlu0 %4036  ;;  %v4148_v33 = vpop.permute.xlu1 %4147  ;;  %11436 = vst [vmem:[#allocation16_spill] sm:$0xff] %v9900_v32 }
 0x5b4   : > { %v4377_v0 = vsel %vm1490_vm8, %v4343_v8, %v4148_v33  ;;  %v3906_v33 = vshrl.u32 %v9702_v1, 16 }
 0x5b5   : > { %4662 = vmatprep.mubr.bf16.mxu0 %v4377_v0  ;;  %3940 = vrot.lane.b32.xlu0 %v9849_v40, %s7383_s15 }
 0x5b6   : > { %4097 = vrot.lane.b32.xlu1 %v9869_v5, %s7383_s15  ;;  %4663 = vmatmul.mubr.bf16.gmra.mrb[92].mxu0 %v4249_v58  ;;  %v3908_v20 = vor.u32 %v3906_v33, %v3904_v43 }
 0x5b7   : > { %v4005_v19 = vpop.permute.xlu0 %4004  ;;  %v4112_v53 = vpop.permute.xlu1 %4111 }
 0x5b8   : > { %v9908_v58 = vsel %vm447_vm1, %v3908_v20, %v9746_v24  ;;  %v9968_v20 = vld [vmem:[%s11390_s1 + $0x30] sm:$0xff] }
 0x5b9   : > { %4056 = vrot.lane.b32.xlu0 %v9702_v1, %s7387_s13 }
 0x5ba   : > { %4167 = vrot.lane.b32.xlu1 %v9879_v28, %s7387_s13 }
 0x5bb   : > { %v3923_v54 = vpop.permute.xlu0 %3922  ;;  %v4080_v60 = vpop.permute.xlu1 %4079 }
 0x5bc   : > { %v4187_v11 = vsel %vm1318_vm4, %v9498_v7, %v3923_v54  ;;  %v4304_v43 = vsel %vm1318_vm4, %v9582_v18, %v4080_v60 }
 0x5bd   : > { %4024 = vrot.lane.b32.xlu0 %v9869_v5, %s7382_s29  ;;  %v4219_v24 = vsel %vm1404_vm6, %v4187_v11, %v4005_v19  ;;  %v4347_v37 = vsel %vm1404_vm6, %v4304_v43, %v4112_v53 }
 0x5be   : > { %4131 = vrot.lane.b32.xlu1 %v9722_v56, %s7382_s29  ;;  %v4255_v7 = vsel %vm1490_vm8, %v4219_v24, %v4037_v13 }
 0x5bf   : > { %v4039_v50 = vpop.permute.xlu0 %4038  ;;  %v4150_v46 = vpop.permute.xlu1 %4149 }
 0x5c0   : > { %v4380_v29 = vsel %vm1490_vm8, %v4345_v49, %v4150_v46  ;;  %v9954_v49 = vld [vmem:[%s11390_s1] sm:$0xff] }
 0x5c1   : > { %4670 = vmatprep.mubr.bf16.mxu0 %v4380_v29  ;;  %3942 = vrot.lane.b32.xlu0 %v9879_v28, %s7383_s15  ;;  %11437 = vst [vmem:[#allocation17_spill] sm:$0xff] %v9954_v49 }
 0x5c2   : > { %4099 = vrot.lane.b32.xlu1 %v9900_v32, %s7383_s15  ;;  %4671 = vmatmul.mubr.bf16.gmra.mrb[96].mxu0 %v4252_v3  ;;  %v9963_v3 = vld [vmem:[%s11390_s1 + $0x10] sm:$0xff] }
 0x5c3   : > { %v4007_v8 = vpop.permute.xlu0 %4006  ;;  %v4114_v0 = vpop.permute.xlu1 %4113 }
 0x5c5   : > { %3944 = vrot.lane.b32.xlu0 %v9908_v58, %s7383_s15 }
 0x5c6   : > { %4169 = vrot.lane.b32.xlu1 %v9908_v58, %s7387_s13 }
 0x5c7   : > { %v3925_v63 = vpop.permute.xlu0 %3924  ;;  %v4082_v35 = vpop.permute.xlu1 %4081 }
 0x5c8   : > { %v4189_v19 = vsel %vm1318_vm4, %v9515_v51, %v3925_v63  ;;  %v4307_v30 = vsel %vm1318_vm4, %v9615_v36, %v4082_v35  ;;  %v9948_v51 = vld [vmem:[%s11390_s1 + $0x20] sm:$0xff]  ;;  %v9982_v63 = vld [vmem:[%s11390_s1 + $0x18] sm:$0xff] }
 0x5c9   : > { %4026 = vrot.lane.b32.xlu0 %v9900_v32, %s7382_s29  ;;  %v4349_v36 = vsel %vm1404_vm6, %v4307_v30, %v4114_v0 }
 0x5ca   : > { %4101 = vrot.lane.b32.xlu1 %v9764_v14, %s7383_s15  ;;  %v10124_v14 = vld [vmem:[%s11390_s1 + $0xb8] sm:$0xff] }
 0x5cb   : > { %v4041_v12 = vpop.permute.xlu0 %4040  ;;  %v4152_v62 = vpop.permute.xlu1 %4151 }
 0x5cc   : > { %v4383_v27 = vsel %vm1490_vm8, %v4347_v37, %v4152_v62  ;;  %v9993_v37 = vld [vmem:[%s11390_s1 + $0x28] sm:$0xff] }
 0x5cd   : > { %4678 = vmatprep.mubr.bf16.mxu0 %v4383_v27  ;;  %4058 = vrot.lane.b32.xlu0 %v9722_v56, %s7387_s13  ;;  %v9939_v56 = vld [vmem:[%s11390_s1 + $0x8] sm:$0xff] }
 0x5ce   : > { %4171 = vrot.lane.b32.xlu1 %v9775_v2, %s7387_s13  ;;  %4679 = vmatmul.mubr.bf16.gmra.mrb[100].mxu0 %v4255_v7 }
 0x5cf   : > { %v4009_v18 = vpop.permute.xlu0 %4008  ;;  %v4116_v54 = vpop.permute.xlu1 %4115 }
 0x5d1   : > { %5007 = vperm.xlu0 %7147, %v9939_v56  }
 0x5d2   : > { %4133 = vrot.lane.b32.xlu1 %v9742_v15, %s7382_s29  ;;  %v4221_v15 = vsel %vm1404_vm6, %v4189_v19, %v4007_v8  ;;  %s7323_s29 = scalar_lea.vmem %s7322_s21, 32 }
 0x5d3   : > { %v3927_v53 = vpop.permute.xlu0 %3926  ;;  %v4084_v60 = vpop.permute.xlu1 %4083 }
 0x5d4   : > { %v4191_v8 = vsel %vm1318_vm4, %v9534_v38, %v3927_v53  ;;  %v4310_v35 = vsel %vm1318_vm4, %v9642_v39, %v4084_v60  ;;  %v9999_v39 = vld [vmem:[%s11390_s1 + $0x50] sm:$0xff]  ;;  %v10012_v53 = vld [vmem:[%s11390_s1 + $0x38] sm:$0xff] }
 0x5d5   : > { %5022 = vperm.xlu0 %7147, %v9948_v51   ;;  %v4223_v43 = vsel %vm1404_vm6, %v4191_v8, %v4009_v18  ;;  %v4351_v38 = vsel %vm1404_vm6, %v4310_v35, %v4116_v54  ;;  %v10007_v18 = vld [vmem:[%s11390_s1 + $0x60] sm:$0xff] }
 0x5d6   : > { %4173 = vrot.lane.b32.xlu1 %v9797_v55, %s7387_s13  ;;  %v4258_v55 = vsel %vm1490_vm8, %v4221_v15, %v4039_v50  ;;  %v9975_v50 = vld [vmem:[%s11390_s1 + $0x40] sm:$0xff]  ;;  %v4261_v7 = vsel %vm1490_vm8, %v4223_v43, %v4041_v12  ;;  %v10021_v15 = vld [vmem:[%s11390_s1 + $0x48] sm:$0xff]  ;;  %s269_s13 = sand.u32 1, %s7371_s25  }
 0x5d7   : > { %v4043_v13 = vpop.permute.xlu0 %4042  ;;  %v4154_v46 = vpop.permute.xlu1 %4153  ;;  %v10050_v43 = vld [vmem:[%s11390_s1 + $0x68] sm:$0xff]  ;;  %s270_s14 = scalar_lea.vmem [#allocation2], %s269_s13  ;;  %s6227_s8 = scalar_lea.sflag [#allocation3], %s269_s13 }
 0x5d8   : > { %v4386_v29 = vsel %vm1490_vm8, %v4349_v36, %v4154_v46  ;;  %v10028_v36 = vld [vmem:[%s11390_s1 + $0x70] sm:$0xff]  ;;  %s6239_s17 = sshll.u32 %s270_s14, 4  ;;  %s11349_s17 = int_to_ptr.vmem [resolvable:$true] %s6239_s17 }
 0x5d9   : > { %4686 = vmatprep.mubr.bf16.mxu0 %v4386_v29  ;;  %5032 = vperm.xlu0 %7147, %v9968_v20   ;;  %s7317_s9 = scalar_lea.vmem %s11349_s17, 16  ;;  %p7324_p0 = scmp.lt.s32.totalorder %s11349_s17, %s7322_s21 }
 0x5da   : > { %4687 = vmatmul.mubr.bf16.gmra.mrb[104].mxu0 %v4258_v55  ;;  %5002 = vperm.xlu1 %7146, %v9954_v49   ;;  %p7318_p11 = scmp.ne.s32.totalorder %s11349_s17, %s7317_s9  ;;  %p7325_p1 = scmp.lt.s32.totalorder %s7323_s29, %s7317_s9 }
 0x5db   : > { %v4011_v33 = vpop.permute.xlu0 %4010  ;;  %v4118_v34 = vpop.permute.xlu1 %4117 }
 0x5dc   : > { %p7319_p12 = pnand %p7318_p11, %p7473_p5  ;;  %p7326_p2 = por %p7325_p1, %p7324_p0 }
 0x5dd   : > { %5042 = vperm.xlu0 %7147, %v9975_v50  }
 0x5de   : > { %5012 = vperm.xlu1 %7146, %v9963_v3   ;;  %p7320_p13 = pneg %p7319_p12 }
 0x5df   : > { %v3929_v0 = vpop.permute.xlu0 %3928  ;;  %v4086_v11 = vpop.permute.xlu1 %4085 }
 0x5e0   : > { %v4193_v12 = vsel %vm1318_vm4, %v9552_v21, %v3929_v0  ;;  %v4313_v46 = vsel %vm1318_vm4, %v9669_v10, %v4086_v11  ;;  %v10037_v0 = vld [vmem:[%s11390_s1 + $0x58] sm:$0xff]  ;;  %p7327_p3 = pnand %p7326_p2, %p7320_p13 }
 0x5e1   : > { %5052 = vperm.xlu0 %7147, %v9999_v39   ;;  %v4225_v29 = vsel %vm1404_vm6, %v4193_v12, %v4011_v33  ;;  %v4353_v8 = vsel %vm1404_vm6, %v4313_v46, %v4118_v34  ;;  %v10045_v33 = vld [vmem:[%s11390_s1 + $0x80] sm:$0xff] }
 0x5e2   : > { %5017 = vperm.xlu1 %7146, %v9982_v63   ;;  %v4264_v11 = vsel %vm1490_vm8, %v4225_v29, %v4043_v13  ;;  %v10056_v13 = vld [vmem:[%s11390_s1 + $0x90] sm:$0xff]  ;;  %v10072_v46 = vld [vmem:[%s11390_s1 + $0xa0] sm:$0xff] }
 0x5e3   : > { %v4045_v24 = vpop.permute.xlu0 %4044  ;;  %v4156_v62 = vpop.permute.xlu1 %4155 }
 0x5e4   : > { %v4389_v27 = vsel %vm1490_vm8, %v4351_v38, %v4156_v62 }
 0x5e5   : > { %4694 = vmatprep.mubr.bf16.mxu0 %v4389_v27  ;;  %5062 = vperm.xlu0 %7147, %v10007_v18  }
 0x5e6   : > { %4695 = vmatmul.mubr.bf16.gmra.mrb[108].mxu0 %v4261_v7  ;;  %5027 = vperm.xlu1 %7146, %v9993_v37   ;;  %v10064_v7 = vld [vmem:[%s11390_s1 + $0x78] sm:$0xff] }
 0x5e7   : > { %v4013_v54 = vpop.permute.xlu0 %4012  ;;  %v4120_v19 = vpop.permute.xlu1 %4119 }
 0x5e9   : > { %5072 = vperm.xlu0 %7147, %v10028_v36  }
 0x5ea   : > { %5037 = vperm.xlu1 %7146, %v10012_v53  }
 0x5eb   : > { %v3931_v60 = vpop.permute.xlu0 %3930  ;;  %v4088_v30 = vpop.permute.xlu1 %4087 }
 0x5ec   : > { %v4195_v62 = vsel %vm1318_vm4, %v9569_v31, %v3931_v60  ;;  %v4316_v12 = vsel %vm1318_vm4, %v9696_v4, %v4088_v30 }
 0x5ed   : > { %5082 = vperm.xlu0 %7147, %v10045_v33   ;;  %v4227_v29 = vsel %vm1404_vm6, %v4195_v62, %v4013_v54  ;;  %v10089_v54 = vld [vmem:[%s11390_s1 + $0xb0] sm:$0xff] }
 0x5ee   : > { %5047 = vperm.xlu1 %7146, %v10021_v15   ;;  %v4267_v30 = vsel %vm1490_vm8, %v4227_v29, %v4045_v24  ;;  %v10100_v24 = vld [vmem:[%s11390_s1 + $0xc0] sm:$0xff] }
 0x5ef   : > { %v4047_v21 = vpop.permute.xlu0 %4046  ;;  %v4158_v55 = vpop.permute.xlu1 %4157 }
 0x5f0   : > { %v4392_v10 = vsel %vm1490_vm8, %v4353_v8, %v4158_v55  ;;  %v4355_v55 = vsel %vm1404_vm6, %v4316_v12, %v4120_v19  ;;  %v10080_v8 = vld [vmem:[%s11390_s1 + $0x88] sm:$0xff] }
 0x5f1   : > { %4702 = vmatprep.mubr.bf16.mxu0 %v4392_v10  ;;  %5092 = vperm.xlu0 %7147, %v10056_v13  }
 0x5f2   : > { %4703 = vmatmul.mubr.bf16.gmra.mrb[112].mxu0 %v4264_v11  ;;  %5057 = vperm.xlu1 %7146, %v10037_v0   ;;  %v10094_v11 = vld [vmem:[%s11390_s1 + $0x98] sm:$0xff] }
 0x5f3   : > { %v4015_v35 = vpop.permute.xlu0 %4014  ;;  %v4122_v34 = vpop.permute.xlu1 %4121 }
 0x5f5   : > { %5102 = vperm.xlu0 %7147, %v10072_v46  }
 0x5f6   : > { %5067 = vperm.xlu1 %7146, %v10050_v43  }
 0x5f7   : > { %v3933_v38 = vpop.permute.xlu0 %3932  ;;  %v4090_v27 = vpop.permute.xlu1 %4089 }
 0x5f8   : > { %v4197_v62 = vsel %vm1318_vm4, %v9588_v42, %v3933_v38 }
 0x5f9   : > { %5112 = vperm.xlu0 %7147, %v10089_v54  }
 0x5fa   : > { %5077 = vperm.xlu1 %7146, %v10064_v7  }
 0x5fb   : > { %v4049_v31 = vpop.permute.xlu0 %4048  ;;  %v4160_v60 = vpop.permute.xlu1 %4159 }
 0x5fc   : > { %v4395_v4 = vsel %vm1490_vm8, %v4355_v55, %v4160_v60  ;;  %v10108_v60 = vld [vmem:[%s11390_s1 + $0xa8] sm:$0xff]  ;;  %v4319_v55 = vsel %vm1318_vm4, %v9727_v61, %v4090_v27 }
 0x5fd   : > { %4710 = vmatprep.mubr.bf16.mxu0 %v4395_v4  ;;  %5122 = vperm.xlu0 %7147, %v10100_v24   ;;  %v10116_v4 = vld [vmem:[%s11390_s1 + $0xd0] sm:$0xff]  ;;  %v4357_v44 = vsel %vm1404_vm6, %v4319_v55, %v4122_v34  ;;  %v10138_v55 = vld [vmem:[%s11390_s1 + $0xc8] sm:$0xff] }
 0x5fe   : > { %4711 = vmatmul.mubr.bf16.gmra.mrb[116].mxu0 %v4267_v30  ;;  %5087 = vperm.xlu1 %7146, %v10080_v8   ;;  %v4229_v30 = vsel %vm1404_vm6, %v4197_v62, %v4015_v35  ;;  %v10133_v35 = vld [vmem:[%s11390_s1 + $0xe0] sm:$0xff] }
 0x5ff   : > { %v4017_v19 = vpop.permute.xlu0 %4016  ;;  %v4124_v10 = vpop.permute.xlu1 %4123  ;;  %v4270_v27 = vsel %vm1490_vm8, %v4229_v30, %v4047_v21  ;;  %v10150_v30 = vld [vmem:[%s11390_s1 + $0xd8] sm:$0xff] }
 0x601   : > { %5132 = vperm.xlu0 %7147, %v10116_v4  }
 0x602   : > { %5097 = vperm.xlu1 %7146, %v10094_v11  }
 0x603   : > { %v3935_v12 = vpop.permute.xlu0 %3934  ;;  %v4092_v29 = vpop.permute.xlu1 %4091 }
 0x605   : > { %5142 = vperm.xlu0 %7147, %v10133_v35  }
 0x606   : > { %5107 = vperm.xlu1 %7146, %v10108_v60  }
 0x607   : > { %v4051_v42 = vpop.permute.xlu0 %4050  ;;  %v4162_v38 = vpop.permute.xlu1 %4161 }
 0x608   : > { %v4398_v61 = vsel %vm1490_vm8, %v4357_v44, %v4162_v38  ;;  %v10144_v44 = vld [vmem:[%s11390_s1 + $0xf0] sm:$0xff]  ;;  %v4199_v38 = vsel %vm1318_vm4, %v9612_v52, %v3935_v12  ;;  %v10173_v12 = vld [vmem:[%s11390_s1 + $0xf8] sm:$0xff] }
 0x609   : > { %4718 = vmatprep.mubr.bf16.mxu0 %v4398_v61  ;;  %11438 = vst [vmem:[#allocation18_spill] sm:$0xff] %v10144_v44  ;;  %5152 = vperm.xlu0 %7147, %v10144_v44   ;;  %v4231_v5 = vsel %vm1404_vm6, %v4199_v38, %v4017_v19  ;;  %v7392_v38 = vmov 1  }
 0x60a   : > { %4719 = vmatmul.mubr.bf16.gmra.mrb[120].mxu0 %v4270_v27  ;;  %5117 = vperm.xlu1 %7146, %v10124_v14   ;;  %v4322_v27 = vsel %vm1318_vm4, %v9768_v25, %v4092_v29  ;;  %v4273_v25 = vsel %vm1490_vm8, %v4231_v5, %v4049_v31 }
 0x60b   : > { %v4019_v34 = vpop.permute.xlu0 %4018  ;;  %v4126_v62 = vpop.permute.xlu1 %4125  ;;  %v4359_v44 = vsel %vm1404_vm6, %v4322_v27, %v4124_v10 }
 0x60d   : > { %7150 = vset.pattern.permute.xlu0 %v11439_v16 }
 0x60e   : > { %5127 = vperm.xlu1 %7146, %v10138_v55   ;;  %5432 = vperm.xlu0 %7150, %v9939_v56  }
 0x60f   : > { %v3937_v21 = vpop.permute.xlu0 %3936 }
 0x610   : > { %v4094_v61 = vpop.permute.xlu1 %4093  ;;  %v4201_v5 = vsel %vm1318_vm4, %v9629_v22, %v3937_v21 }
 0x611   : > { %v4325_v10 = vsel %vm1318_vm4, %v9817_v48, %v4094_v61  ;;  %v4233_v27 = vsel %vm1404_vm6, %v4201_v5, %v4019_v34 }
 0x612   : > { %5137 = vperm.xlu1 %7146, %v10150_v30   ;;  %7151 = vset.pattern.permute.xlu0 %v7392_v38  ;;  %v4276_v22 = vsel %vm1490_vm8, %v4233_v27, %v4051_v42 }
 0x613   : > { %v4053_v32 = vpop.permute.xlu0 %4052  ;;  %5658 = vperm.xlu0 %7151, %v9954_v49  }
 0x614   : > { %v4164_v45 = vpop.permute.xlu1 %4163 }
 0x615   : > { %v4401_v52 = vsel %vm1490_vm8, %v4359_v44, %v4164_v45 }
 0x616   : > { %4726 = vmatprep.mubr.bf16.mxu0 %v4401_v52  ;;  %5147 = vperm.xlu1 %7146, %v10162_v57  }
 0x617   : > { %4727 = vmatmul.mubr.bf16.gmra.mrb[124].mxu0 %v4273_v25  ;;  %v4021_v19 = vpop.permute.xlu0 %4020  ;;  %5670 = vperm.xlu0 %7151, %v9982_v63   ;;  %v4361_v25 = vsel %vm1404_vm6, %v4325_v10, %v4126_v62 }
 0x618   : > { %v4128_v29 = vpop.permute.xlu1 %4127 }
 0x61a   : > { %5157 = vperm.xlu1 %7146, %v10173_v12  }
 0x61b   : > { %v3939_v45 = vpop.permute.xlu0 %3938  ;;  %5678 = vperm.xlu0 %7151, %v9993_v37  }
 0x61c   : > { %v4096_v31 = vpop.permute.xlu1 %4095 }
 0x61d   : > { %v4328_v61 = vsel %vm1318_vm4, %v9849_v40, %v4096_v31 }
 0x61e   : > { %7148 = vset.pattern.permute.xlu1 %v7392_v38  ;;  %v4363_v10 = vsel %vm1404_vm6, %v4328_v61, %v4128_v29 }
 0x61f   : > { %v4055_v44 = vpop.permute.xlu0 %4054  ;;  %5662 = vperm.xlu1 %7148, %v9939_v56   ;;  %5686 = vperm.xlu0 %7151, %v10012_v53   ;;  %v4203_v56 = vsel %vm1318_vm4, %v9648_v47, %v3939_v45 }
 0x620   : > { %v4166_v52 = vpop.permute.xlu1 %4165  ;;  %v4235_v42 = vsel %vm1404_vm6, %v4203_v56, %v4021_v19 }
 0x621   : > { %v4404_v49 = vsel %vm1490_vm8, %v4361_v25, %v4166_v52  ;;  %v4279_v47 = vsel %vm1490_vm8, %v4235_v42, %v4053_v32 }
 0x622   : > { %4734 = vmatprep.mubr.bf16.mxu0 %v4404_v49 }
 0x623   : > { %4735 = vmatmul.mubr.bf16.gmra.mrb[128].mxu0 %v4276_v22  ;;  %v4023_v48 = vpop.permute.xlu0 %4022  ;;  %5666 = vperm.xlu1 %7148, %v9963_v3  }
 0x624   : > { %v4130_v21 = vpop.permute.xlu1 %4129  ;;  %5694 = vperm.xlu0 %7151, %v10021_v15  }
 0x627   : > { %v3941_v34 = vpop.permute.xlu0 %3940  ;;  %5674 = vperm.xlu1 %7148, %v9948_v51  }
 0x628   : > { %v4098_v62 = vpop.permute.xlu1 %4097  ;;  %5702 = vperm.xlu0 %7151, %v10037_v0   ;;  %v4205_v19 = vsel %vm1318_vm4, %v9666_v41, %v3941_v34 }
 0x629   : > { %v4331_v31 = vsel %vm1318_vm4, %v9879_v28, %v4098_v62  ;;  %v4237_v32 = vsel %vm1404_vm6, %v4205_v19, %v4023_v48 }
 0x62a   : > { %v4365_v22 = vsel %vm1404_vm6, %v4331_v31, %v4130_v21  ;;  %v4282_v41 = vsel %vm1490_vm8, %v4237_v32, %v4055_v44 }
 0x62b   : > { %v4057_v49 = vpop.permute.xlu0 %4056  ;;  %5682 = vperm.xlu1 %7148, %v9968_v20  }
 0x62c   : > { %v4168_v5 = vpop.permute.xlu1 %4167  ;;  %5710 = vperm.xlu0 %7151, %v10050_v43  }
 0x62d   : > { %v4407_v27 = vsel %vm1490_vm8, %v4363_v10, %v4168_v5 }
 0x62e   : > { %4742 = vmatprep.mubr.bf16.mxu0 %v4407_v27 }
 0x62f   : > { %4743 = vmatmul.mubr.bf16.gmra.mrb[132].mxu0 %v4279_v47  ;;  %v4025_v45 = vpop.permute.xlu0 %4024  ;;  %5690 = vperm.xlu1 %7148, %v9975_v50  }
 0x630   : > { %v4132_v40 = vpop.permute.xlu1 %4131  ;;  %5718 = vperm.xlu0 %7151, %v10064_v7  }
 0x633   : > { %5698 = vperm.xlu1 %7148, %v9999_v39   ;;  %v3943_v52 = vpop.permute.xlu0 %3942 }
 0x634   : > { %v4100_v29 = vpop.permute.xlu1 %4099  ;;  %5726 = vperm.xlu0 %7151, %v10080_v8   ;;  %v4207_v28 = vsel %vm1318_vm4, %v9683_v9, %v3943_v52 }
 0x635   : > { %v4334_v62 = vsel %vm1318_vm4, %v9908_v58, %v4100_v29  ;;  %v4239_v21 = vsel %vm1404_vm6, %v4207_v28, %v4025_v45 }
 0x636   : > { %v4367_v44 = vsel %vm1404_vm6, %v4334_v62, %v4132_v40  ;;  %v4285_v9 = vsel %vm1490_vm8, %v4239_v21, %v4057_v49 }
 0x637   : > { %5706 = vperm.xlu1 %7148, %v10007_v18   ;;  %v3945_v34 = vpop.permute.xlu0 %3944 }
 0x638   : > { %v4170_v25 = vpop.permute.xlu1 %4169  ;;  %5734 = vperm.xlu0 %7151, %v10094_v11   ;;  %v4209_v47 = vsel %vm1318_vm4, %v9702_v1, %v3945_v34  ;;  %v11443_v1 = vld [vmem:[#allocation7_spill] sm:$0xff] }
 0x639   : > { %v4410_v56 = vsel %vm1490_vm8, %v4365_v22, %v4170_v25  ;;  %v11453_v25 = vmov 0.0  }
 0x63a   : > { %4750 = vmatprep.mubr.bf16.mxu0 %v4410_v56 }
 0x63b   : > { %4751 = vmatmul.mubr.bf16.gmra.mrb[136].mxu0 %v4282_v41  ;;  %5714 = vperm.xlu1 %7148, %v10028_v36   ;;  %v4027_v42 = vpop.permute.xlu0 %4026 }
 0x63c   : > { %v4102_v48 = vpop.permute.xlu1 %4101  ;;  %5742 = vperm.xlu0 %7151, %v10108_v60   ;;  %v4241_v49 = vsel %vm1404_vm6, %v4209_v47, %v4027_v42 }
 0x63d   : > { %v4337_v10 = vsel %vm1318_vm4, %v9775_v2, %v4102_v48 }
 0x63f   : > { %5722 = vperm.xlu1 %7148, %v10045_v33   ;;  %v4059_v27 = vpop.permute.xlu0 %4058 }
 0x640   : > { %v4172_v61 = vpop.permute.xlu1 %4171  ;;  %5750 = vperm.xlu0 %7151, %v10124_v14   ;;  %v4288_v29 = vsel %vm1490_vm8, %v4241_v49, %v4059_v27 }
 0x641   : > { %v4413_v5 = vsel %vm1490_vm8, %v4367_v44, %v4172_v61 }
 0x642   : > { %4758 = vmatprep.mubr.bf16.mxu0 %v4413_v5 }
 0x643   : > { %4759 = vmatmul.mubr.bf16.gmra.mrb[140].mxu0 %v4285_v9  ;;  %5730 = vperm.xlu1 %7148, %v10056_v13  }
 0x644   : > { %v4134_v58 = vpop.permute.xlu1 %4133  ;;  %5758 = vperm.xlu0 %7151, %v10138_v55  }
 0x645   : > { %v4369_v45 = vsel %vm1404_vm6, %v4337_v10, %v4134_v58 }
 0x647   : > { %5738 = vperm.xlu1 %7148, %v10072_v46  }
 0x648   : > { %v4174_v40 = vpop.permute.xlu1 %4173  ;;  %5766 = vperm.xlu0 %7151, %v10150_v30  }
 0x649   : > { %v4416_v19 = vsel %vm1490_vm8, %v4369_v45, %v4174_v40 }
 0x64a   : > { %4766 = vmatprep.mubr.bf16.mxu0 %v4416_v19 }
 0x64b   : > { %4767 = vmatmul.mubr.bf16.gmra.mrb[144].mxu0 %v4288_v29  ;;  %5746 = vperm.xlu1 %7148, %v10089_v54  }
 0x64c   : > { %6839 = vmatprep.mubr.msk.bf16.mxu0 %vm1318_vm4, %v9488_v17  ;;  %5774 = vperm.xlu0 %7151, %v10162_v57   ;;  %v11440_v17 = vld [vmem:[#allocation17_spill] sm:$0xff] }
 0x64f   : > { %5754 = vperm.xlu1 %7148, %v10100_v24  }
 0x650   : > { %5782 = vperm.xlu0 %7151, %v10173_v12  }
 0x653   : > { %6840 = vmatmul.mubr.msk.bf16.vlgmr.msra.gmra.mrb[148].mxu0 %vm1318_vm4, %v9518_v59  ;;  %5762 = vperm.xlu1 %7148, %v10116_v4   ;;  %v11441_v59 = vld [vmem:[#allocation18_spill] sm:$0xff] }
 0x654   : > { %6843 = vmatprep.mubr.msk.bf16.mxu0 %vm1318_vm4, %v9545_v6  ;;  %7154 = vset.pattern.permute.xlu0 %v11439_v16  ;;  %v11442_v6 = vld [vmem:[#allocation6_spill] sm:$0xff] }
 0x655   : > { %5448 = vperm.xlu0 %7154, %v9993_v37   ;;  %v11447_v37 = vld [vmem:[#allocation13_spill] sm:$0xff] }
 0x657   : > { %5770 = vperm.xlu1 %7148, %v10133_v35  }
 0x659   : > { %5460 = vperm.xlu0 %7154, %v9975_v50   ;;  %v11446_v50 = vld [vmem:[#allocation10_spill] sm:$0xff]  ;;  %v10334_v28 = vpop.permute.xlu1 %5002 }
 0x65b   : > { %6844 = vmatmul.mubr.msk.bf16.gmra.mrb[152].mxu0 %vm1318_vm4, %v9572_v23  ;;  %7149 = vset.pattern.permute.xlu1 %v11439_v16  ;;  %v11444_v23 = vld [vmem:[#allocation8_spill] sm:$0xff] }
 0x65c   : > { %6847 = vmatprep.mubr.msk.bf16.mxu0 %vm1318_vm4, %v9605_v26  ;;  %5428 = vperm.xlu1 %7149, %v11440_v17   ;;  %v11445_v26 = vld [vmem:[#allocation9_spill] sm:$0xff]  ;;  %v10360_v17 = vpop.permute.xlu0 %5007 }
 0x65d   : > { %5468 = vperm.xlu0 %7154, %v9999_v39   ;;  %v10341_v21 = vpop.permute.xlu1 %5012 }
 0x660   : > { %7152 = vset.pattern.permute.xlu1 %v7392_v38 }
 0x661   : > { %5778 = vperm.xlu1 %7152, %v11441_v59   ;;  %5476 = vperm.xlu0 %7154, %v10007_v18   ;;  %v10346_v5 = vpop.permute.xlu1 %5017 }
 0x663   : > { %6848 = vmatmul.mubr.msk.bf16.gmra.mrb[156].mxu0 %vm1318_vm4, %v11442_v6 }
 0x664   : > { %6851 = vmatprep.mubr.msk.bf16.mxu0 %vm1318_vm4, %v11443_v1 }
 0x665   : > { %7153 = vset.pattern.permute.xlu1 %v11439_v16  ;;  %5484 = vperm.xlu0 %7154, %v10028_v36  }
 0x666   : > { %5436 = vperm.xlu1 %7153, %v9963_v3  }
 0x669   : > { %5492 = vperm.xlu0 %7154, %v10045_v33  }
 0x66a   : > { %5440 = vperm.xlu1 %7153, %v9982_v63  }
 0x66b   : > { %6852 = vmatmul.mubr.msk.bf16.gmra.mrb[160].mxu0 %vm1318_vm4, %v11444_v23 }
 0x66c   : > { %6855 = vmatprep.mubr.msk.bf16.mxu0 %vm1318_vm4, %v11445_v26 }
 0x66d   : > { %5500 = vperm.xlu0 %7154, %v10056_v13  }
 0x66e   : > { %5444 = vperm.xlu1 %7153, %v9948_v51   ;;  %v11448_v51 = vld [vmem:[#allocation14_spill] sm:$0xff] }
 0x671   : > { %v6516_v2 = vpop.f32.mrb[84].mxu0  ;;  %5508 = vperm.xlu0 %7154, %v10072_v46  }
 0x672   : > { %v6517_v16 = vpop.f32.mrb[85].mxu0  ;;  %5452 = vperm.xlu1 %7153, %v9968_v20   ;;  %v11449_v20 = vld [vmem:[#allocation15_spill] sm:$0xff] }
 0x673   : > { %v10284_v3 = vadd.f32 %v6517_v16, %v6516_v2  ;;  %6856 = vmatmul.mubr.msk.bf16.gmra.mrb[164].mxu0 %vm1318_vm4, %v11446_v50  ;;  %v6519_v63 = vpop.f32.mrb[86].mxu0  ;;  %v10368_v2 = vpop.permute.xlu0 %5022 }
 0x674   : > { %6859 = vmatprep.mubr.msk.bf16.mxu0 %vm1318_vm4, %v11447_v37  ;;  %v6520_v39 = vpop.f32.mrb[87].mxu0 }
 0x675   : > { %v10290_v18 = vadd.f32 %v6520_v39, %v6519_v63  ;;  %5516 = vperm.xlu0 %7154, %v10089_v54   ;;  %v11451_v54 = vld [vmem:[#allocation11_spill] sm:$0xff] }
 0x676   : > { %5456 = vperm.xlu1 %7153, %v10012_v53  }
 0x677   : > { %v10372_v37 = vpop.permute.xlu0 %5032 }
 0x679   : > { %5524 = vperm.xlu0 %7154, %v10100_v24  }
 0x67a   : > { %5464 = vperm.xlu1 %7153, %v10021_v15   ;;  %v11450_v15 = vld [vmem:[#allocation16_spill] sm:$0xff] }
 0x67b   : > { %6860 = vmatmul.mubr.msk.bf16.gmra.mrb[168].mxu0 %vm1318_vm4, %v11448_v51 }
 0x67c   : > { %6863 = vmatprep.mubr.msk.bf16.mxu0 %vm1318_vm4, %v11449_v20 }
 0x67d   : > { %v6522_v36 = vpop.f32.mrb[88].mxu0  ;;  %5532 = vperm.xlu0 %7154, %v10116_v4  }
 0x67e   : > { %v6523_v33 = vpop.f32.mrb[89].mxu0  ;;  %5472 = vperm.xlu1 %7153, %v10037_v0  }
 0x67f   : > { %v10302_v13 = vadd.f32 %v6523_v33, %v6522_v36  ;;  %v6525_v53 = vpop.f32.mrb[90].mxu0 }
 0x680   : > { %v6526_v46 = vpop.f32.mrb[91].mxu0 }
 0x681   : > { %v10304_v31 = vadd.f32 %v6526_v46, %v6525_v53  ;;  %5540 = vperm.xlu0 %7154, %v10133_v35   ;;  %v10380_v53 = vpop.permute.xlu0 %5042 }
 0x682   : > { %5480 = vperm.xlu1 %7153, %v10050_v43   ;;  %v11452_v43 = vld [vmem:[#allocation12_spill] sm:$0xff] }
 0x683   : > { %6864 = vmatmul.mubr.msk.bf16.gmra.mrb[172].mxu0 %vm1318_vm4, %v11450_v15 }
 0x684   : > { %6867 = vmatprep.mubr.msk.bf16.mxu0 %vm1318_vm4, %v11451_v54 }
 0x685   : > { %5548 = vperm.xlu0 %7154, %v11441_v59  }
 0x686   : > { %5488 = vperm.xlu1 %7153, %v10064_v7  }
 0x689   : > { %v6528_v0 = vpop.f32.mrb[92].mxu0  ;;  %7155 = vset.pattern.permute.xlu0 %v7392_v38 }
 0x68a   : > { %v6529_v24 = vpop.f32.mrb[93].mxu0  ;;  %5496 = vperm.xlu1 %7153, %v10080_v8  }
 0x68b   : > { %v10316_v52 = vadd.f32 %v6529_v24, %v6528_v0  ;;  %6868 = vmatmul.mubr.msk.bf16.gmra.mrb[176].mxu0 %vm1318_vm4, %v11452_v43  ;;  %v6531_v4 = vpop.f32.mrb[94].mxu0  ;;  %v10384_v0 = vpop.permute.xlu0 %5052 }
 0x68c   : > { %v6532_v32 = vpop.f32.mrb[95].mxu0  ;;  %6887 = vmatprep.mubr.msk.f32.mxu0 %vm7390_vm10, %v11453_v25 }
 0x68d   : > { %v10322_v22 = vadd.f32 %v6532_v32, %v6531_v4 }
 0x68e   : > { %5504 = vperm.xlu1 %7153, %v10094_v11  }
 0x692   : > { %5512 = vperm.xlu1 %7153, %v10108_v60  }
 0x695   : > { %v6534_v7 = vpop.f32.mrb[96].mxu0 }
 0x696   : > { %v6535_v8 = vpop.f32.mrb[97].mxu0  ;;  %5520 = vperm.xlu1 %7153, %v10124_v14  }
 0x697   : > { %v10328_v35 = vadd.f32 %v6535_v8, %v6534_v7  ;;  %v6537_v56 = vpop.f32.mrb[98].mxu0  ;;  %v10392_v8 = vpop.permute.xlu0 %5062 }
 0x698   : > { %v6538_v41 = vpop.f32.mrb[99].mxu0 }
 0x699   : > { %v10330_v34 = vadd.f32 %v6538_v41, %v6537_v56 }
 0x69a   : > { %5528 = vperm.xlu1 %7153, %v10138_v55  }
 0x69e   : > { %5536 = vperm.xlu1 %7153, %v10150_v30  }
 0x6a1   : > { %v6540_v11 = vpop.f32.mrb[100].mxu0 }
 0x6a2   : > { %v6541_v38 = vpop.f32.mrb[101].mxu0  ;;  %5544 = vperm.xlu1 %7153, %v10162_v57   ;;  %v10350_v57 = vpop.permute.xlu1 %5027 }
 0x6a3   : > { %v10337_v60 = vadd.f32 %v6541_v38, %v6540_v11  ;;  %v6543_v48 = vpop.f32.mrb[102].mxu0  ;;  %v10396_v11 = vpop.permute.xlu0 %5072 }
 0x6a4   : > { %v6544_v14 = vpop.f32.mrb[103].mxu0 }
 0x6a5   : > { %v10339_v62 = vadd.f32 %v6544_v14, %v6543_v48 }
 0x6a6   : > { %5552 = vperm.xlu1 %7153, %v10173_v12   ;;  %v10354_v40 = vpop.permute.xlu1 %5037 }
 0x6aa   : > { %v10358_v49 = vpop.permute.xlu1 %5047 }
 0x6ad   : > { %v6546_v61 = vpop.f32.mrb[104].mxu0 }
 0x6ae   : > { %v6547_v55 = vpop.f32.mrb[105].mxu0  ;;  %v10364_v23 = vpop.permute.xlu1 %5057 }
 0x6af   : > { %v10344_v44 = vadd.f32 %v6547_v55, %v6546_v61  ;;  %v6549_v30 = vpop.f32.mrb[106].mxu0 }
 0x6b0   : > { %v6550_v42 = vpop.f32.mrb[107].mxu0 }
 0x6b1   : > { %v10348_v9 = vadd.f32 %v6550_v42, %v6549_v30  ;;  %v10404_v42 = vpop.permute.xlu0 %5082 }
 0x6b2   : > { %v10370_v16 = vpop.permute.xlu1 %5067 }
 0x6b6   : > { %v10376_v36 = vpop.permute.xlu1 %5077 }
 0x6b9   : > { %v6552_v58 = vpop.f32.mrb[108].mxu0 }
 0x6ba   : > { %v6553_v10 = vpop.f32.mrb[109].mxu0  ;;  %v10382_v46 = vpop.permute.xlu1 %5087 }
 0x6bb   : > { %v10352_v27 = vadd.f32 %v6553_v10, %v6552_v58  ;;  %v6555_v47 = vpop.f32.mrb[110].mxu0 }
 0x6bc   : > { %v6556_v45 = vpop.f32.mrb[111].mxu0 }
 0x6bd   : > { %v10356_v12 = vadd.f32 %v6556_v45, %v6555_v47  ;;  %v10408_v47 = vpop.permute.xlu0 %5092 }
 0x6be   : > { %v10388_v32 = vpop.permute.xlu1 %5097 }
 0x6c2   : > { %v10394_v56 = vpop.permute.xlu1 %5107 }
 0x6c3   : > { %11454 = vst [vmem:[#allocation17_spill] sm:$0xff] %v10394_v56 }
 0x6c5   : > { %v6558_v19 = vpop.f32.mrb[112].mxu0 }
 0x6c6   : > { %v6559_v29 = vpop.f32.mrb[113].mxu0  ;;  %v10400_v61 = vpop.permute.xlu1 %5117 }
 0x6c7   : > { %v10362_v59 = vadd.f32 %v6559_v29, %v6558_v19  ;;  %v6561_v6 = vpop.f32.mrb[114].mxu0 }
 0x6c8   : > { %v6562_v1 = vpop.f32.mrb[115].mxu0 }
 0x6c9   : > { %v10366_v26 = vadd.f32 %v6562_v1, %v6561_v6 }
 0x6ca   : > { %v10406_v58 = vpop.permute.xlu1 %5127 }
 0x6cb   : > { %11455 = vst [vmem:[#allocation18_spill] sm:$0xff] %v10406_v58 }
 0x6ce   : > { %v10412_v6 = vpop.permute.xlu1 %5137 }
 0x6cf   : > { %11456 = vst [vmem:[#allocation6_spill] sm:$0xff] %v10412_v6 }
 0x6d1   : > { %v6564_v50 = vpop.f32.mrb[116].mxu0 }
 0x6d2   : > { %v6565_v63 = vpop.f32.mrb[117].mxu0 }
 0x6d3   : > { %v10374_v39 = vadd.f32 %v6565_v63, %v6564_v50  ;;  %v6567_v51 = vpop.f32.mrb[118].mxu0  ;;  %v10416_v63 = vpop.permute.xlu0 %5102 }
 0x6d4   : > { %v6568_v20 = vpop.f32.mrb[119].mxu0 }
 0x6d5   : > { %v10378_v33 = vadd.f32 %v6568_v20, %v6567_v51  ;;  %v10418_v51 = vpop.permute.xlu1 %5147 }
 0x6d6   : > { %11457 = vst [vmem:[#allocation7_spill] sm:$0xff] %v10418_v51 }
 0x6d7   : > { %v10420_v20 = vpop.permute.xlu0 %5112 }
 0x6dd   : > { %v6570_v15 = vpop.f32.mrb[120].mxu0 }
 0x6de   : > { %v6571_v54 = vpop.f32.mrb[121].mxu0 }
 0x6df   : > { %v10386_v24 = vadd.f32 %v6571_v54, %v6570_v15  ;;  %v6573_v43 = vpop.f32.mrb[122].mxu0 }
 0x6e0   : > { %v6574_v4 = vpop.f32.mrb[123].mxu0 }
 0x6e1   : > { %v10390_v7 = vadd.f32 %v6574_v4, %v6573_v43  ;;  %v10422_v43 = vpop.permute.xlu1 %5157 }
 0x6e2   : > { %11458 = vst [vmem:[#allocation8_spill] sm:$0xff] %v10422_v43 }
 0x6ea   : > { %v6576_v41 = vpop.f32.mrb[124].mxu0 }
 0x6eb   : > { %v6577_v38 = vpop.f32.mrb[125].mxu0 }
 0x6ec   : > { %v10398_v48 = vadd.f32 %v6577_v38, %v6576_v41  ;;  %v6579_v14 = vpop.f32.mrb[126].mxu0 }
 0x6ed   : > { %v6580_v55 = vpop.f32.mrb[127].mxu0 }
 0x6ee   : > { %v10402_v30 = vadd.f32 %v6580_v55, %v6579_v14  ;;  %v10428_v55 = vpop.permute.xlu0 %5122 }
 0x6ef   : > { %11461 = vst [vmem:[#allocation13_spill] sm:$0xff] %v10428_v55 }
 0x6f6   : > { %v6582_v10 = vpop.f32.mrb[128].mxu0 }
 0x6f7   : > { %v6583_v45 = vpop.f32.mrb[129].mxu0 }
 0x6f8   : > { %v10410_v19 = vadd.f32 %v6583_v45, %v6582_v10  ;;  %v6585_v29 = vpop.f32.mrb[130].mxu0  ;;  %v10430_v10 = vpop.permute.xlu1 %5662 }
 0x6f9   : > { %v6586_v1 = vpop.f32.mrb[131].mxu0  ;;  %11462 = vst [vmem:[#allocation14_spill] sm:$0xff] %v10430_v10  ;;  %v10432_v45 = vpop.permute.xlu0 %5132 }
 0x6fa   : > { %v10414_v50 = vadd.f32 %v6586_v1, %v6585_v29  ;;  %11463 = vst [vmem:[#allocation15_spill] sm:$0xff] %v10432_v45 }
 0x6fc   : > { %v10434_v25 = vpop.permute.xlu1 %5666 }
 0x6fd   : > { %11464 = vst [vmem:[#allocation16_spill] sm:$0xff] %v10434_v25  ;;  %v11472_v25 = vld [vmem:[#allocation5_spill] sm:$0xff] }
 0x702   : > { %v6588_v15 = vpop.f32.mrb[132].mxu0 }
 0x703   : > { %v6589_v54 = vpop.f32.mrb[133].mxu0 }
 0x704   : > { %v10424_v4 = vadd.f32 %v6589_v54, %v6588_v15  ;;  %v6591_v41 = vpop.f32.mrb[134].mxu0  ;;  %v10440_v54 = vpop.permute.xlu0 %5142 }
 0x705   : > { %v6592_v38 = vpop.f32.mrb[135].mxu0  ;;  %11466 = vst [vmem:[#allocation12_spill] sm:$0xff] %v10440_v54 }
 0x706   : > { %11459 = vst [vmem:[#allocation9_spill] sm:$0xff] %v10424_v4  ;;  %v10426_v14 = vadd.f32 %v6592_v38, %v6591_v41  ;;  %v10442_v41 = vpop.permute.xlu1 %5674 }
 0x707   : > { %11467 = vst [vmem:[#allocation19_spill] sm:$0xff] %v10442_v41 }
 0x708   : > { %11460 = vst [vmem:[#allocation10_spill] sm:$0xff] %v10426_v14  ;;  %v10446_v14 = vpop.permute.xlu0 %5152 }
 0x709   : > { %11469 = vst [vmem:[#allocation21_spill] sm:$0xff] %v10446_v14 }
 0x70e   : > { %v6594_v29 = vpop.f32.mrb[136].mxu0 }
 0x70f   : > { %v6595_v1 = vpop.f32.mrb[137].mxu0 }
 0x710   : > { %v10436_v51 = vadd.f32 %v6595_v1, %v6594_v29  ;;  %v6597_v58 = vpop.f32.mrb[138].mxu0  ;;  %v10450_v29 = vpop.permute.xlu1 %5682 }
 0x711   : > { %v6598_v43 = vpop.f32.mrb[139].mxu0  ;;  %11471 = vst [vmem:[#allocation23_spill] sm:$0xff] %v10450_v29 }
 0x712   : > { %v10438_v15 = vadd.f32 %v6598_v43, %v6597_v58  ;;  %v4456_v58 = vsub.s32 3, %v11472_v25 }
 0x714   : > { %11465 = vst [vmem:[#allocation11_spill] sm:$0xff] %v10438_v15  ;;  %v10453_v15 = vpop.permute.xlu0 %5432 }
 0x715   : > { %11473 = vst [vmem:[#allocation5_spill] sm:$0xff] %v10453_v15 }
 0x716   : > { %v6600_v38 = vpop.f32.mrb[140].mxu0 }
 0x717   : > { %v6601_v6 = vpop.f32.mrb[141].mxu0 }
 0x718   : > { %v10444_v55 = vadd.f32 %v6601_v6, %v6600_v38  ;;  %v6603_v10 = vpop.f32.mrb[142].mxu0  ;;  %v10457_v6 = vpop.permute.xlu1 %5690 }
 0x719   : > { %v6604_v45 = vpop.f32.mrb[143].mxu0  ;;  %11475 = vst [vmem:[#allocation25_spill] sm:$0xff] %v10457_v6  ;;  %v10468_v29 = vpop.permute.xlu0 %5658 }
 0x71a   : > { %11468 = vst [vmem:[#allocation20_spill] sm:$0xff] %v10444_v55  ;;  %v10448_v4 = vadd.f32 %v6604_v45, %v6603_v10  ;;  %v7316_v10 = vld [vmem:[%s11393_s4] sm:$0xff]  ;;  %11477 = vst [vmem:[#allocation27_spill] sm:$0xff] %v10468_v29 }
 0x71b   : > { %v10464_v45 = vrot.slane %v7316_v10, %v4456_v58 }
 0x71c   : > { %11470 = vst [vmem:[#allocation22_spill] sm:$0xff] %v10448_v4 }
 0x71d   : > { %v4657_v25 = vadd.f32 %v10302_v13, %v10464_v45  ;;  %v4652_v58 = vadd.f32 %v10290_v18, %v10464_v45  ;;  %v10478_v29 = vpop.permute.xlu0 %5670  ;;  %v4676_v18 = vadd.f32 %v10330_v34, %v10464_v45  ;;  %v4681_v34 = vadd.f32 %v10337_v60, %v10464_v45 }
 0x71e   : > { %v6606_v1 = vpop.f32.mrb[144].mxu0  ;;  %11479 = vst [vmem:[#allocation29_spill] sm:$0xff] %v10478_v29  ;;  %v4689_v60 = vadd.f32 %v10344_v44, %v10464_v45 }
 0x71f   : > { %v6607_v43 = vpop.f32.mrb[145].mxu0 }
 0x720   : > { %v10455_v54 = vadd.f32 %v6607_v43, %v6606_v1  ;;  %v6609_v41 = vpop.f32.mrb[146].mxu0  ;;  %v4649_v1 = vadd.f32 %v10284_v3, %v10464_v45  ;;  %v4673_v3 = vadd.f32 %v10328_v35, %v10464_v45 }
 0x721   : > { %v6610_v56 = vpop.f32.mrb[147].mxu0  ;;  %v10493_v29 = vpop.permute.xlu0 %5678 }
 0x722   : > { %11474 = vst [vmem:[#allocation24_spill] sm:$0xff] %v10455_v54  ;;  %v10459_v38 = vadd.f32 %v6610_v56, %v6609_v41  ;;  %v4660_v56 = vadd.f32 %v10304_v31, %v10464_v45  ;;  %v10474_v41 = vpop.permute.xlu1 %5698 }
 0x723   : > { %11478 = vst [vmem:[#allocation28_spill] sm:$0xff] %v10474_v41 }
 0x724   : > { %11476 = vst [vmem:[#allocation26_spill] sm:$0xff] %v10459_v38 }
 0x726   : > { %v6841_v15 = vpop.f32.mrb[148].mxu0 }
 0x727   : > { %v4818_v43 = vadd.f32 %v6841_v15, %v4657_v25  ;;  %v4809_v14 = vpop.f32.mrb[149].mxu0  ;;  %v10482_v15 = vpop.permute.xlu1 %5706 }
 0x728   : > { %v4810_v6 = vadd.f32 %v4809_v14, %v4649_v1  ;;  %v6842_v4 = vpop.f32.mrb[150].mxu0  ;;  %11480 = vst [vmem:[#allocation30_spill] sm:$0xff] %v10482_v15  ;;  %v4665_v14 = vadd.f32 %v10316_v52, %v10464_v45 }
 0x729   : > { %v4821_v10 = vadd.f32 %v6842_v4, %v4660_v56  ;;  %v4812_v13 = vpop.f32.mrb[151].mxu0  ;;  %v4938_v55 = vmax.f32 %v4818_v43, 0.0  ;;  %v4668_v43 = vadd.f32 %v10322_v22, %v10464_v45 }
 0x72a   : > { %v4813_v38 = vadd.f32 %v4812_v13, %v4652_v58  ;;  %v4936_v25 = vmax.f32 %v4810_v6, 0.0 }
 0x72b   : > { %v4939_v1 = vmax.f32 %v4821_v10, 0.0  ;;  %v10491_v35 = vadd.f32 %v10341_v21, %v4938_v55  ;;  %v4684_v55 = vadd.f32 %v10339_v62, %v10464_v45 }
 0x72c   : > { %v4937_v4 = vmax.f32 %v4813_v38, 0.0  ;;  %v10496_v52 = vadd.f32 %v10334_v28, %v4936_v25  ;;  %v10508_v38 = vpop.permute.xlu1 %5714 }
 0x72e   : > { %v6845_v31 = vpop.f32.mrb[152].mxu0  ;;  %v10511_v28 = vadd.f32 %v10360_v17, %v4937_v4  ;;  %v4692_v17 = vadd.f32 %v10348_v9, %v10464_v45 }
 0x72f   : > { %v4834_v41 = vadd.f32 %v6845_v31, %v4673_v3  ;;  %v4825_v54 = vpop.f32.mrb[153].mxu0 }
 0x730   : > { %v4826_v56 = vadd.f32 %v4825_v54, %v4665_v14  ;;  %v6846_v58 = vpop.f32.mrb[154].mxu0  ;;  %v10501_v54 = vadd.f32 %v10346_v5, %v4939_v1  ;;  %v5194_v5 = vsel %vm1318_vm4, %v10491_v35, -inf }
 0x731   : > { %v4942_v6 = vmax.f32 %v4834_v41, 0.0  ;;  %v4837_v13 = vadd.f32 %v6846_v58, %v4676_v18  ;;  %v4828_v15 = vpop.f32.mrb[155].mxu0  ;;  %v5193_v58 = vsel %vm1318_vm4, %v10511_v28, -inf }
 0x732   : > { %v4940_v10 = vmax.f32 %v4826_v56, 0.0  ;;  %v4829_v3 = vadd.f32 %v4828_v15, %v4668_v43  ;;  %v5195_v1 = vsel %vm1318_vm4, %v10501_v54, -inf  ;;  %v10538_v56 = vpop.permute.xlu0 %5686 }
 0x733   : > { %v10504_v22 = vadd.f32 %v10372_v37, %v4942_v6  ;;  %v4943_v21 = vmax.f32 %v4837_v13, 0.0 }
 0x734   : > { %v10514_v41 = vadd.f32 %v10368_v2, %v4940_v10  ;;  %v4941_v15 = vmax.f32 %v4829_v3, 0.0  ;;  %v5192_v2 = vsel %vm1318_vm4, %v10496_v52, -inf }
 0x735   : > { %v5200_v37 = vsel %vm1318_vm4, %v10504_v22, -inf  ;;  %v10523_v62 = vadd.f32 %v10354_v40, %v4943_v21 }
 0x736   : > { %v5201_v25 = vmax.f32 %v5194_v5, %v5200_v37  ;;  %v5196_v31 = vsel %vm1318_vm4, %v10514_v41, -inf  ;;  %v10532_v44 = vadd.f32 %v10350_v57, %v4941_v15  ;;  %v6849_v14 = vpop.f32.mrb[156].mxu0  ;;  %v10544_v5 = vpop.permute.xlu1 %5722 }
 0x737   : > { %v5197_v18 = vmax.f32 %v5192_v2, %v5196_v31  ;;  %v5202_v40 = vsel %vm1318_vm4, %v10523_v62, -inf  ;;  %v4850_v4 = vadd.f32 %v6849_v14, %v4689_v60  ;;  %v4841_v9 = vpop.f32.mrb[157].mxu0 }
 0x738   : > { %v5203_v43 = vmax.f32 %v5195_v1, %v5202_v40  ;;  %v5198_v57 = vsel %vm1318_vm4, %v10532_v44, -inf  ;;  %v4842_v6 = vadd.f32 %v4841_v9, %v4681_v34  ;;  %v6850_v13 = vpop.f32.mrb[158].mxu0 }
 0x739   : > { %v5199_v10 = vmax.f32 %v5193_v58, %v5198_v57  ;;  %v4946_v3 = vmax.f32 %v4850_v4, 0.0  ;;  %v4853_v21 = vadd.f32 %v6850_v13, %v4692_v17  ;;  %v4844_v15 = vpop.f32.mrb[159].mxu0  ;;  %v4705_v17 = vadd.f32 %v10362_v59, %v10464_v45  ;;  %v10559_v4 = vpop.permute.xlu0 %5694 }
 0x73a   : > { %v4944_v37 = vmax.f32 %v4842_v6, 0.0  ;;  %v4845_v60 = vadd.f32 %v4844_v15, %v4684_v55  ;;  %v4697_v58 = vadd.f32 %v10352_v27, %v10464_v45  ;;  %v4708_v59 = vadd.f32 %v10366_v26, %v10464_v45 }
 0x73b   : > { %v10547_v2 = vadd.f32 %v10384_v0, %v4946_v3  ;;  %v4947_v31 = vmax.f32 %v4853_v21, 0.0  ;;  %v4700_v27 = vadd.f32 %v10356_v12, %v10464_v45 }
 0x73c   : > { %v10550_v14 = vadd.f32 %v10380_v53, %v4944_v37  ;;  %v4945_v1 = vmax.f32 %v4845_v60, 0.0 }
 0x73d   : > { %v5208_v34 = vsel %vm1318_vm4, %v10547_v2, -inf  ;;  %v10555_v40 = vadd.f32 %v10364_v23, %v4947_v31 }
 0x73e   : > { %v5209_v55 = vmax.f32 %v5201_v25, %v5208_v34  ;;  %v5204_v0 = vsel %vm1318_vm4, %v10550_v14, -inf  ;;  %v10564_v9 = vadd.f32 %v10358_v49, %v4945_v1  ;;  %v6853_v53 = vpop.f32.mrb[160].mxu0  ;;  %v10572_v25 = vpop.permute.xlu1 %5730 }
 0x73f   : > { %v5205_v57 = vmax.f32 %v5197_v18, %v5204_v0  ;;  %v5210_v23 = vsel %vm1318_vm4, %v10555_v40, -inf  ;;  %v4866_v6 = vadd.f32 %v6853_v53, %v4705_v17  ;;  %v4857_v13 = vpop.f32.mrb[161].mxu0  ;;  %11481 = vst [vmem:[#allocation31_spill] sm:$0xff] %v10572_v25  ;;  %v10581_v0 = vpop.permute.xlu0 %5702 }
 0x740   : > { %v5211_v3 = vmax.f32 %v5203_v43, %v5210_v23  ;;  %v5206_v49 = vsel %vm1318_vm4, %v10564_v9, -inf  ;;  %v4858_v21 = vadd.f32 %v4857_v13, %v4697_v58  ;;  %v6854_v15 = vpop.f32.mrb[162].mxu0 }
 0x741   : > { %v5207_v18 = vmax.f32 %v5199_v10, %v5206_v49  ;;  %v4950_v37 = vmax.f32 %v4866_v6, 0.0  ;;  %v4869_v60 = vadd.f32 %v6854_v15, %v4708_v59  ;;  %v4860_v31 = vpop.f32.mrb[163].mxu0  ;;  %v4721_v10 = vadd.f32 %v10386_v24, %v10464_v45 }
 0x742   : > { %v4948_v1 = vmax.f32 %v4858_v21, 0.0  ;;  %v4861_v34 = vadd.f32 %v4860_v31, %v4700_v27  ;;  %v10593_v23 = vpop.permute.xlu1 %5738  ;;  %v4713_v59 = vadd.f32 %v10374_v39, %v10464_v45  ;;  %v4724_v24 = vadd.f32 %v10390_v7, %v10464_v45 }
 0x743   : > { %v10579_v17 = vadd.f32 %v10396_v11, %v4950_v37  ;;  %v4951_v26 = vmax.f32 %v4869_v60, 0.0  ;;  %11482 = vst [vmem:[#allocation32_spill] sm:$0xff] %v10593_v23  ;;  %v4716_v60 = vadd.f32 %v10378_v33, %v10464_v45  ;;  %v11502_v23 = vld [vmem:[#allocation21_spill] sm:$0xff] }
 0x744   : > { %v10584_v43 = vadd.f32 %v10392_v8, %v4948_v1  ;;  %v4949_v53 = vmax.f32 %v4861_v34, 0.0  ;;  %v10610_v34 = vpop.permute.xlu0 %5710 }
 0x745   : > { %v5216_v58 = vsel %vm1318_vm4, %v10579_v17, -inf  ;;  %v10589_v12 = vadd.f32 %v10376_v36, %v4951_v26 }
 0x746   : > { %v5217_v11 = vmax.f32 %v5209_v55, %v5216_v58  ;;  %v5212_v6 = vsel %vm1318_vm4, %v10584_v43, -inf  ;;  %v10598_v13 = vadd.f32 %v10370_v16, %v4949_v53  ;;  %v6857_v8 = vpop.f32.mrb[164].mxu0 }
 0x747   : > { %v5213_v49 = vmax.f32 %v5205_v57, %v5212_v6  ;;  %v5218_v36 = vsel %vm1318_vm4, %v10589_v12, -inf  ;;  %v4882_v21 = vadd.f32 %v6857_v8, %v4721_v10  ;;  %v4873_v15 = vpop.f32.mrb[165].mxu0  ;;  %v4737_v8 = vadd.f32 %v10410_v19, %v10464_v45 }
 0x748   : > { %v5219_v55 = vmax.f32 %v5211_v3, %v5218_v36  ;;  %v5214_v27 = vsel %vm1318_vm4, %v10598_v13, -inf  ;;  %v4874_v37 = vadd.f32 %v4873_v15, %v4713_v59  ;;  %v6858_v16 = vpop.f32.mrb[166].mxu0  ;;  %v10615_v3 = vpop.permute.xlu1 %5746  ;;  %v4740_v19 = vadd.f32 %v10414_v50, %v10464_v45 }
 0x749   : > { %v5215_v31 = vmax.f32 %v5207_v18, %v5214_v27  ;;  %v4954_v39 = vmax.f32 %v4882_v21, 0.0  ;;  %v4885_v57 = vadd.f32 %v6858_v16, %v4724_v24  ;;  %v4876_v1 = vpop.f32.mrb[167].mxu0  ;;  %11483 = vst [vmem:[#allocation33_spill] sm:$0xff] %v10615_v3  ;;  %v4729_v21 = vadd.f32 %v10398_v48, %v10464_v45 }
 0x74a   : > { %v4952_v26 = vmax.f32 %v4874_v37, 0.0  ;;  %v4877_v53 = vadd.f32 %v4876_v1, %v4716_v60  ;;  %v4732_v48 = vadd.f32 %v10402_v30, %v10464_v45 }
 0x74b   : > { %v10613_v58 = vadd.f32 %v10408_v47, %v4954_v39  ;;  %v4955_v7 = vmax.f32 %v4885_v57, 0.0 }
 0x74c   : > { %v10618_v10 = vadd.f32 %v10404_v42, %v4952_v26  ;;  %v4953_v6 = vmax.f32 %v4877_v53, 0.0  ;;  %v10648_v26 = vpop.permute.xlu1 %5754 }
 0x74d   : > { %v5224_v33 = vsel %vm1318_vm4, %v10613_v58, -inf  ;;  %v10623_v18 = vadd.f32 %v10388_v32, %v4955_v7  ;;  %11484 = vst [vmem:[#allocation34_spill] sm:$0xff] %v10648_v26 }
 0x74e   : > { %v10627_v59 = vmax.f32 %v5217_v11, %v5224_v33  ;;  %v5220_v47 = vsel %vm1318_vm4, %v10618_v10, -inf  ;;  %v10632_v36 = vadd.f32 %v10382_v46, %v4953_v6  ;;  %v6861_v42 = vpop.f32.mrb[168].mxu0  ;;  %v10642_v11 = vpop.permute.xlu0 %5718 }
 0x74f   : > { %v10636_v15 = vmax.f32 %v5213_v49, %v5220_v47  ;;  %v5226_v32 = vsel %vm1318_vm4, %v10623_v18, -inf  ;;  %v4898_v24 = vadd.f32 %v6861_v42, %v4737_v8  ;;  %v4889_v27 = vpop.f32.mrb[169].mxu0 }
 0x750   : > { %v5227_v37 = vmax.f32 %v5219_v55, %v5226_v32  ;;  %v5222_v46 = vsel %vm1318_vm4, %v10632_v36, -inf  ;;  %v4890_v16 = vadd.f32 %v4889_v27, %v4729_v21  ;;  %v6862_v60 = vpop.f32.mrb[170].mxu0  ;;  %v11486_v21 = vld [vmem:[#allocation17_spill] sm:$0xff] }
 0x751   : > { %v5223_v49 = vmax.f32 %v5215_v31, %v5222_v46  ;;  %v4958_v39 = vmax.f32 %v4898_v24, 0.0  ;;  %v4901_v57 = vadd.f32 %v6862_v60, %v4740_v19  ;;  %v4892_v1 = vpop.f32.mrb[171].mxu0  ;;  %v4753_v31 = vadd.f32 %v10436_v51, %v10464_v45  ;;  %v11487_v24 = vld [vmem:[#allocation9_spill] sm:$0xff]  ;;  %v10678_v60 = vpop.permute.xlu1 %5762 }
 0x752   : > { %v4956_v53 = vmax.f32 %v4890_v16, 0.0  ;;  %v4893_v7 = vadd.f32 %v4892_v1, %v4732_v48  ;;  %v10663_v47 = vpop.permute.xlu0 %5726  ;;  %v4745_v27 = vadd.f32 %v11487_v24, %v10464_v45  ;;  %v11488_v16 = vld [vmem:[#allocation11_spill] sm:$0xff]  ;;  %11489 = vst [vmem:[#allocation17_spill] sm:$0xff] %v10678_v60 }
 0x753   : > { %v10651_v50 = vadd.f32 %v10420_v20, %v4958_v39  ;;  %v4959_v55 = vmax.f32 %v4901_v57, 0.0  ;;  %11485 = vst [vmem:[#allocation35_spill] sm:$0xff] %v10663_v47 }
 0x754   : > { %v10654_v6 = vadd.f32 %v10416_v63, %v4956_v53  ;;  %v4957_v33 = vmax.f32 %v4893_v7, 0.0  ;;  %v11490_v53 = vld [vmem:[#allocation10_spill] sm:$0xff] }
 0x755   : > { %v5232_v8 = vsel %vm1318_vm4, %v10651_v50, -inf  ;;  %v10659_v30 = vadd.f32 %v10400_v61, %v4959_v55  ;;  %v4748_v7 = vadd.f32 %v11490_v53, %v10464_v45  ;;  %v11494_v53 = vld [vmem:[#allocation6_spill] sm:$0xff] }
 0x756   : > { %v5233_v42 = vmax.f32 %v10627_v59, %v5232_v8  ;;  %v5228_v20 = vsel %vm1318_vm4, %v10654_v6, -inf  ;;  %v10669_v63 = vadd.f32 %v11486_v21, %v4957_v33  ;;  %v6865_v32 = vpop.f32.mrb[172].mxu0  ;;  %v4756_v59 = vadd.f32 %v11488_v16, %v10464_v45  ;;  %v11491_v21 = vld [vmem:[#allocation15_spill] sm:$0xff]  ;;  %v10687_v16 = vpop.permute.xlu0 %5734 }
 0x757   : > { %v5229_v61 = vmax.f32 %v10636_v15, %v5228_v20  ;;  %v5234_v19 = vsel %vm1318_vm4, %v10659_v30, -inf  ;;  %v4914_v51 = vadd.f32 %v6865_v32, %v4753_v31  ;;  %v4905_v46 = vpop.f32.mrb[173].mxu0  ;;  %11492 = vst [vmem:[#allocation9_spill] sm:$0xff] %v10687_v16 }
 0x758   : > { %v5235_v48 = vmax.f32 %v5227_v37, %v5234_v19  ;;  %v5230_v39 = vsel %vm1318_vm4, %v10669_v63, -inf  ;;  %v4906_v57 = vadd.f32 %v4905_v46, %v4745_v27  ;;  %v6866_v1 = vpop.f32.mrb[174].mxu0  ;;  %v11493_v37 = vld [vmem:[#allocation13_spill] sm:$0xff] }
 0x759   : > { %v5231_v15 = vmax.f32 %v5223_v49, %v5230_v39  ;;  %v4962_v55 = vmax.f32 %v4914_v51, 0.0  ;;  %v4917_v33 = vadd.f32 %v6866_v1, %v4756_v59  ;;  %v4908_v8 = vpop.f32.mrb[175].mxu0  ;;  %v11495_v51 = vld [vmem:[#allocation24_spill] sm:$0xff]  ;;  %v10699_v39 = vpop.permute.xlu1 %5770 }
 0x75a   : > { %v4960_v31 = vmax.f32 %v4906_v57, 0.0  ;;  %v4909_v20 = vadd.f32 %v4908_v8, %v4748_v7  ;;  %v4769_v59 = vadd.f32 %v11495_v51, %v10464_v45  ;;  %11496 = vst [vmem:[#allocation11_spill] sm:$0xff] %v10699_v39  ;;  %v11497_v7 = vld [vmem:[#allocation18_spill] sm:$0xff]  ;;  %v11498_v8 = vld [vmem:[#allocation20_spill] sm:$0xff]  ;;  %v10716_v3 = vpop.permute.xlu0 %5742 }
 0x75b   : > { %v10685_v32 = vadd.f32 %v11491_v21, %v4962_v55  ;;  %v4963_v24 = vmax.f32 %v4917_v33, 0.0  ;;  %11501 = vst [vmem:[#allocation10_spill] sm:$0xff] %v10716_v3 }
 0x75c   : > { %v10690_v19 = vadd.f32 %v11493_v37, %v4960_v31  ;;  %v4961_v27 = vmax.f32 %v4909_v20, 0.0  ;;  %v4761_v31 = vadd.f32 %v11498_v8, %v10464_v45 }
 0x75d   : > { %v5240_v46 = vsel %vm1318_vm4, %v10685_v32, -inf  ;;  %v10695_v49 = vadd.f32 %v11494_v53, %v4963_v24  ;;  %v11499_v53 = vld [vmem:[#allocation26_spill] sm:$0xff] }
 0x75e   : > { %v5241_v57 = vmax.f32 %v5233_v42, %v5240_v46  ;;  %v5236_v1 = vsel %vm1318_vm4, %v10690_v19, -inf  ;;  %v10704_v55 = vadd.f32 %v11497_v7, %v4961_v27  ;;  %v6869_v33 = vpop.f32.mrb[176].mxu0  ;;  %v4772_v51 = vadd.f32 %v11499_v53, %v10464_v45  ;;  %v11500_v7 = vld [vmem:[#allocation22_spill] sm:$0xff]  ;;  %v11503_v53 = vld [vmem:[#allocation12_spill] sm:$0xff] }
 0x75f   : > { %v5237_v20 = vmax.f32 %v5229_v61, %v5236_v1  ;;  %v5242_v21 = vsel %vm1318_vm4, %v10695_v49, -inf  ;;  %v4930_v24 = vadd.f32 %v6869_v33, %v4769_v59  ;;  %v4921_v37 = vpop.f32.mrb[177].mxu0  ;;  %v4764_v60 = vadd.f32 %v11500_v7, %v10464_v45  ;;  %v10738_v7 = vpop.permute.xlu0 %5750 }
 0x760   : > { %v5243_v42 = vmax.f32 %v5235_v48, %v5242_v21  ;;  %v5238_v46 = vsel %vm1318_vm4, %v10704_v55, -inf  ;;  %v4922_v39 = vadd.f32 %v4921_v37, %v4761_v31  ;;  %v6870_v27 = vpop.f32.mrb[178].mxu0  ;;  %v10721_v21 = vpop.permute.xlu1 %5428  ;;  %11506 = vst [vmem:[#allocation15_spill] sm:$0xff] %v10738_v7 }
 0x761   : > { %v5239_v26 = vmax.f32 %v5231_v15, %v5238_v46  ;;  %v4966_v8 = vmax.f32 %v4930_v24, 0.0  ;;  %v4933_v61 = vadd.f32 %v6870_v27, %v4772_v51  ;;  %v4924_v1 = vpop.f32.mrb[179].mxu0  ;;  %v11504_v15 = vld [vmem:[#allocation8_spill] sm:$0xff] }
 0x762   : > { %v4964_v59 = vmax.f32 %v4922_v39, 0.0  ;;  %v4925_v33 = vadd.f32 %v4924_v1, %v4764_v60  ;;  %v11505_v39 = vld [vmem:[#allocation7_spill] sm:$0xff] }
 0x763   : > { %v10719_v16 = vadd.f32 %v11502_v23, %v4966_v8  ;;  %v4967_v48 = vmax.f32 %v4933_v61, 0.0 }
 0x764   : > { %v10724_v31 = vadd.f32 %v11503_v53, %v4964_v59  ;;  %v4965_v37 = vmax.f32 %v4925_v33, 0.0  ;;  %v10742_v59 = vpop.permute.xlu1 %5778  ;;  %v10744_v53 = vpop.permute.xlu0 %5758 }
 0x765   : > { %v5248_v45 = vsel %vm1318_vm4, %v10719_v16, -inf  ;;  %v10729_v24 = vadd.f32 %v11504_v15, %v4967_v48  ;;  %11507 = vst [vmem:[#allocation13_spill] sm:$0xff] %v10742_v59  ;;  %11508 = vst [vmem:[#allocation6_spill] sm:$0xff] %v10744_v53  ;;  %v11518_v53 = vld [vmem:[#allocation14_spill] sm:$0xff] }
 0x766   : > { %v5249_v51 = vmax.f32 %v5241_v57, %v5248_v45  ;;  %v5244_v60 = vsel %vm1318_vm4, %v10724_v31, -inf  ;;  %v10734_v23 = vadd.f32 %v11505_v39, %v4965_v37 }
 0x767   : > { %v5245_v46 = vmax.f32 %v5237_v20, %v5244_v60  ;;  %v5250_v27 = vsel %vm1318_vm4, %v10729_v24, -inf }
 0x768   : > { %v5251_v8 = vmax.f32 %v5243_v42, %v5250_v27  ;;  %v5246_v61 = vsel %vm1318_vm4, %v10734_v23, -inf  ;;  %v10746_v45 = vpop.permute.xlu1 %5436  ;;  %v10748_v60 = vpop.permute.xlu0 %5766 }
 0x769   : > { %v5247_v1 = vmax.f32 %v5239_v26, %v5246_v61  ;;  %11509 = vst [vmem:[#allocation24_spill] sm:$0xff] %v10748_v60 }
 0x76a   : > { %v5253_v57 = vmax.f32 %v5249_v51, %v5251_v8 }
 0x76b   : > { %v5252_v33 = vmax.f32 %v5245_v46, %v5247_v1 }
 0x76c   : > { %v10750_v42 = vpop.permute.xlu1 %5440  ;;  %v10754_v26 = vpop.permute.xlu0 %5774 }
 0x76d   : > { %v5254_v48 = vmax.f32 %v5252_v33, %v5253_v57  ;;  %11510 = vst [vmem:[#allocation18_spill] sm:$0xff] %v10754_v26 }
 0x76f   : > { %v5255_v37 = vrot.slane %v5254_v48, 4 }
 0x770   : > { %v10764_v1 = vpop.permute.xlu1 %5444 }
 0x771   : > { %v5256_v20 = vmax.f32 %v5254_v48, %v5255_v37 }
 0x773   : > { %v5257_v15 = vrot.slane %v5256_v20, 2 }
 0x775   : > { %v5258_v39 = vmax.f32 %v5256_v20, %v5257_v15  ;;  %v10794_v20 = vpop.permute.xlu0 %5782 }
 0x776   : > { %11511 = vst [vmem:[#allocation20_spill] sm:$0xff] %v10794_v20 }
 0x777   : > { %v5259_v27 = vrot.slane %v5258_v39, 1 }
 0x779   : > { %v10752_v7 = vmax.f32 %v5258_v39, %v5259_v27  ;;  %v5449_v20 = vpop.permute.xlu0 %5448 }
 0x77b   : > { %v5261_v46 = vsub.f32 %v10496_v52, %v10752_v7  ;;  %v5262_v8 = vsub.f32 %v10511_v28, %v10752_v7  ;;  %v5263_v61 = vsub.f32 %v10491_v35, %v10752_v7  ;;  %v5264_v57 = vsub.f32 %v10501_v54, %v10752_v7 }
 0x77c   : > { %v5265_v33 = vsub.f32 %v10514_v41, %v10752_v7  ;;  %v5266_v48 = vsub.f32 %v10532_v44, %v10752_v7  ;;  %v5267_v52 = vsub.f32 %v10504_v22, %v10752_v7  ;;  %v5268_v28 = vsub.f32 %v10523_v62, %v10752_v7 }
 0x77d   : > { %v5269_v35 = vsub.f32 %v10550_v14, %v10752_v7  ;;  %v5270_v37 = vsub.f32 %v10564_v9, %v10752_v7  ;;  %v5271_v54 = vsub.f32 %v10547_v2, %v10752_v7  ;;  %v5272_v41 = vsub.f32 %v10555_v40, %v10752_v7  ;;  %v10812_v14 = vpop.permute.xlu1 %5452  ;;  %v10826_v9 = vpop.permute.xlu0 %5460 }
 0x77e   : > { %v5293_v40 = vmul.f32 1.442695, %v5261_v46  ;;  %v5295_v62 = vmul.f32 1.442695, %v5262_v8  ;;  %v5297_v22 = vmul.f32 1.442695, %v5263_v61 }
 0x77f   : > { %v5299_v44 = vmul.f32 1.442695, %v5264_v57  ;;  %v5301_v15 = vmul.f32 1.442695, %v5265_v33  ;;  %v5303_v39 = vmul.f32 1.442695, %v5266_v48 }
 0x780   : > { %7248 = vpow2.f32 %v5293_v40  ;;  %v5305_v59 = vmul.f32 1.442695, %v5267_v52  ;;  %v5307_v51 = vmul.f32 1.442695, %v5268_v28  ;;  %v5309_v2 = vmul.f32 1.442695, %v5269_v35 }
 0x781   : > { %7250 = vpow2.f32 %v5295_v62  ;;  %v5457_v27 = vpop.permute.xlu1 %5456  ;;  %v5892_v46 = vld [vmem:[%s11394_s5] sm:$0xff]  ;;  %v5893_v8 = vld [vmem:[%s11394_s5 + $0x8] sm:$0xff]  ;;  %v5311_v57 = vmul.f32 1.442695, %v5270_v37  ;;  %v5894_v33 = vld [vmem:[%s11394_s5 + $0x10] sm:$0xff]  ;;  %v11417_v52 = vmov 0.0|0.0  }
 0x782   : > { %7252 = vpow2.f32 %v5297_v22  ;;  %6941 = vmatprep.subr.bf16.mxu0 %v11417_v52  ;;  %v6942_v28 = vpack.c.bf16 %v5893_v8, %v5892_v46  ;;  %v11512_v37 = vld [vmem:[#allocation5_spill] sm:$0xff]  ;;  %v5315_v26 = vmul.f32 1.442695, %v5272_v41  ;;  %v11514_v41 = vsub.f32 %v10584_v43, %v10752_v7 }
 0x783   : > { %7254 = vpow2.f32 %v5299_v44  ;;  %v5313_v44 = vmul.f32 1.442695, %v5271_v54 }
 0x784   : > { %7256 = vpow2.f32 %v5301_v15  ;;  %6943 = vmatpush3.bf16.msra.mxu0 %v6942_v28 }
 0x785   : > { %7258 = vpow2.f32 %v5303_v39  ;;  %v10834_v61 = vpop.permute.xlu1 %5464  ;;  %v5469_v39 = vpop.permute.xlu0 %5468 }
 0x786   : > { %7260 = vpow2.f32 %v5305_v59  ;;  %v5895_v59 = vld [vmem:[%s11394_s5 + $0x18] sm:$0xff] }
 0x787   : > { %7262 = vpow2.f32 %v5307_v51  ;;  %v6945_v40 = vpack.c.bf16 %v5895_v59, %v5894_v33 }
 0x788   : > { %7264 = vpow2.f32 %v5309_v2  ;;  %v11513_v2 = vmov 0.0|0.0  }
 0x789   : > { %7266 = vpow2.f32 %v5311_v57  ;;  %6944 = vmatprep.subr.bf16.mxu0 %v11513_v2  ;;  %v5473_v57 = vpop.permute.xlu1 %5472 }
 0x78a   : > { %v7249_v48 = vpop.eup %7248  ;;  %7268 = vpow2.f32 %v5313_v44  ;;  %6946 = vmatpush3.bf16.msra.mxu0 %v6945_v40 }
 0x78b   : > { %v7251_v35 = vpop.eup %7250  ;;  %v5555_v22 = vmul.f32 %v7249_v48, %v10721_v21  ;;  %7270 = vpow2.f32 %v5315_v26  ;;  %6947 = vmatprep.subr.bf16.mxu0 %v11513_v2 }
 0x78c   : > { %v10844_v51 = vpop.eup %7252  ;;  %v5556_v62 = vmul.f32 %v7251_v35, %v11512_v37  ;;  %v5786_v3 = vmul.f32 %v7251_v35, %v11518_v53  ;;  %v11519_v53 = vsub.f32 %v10589_v12, %v10752_v7 }
 0x78d   : > { %v10847_v15 = vpop.eup %7254  ;;  %v5557_v52 = vmul.f32 %v10844_v51, %v10746_v45  ;;  %v5587_v46 = vsel %vm1318_vm4, %v5555_v22, 0.0  ;;  %v5317_v45 = vmul.f32 1.442695, %v11514_v41  ;;  %v5360_v12 = vsel %vm1318_vm4, %v10844_v51, 0.0 }
 0x78e   : > { %v10853_v54 = vpop.eup %7256  ;;  %v5558_v21 = vmul.f32 %v10847_v15, %v10750_v42  ;;  %v5588_v8 = vsel %vm1318_vm4, %v5556_v62, 0.0 }
 0x78f   : > { %v10858_v33 = vpop.eup %7258  ;;  %v5589_v59 = vadd.f32 %v5588_v8, %v5587_v46  ;;  %v5559_v28 = vmul.f32 %v10853_v54, %v10764_v1  ;;  %v5590_v22 = vsel %vm1318_vm4, %v5557_v52, 0.0  ;;  %v5477_v8 = vpop.permute.xlu0 %5476  ;;  %7272 = vpow2.f32 %v5317_v45 }
 0x790   : > { %v10866_v37 = vpop.eup %7260  ;;  %v5560_v44 = vmul.f32 %v10858_v33, %v5449_v20  ;;  %v5592_v62 = vsel %vm1318_vm4, %v5558_v21, 0.0  ;;  %v10881_v20 = vpop.permute.xlu1 %5480  ;;  %v5357_v45 = vsel %vm1318_vm4, %v7249_v48, 0.0 }
 0x791   : > { %v5591_v42 = vadd.f32 %v5590_v22, %v5589_v59  ;;  %v10871_v46 = vpop.eup %7262  ;;  %v5561_v1 = vmul.f32 %v10866_v37, %v10812_v14  ;;  %v5594_v52 = vsel %vm1318_vm4, %v5559_v28, 0.0  ;;  %v11515_v59 = vsub.f32 %v10598_v13, %v10752_v7 }
 0x792   : > { %v10876_v40 = vpop.eup %7264  ;;  %v5562_v21 = vmul.f32 %v10871_v46, %v5457_v27  ;;  %v5596_v22 = vsel %vm1318_vm4, %v5560_v44, 0.0 }
 0x793   : > { %v5593_v43 = vadd.f32 %v5592_v62, %v5591_v42  ;;  %v5319_v41 = vmul.f32 1.442695, %v11515_v59  ;;  %v5358_v42 = vsel %vm1318_vm4, %v7251_v35, 0.0  ;;  %v10887_v14 = vpop.eup %7266  ;;  %v11516_v62 = vsub.f32 %v10579_v17, %v10752_v7  ;;  %v11517_v59 = vld [vmem:[#allocation27_spill] sm:$0xff]  ;;  %v10899_v47 = vpop.permute.xlu0 %5484 }
 0x794   : > { %v5563_v13 = vmul.f32 %v10876_v40, %v10826_v9  ;;  %v5785_v27 = vmul.f32 %v7249_v48, %v11517_v59  ;;  %v10896_v60 = vpop.eup %7268  ;;  %v5359_v25 = vadd.f32 %v5358_v42, %v5357_v45  ;;  %v5564_v17 = vmul.f32 %v10887_v14, %v10834_v61  ;;  %v11520_v61 = vld [vmem:[#allocation16_spill] sm:$0xff] }
 0x795   : > { %v5595_v26 = vadd.f32 %v5594_v52, %v5593_v43  ;;  %v5321_v43 = vmul.f32 1.442695, %v11516_v62  ;;  %v5598_v52 = vsel %vm1318_vm4, %v5561_v1, 0.0  ;;  %7274 = vpow2.f32 %v5319_v41  ;;  %v10906_v1 = vpop.permute.xlu1 %5488  ;;  %v5896_v59 = vld [vmem:[%s11394_s5 + $0x20] sm:$0xff] }
 0x796   : > { %v5565_v48 = vmul.f32 %v10896_v60, %v5469_v39  ;;  %v5323_v35 = vmul.f32 1.442695, %v11519_v53  ;;  %v5817_v42 = vsel %vm1318_vm4, %v5785_v27, 0.0  ;;  %v5818_v62 = vsel %vm1318_vm4, %v5786_v3, 0.0  ;;  %v5897_v27 = vld [vmem:[%s11394_s5 + $0x28] sm:$0xff] }
 0x797   : > { %v5597_v28 = vadd.f32 %v5596_v22, %v5595_v26  ;;  %v5600_v26 = vsel %vm1318_vm4, %v5562_v21, 0.0  ;;  %v10904_v22 = vpop.eup %7270  ;;  %7276 = vpow2.f32 %v5321_v43  ;;  %v5787_v21 = vmul.f32 %v10844_v51, %v11520_v61 }
 0x798   : > { %v5604_v43 = vsel %vm1318_vm4, %v5564_v17, 0.0  ;;  %v5566_v39 = vmul.f32 %v10904_v22, %v5473_v57  ;;  %v5606_v51 = vsel %vm1318_vm4, %v5565_v48, 0.0  ;;  %v5819_v61 = vadd.f32 %v5818_v62, %v5817_v42 }
 0x799   : > { %v5599_v44 = vadd.f32 %v5598_v52, %v5597_v28  ;;  %v5602_v28 = vsel %vm1318_vm4, %v5563_v13, 0.0  ;;  %v10913_v41 = vpop.eup %7272  ;;  %v11521_v13 = vsub.f32 %v10618_v10, %v10752_v7  ;;  %v11523_v10 = vsub.f32 %v10613_v58, %v10752_v7  ;;  %v5899_v58 = vld [vmem:[%s11394_s5 + $0x38] sm:$0xff] }
 0x79a   : > { %v5567_v53 = vmul.f32 %v10913_v41, %v5477_v8  ;;  %v6948_v48 = vpack.c.bf16 %v5897_v27, %v5896_v59  ;;  %v5364_v8 = vsel %vm1318_vm4, %v10853_v54, 0.0  ;;  %7278 = vpow2.f32 %v5323_v35 }
 0x79b   : > { %v5601_v9 = vadd.f32 %v5600_v26, %v5599_v44  ;;  %v5325_v52 = vmul.f32 1.442695, %v11521_v13  ;;  %v11522_v44 = vsub.f32 %v10632_v36, %v10752_v7  ;;  %v5329_v17 = vmul.f32 1.442695, %v11523_v10  ;;  %v5898_v36 = vld [vmem:[%s11394_s5 + $0x30] sm:$0xff]  ;;  %v10951_v13 = vpop.permute.xlu1 %5496 }
 0x79c   : > { %v5361_v26 = vadd.f32 %v5360_v12, %v5359_v25  ;;  %v5820_v25 = vsel %vm1318_vm4, %v5787_v21, 0.0  ;;  %v5608_v12 = vsel %vm1318_vm4, %v5566_v39, 0.0  ;;  %6949 = vmatpush3.bf16.msra.mxu0 %v6948_v48  ;;  %v5610_v21 = vsel %vm1318_vm4, %v5567_v53, 0.0 }
 0x79d   : > { %v5603_v45 = vadd.f32 %v5602_v28, %v5601_v9  ;;  %v5327_v57 = vmul.f32 1.442695, %v11522_v44  ;;  %v10938_v9 = vpop.permute.xlu0 %5492  ;;  %v5362_v28 = vsel %vm1318_vm4, %v10847_v15, 0.0  ;;  %v5821_v42 = vadd.f32 %v5820_v25, %v5819_v61  ;;  %6950 = vmatprep.subr.bf16.mxu0 %v11513_v2 }
 0x79e   : > { %7280 = vpow2.f32 %v5325_v52  ;;  %v11524_v35 = vsub.f32 %v10623_v18, %v10752_v7  ;;  %v11529_v25 = vsub.f32 %v10659_v30, %v10752_v7 }
 0x79f   : > { %v5605_v3 = vadd.f32 %v5604_v43, %v5603_v45  ;;  %v5363_v43 = vadd.f32 %v5362_v28, %v5361_v26  ;;  %v10956_v62 = vpop.eup %7274  ;;  %7282 = vpow2.f32 %v5327_v57  ;;  %v11525_v28 = vsub.f32 %v10654_v6, %v10752_v7  ;;  %v10973_v61 = vpop.permute.xlu1 %5504 }
 0x7a0   : > { %v5568_v26 = vmul.f32 %v10956_v62, %v10881_v20  ;;  %v5331_v59 = vmul.f32 1.442695, %v11524_v35  ;;  %7284 = vpow2.f32 %v5329_v17  ;;  %v11527_v57 = vsub.f32 %v10669_v63, %v10752_v7 }
 0x7a1   : > { %v5607_v45 = vadd.f32 %v5606_v51, %v5605_v3  ;;  %v5365_v10 = vadd.f32 %v5364_v8, %v5363_v43  ;;  %v6951_v3 = vpack.c.bf16 %v5899_v58, %v5898_v36  ;;  %v10962_v39 = vpop.eup %7276  ;;  %v10967_v51 = vpop.permute.xlu0 %5500  ;;  %v5333_v53 = vmul.f32 1.442695, %v11525_v28 }
 0x7a2   : > { %v5612_v52 = vsel %vm1318_vm4, %v5568_v26, 0.0  ;;  %v11526_v36 = vsub.f32 %v10734_v23, %v10752_v7  ;;  %v5335_v58 = vmul.f32 1.442695, %v11527_v57  ;;  %v11528_v6 = vsub.f32 %v10651_v50, %v10752_v7 }
 0x7a3   : > { %v5609_v44 = vadd.f32 %v5608_v12, %v5607_v45  ;;  %6952 = vmatpush3.bf16.msra.mxu0 %v6951_v3  ;;  %v5569_v45 = vmul.f32 %v10962_v39, %v10899_v47  ;;  %v5339_v43 = vmul.f32 1.442695, %v11529_v25  ;;  %v11530_v23 = vsub.f32 %v10690_v19, %v10752_v7  ;;  %v11534_v3 = vld [vmem:[#allocation29_spill] sm:$0xff] }
 0x7a4   : > { %v5351_v18 = vmul.f32 1.442695, %v11526_v36  ;;  %6953 = vmatprep.subr.bf16.mxu0 %v11513_v2  ;;  %v5337_v17 = vmul.f32 1.442695, %v11528_v6  ;;  %7286 = vpow2.f32 %v5331_v59  ;;  %v11531_v63 = vsub.f32 %v10704_v55, %v10752_v7  ;;  %v11009_v55 = vpop.eup %7278 }
 0x7a5   : > { %v5611_v27 = vadd.f32 %v5610_v21, %v5609_v44  ;;  %v5341_v48 = vmul.f32 1.442695, %v11530_v23  ;;  %v11532_v47 = vsub.f32 %v10685_v32, %v10752_v7  ;;  %v5614_v50 = vsel %vm1318_vm4, %v5569_v45, 0.0  ;;  %v11007_v26 = vpop.permute.xlu0 %5508 }
 0x7a6   : > { %v5343_v12 = vmul.f32 1.442695, %v11531_v63  ;;  %v11533_v44 = vsub.f32 %v10695_v49, %v10752_v7  ;;  %v5788_v19 = vmul.f32 %v10847_v15, %v11534_v3  ;;  %7288 = vpow2.f32 %v5333_v53  ;;  %v11538_v53 = vld [vmem:[#allocation19_spill] sm:$0xff] }
 0x7a7   : > { %v5613_v20 = vadd.f32 %v5612_v52, %v5611_v27  ;;  %v5345_v8 = vmul.f32 1.442695, %v11532_v47  ;;  %7290 = vpow2.f32 %v5351_v18  ;;  %v11535_v32 = vsub.f32 %v10724_v31, %v10752_v7 }
 0x7a8   : > { %v11003_v30 = vmul.f32 1.442695, %v11533_v44  ;;  %v11536_v49 = vsub.f32 %v10719_v16, %v10752_v7  ;;  %v11537_v15 = vsub.f32 %v10729_v24, %v10752_v7  ;;  %v11026_v52 = vpop.eup %7280  ;;  %v5366_v28 = vsel %vm1318_vm4, %v10858_v33, 0.0  ;;  %v11034_v16 = vpop.permute.xlu1 %5512  ;;  %v11540_v44 = vld [vmem:[#allocation25_spill] sm:$0xff] }
 0x7a9   : > { %v5615_v21 = vadd.f32 %v5614_v50, %v5613_v20  ;;  %v11014_v35 = vmul.f32 1.442695, %v11535_v32  ;;  %v5368_v31 = vsel %vm1318_vm4, %v10866_v37, 0.0  ;;  %v5789_v20 = vmul.f32 %v10853_v54, %v11538_v53  ;;  %v11044_v57 = vpop.eup %7282  ;;  %v5517_v50 = vpop.permute.xlu0 %5516 }
 0x7aa   : > { %v11019_v59 = vmul.f32 1.442695, %v11536_v49  ;;  %v11024_v27 = vmul.f32 1.442695, %v11537_v15  ;;  %7292 = vpow2.f32 %v5335_v58  ;;  %v5370_v36 = vsel %vm1318_vm4, %v10871_v46, 0.0  ;;  %v11539_v58 = vld [vmem:[#allocation23_spill] sm:$0xff] }
 0x7ab   : > { %v5372_v24 = vsel %vm1318_vm4, %v10876_v40, 0.0  ;;  %v5374_v7 = vsel %vm1318_vm4, %v10887_v14, 0.0  ;;  %v5790_v18 = vmul.f32 %v10858_v33, %v10493_v29  ;;  %v5376_v54 = vsel %vm1318_vm4, %v10896_v60, 0.0  ;;  %v11059_v33 = vpop.eup %7284 }
 0x7ac   : > { %v5791_v45 = vmul.f32 %v10866_v37, %v11539_v58  ;;  %7294 = vpow2.f32 %v5337_v17  ;;  %v5822_v6 = vsel %vm1318_vm4, %v5788_v19, 0.0  ;;  %v11053_v25 = vsel %vm1318_vm4, %v10904_v22, 0.0 }
 0x7ad   : > { %v5570_v23 = vmul.f32 %v11009_v55, %v10906_v1  ;;  %v5823_v63 = vadd.f32 %v5822_v6, %v5821_v42  ;;  %v5571_v29 = vmul.f32 %v11026_v52, %v10938_v9  ;;  %v5792_v47 = vmul.f32 %v10871_v46, %v10538_v56  ;;  %v5525_v6 = vpop.permute.xlu0 %5524 }
 0x7ae   : > { %7296 = vpow2.f32 %v5339_v43  ;;  %v5824_v37 = vsel %vm1318_vm4, %v5789_v20, 0.0  ;;  %v5367_v17 = vadd.f32 %v5366_v28, %v5365_v10  ;;  %v5793_v3 = vmul.f32 %v10876_v40, %v11540_v44  ;;  %v11069_v9 = vpop.eup %7286  ;;  %v5521_v43 = vpop.permute.xlu1 %5520 }
 0x7af   : > { %v5616_v19 = vsel %vm1318_vm4, %v5570_v23, 0.0  ;;  %v5825_v1 = vadd.f32 %v5824_v37, %v5823_v63  ;;  %v5572_v42 = vmul.f32 %v11044_v57, %v10951_v13  ;;  %7298 = vpow2.f32 %v5341_v48 }
 0x7b0   : > { %v5826_v32 = vsel %vm1318_vm4, %v5790_v18, 0.0  ;;  %v5617_v56 = vadd.f32 %v5616_v19, %v5615_v21  ;;  %v5369_v46 = vadd.f32 %v5368_v31, %v5367_v17  ;;  %v5794_v10 = vmul.f32 %v10887_v14, %v10559_v4  ;;  %v11077_v28 = vpop.eup %7288  ;;  %v11541_v21 = vld [vmem:[#allocation28_spill] sm:$0xff] }
 0x7b1   : > { %v5618_v49 = vsel %vm1318_vm4, %v5571_v29, 0.0  ;;  %v5827_v40 = vadd.f32 %v5826_v32, %v5825_v1  ;;  %v5573_v15 = vmul.f32 %v11059_v33, %v10967_v51  ;;  %7300 = vpow2.f32 %v5343_v12  ;;  %v11080_v20 = vpop.eup %7290 }
 0x7b2   : > { %v5828_v13 = vsel %vm1318_vm4, %v5791_v45, 0.0  ;;  %v5619_v48 = vadd.f32 %v5618_v49, %v5617_v56  ;;  %v5371_v53 = vadd.f32 %v5370_v36, %v5369_v46  ;;  %v5795_v31 = vmul.f32 %v10896_v60, %v11541_v21  ;;  %v5529_v37 = vpop.permute.xlu1 %5528 }
 0x7b3   : > { %v5620_v4 = vsel %vm1318_vm4, %v5572_v42, 0.0  ;;  %v5829_v14 = vadd.f32 %v5828_v13, %v5827_v40  ;;  %v5574_v18 = vmul.f32 %v11069_v9, %v10973_v61  ;;  %7302 = vpow2.f32 %v5345_v8 }
 0x7b4   : > { %v11087_v58 = vpop.eup %7292  ;;  %v5830_v51 = vsel %vm1318_vm4, %v5792_v47, 0.0  ;;  %v5621_v12 = vadd.f32 %v5620_v4, %v5619_v48  ;;  %v5373_v45 = vadd.f32 %v5372_v24, %v5371_v53  ;;  %v5796_v36 = vmul.f32 %v10904_v22, %v10581_v0  ;;  %v11542_v24 = vld [vmem:[#allocation30_spill] sm:$0xff] }
 0x7b5   : > { %v5622_v23 = vsel %vm1318_vm4, %v5573_v15, 0.0  ;;  %v5831_v60 = vadd.f32 %v5830_v51, %v5829_v14  ;;  %v5575_v63 = vmul.f32 %v11077_v28, %v11007_v26  ;;  %7304 = vpow2.f32 %v11003_v30 }
 0x7b6   : > { %v11095_v29 = vpop.eup %7294  ;;  %v5832_v61 = vsel %vm1318_vm4, %v5793_v3, 0.0  ;;  %v5623_v8 = vadd.f32 %v5622_v23, %v5621_v12  ;;  %v5375_v47 = vadd.f32 %v5374_v7, %v5373_v45  ;;  %v5797_v17 = vmul.f32 %v10913_v41, %v11542_v24  ;;  %v5537_v21 = vpop.permute.xlu1 %5536 }
 0x7b7   : > { %v5624_v0 = vsel %vm1318_vm4, %v5574_v18, 0.0  ;;  %v5833_v22 = vadd.f32 %v5832_v61, %v5831_v60  ;;  %v5576_v44 = vmul.f32 %v11087_v58, %v11034_v16  ;;  %7306 = vpow2.f32 %v11014_v35 }
 0x7b8   : > { %v11104_v19 = vpop.eup %7296  ;;  %v5834_v30 = vsel %vm1318_vm4, %v5794_v10, 0.0  ;;  %v5625_v26 = vadd.f32 %v5624_v0, %v5623_v8  ;;  %v5377_v3 = vadd.f32 %v5376_v54, %v5375_v47  ;;  %v5380_v7 = vsel %vm1318_vm4, %v10913_v41, 0.0  ;;  %v5533_v10 = vpop.permute.xlu0 %5532 }
 0x7b9   : > { %v5626_v1 = vsel %vm1318_vm4, %v5575_v63, 0.0  ;;  %v5835_v42 = vadd.f32 %v5834_v30, %v5833_v22  ;;  %v5577_v32 = vmul.f32 %v11095_v29, %v5517_v50  ;;  %v11112_v56 = vpop.eup %7298  ;;  %v5836_v16 = vsel %vm1318_vm4, %v5795_v31, 0.0 }
 0x7ba   : > { %v5838_v46 = vsel %vm1318_vm4, %v5796_v36, 0.0  ;;  %v5627_v49 = vadd.f32 %v5626_v1, %v5625_v26  ;;  %v5379_v35 = vadd.f32 %v11053_v25, %v5377_v3  ;;  %v5840_v54 = vsel %vm1318_vm4, %v5797_v17, 0.0  ;;  %v5545_v0 = vpop.permute.xlu1 %5544  ;;  %v11543_v26 = vld [vmem:[#allocation35_spill] sm:$0xff] }
 0x7bb   : > { %v5628_v40 = vsel %vm1318_vm4, %v5576_v44, 0.0  ;;  %v5837_v41 = vadd.f32 %v5836_v16, %v5835_v42  ;;  %v5578_v15 = vmul.f32 %v11104_v19, %v5521_v43  ;;  %v11120_v13 = vpop.eup %7300  ;;  %7308 = vpow2.f32 %v11019_v59 }
 0x7bc   : > { %v5798_v50 = vmul.f32 %v10956_v62, %v10610_v34  ;;  %v5629_v48 = vadd.f32 %v5628_v40, %v5627_v49  ;;  %v5381_v53 = vadd.f32 %v5380_v7, %v5379_v35  ;;  %v5382_v25 = vsel %vm1318_vm4, %v10956_v62, 0.0  ;;  %v11544_v49 = vld [vmem:[#allocation31_spill] sm:$0xff] }
 0x7bd   : > { %v5630_v31 = vsel %vm1318_vm4, %v5577_v32, 0.0  ;;  %v5839_v4 = vadd.f32 %v5838_v46, %v5837_v41  ;;  %v5579_v14 = vmul.f32 %v11112_v56, %v5525_v6  ;;  %v11129_v18 = vpop.eup %7302  ;;  %7310 = vpow2.f32 %v11024_v27 }
 0x7be   : > { %v5799_v59 = vmul.f32 %v10962_v39, %v10508_v38  ;;  %v5631_v43 = vadd.f32 %v5630_v31, %v5629_v48  ;;  %v5383_v34 = vadd.f32 %v5382_v25, %v5381_v53  ;;  %v5384_v51 = vsel %vm1318_vm4, %v10962_v39, 0.0  ;;  %v5541_v38 = vpop.permute.xlu0 %5540 }
 0x7bf   : > { %v5632_v12 = vsel %vm1318_vm4, %v5578_v15, 0.0  ;;  %v5841_v62 = vadd.f32 %v5840_v54, %v5839_v4  ;;  %v5580_v45 = vmul.f32 %v11120_v13, %v5529_v37  ;;  %v11138_v36 = vpop.eup %7304  ;;  %v5800_v6 = vmul.f32 %v11009_v55, %v10642_v11 }
 0x7c0   : > { %v5842_v27 = vsel %vm1318_vm4, %v5798_v50, 0.0  ;;  %v5633_v23 = vadd.f32 %v5632_v12, %v5631_v43  ;;  %v5385_v60 = vadd.f32 %v5384_v51, %v5383_v34  ;;  %v5386_v63 = vsel %vm1318_vm4, %v11009_v55, 0.0  ;;  %v11546_v12 = vld [vmem:[#allocation32_spill] sm:$0xff] }
 0x7c1   : > { %v5634_v39 = vsel %vm1318_vm4, %v5579_v14, 0.0  ;;  %v5843_v61 = vadd.f32 %v5842_v27, %v5841_v62  ;;  %v5581_v8 = vmul.f32 %v11129_v18, %v5533_v10  ;;  %v11147_v47 = vpop.eup %7306  ;;  %v5801_v37 = vmul.f32 %v11026_v52, %v10544_v5 }
 0x7c2   : > { %v5844_v11 = vsel %vm1318_vm4, %v5799_v59, 0.0  ;;  %v5635_v24 = vadd.f32 %v5634_v39, %v5633_v23  ;;  %v5387_v17 = vadd.f32 %v5386_v63, %v5385_v60  ;;  %v5388_v22 = vsel %vm1318_vm4, %v11026_v52, 0.0  ;;  %v5549_v41 = vpop.permute.xlu0 %5548  ;;  %v5553_v59 = vpop.permute.xlu1 %5552  ;;  %v11547_v63 = vld [vmem:[#allocation10_spill] sm:$0xff] }
 0x7c3   : > { %v5636_v55 = vsel %vm1318_vm4, %v5580_v45, 0.0  ;;  %v5845_v44 = vadd.f32 %v5844_v11, %v5843_v61  ;;  %v5582_v30 = vmul.f32 %v11138_v36, %v5537_v21  ;;  %v5802_v3 = vmul.f32 %v11044_v57, %v11543_v26  ;;  %v11545_v21 = vld [vmem:[#allocation9_spill] sm:$0xff] }
 0x7c4   : > { %v5846_v7 = vsel %vm1318_vm4, %v5800_v6, 0.0  ;;  %v5637_v1 = vadd.f32 %v5636_v55, %v5635_v24  ;;  %v5389_v5 = vadd.f32 %v5388_v22, %v5387_v17  ;;  %v5390_v42 = vsel %vm1318_vm4, %v11044_v57, 0.0 }
 0x7c5   : > { %v5638_v32 = vsel %vm1318_vm4, %v5581_v8, 0.0  ;;  %v5847_v16 = vadd.f32 %v5846_v7, %v5845_v44  ;;  %v5583_v52 = vmul.f32 %v11147_v47, %v5541_v38  ;;  %v11163_v46 = vpop.eup %7308  ;;  %v5803_v35 = vmul.f32 %v11059_v33, %v11544_v49  ;;  %v11549_v7 = vld [vmem:[#allocation15_spill] sm:$0xff] }
 0x7c6   : > { %v5848_v10 = vsel %vm1318_vm4, %v5801_v37, 0.0  ;;  %v5639_v54 = vadd.f32 %v5638_v32, %v5637_v1  ;;  %v5391_v40 = vadd.f32 %v5390_v42, %v5389_v5  ;;  %v5392_v15 = vsel %vm1318_vm4, %v11059_v33, 0.0 }
 0x7c7   : > { %v5640_v57 = vsel %vm1318_vm4, %v5582_v30, 0.0  ;;  %v5849_v50 = vadd.f32 %v5848_v10, %v5847_v16  ;;  %v5584_v48 = vmul.f32 %v11080_v20, %v5545_v0  ;;  %v11172_v53 = vpop.eup %7310  ;;  %v5804_v25 = vmul.f32 %v11069_v9, %v11545_v21  ;;  %v11548_v0 = vld [vmem:[#allocation33_spill] sm:$0xff] }
 0x7c8   : > { %v5850_v31 = vsel %vm1318_vm4, %v5802_v3, 0.0  ;;  %v5641_v4 = vadd.f32 %v5640_v57, %v5639_v54  ;;  %v5393_v14 = vadd.f32 %v5392_v15, %v5391_v40  ;;  %v5394_v43 = vsel %vm1318_vm4, %v11069_v9, 0.0  ;;  %v11552_v21 = vld [vmem:[#allocation17_spill] sm:$0xff] }
 0x7c9   : > { %v5642_v33 = vsel %vm1318_vm4, %v5583_v52, 0.0  ;;  %v5851_v34 = vadd.f32 %v5850_v31, %v5849_v50  ;;  %v5585_v51 = vmul.f32 %v11163_v46, %v5549_v41  ;;  %v5805_v62 = vmul.f32 %v11077_v28, %v11546_v12  ;;  %v11550_v52 = vld [vmem:[#allocation34_spill] sm:$0xff]  ;;  %v11554_v12 = vld [vmem:[#allocation11_spill] sm:$0xff] }
 0x7ca   : > { %v5852_v45 = vsel %vm1318_vm4, %v5803_v35, 0.0  ;;  %v5643_v6 = vadd.f32 %v5642_v33, %v5641_v4  ;;  %v5395_v27 = vadd.f32 %v5394_v43, %v5393_v14  ;;  %v5396_v23 = vsel %vm1318_vm4, %v11077_v28, 0.0  ;;  %v11551_v41 = vld [vmem:[#allocation6_spill] sm:$0xff] }
 0x7cb   : > { %v5644_v60 = vsel %vm1318_vm4, %v5584_v48, 0.0  ;;  %v5853_v38 = vadd.f32 %v5852_v45, %v5851_v34  ;;  %v5586_v9 = vmul.f32 %v11172_v53, %v5553_v59  ;;  %v5806_v39 = vmul.f32 %v11087_v58, %v11547_v63  ;;  %v11553_v59 = vld [vmem:[#allocation24_spill] sm:$0xff] }
 0x7cc   : > { %v5854_v61 = vsel %vm1318_vm4, %v5804_v25, 0.0  ;;  %v5645_v8 = vadd.f32 %v5644_v60, %v5643_v6  ;;  %v5397_v37 = vadd.f32 %v5396_v23, %v5395_v27  ;;  %v5398_v11 = vsel %vm1318_vm4, %v11087_v58, 0.0  ;;  %v11555_v23 = vld [vmem:[#allocation18_spill] sm:$0xff] }
 0x7cd   : > { %v5646_v24 = vsel %vm1318_vm4, %v5585_v51, 0.0  ;;  %v5855_v17 = vadd.f32 %v5854_v61, %v5853_v38  ;;  %v5807_v28 = vmul.f32 %v11095_v29, %v11548_v0  ;;  %v5856_v22 = vsel %vm1318_vm4, %v5805_v62, 0.0 }
 0x7ce   : > { %v5647_v55 = vadd.f32 %v5646_v24, %v5645_v8  ;;  %v5399_v44 = vadd.f32 %v5398_v11, %v5397_v37  ;;  %v5400_v30 = vsel %vm1318_vm4, %v11095_v29, 0.0  ;;  %v5648_v26 = vsel %vm1318_vm4, %v5586_v9, 0.0  ;;  %v11557_v24 = vld [vmem:[#allocation20_spill] sm:$0xff] }
 0x7cf   : > { %v5857_v3 = vadd.f32 %v5856_v22, %v5855_v17  ;;  %v5808_v1 = vmul.f32 %v11104_v19, %v11549_v7  ;;  %v5858_v58 = vsel %vm1318_vm4, %v5806_v39, 0.0  ;;  %v5402_v32 = vsel %vm1318_vm4, %v11104_v19, 0.0  ;;  %v11556_v39 = vld [vmem:[#allocation13_spill] sm:$0xff] }
 0x7d0   : > { %v5649_v5 = vadd.f32 %v5648_v26, %v5647_v55  ;;  %v5401_v42 = vadd.f32 %v5400_v30, %v5399_v44  ;;  %v5809_v49 = vmul.f32 %v11112_v56, %v11550_v52  ;;  %v5860_v35 = vsel %vm1318_vm4, %v5807_v28, 0.0 }
 0x7d1   : > { %v5859_v16 = vadd.f32 %v5858_v58, %v5857_v3  ;;  %v5404_v10 = vsel %vm1318_vm4, %v11112_v56, 0.0  ;;  %v5810_v15 = vmul.f32 %v11120_v13, %v11551_v41  ;;  %v5862_v57 = vsel %vm1318_vm4, %v5808_v1, 0.0 }
 0x7d2   : > { %v5403_v29 = vadd.f32 %v5402_v32, %v5401_v42  ;;  %v5406_v19 = vsel %vm1318_vm4, %v11120_v13, 0.0  ;;  %v5811_v25 = vmul.f32 %v11129_v18, %v11552_v21  ;;  %v5864_v31 = vsel %vm1318_vm4, %v5809_v49, 0.0 }
 0x7d3   : > { %v5861_v54 = vadd.f32 %v5860_v35, %v5859_v16  ;;  %v5408_v56 = vsel %vm1318_vm4, %v11129_v18, 0.0  ;;  %v5812_v43 = vmul.f32 %v11138_v36, %v11553_v59  ;;  %v5866_v33 = vsel %vm1318_vm4, %v5810_v15, 0.0 }
 0x7d4   : > { %v5405_v40 = vadd.f32 %v5404_v10, %v5403_v29  ;;  %v5410_v13 = vsel %vm1318_vm4, %v11138_v36, 0.0  ;;  %v5813_v62 = vmul.f32 %v11147_v47, %v11554_v12  ;;  %v5868_v45 = vsel %vm1318_vm4, %v5811_v25, 0.0  ;;  %v6059_v12 = vld [vmem:[%s11394_s5 + $0x78] sm:$0xff] }
 0x7d5   : > { %v5863_v50 = vadd.f32 %v5862_v57, %v5861_v54  ;;  %v5412_v18 = vsel %vm1318_vm4, %v11147_v47, 0.0  ;;  %v5814_v60 = vmul.f32 %v11080_v20, %v11555_v23  ;;  %v5870_v38 = vsel %vm1318_vm4, %v5812_v43, 0.0  ;;  %v5978_v43 = vld [vmem:[%s11394_s5 + $0x60] sm:$0xff] }
 0x7d6   : > { %v5407_v48 = vadd.f32 %v5406_v19, %v5405_v40  ;;  %v5414_v36 = vsel %vm1318_vm4, %v11080_v20, 0.0  ;;  %v5815_v61 = vmul.f32 %v11163_v46, %v11556_v39  ;;  %v5872_v8 = vsel %vm1318_vm4, %v5813_v62, 0.0  ;;  %v6060_v62 = vld [vmem:[%s11394_s5 + $0x80] sm:$0xff] }
 0x7d7   : > { %v5865_v4 = vadd.f32 %v5864_v31, %v5863_v50  ;;  %v5416_v47 = vsel %vm1318_vm4, %v11163_v46, 0.0  ;;  %v5816_v17 = vmul.f32 %v11172_v53, %v11557_v24  ;;  %v5874_v0 = vsel %vm1318_vm4, %v5814_v60, 0.0  ;;  %v5976_v31 = vld [vmem:[%s11394_s5 + $0x50] sm:$0xff]  ;;  %v6061_v60 = vld [vmem:[%s11394_s5 + $0x88] sm:$0xff] }
 0x7d8   : > { %v5409_v14 = vadd.f32 %v5408_v56, %v5407_v48  ;;  %v5418_v20 = vsel %vm1318_vm4, %v11172_v53, 0.0  ;;  %v5876_v55 = vsel %vm1318_vm4, %v5815_v61, 0.0  ;;  %v5650_v3 = vrot.slane %v5649_v5, 4  ;;  %v5975_v48 = vld [vmem:[%s11394_s5 + $0x48] sm:$0xff]  ;;  %v5977_v56 = vld [vmem:[%s11394_s5 + $0x58] sm:$0xff] }
 0x7d9   : > { %v5867_v34 = vadd.f32 %v5866_v33, %v5865_v4  ;;  %v5878_v26 = vsel %vm1318_vm4, %v5816_v17, 0.0  ;;  %v11558_v59 = vmov 0.0   ;;  %v5979_v33 = vld [vmem:[%s11394_s5 + $0x68] sm:$0xff] }
 0x7da   : > { %v5411_v51 = vadd.f32 %v5410_v13, %v5409_v14  ;;  %v5651_v42 = vadd.f32 %v5650_v3, %v5649_v5  ;;  %v5974_v5 = vld [vmem:[%s11394_s5 + $0x40] sm:$0xff]  ;;  %v6957_v14 = vpack.c.bf16 %v5977_v56, %v5976_v31  ;;  %v6960_v13 = vpack.c.bf16 %v5979_v33, %v5978_v43  ;;  %v6065_v61 = vld [vmem:[%s11394_s5 + $0xa8] sm:$0xff] }
 0x7db   : > { %v5869_v6 = vadd.f32 %v5868_v45, %v5867_v34  ;;  %v6954_v21 = vpack.c.bf16 %v5975_v48, %v5974_v5  ;;  %v5980_v34 = vld [vmem:[%s11394_s5 + $0x70] sm:$0xff]  ;;  %v6148_v3 = vld [vmem:[%s11394_s5 + $0xe0] sm:$0xff] }
 0x7dc   : > { %v5413_v27 = vadd.f32 %v5412_v18, %v5411_v51  ;;  %v5652_v49 = vrot.slane %v5651_v42, 2  ;;  %v11280_v51 = vld [vmem:[%s11395_s6] sm:$0xff] }
 0x7dd   : > { %v5871_v9 = vadd.f32 %v5870_v38, %v5869_v6  ;;  %v6062_v38 = vld [vmem:[%s11394_s5 + $0x90] sm:$0xff] }
 0x7de   : > { %v5415_v63 = vadd.f32 %v5414_v36, %v5413_v27  ;;  %v5653_v29 = vadd.f32 %v5652_v49, %v5651_v42  ;;  %v6963_v27 = vpack.c.bf16 %v6060_v62, %v6059_v12  ;;  %v6966_v36 = vpack.c.bf16 %v6062_v38, %v6061_v60 }
 0x7df   : > { %v5873_v37 = vadd.f32 %v5872_v8, %v5871_v9  ;;  %v6063_v9 = vld [vmem:[%s11394_s5 + $0x98] sm:$0xff]  ;;  %v5982_v8 = vrot.slane %v11280_v51, 1  ;;  %v6149_v42 = vrot.slane %v11280_v51, 3 }
 0x7e0   : > { %v5417_v11 = vadd.f32 %v5416_v47, %v5415_v63  ;;  %v5654_v54 = vrot.slane %v5653_v29, 1  ;;  %v6064_v63 = vld [vmem:[%s11394_s5 + $0xa0] sm:$0xff]  ;;  %v6142_v47 = vld [vmem:[%s11394_s5 + $0xb0] sm:$0xff] }
 0x7e1   : > { %v5875_v28 = vadd.f32 %v5874_v0, %v5873_v37  ;;  %v6969_v39 = vpack.c.bf16 %v6064_v63, %v6063_v9  ;;  %v6143_v37 = vld [vmem:[%s11394_s5 + $0xb8] sm:$0xff] }
 0x7e2   : > { %v5419_v22 = vadd.f32 %v5418_v20, %v5417_v11  ;;  %v5655_v15 = vadd.f32 %v5654_v54, %v5653_v29  ;;  %v6972_v0 = vpack.c.bf16 %v6143_v37, %v6142_v47 }
 0x7e3   : > { %v5877_v44 = vadd.f32 %v5876_v55, %v5875_v28  ;;  %v6144_v28 = vld [vmem:[%s11394_s5 + $0xc0] sm:$0xff] }
 0x7e4   : > { %v5420_v30 = vrot.slane %v5419_v22, 4 }
 0x7e5   : > { %v5879_v46 = vadd.f32 %v5878_v26, %v5877_v44  ;;  %v6146_v44 = vld [vmem:[%s11394_s5 + $0xd0] sm:$0xff] }
 0x7e6   : > { %v5421_v7 = vadd.f32 %v5420_v30, %v5419_v22  ;;  %v6145_v22 = vld [vmem:[%s11394_s5 + $0xc8] sm:$0xff]  ;;  %v6147_v30 = vld [vmem:[%s11394_s5 + $0xd8] sm:$0xff] }
 0x7e7   : > { %v5880_v1 = vrot.slane %v5879_v46, 4  ;;  %v6975_v55 = vpack.c.bf16 %v6145_v22, %v6144_v28  ;;  %v6978_v26 = vpack.c.bf16 %v6147_v30, %v6146_v44 }
 0x7e8   : > { %v5422_v58 = vrot.slane %v5421_v7, 2 }
 0x7e9   : > { %v5881_v32 = vadd.f32 %v5880_v1, %v5879_v46 }
 0x7ea   : > { %v5423_v16 = vadd.f32 %v5422_v58, %v5421_v7 }
 0x7eb   : > { %v5882_v35 = vrot.slane %v5881_v32, 2 }
 0x7ec   : > { %v5424_v52 = vrot.slane %v5423_v16, 1 }
 0x7ed   : > { %v5883_v10 = vadd.f32 %v5882_v35, %v5881_v32 }
 0x7ee   : > { %v5425_v53 = vadd.f32 %v5424_v52, %v5423_v16 }
 0x7ef   : > { %v5884_v40 = vrot.slane %v5883_v10, 1 }
 0x7f0   : > { %7312 = vrcp.f32 %v5425_v53 }
 0x7f1   : > { %v5885_v41 = vadd.f32 %v5884_v40, %v5883_v10 }
 0x7fa   : > { %v7313_v57 = vpop.eup %7312 }
 0x7fb   : > { %v5886_v19 = vmul.f32 %v7313_v57, %v5885_v41  ;;  %v5656_v50 = vmul.f32 %v7313_v57, %v5655_v15 }
 0x7fd   : > { %5888 = vrot.lane.b32.xlu0 %v5886_v19, %s7383_s15  ;;  %s11347_s15 = scalar_lea.hbm %s11396_s7, %s6451_s18 }
 0x86f   : > { %v5889_v25 = vpop.permute.xlu0 %5888 }
 0x870   : > { %v5891_v4 = vsel %vm1318_vm4, %v5656_v50, %v5889_v25 }
 0x871   : > { %6888 = vmatmul.mubr.msk.f32.vlgmr.msra.gmra.mrb[180].mxu0 %vm1404_vm6, %v5891_v4 }
 0x872   : > { %6955 = vmatpush3.bf16.msra.mxu0 %v6954_v21  ;;  %6904 = vmatprep.mubr.msk.f32.mxu0 %vm7390_vm10, %v11558_v59 }
 0x873   : > { %6956 = vmatprep.subr.bf16.mxu0 %v11513_v2 }
 0x876   : > { %6958 = vmatpush3.bf16.msra.mxu0 %v6957_v14 }
 0x877   : > { %6959 = vmatprep.subr.bf16.mxu0 %v11513_v2 }
 0x87a   : > { %6961 = vmatpush3.bf16.msra.mxu0 %v6960_v13 }
 0x87b   : > { %6902 = vmatprep.subr.mxu0 %v11558_v59 }
 0x87e   : > { %6903 = vmatpush3.msra.mxu0 %v5980_v34 }
 0x87f   : > { %6962 = vmatprep.subr.bf16.mxu0 %v11513_v2 }
 0x944   : > { %v5969_v45 = vpop.f32.mrb[180].mxu0 }
 0x945   : > { %v5970_v18 = vadd.f32 %v5969_v45, %v11280_v51  ;;  %v6889_v6 = vpop.f32.mrb[181].mxu0 }
 0x947   : > { %v5973_v23 = vmax.f32 %v5970_v18, 0.0 }
 0x949   : > { %6905 = vmatmul.mubr.msk.f32.vlgmr.msra.gmra.mrb[182].mxu0 %vm5984_vm11, %v5973_v23 }
 0x94a   : > { %6964 = vmatpush3.bf16.msra.mxu0 %v6963_v27  ;;  %6921 = vmatprep.mubr.msk.f32.mxu0 %vm7390_vm10, %v11558_v59 }
 0x94b   : > { %6965 = vmatprep.subr.bf16.mxu0 %v11513_v2 }
 0x94e   : > { %6967 = vmatpush3.bf16.msra.mxu0 %v6966_v36 }
 0x94f   : > { %6968 = vmatprep.subr.bf16.mxu0 %v11513_v2 }
 0x952   : > { %6970 = vmatpush3.bf16.msra.mxu0 %v6969_v39 }
 0x953   : > { %6919 = vmatprep.subr.mxu0 %v11558_v59 }
 0x956   : > { %6920 = vmatpush3.msra.mxu0 %v6065_v61 }
 0x957   : > { %6971 = vmatprep.subr.bf16.mxu0 %v11513_v2 }
 0xa1c   : > { %v6054_v11 = vpop.f32.mrb[182].mxu0 }
 0xa1d   : > { %v6055_v24 = vadd.f32 %v6054_v11, %v5982_v8  ;;  %v6906_v17 = vpop.f32.mrb[183].mxu0 }
 0xa1f   : > { %v6058_v20 = vmax.f32 %v6055_v24, 0.0 }
 0xa21   : > { %6922 = vmatmul.mubr.msk.f32.vlgmr.msra.gmra.mrb[184].mxu0 %vm5984_vm11, %v6058_v20 }
 0xa22   : > { %6973 = vmatpush3.bf16.msra.mxu0 %v6972_v0  ;;  %6938 = vmatprep.mubr.msk.f32.mxu0 %vm7390_vm10, %v11558_v59 }
 0xa23   : > { %6974 = vmatprep.subr.bf16.mxu0 %v11513_v2 }
 0xa26   : > { %6976 = vmatpush3.bf16.msra.mxu0 %v6975_v55 }
 0xa27   : > { %6977 = vmatprep.subr.bf16.mxu0 %v11513_v2  ;;  %v6066_v2 = vrot.slane %v11280_v51, 2 }
 0xa2a   : > { %6979 = vmatpush3.bf16.msra.mxu0 %v6978_v26 }
 0xa2b   : > { %6936 = vmatprep.subr.mxu0 %v11558_v59 }
 0xa2e   : > { %6937 = vmatpush3.msra.mxu0 %v6148_v3 }
 0xaf4   : > { %v6137_v46 = vpop.f32.mrb[184].mxu0 }
 0xaf5   : > { %v6138_v7 = vadd.f32 %v6137_v46, %v6066_v2  ;;  %v6923_v1 = vpop.f32.mrb[185].mxu0 }
 0xaf7   : > { %v6141_v58 = vmax.f32 %v6138_v7, 0.0 }
 0xaf9   : > { %6939 = vmatmul.mubr.msk.f32.vlgmr.msra.gmra.mrb[186].mxu0 %vm5984_vm11, %v6141_v58 }
 0xbcc   : > { %v6220_v32 = vpop.f32.mrb[186].mxu0 }
 0xbcd   : > { %v6221_v16 = vadd.f32 %v6220_v32, %v6149_v42  ;;  %v6940_v52 = vpop.f32.mrb[187].mxu0 }
 0xbcf   : > { %6225 = vst.msk [vmem:[%s270_s14] sm:$0x1] %vm6224_vm12, %v6221_v16 }
 0xbd0   : > { %7330 = shalt.err (!%p7327_p3)
}
 0xbd1   : > { %s7331_s16 = scalar_lea.hbm %s11347_s15, 16  ;;  %s7335_s13 = scalar_lea.hbm %s11396_s7, 32 }
 0xbd2   : > { %p7332_p4 = scmp.ne.s32.totalorder %s11347_s15, %s7331_s16  ;;  %p7336_p9 = scmp.lt.u32.totalorder %s11347_s15, %s11396_s7 }
 0xbd3   : > { %p7337_p10 = scmp.lt.u32.totalorder %s7335_s13, %s7331_s16  ;;  %p7339_p12 = scmp.lt.u32.totalorder %s7331_s16, %s11347_s15 }
 0xbd4   : > { %p7333_p7 = pnand %p7332_p4, %p7473_p5 }
 0xbd5   : > { %p7338_p11 = por %p7337_p10, %p7336_p9 }
 0xbd6   : > { %p7334_p8 = pneg %p7333_p7 }
 0xbd7   : > { %p7340_p13 = por %p7339_p12, %p7338_p11 }
 0xbd9   : > { %p7341_p0 = pnand %p7340_p13, %p7334_p8 }
 0xbdb   : > { %7344 = shalt.err (!%p7341_p0)
}
 0xbdc   : > { %7094 = dma.vmem_to_hbm [thread:$0]  (%p7473_p5), %s11349_s17, 16, %s11347_s15, %s6227_s8  }
 0xbdd PF: > { %p7100_p1 = scmp.ge.s32.totalorder %s7379_s27, 2  ;;  %s6251_s20 = sand.u32 1, %s7367_s24  }
 0xbde   : > { %s6252_s22 = scalar_lea.sflag [#allocation3], %s6251_s20 }
 0xbdf   : > { %p7097_p2 = pnand %p7100_p1, %p7477_p6 }
 0xbe1   : > { %7362 = dma.done.wait (!%p7097_p2), %s6252_s22, 16  }
 0xbe2   : > { %7364 = vsyncadd (!%p7097_p2), %s6252_s22, 4294967280  ;;  %p17_p3 = scmp.ge.s32.totalorder %s7460_s30, 4   ;;  %s11559_s24 = smov %s7371_s25 }
 0xbe3   : > { %s11560_s25 = smov %s7375_s26  ;;  %s11561_s26 = smov %s7471_s10 }
 0xbe4   : > { %s11562_s27 = smov %s7460_s30  ;;  %19 = sbr.rel (!%p17_p3) target bundleno = 3 (0x3), region = 83 }
 0xbeb   :  { %6256 = vsyncpa [#allocation3], 1 }
 0xbec   :  { %6258 = vsyncpa [#allocation3 + $0x1], 1 }

</bundles_post_ra>
